<compile_context>
chip_gen: v6e
topology: v6e:2x2x1
jax: 0.10.0
libtpu: 0.0.40
codegen_flags: <defaults>
</compile_context>

<pallas_src>
import jax
import jax.numpy as jnp
from jax.experimental import pallas as pl
from jax.experimental.pallas import tpu as pltpu


# ------------------------- fused gated-block kernel -------------------------

def _make_block_kernel(H, W, C, taps_v, taps_h, residual, with_head):
    """Kernel computing one full GatedMaskConv2d2 block for one batch element.
    taps_v: kept vstack taps (dy, dx); taps_h: kept hstack dx.  If with_head,
    the 1x1->ReLU->1x1 output head is fused and the (unused) out_v is skipped."""
    HW = H * W
    f32 = jnp.float32
    bf16 = jnp.bfloat16

    def kernel(*refs):
        (xvp_ref, xhp_ref,
         wvt_ref, wvs_ref, bvt_ref, bvs_ref,
         att_ref, ast_ref, ats_ref, ass_ref, ct_ref, cs_ref,
         wht_ref, whs_ref, bht_ref, bhs_ref,
         rw_ref, rb_ref,
         condt_ref, conds_ref) = refs[:20]
        if with_head:
            w1_ref, b1_ref, w2_ref, b2_ref, logits_ref = refs[20:]
        else:
            outv_ref, outh_ref = refs[20:]

        xvp = xvp_ref[0]            # [H + k//2, W + k - 1, C]  (f32, padded)
        xhp = xhp_ref[0]            # [H, W + k//2, C]          (f32, padded)

        # ---- vertical stack: causal conv as per-tap accumulating matmuls ----
        hv_t = bvt_ref[...]         # [1, C] -> broadcasts to [HW, C]
        hv_s = bvs_ref[...]
        for t, (dy, dx) in enumerate(taps_v):
            win = xvp[dy:dy + H, dx:dx + W, :].reshape(HW, C).astype(bf16)
            hv_t = hv_t + jnp.dot(win, wvt_ref[t], preferred_element_type=f32)
            hv_s = hv_s + jnp.dot(win, wvs_ref[t], preferred_element_type=f32)

        cond_t = condt_ref[0]       # [1, C] class conditioning (tanh half)
        cond_s = conds_ref[0]       # [1, C] class conditioning (sigmoid half)

        if not with_head:
            # out_v of the last block is never used downstream -> skip it there.
            out_v = jnp.tanh(hv_t + cond_t) * jax.nn.sigmoid(hv_s + cond_s)
            outv_ref[0] = out_v.reshape(H, W, C).astype(outv_ref.dtype)

        # ---- v_to_h 1x1 conv, split into lane-dense [HW, C] halves ----
        hv_tb = hv_t.astype(bf16)
        hv_sb = hv_s.astype(bf16)
        v2h_t = (jnp.dot(hv_tb, att_ref[...], preferred_element_type=f32)
                 + jnp.dot(hv_sb, ast_ref[...], preferred_element_type=f32)
                 + ct_ref[...])
        v2h_s = (jnp.dot(hv_tb, ats_ref[...], preferred_element_type=f32)
                 + jnp.dot(hv_sb, ass_ref[...], preferred_element_type=f32)
                 + cs_ref[...])

        # ---- horizontal stack: causal 1xk conv, per-tap accumulation ----
        hh_t = bht_ref[...]
        hh_s = bhs_ref[...]
        for t, dx in enumerate(taps_h):
            win = xhp[:, dx:dx + W, :].reshape(HW, C).astype(bf16)
            hh_t = hh_t + jnp.dot(win, wht_ref[t], preferred_element_type=f32)
            hh_s = hh_s + jnp.dot(win, whs_ref[t], preferred_element_type=f32)

        g = jnp.tanh(hh_t + v2h_t + cond_t) * jax.nn.sigmoid(hh_s + v2h_s + cond_s)
        out_h = (jnp.dot(g.astype(bf16), rw_ref[...], preferred_element_type=f32)
                 + rb_ref[...])
        if residual:
            pad_l = xhp.shape[1] - W
            out_h = out_h + xhp[:, pad_l:, :].reshape(HW, C)   # exact f32 residual

        if with_head:
            # Fused output head: 1x1 conv -> ReLU -> 1x1 conv, row ([HW, C])
            # orientation so it reuses the exact matmul pattern of the block.
            h1 = jnp.dot(out_h.astype(bf16), w1_ref[...],
                         preferred_element_type=f32) + b1_ref[...]
            h1 = jnp.maximum(h1, 0.0).astype(bf16)             # [HW, 512]
            logits = (jnp.dot(h1, w2_ref[...], preferred_element_type=f32)
                      + b2_ref[...])                           # [HW, K]
            logits_ref[0] = logits.astype(logits_ref.dtype)
        else:
            outh_ref[0] = out_h.reshape(H, W, C).astype(outh_ref.dtype)

    return kernel


def gated_block(bp, x_v, x_h, cond_t, cond_s, head=None):
    """One GatedMaskConv2d2 block as a single fused pallas_call over the batch.
    If `head` is given, the network's output head is fused in and the call
    returns logits [B, H*W, K] instead of (out_v, out_h)."""
    B, H, W, C = x_v.shape
    k = bp["kernel_size"]
    p = k // 2

    # Tiny plain-JAX pads (the im2col itself happens per-tap inside VMEM).
    xvp = jnp.pad(x_v, ((0, 0), (p, 0), (p, p), (0, 0)))   # top + both sides
    xhp = jnp.pad(x_h, ((0, 0), (0, 0), (p, 0), (0, 0)))   # left only

    kernel = _make_block_kernel(H, W, C, bp["taps_v"], bp["taps_h"],
                                bp["residual"], head is not None)

    def full(a):
        nd = a.ndim
        return pl.BlockSpec(a.shape, lambda b, _nd=nd: (0,) * _nd)

    act_v_spec = pl.BlockSpec((1,) + tuple(xvp.shape[1:]), lambda b: (b, 0, 0, 0))
    act_h_spec = pl.BlockSpec((1,) + tuple(xhp.shape[1:]), lambda b: (b, 0, 0, 0))
    cond_spec = pl.BlockSpec((1, 1, C), lambda b: (b, 0, 0))
    out_spec = pl.BlockSpec((1, H, W, C), lambda b: (b, 0, 0, 0))

    weights = [bp["wv_t"], bp["wv_s"], bp["bv_t"], bp["bv_s"],
               bp["a_tt"], bp["a_st"], bp["a_ts"], bp["a_ss"], bp["c_t"], bp["c_s"],
               bp["wh_t"], bp["wh_s"], bp["bh_t"], bp["bh_s"],
               bp["r_w"], bp["r_b"]]

    inputs = [xvp, xhp] + weights + [cond_t, cond_s]
    in_specs = ([act_v_spec, act_h_spec] + [full(w) for w in weights]
                + [cond_spec, cond_spec])

    if head is None:
        out_shape = (jax.ShapeDtypeStruct((B, H, W, C), jnp.float32),
                     jax.ShapeDtypeStruct((B, H, W, C), jnp.float32))
        out_specs = (out_spec, out_spec)
    else:
        hw = H * W
        K = head["w2"].shape[1]
        inputs += [head["w1"], head["b1"], head["w2"], head["b2"]]
        in_specs += [full(head["w1"]), full(head["b1"]),
                     full(head["w2"]), full(head["b2"])]
        out_shape = jax.ShapeDtypeStruct((B, hw, K), jnp.float32)
        out_specs = pl.BlockSpec((1, hw, K), lambda b: (b, 0, 0))

    return pl.pallas_call(
        kernel,
        out_shape=out_shape,
        grid=(B,),
        in_specs=in_specs,
        out_specs=out_specs,
        compiler_params=pltpu.CompilerParams(dimension_semantics=("parallel",)),
    )(*inputs)


# ------------------------------ parameters ------------------------------

def init_params(key, dim, num_blocks, num_classes, input_dim):
    keys = iter(jax.random.split(key, 12 * num_blocks + 12))

    def nrm(shape, scale=0.05):
        return scale * jax.random.normal(next(keys), shape, dtype=jnp.float32)

    params = {"map_input": nrm((input_dim, dim))}
    blocks = []
    for i in range(num_blocks):
        k, mask_type, residual = (7, "A", False) if i == 0 else (3, "B", True)
        kh_v = k // 2 + 1
        kw_h = k // 2 + 1
        vstack_w = nrm((kh_v, k, dim, 2 * dim))
        vstack_w = vstack_w.at[-1, :, :, :].set(0.0)        # vstack causal mask
        hstack_w = nrm((1, kw_h, dim, 2 * dim))
        if mask_type == "A":
            hstack_w = hstack_w.at[:, -1, :, :].set(0.0)    # hstack mask (type A)
        blocks.append(dict(
            kernel_size=k, mask_type=mask_type, residual=residual,
            vstack_w=vstack_w, vstack_b=nrm((2 * dim,)),
            v_to_h_w=nrm((2 * dim, 2 * dim)), v_to_h_b=nrm((2 * dim,)),
            hstack_w=hstack_w, hstack_b=nrm((2 * dim,)),
            h_to_res_w=nrm((dim, dim)), h_to_res_b=nrm((dim,)),
            class_emb=nrm((num_classes, 2 * dim)),
        ))
    params["blocks"] = blocks
    params["head"] = dict(
        w1=nrm((dim, 512)), b1=nrm((512,)),
        w2=nrm((512, input_dim)), b2=nrm((input_dim,)),
    )
    return params


def prepare_params(params):
    """One-time conversion into kernel-ready form: drop the zeroed causal taps,
    split tanh/sigmoid weight halves, reshape to per-tap [n_taps, C, C] stacks,
    stack the class embeddings of all blocks (single gather at runtime) and
    cast matmul operands to bf16 (biases / conditioning stay f32)."""
    C = params["map_input"].shape[1]
    bf16 = jnp.bfloat16
    kp = {"map_input": params["map_input"]}
    blocks = []
    emb_all = []
    for bp in params["blocks"]:
        k = bp["kernel_size"]
        p = k // 2
        # vstack: last kernel row is zeroed by the causal mask -> drop it.
        wv = bp["vstack_w"][:p].reshape(p * k, C, 2 * C)
        taps_v = [(dy, dx) for dy in range(p) for dx in range(k)]
        # hstack: mask 'A' zeroes the last kernel column -> drop it.
        if bp["mask_type"] == "A":
            wh = bp["hstack_w"][:, :p].reshape(p, C, 2 * C)
            taps_h = list(range(p))
        else:
            wh = bp["hstack_w"].reshape(p + 1, C, 2 * C)
            taps_h = list(range(p + 1))
        A = bp["v_to_h_w"]
        c = bp["v_to_h_b"]
        blocks.append(dict(
            kernel_size=k, residual=bp["residual"],
            taps_v=taps_v, taps_h=taps_h,
            wv_t=wv[:, :, :C].astype(bf16), wv_s=wv[:, :, C:].astype(bf16),
            bv_t=bp["vstack_b"][:C].reshape(1, C),
            bv_s=bp["vstack_b"][C:].reshape(1, C),
            a_tt=A[:C, :C].astype(bf16), a_st=A[C:, :C].astype(bf16),
            a_ts=A[:C, C:].astype(bf16), a_ss=A[C:, C:].astype(bf16),
            c_t=c[:C].reshape(1, C), c_s=c[C:].reshape(1, C),
            wh_t=wh[:, :, :C].astype(bf16), wh_s=wh[:, :, C:].astype(bf16),
            bh_t=bp["hstack_b"][:C].reshape(1, C),
            bh_s=bp["hstack_b"][C:].reshape(1, C),
            r_w=bp["h_to_res_w"].astype(bf16),
            r_b=bp["h_to_res_b"].reshape(1, C),
        ))
        emb_all.append(bp["class_emb"])
    kp["blocks"] = blocks
    kp["class_emb_all"] = jnp.stack(emb_all, axis=0)   # [n_blocks, n_classes, 2C]
    head = params["head"]
    kp["head"] = dict(
        w1=head["w1"].astype(bf16), b1=head["b1"].reshape(1, -1),
        w2=head["w2"].astype(bf16), b2=head["b2"].reshape(1, -1),
    )
    return kp


# ------------------------------ forward pass ------------------------------

def pixelcnn_forward(kparams, x, label):
    """x: int32 [B, H, W] codebook indices; label: int32 [B].
    Returns logits [B, K, H, W] (NCHW, matching the PyTorch module)."""
    B, H, W = x.shape
    C = kparams["map_input"].shape[1]
    # TODO(synk): embedding lookups (map_input / class_condition) are tiny
    # plain-JAX gathers; no Pallas gather is warranted at these sizes.
    emb = jnp.take(kparams["map_input"], x.reshape(-1), axis=0)
    xc = emb.reshape(B, H, W, -1)

    # Single stacked gather for every block's class conditioning.
    cond_all = jnp.take(kparams["class_emb_all"], label, axis=1)  # [nb, B, 2C]

    x_v, x_h = xc, xc
    n_blocks = len(kparams["blocks"])
    logits = None
    for i, bp in enumerate(kparams["blocks"]):
        cond_t = cond_all[i, :, :C].reshape(B, 1, C)
        cond_s = cond_all[i, :, C:].reshape(B, 1, C)
        if i < n_blocks - 1:
            x_v, x_h = gated_block(bp, x_v, x_h, cond_t, cond_s)
        else:
            # Last block: the output head is fused into the same pallas_call.
            logits = gated_block(bp, x_v, x_h, cond_t, cond_s,
                                 head=kparams["head"])
    K = kparams["head"]["w2"].shape[1]
    # Tiny layout fix-up to NCHW (logits come out [B, H*W, K]).
    return logits.reshape(B, H, W, K).transpose(0, 3, 1, 2)


if __name__ == "__main__":
    dim, num_blocks, num_classes, input_dim = 32, 3, 10, 64
    B, H, W = 2, 8, 8

    key = jax.random.PRNGKey(0)
    pkey, xkey, lkey = jax.random.split(key, 3)
    params = init_params(pkey, dim, num_blocks, num_classes, input_dim)
    kparams = prepare_params(params)
    x = jax.random.randint(xkey, (B, H, W), 0, input_dim, dtype=jnp.int32)
    label = jax.random.randint(lkey, (B,), 0, num_classes, dtype=jnp.int32)

    fwd = jax.jit(lambda x_, l_: pixelcnn_forward(kparams, x_, l_))
    out = jax.block_until_ready(fwd(x, label))

    assert out.shape == (B, input_dim, H, W), out.shape
    assert out.dtype == jnp.float32
    assert bool(jnp.all(jnp.isfinite(out)))
    print("KERNEL_OK")
</pallas_src>

<mosaic_0001>
module attributes {stable_mosaic.version = 11 : i64} {
  func.func @kernel(%arg0: i32, %arg1: memref<1x11x14x32xf32, #tpu.memory_space<vmem>>, %arg2: memref<1x8x11x32xf32, #tpu.memory_space<vmem>>, %arg3: memref<21x32x32xbf16, #tpu.memory_space<vmem>>, %arg4: memref<21x32x32xbf16, #tpu.memory_space<vmem>>, %arg5: memref<1x32xf32, #tpu.memory_space<vmem>>, %arg6: memref<1x32xf32, #tpu.memory_space<vmem>>, %arg7: memref<32x32xbf16, #tpu.memory_space<vmem>>, %arg8: memref<32x32xbf16, #tpu.memory_space<vmem>>, %arg9: memref<32x32xbf16, #tpu.memory_space<vmem>>, %arg10: memref<32x32xbf16, #tpu.memory_space<vmem>>, %arg11: memref<1x32xf32, #tpu.memory_space<vmem>>, %arg12: memref<1x32xf32, #tpu.memory_space<vmem>>, %arg13: memref<3x32x32xbf16, #tpu.memory_space<vmem>>, %arg14: memref<3x32x32xbf16, #tpu.memory_space<vmem>>, %arg15: memref<1x32xf32, #tpu.memory_space<vmem>>, %arg16: memref<1x32xf32, #tpu.memory_space<vmem>>, %arg17: memref<32x32xbf16, #tpu.memory_space<vmem>>, %arg18: memref<1x32xf32, #tpu.memory_space<vmem>>, %arg19: memref<1x1x32xf32, #tpu.memory_space<vmem>>, %arg20: memref<1x1x32xf32, #tpu.memory_space<vmem>>, %arg21: memref<1x8x8x32xf32, #tpu.memory_space<vmem>>, %arg22: memref<1x8x8x32xf32, #tpu.memory_space<vmem>>) attributes {dimension_semantics = [#tpu.dimension_semantics<parallel>], iteration_bounds = array<i64: 2>, scalar_prefetch = 0 : i64, scratch_operands = 0 : i64, tpu.core_type = #tpu.core_type<tc>, window_params = [{transform_indices = @transform_0, window_bounds = array<i64: 1, 11, 14, 32>}, {transform_indices = @transform_1, window_bounds = array<i64: 1, 8, 11, 32>}, {pipeline_mode = #tpu.pipeline_mode<synchronous>, transform_indices = @transform_2, window_bounds = array<i64: 21, 32, 32>}, {pipeline_mode = #tpu.pipeline_mode<synchronous>, transform_indices = @transform_3, window_bounds = array<i64: 21, 32, 32>}, {pipeline_mode = #tpu.pipeline_mode<synchronous>, transform_indices = @transform_4, window_bounds = array<i64: 1, 32>}, {pipeline_mode = #tpu.pipeline_mode<synchronous>, transform_indices = @transform_5, window_bounds = array<i64: 1, 32>}, {pipeline_mode = #tpu.pipeline_mode<synchronous>, transform_indices = @transform_6, window_bounds = array<i64: 32, 32>}, {pipeline_mode = #tpu.pipeline_mode<synchronous>, transform_indices = @transform_7, window_bounds = array<i64: 32, 32>}, {pipeline_mode = #tpu.pipeline_mode<synchronous>, transform_indices = @transform_8, window_bounds = array<i64: 32, 32>}, {pipeline_mode = #tpu.pipeline_mode<synchronous>, transform_indices = @transform_9, window_bounds = array<i64: 32, 32>}, {pipeline_mode = #tpu.pipeline_mode<synchronous>, transform_indices = @transform_10, window_bounds = array<i64: 1, 32>}, {pipeline_mode = #tpu.pipeline_mode<synchronous>, transform_indices = @transform_11, window_bounds = array<i64: 1, 32>}, {pipeline_mode = #tpu.pipeline_mode<synchronous>, transform_indices = @transform_12, window_bounds = array<i64: 3, 32, 32>}, {pipeline_mode = #tpu.pipeline_mode<synchronous>, transform_indices = @transform_13, window_bounds = array<i64: 3, 32, 32>}, {pipeline_mode = #tpu.pipeline_mode<synchronous>, transform_indices = @transform_14, window_bounds = array<i64: 1, 32>}, {pipeline_mode = #tpu.pipeline_mode<synchronous>, transform_indices = @transform_15, window_bounds = array<i64: 1, 32>}, {pipeline_mode = #tpu.pipeline_mode<synchronous>, transform_indices = @transform_16, window_bounds = array<i64: 32, 32>}, {pipeline_mode = #tpu.pipeline_mode<synchronous>, transform_indices = @transform_17, window_bounds = array<i64: 1, 32>}, {transform_indices = @transform_18, window_bounds = array<i64: 1, 1, 32>}, {transform_indices = @transform_19, window_bounds = array<i64: 1, 1, 32>}, {transform_indices = @transform_20, window_bounds = array<i64: 1, 8, 8, 32>}, {transform_indices = @transform_21, window_bounds = array<i64: 1, 8, 8, 32>}]} {
    %c0 = arith.constant 0 : index
    %c0_0 = arith.constant 0 : index
    %c0_1 = arith.constant 0 : index
    %c0_2 = arith.constant 0 : index
    %0 = vector.load %arg1[%c0, %c0_0, %c0_1, %c0_2] : memref<1x11x14x32xf32, #tpu.memory_space<vmem>>, vector<1x11x14x32xf32>
    %1 = vector.shape_cast %0 : vector<1x11x14x32xf32> to vector<11x14x32xf32>
    %c0_3 = arith.constant 0 : index
    %c0_4 = arith.constant 0 : index
    %c0_5 = arith.constant 0 : index
    %c0_6 = arith.constant 0 : index
    %2 = vector.load %arg2[%c0_3, %c0_4, %c0_5, %c0_6] : memref<1x8x11x32xf32, #tpu.memory_space<vmem>>, vector<1x8x11x32xf32>
    %3 = vector.shape_cast %2 : vector<1x8x11x32xf32> to vector<8x11x32xf32>
    %c0_7 = arith.constant 0 : index
    %c0_8 = arith.constant 0 : index
    %4 = vector.load %arg5[%c0_7, %c0_8] : memref<1x32xf32, #tpu.memory_space<vmem>>, vector<1x32xf32>
    %c0_9 = arith.constant 0 : index
    %c0_10 = arith.constant 0 : index
    %5 = vector.load %arg6[%c0_9, %c0_10] : memref<1x32xf32, #tpu.memory_space<vmem>>, vector<1x32xf32>
    %6 = vector.extract_strided_slice %1 {offsets = [0, 0, 0], sizes = [8, 8, 32], strides = [1, 1, 1]} : vector<11x14x32xf32> to vector<8x8x32xf32>
    %7 = vector.shape_cast %6 : vector<8x8x32xf32> to vector<64x32xf32>
    %8 = arith.truncf %7 : vector<64x32xf32> to vector<64x32xbf16>
    %c0_11 = arith.constant 0 : index
    %c0_12 = arith.constant 0 : index
    %c0_13 = arith.constant 0 : index
    %9 = vector.load %arg3[%c0_11, %c0_12, %c0_13] : memref<21x32x32xbf16, #tpu.memory_space<vmem>>, vector<1x32x32xbf16>
    %10 = vector.shape_cast %9 : vector<1x32x32xbf16> to vector<32x32xbf16>
    %cst = arith.constant dense<0.000000e+00> : vector<64x32xf32>
    %11 = tpu.matmul %8, %10, %cst {dimension_numbers = #tpu.dot_dimension_numbers<[1], [0], [0], [1], [0, 0, 1, 1], [], []>} : vector<64x32xbf16>, vector<32x32xbf16>, vector<64x32xf32> -> vector<64x32xf32>
    %12 = vector.broadcast %4 : vector<1x32xf32> to vector<64x32xf32>
    %13 = arith.addf %12, %11 : vector<64x32xf32>
    %c0_14 = arith.constant 0 : index
    %c0_15 = arith.constant 0 : index
    %c0_16 = arith.constant 0 : index
    %14 = vector.load %arg4[%c0_14, %c0_15, %c0_16] : memref<21x32x32xbf16, #tpu.memory_space<vmem>>, vector<1x32x32xbf16>
    %15 = vector.shape_cast %14 : vector<1x32x32xbf16> to vector<32x32xbf16>
    %cst_17 = arith.constant dense<0.000000e+00> : vector<64x32xf32>
    %16 = tpu.matmul %8, %15, %cst_17 {dimension_numbers = #tpu.dot_dimension_numbers<[1], [0], [0], [1], [0, 0, 1, 1], [], []>} : vector<64x32xbf16>, vector<32x32xbf16>, vector<64x32xf32> -> vector<64x32xf32>
    %17 = vector.broadcast %5 : vector<1x32xf32> to vector<64x32xf32>
    %18 = arith.addf %17, %16 : vector<64x32xf32>
    %19 = vector.extract_strided_slice %1 {offsets = [0, 1, 0], sizes = [8, 8, 32], strides = [1, 1, 1]} : vector<11x14x32xf32> to vector<8x8x32xf32>
    %20 = vector.shape_cast %19 : vector<8x8x32xf32> to vector<64x32xf32>
    %21 = arith.truncf %20 : vector<64x32xf32> to vector<64x32xbf16>
    %c1 = arith.constant 1 : index
    %c0_18 = arith.constant 0 : index
    %c0_19 = arith.constant 0 : index
    %22 = vector.load %arg3[%c1, %c0_18, %c0_19] : memref<21x32x32xbf16, #tpu.memory_space<vmem>>, vector<1x32x32xbf16>
    %23 = vector.shape_cast %22 : vector<1x32x32xbf16> to vector<32x32xbf16>
    %cst_20 = arith.constant dense<0.000000e+00> : vector<64x32xf32>
    %24 = tpu.matmul %21, %23, %cst_20 {dimension_numbers = #tpu.dot_dimension_numbers<[1], [0], [0], [1], [0, 0, 1, 1], [], []>} : vector<64x32xbf16>, vector<32x32xbf16>, vector<64x32xf32> -> vector<64x32xf32>
    %25 = arith.addf %13, %24 : vector<64x32xf32>
    %c1_21 = arith.constant 1 : index
    %c0_22 = arith.constant 0 : index
    %c0_23 = arith.constant 0 : index
    %26 = vector.load %arg4[%c1_21, %c0_22, %c0_23] : memref<21x32x32xbf16, #tpu.memory_space<vmem>>, vector<1x32x32xbf16>
    %27 = vector.shape_cast %26 : vector<1x32x32xbf16> to vector<32x32xbf16>
    %cst_24 = arith.constant dense<0.000000e+00> : vector<64x32xf32>
    %28 = tpu.matmul %21, %27, %cst_24 {dimension_numbers = #tpu.dot_dimension_numbers<[1], [0], [0], [1], [0, 0, 1, 1], [], []>} : vector<64x32xbf16>, vector<32x32xbf16>, vector<64x32xf32> -> vector<64x32xf32>
    %29 = arith.addf %18, %28 : vector<64x32xf32>
    %30 = vector.extract_strided_slice %1 {offsets = [0, 2, 0], sizes = [8, 8, 32], strides = [1, 1, 1]} : vector<11x14x32xf32> to vector<8x8x32xf32>
    %31 = vector.shape_cast %30 : vector<8x8x32xf32> to vector<64x32xf32>
    %32 = arith.truncf %31 : vector<64x32xf32> to vector<64x32xbf16>
    %c2 = arith.constant 2 : index
    %c0_25 = arith.constant 0 : index
    %c0_26 = arith.constant 0 : index
    %33 = vector.load %arg3[%c2, %c0_25, %c0_26] : memref<21x32x32xbf16, #tpu.memory_space<vmem>>, vector<1x32x32xbf16>
    %34 = vector.shape_cast %33 : vector<1x32x32xbf16> to vector<32x32xbf16>
    %cst_27 = arith.constant dense<0.000000e+00> : vector<64x32xf32>
    %35 = tpu.matmul %32, %34, %cst_27 {dimension_numbers = #tpu.dot_dimension_numbers<[1], [0], [0], [1], [0, 0, 1, 1], [], []>} : vector<64x32xbf16>, vector<32x32xbf16>, vector<64x32xf32> -> vector<64x32xf32>
    %36 = arith.addf %25, %35 : vector<64x32xf32>
    %c2_28 = arith.constant 2 : index
    %c0_29 = arith.constant 0 : index
    %c0_30 = arith.constant 0 : index
    %37 = vector.load %arg4[%c2_28, %c0_29, %c0_30] : memref<21x32x32xbf16, #tpu.memory_space<vmem>>, vector<1x32x32xbf16>
    %38 = vector.shape_cast %37 : vector<1x32x32xbf16> to vector<32x32xbf16>
    %cst_31 = arith.constant dense<0.000000e+00> : vector<64x32xf32>
    %39 = tpu.matmul %32, %38, %cst_31 {dimension_numbers = #tpu.dot_dimension_numbers<[1], [0], [0], [1], [0, 0, 1, 1], [], []>} : vector<64x32xbf16>, vector<32x32xbf16>, vector<64x32xf32> -> vector<64x32xf32>
    %40 = arith.addf %29, %39 : vector<64x32xf32>
    %41 = vector.extract_strided_slice %1 {offsets = [0, 3, 0], sizes = [8, 8, 32], strides = [1, 1, 1]} : vector<11x14x32xf32> to vector<8x8x32xf32>
    %42 = vector.shape_cast %41 : vector<8x8x32xf32> to vector<64x32xf32>
    %43 = arith.truncf %42 : vector<64x32xf32> to vector<64x32xbf16>
    %c3 = arith.constant 3 : index
    %c0_32 = arith.constant 0 : index
    %c0_33 = arith.constant 0 : index
    %44 = vector.load %arg3[%c3, %c0_32, %c0_33] : memref<21x32x32xbf16, #tpu.memory_space<vmem>>, vector<1x32x32xbf16>
    %45 = vector.shape_cast %44 : vector<1x32x32xbf16> to vector<32x32xbf16>
    %cst_34 = arith.constant dense<0.000000e+00> : vector<64x32xf32>
    %46 = tpu.matmul %43, %45, %cst_34 {dimension_numbers = #tpu.dot_dimension_numbers<[1], [0], [0], [1], [0, 0, 1, 1], [], []>} : vector<64x32xbf16>, vector<32x32xbf16>, vector<64x32xf32> -> vector<64x32xf32>
    %47 = arith.addf %36, %46 : vector<64x32xf32>
    %c3_35 = arith.constant 3 : index
    %c0_36 = arith.constant 0 : index
    %c0_37 = arith.constant 0 : index
    %48 = vector.load %arg4[%c3_35, %c0_36, %c0_37] : memref<21x32x32xbf16, #tpu.memory_space<vmem>>, vector<1x32x32xbf16>
    %49 = vector.shape_cast %48 : vector<1x32x32xbf16> to vector<32x32xbf16>
    %cst_38 = arith.constant dense<0.000000e+00> : vector<64x32xf32>
    %50 = tpu.matmul %43, %49, %cst_38 {dimension_numbers = #tpu.dot_dimension_numbers<[1], [0], [0], [1], [0, 0, 1, 1], [], []>} : vector<64x32xbf16>, vector<32x32xbf16>, vector<64x32xf32> -> vector<64x32xf32>
    %51 = arith.addf %40, %50 : vector<64x32xf32>
    %52 = vector.extract_strided_slice %1 {offsets = [0, 4, 0], sizes = [8, 8, 32], strides = [1, 1, 1]} : vector<11x14x32xf32> to vector<8x8x32xf32>
    %53 = vector.shape_cast %52 : vector<8x8x32xf32> to vector<64x32xf32>
    %54 = arith.truncf %53 : vector<64x32xf32> to vector<64x32xbf16>
    %c4 = arith.constant 4 : index
    %c0_39 = arith.constant 0 : index
    %c0_40 = arith.constant 0 : index
    %55 = vector.load %arg3[%c4, %c0_39, %c0_40] : memref<21x32x32xbf16, #tpu.memory_space<vmem>>, vector<1x32x32xbf16>
    %56 = vector.shape_cast %55 : vector<1x32x32xbf16> to vector<32x32xbf16>
    %cst_41 = arith.constant dense<0.000000e+00> : vector<64x32xf32>
    %57 = tpu.matmul %54, %56, %cst_41 {dimension_numbers = #tpu.dot_dimension_numbers<[1], [0], [0], [1], [0, 0, 1, 1], [], []>} : vector<64x32xbf16>, vector<32x32xbf16>, vector<64x32xf32> -> vector<64x32xf32>
    %58 = arith.addf %47, %57 : vector<64x32xf32>
    %c4_42 = arith.constant 4 : index
    %c0_43 = arith.constant 0 : index
    %c0_44 = arith.constant 0 : index
    %59 = vector.load %arg4[%c4_42, %c0_43, %c0_44] : memref<21x32x32xbf16, #tpu.memory_space<vmem>>, vector<1x32x32xbf16>
    %60 = vector.shape_cast %59 : vector<1x32x32xbf16> to vector<32x32xbf16>
    %cst_45 = arith.constant dense<0.000000e+00> : vector<64x32xf32>
    %61 = tpu.matmul %54, %60, %cst_45 {dimension_numbers = #tpu.dot_dimension_numbers<[1], [0], [0], [1], [0, 0, 1, 1], [], []>} : vector<64x32xbf16>, vector<32x32xbf16>, vector<64x32xf32> -> vector<64x32xf32>
    %62 = arith.addf %51, %61 : vector<64x32xf32>
    %63 = vector.extract_strided_slice %1 {offsets = [0, 5, 0], sizes = [8, 8, 32], strides = [1, 1, 1]} : vector<11x14x32xf32> to vector<8x8x32xf32>
    %64 = vector.shape_cast %63 : vector<8x8x32xf32> to vector<64x32xf32>
    %65 = arith.truncf %64 : vector<64x32xf32> to vector<64x32xbf16>
    %c5 = arith.constant 5 : index
    %c0_46 = arith.constant 0 : index
    %c0_47 = arith.constant 0 : index
    %66 = vector.load %arg3[%c5, %c0_46, %c0_47] : memref<21x32x32xbf16, #tpu.memory_space<vmem>>, vector<1x32x32xbf16>
    %67 = vector.shape_cast %66 : vector<1x32x32xbf16> to vector<32x32xbf16>
    %cst_48 = arith.constant dense<0.000000e+00> : vector<64x32xf32>
    %68 = tpu.matmul %65, %67, %cst_48 {dimension_numbers = #tpu.dot_dimension_numbers<[1], [0], [0], [1], [0, 0, 1, 1], [], []>} : vector<64x32xbf16>, vector<32x32xbf16>, vector<64x32xf32> -> vector<64x32xf32>
    %69 = arith.addf %58, %68 : vector<64x32xf32>
    %c5_49 = arith.constant 5 : index
    %c0_50 = arith.constant 0 : index
    %c0_51 = arith.constant 0 : index
    %70 = vector.load %arg4[%c5_49, %c0_50, %c0_51] : memref<21x32x32xbf16, #tpu.memory_space<vmem>>, vector<1x32x32xbf16>
    %71 = vector.shape_cast %70 : vector<1x32x32xbf16> to vector<32x32xbf16>
    %cst_52 = arith.constant dense<0.000000e+00> : vector<64x32xf32>
    %72 = tpu.matmul %65, %71, %cst_52 {dimension_numbers = #tpu.dot_dimension_numbers<[1], [0], [0], [1], [0, 0, 1, 1], [], []>} : vector<64x32xbf16>, vector<32x32xbf16>, vector<64x32xf32> -> vector<64x32xf32>
    %73 = arith.addf %62, %72 : vector<64x32xf32>
    %74 = vector.extract_strided_slice %1 {offsets = [0, 6, 0], sizes = [8, 8, 32], strides = [1, 1, 1]} : vector<11x14x32xf32> to vector<8x8x32xf32>
    %75 = vector.shape_cast %74 : vector<8x8x32xf32> to vector<64x32xf32>
    %76 = arith.truncf %75 : vector<64x32xf32> to vector<64x32xbf16>
    %c6 = arith.constant 6 : index
    %c0_53 = arith.constant 0 : index
    %c0_54 = arith.constant 0 : index
    %77 = vector.load %arg3[%c6, %c0_53, %c0_54] : memref<21x32x32xbf16, #tpu.memory_space<vmem>>, vector<1x32x32xbf16>
    %78 = vector.shape_cast %77 : vector<1x32x32xbf16> to vector<32x32xbf16>
    %cst_55 = arith.constant dense<0.000000e+00> : vector<64x32xf32>
    %79 = tpu.matmul %76, %78, %cst_55 {dimension_numbers = #tpu.dot_dimension_numbers<[1], [0], [0], [1], [0, 0, 1, 1], [], []>} : vector<64x32xbf16>, vector<32x32xbf16>, vector<64x32xf32> -> vector<64x32xf32>
    %80 = arith.addf %69, %79 : vector<64x32xf32>
    %c6_56 = arith.constant 6 : index
    %c0_57 = arith.constant 0 : index
    %c0_58 = arith.constant 0 : index
    %81 = vector.load %arg4[%c6_56, %c0_57, %c0_58] : memref<21x32x32xbf16, #tpu.memory_space<vmem>>, vector<1x32x32xbf16>
    %82 = vector.shape_cast %81 : vector<1x32x32xbf16> to vector<32x32xbf16>
    %cst_59 = arith.constant dense<0.000000e+00> : vector<64x32xf32>
    %83 = tpu.matmul %76, %82, %cst_59 {dimension_numbers = #tpu.dot_dimension_numbers<[1], [0], [0], [1], [0, 0, 1, 1], [], []>} : vector<64x32xbf16>, vector<32x32xbf16>, vector<64x32xf32> -> vector<64x32xf32>
    %84 = arith.addf %73, %83 : vector<64x32xf32>
    %85 = vector.extract_strided_slice %1 {offsets = [1, 0, 0], sizes = [8, 8, 32], strides = [1, 1, 1]} : vector<11x14x32xf32> to vector<8x8x32xf32>
    %86 = vector.shape_cast %85 : vector<8x8x32xf32> to vector<64x32xf32>
    %87 = arith.truncf %86 : vector<64x32xf32> to vector<64x32xbf16>
    %c7 = arith.constant 7 : index
    %c0_60 = arith.constant 0 : index
    %c0_61 = arith.constant 0 : index
    %88 = vector.load %arg3[%c7, %c0_60, %c0_61] : memref<21x32x32xbf16, #tpu.memory_space<vmem>>, vector<1x32x32xbf16>
    %89 = vector.shape_cast %88 : vector<1x32x32xbf16> to vector<32x32xbf16>
    %cst_62 = arith.constant dense<0.000000e+00> : vector<64x32xf32>
    %90 = tpu.matmul %87, %89, %cst_62 {dimension_numbers = #tpu.dot_dimension_numbers<[1], [0], [0], [1], [0, 0, 1, 1], [], []>} : vector<64x32xbf16>, vector<32x32xbf16>, vector<64x32xf32> -> vector<64x32xf32>
    %91 = arith.addf %80, %90 : vector<64x32xf32>
    %c7_63 = arith.constant 7 : index
    %c0_64 = arith.constant 0 : index
    %c0_65 = arith.constant 0 : index
    %92 = vector.load %arg4[%c7_63, %c0_64, %c0_65] : memref<21x32x32xbf16, #tpu.memory_space<vmem>>, vector<1x32x32xbf16>
    %93 = vector.shape_cast %92 : vector<1x32x32xbf16> to vector<32x32xbf16>
    %cst_66 = arith.constant dense<0.000000e+00> : vector<64x32xf32>
    %94 = tpu.matmul %87, %93, %cst_66 {dimension_numbers = #tpu.dot_dimension_numbers<[1], [0], [0], [1], [0, 0, 1, 1], [], []>} : vector<64x32xbf16>, vector<32x32xbf16>, vector<64x32xf32> -> vector<64x32xf32>
    %95 = arith.addf %84, %94 : vector<64x32xf32>
    %96 = vector.extract_strided_slice %1 {offsets = [1, 1, 0], sizes = [8, 8, 32], strides = [1, 1, 1]} : vector<11x14x32xf32> to vector<8x8x32xf32>
    %97 = vector.shape_cast %96 : vector<8x8x32xf32> to vector<64x32xf32>
    %98 = arith.truncf %97 : vector<64x32xf32> to vector<64x32xbf16>
    %c8 = arith.constant 8 : index
    %c0_67 = arith.constant 0 : index
    %c0_68 = arith.constant 0 : index
    %99 = vector.load %arg3[%c8, %c0_67, %c0_68] : memref<21x32x32xbf16, #tpu.memory_space<vmem>>, vector<1x32x32xbf16>
    %100 = vector.shape_cast %99 : vector<1x32x32xbf16> to vector<32x32xbf16>
    %cst_69 = arith.constant dense<0.000000e+00> : vector<64x32xf32>
    %101 = tpu.matmul %98, %100, %cst_69 {dimension_numbers = #tpu.dot_dimension_numbers<[1], [0], [0], [1], [0, 0, 1, 1], [], []>} : vector<64x32xbf16>, vector<32x32xbf16>, vector<64x32xf32> -> vector<64x32xf32>
    %102 = arith.addf %91, %101 : vector<64x32xf32>
    %c8_70 = arith.constant 8 : index
    %c0_71 = arith.constant 0 : index
    %c0_72 = arith.constant 0 : index
    %103 = vector.load %arg4[%c8_70, %c0_71, %c0_72] : memref<21x32x32xbf16, #tpu.memory_space<vmem>>, vector<1x32x32xbf16>
    %104 = vector.shape_cast %103 : vector<1x32x32xbf16> to vector<32x32xbf16>
    %cst_73 = arith.constant dense<0.000000e+00> : vector<64x32xf32>
    %105 = tpu.matmul %98, %104, %cst_73 {dimension_numbers = #tpu.dot_dimension_numbers<[1], [0], [0], [1], [0, 0, 1, 1], [], []>} : vector<64x32xbf16>, vector<32x32xbf16>, vector<64x32xf32> -> vector<64x32xf32>
    %106 = arith.addf %95, %105 : vector<64x32xf32>
    %107 = vector.extract_strided_slice %1 {offsets = [1, 2, 0], sizes = [8, 8, 32], strides = [1, 1, 1]} : vector<11x14x32xf32> to vector<8x8x32xf32>
    %108 = vector.shape_cast %107 : vector<8x8x32xf32> to vector<64x32xf32>
    %109 = arith.truncf %108 : vector<64x32xf32> to vector<64x32xbf16>
    %c9 = arith.constant 9 : index
    %c0_74 = arith.constant 0 : index
    %c0_75 = arith.constant 0 : index
    %110 = vector.load %arg3[%c9, %c0_74, %c0_75] : memref<21x32x32xbf16, #tpu.memory_space<vmem>>, vector<1x32x32xbf16>
    %111 = vector.shape_cast %110 : vector<1x32x32xbf16> to vector<32x32xbf16>
    %cst_76 = arith.constant dense<0.000000e+00> : vector<64x32xf32>
    %112 = tpu.matmul %109, %111, %cst_76 {dimension_numbers = #tpu.dot_dimension_numbers<[1], [0], [0], [1], [0, 0, 1, 1], [], []>} : vector<64x32xbf16>, vector<32x32xbf16>, vector<64x32xf32> -> vector<64x32xf32>
    %113 = arith.addf %102, %112 : vector<64x32xf32>
    %c9_77 = arith.constant 9 : index
    %c0_78 = arith.constant 0 : index
    %c0_79 = arith.constant 0 : index
    %114 = vector.load %arg4[%c9_77, %c0_78, %c0_79] : memref<21x32x32xbf16, #tpu.memory_space<vmem>>, vector<1x32x32xbf16>
    %115 = vector.shape_cast %114 : vector<1x32x32xbf16> to vector<32x32xbf16>
    %cst_80 = arith.constant dense<0.000000e+00> : vector<64x32xf32>
    %116 = tpu.matmul %109, %115, %cst_80 {dimension_numbers = #tpu.dot_dimension_numbers<[1], [0], [0], [1], [0, 0, 1, 1], [], []>} : vector<64x32xbf16>, vector<32x32xbf16>, vector<64x32xf32> -> vector<64x32xf32>
    %117 = arith.addf %106, %116 : vector<64x32xf32>
    %118 = vector.extract_strided_slice %1 {offsets = [1, 3, 0], sizes = [8, 8, 32], strides = [1, 1, 1]} : vector<11x14x32xf32> to vector<8x8x32xf32>
    %119 = vector.shape_cast %118 : vector<8x8x32xf32> to vector<64x32xf32>
    %120 = arith.truncf %119 : vector<64x32xf32> to vector<64x32xbf16>
    %c10 = arith.constant 10 : index
    %c0_81 = arith.constant 0 : index
    %c0_82 = arith.constant 0 : index
    %121 = vector.load %arg3[%c10, %c0_81, %c0_82] : memref<21x32x32xbf16, #tpu.memory_space<vmem>>, vector<1x32x32xbf16>
    %122 = vector.shape_cast %121 : vector<1x32x32xbf16> to vector<32x32xbf16>
    %cst_83 = arith.constant dense<0.000000e+00> : vector<64x32xf32>
    %123 = tpu.matmul %120, %122, %cst_83 {dimension_numbers = #tpu.dot_dimension_numbers<[1], [0], [0], [1], [0, 0, 1, 1], [], []>} : vector<64x32xbf16>, vector<32x32xbf16>, vector<64x32xf32> -> vector<64x32xf32>
    %124 = arith.addf %113, %123 : vector<64x32xf32>
    %c10_84 = arith.constant 10 : index
    %c0_85 = arith.constant 0 : index
    %c0_86 = arith.constant 0 : index
    %125 = vector.load %arg4[%c10_84, %c0_85, %c0_86] : memref<21x32x32xbf16, #tpu.memory_space<vmem>>, vector<1x32x32xbf16>
    %126 = vector.shape_cast %125 : vector<1x32x32xbf16> to vector<32x32xbf16>
    %cst_87 = arith.constant dense<0.000000e+00> : vector<64x32xf32>
    %127 = tpu.matmul %120, %126, %cst_87 {dimension_numbers = #tpu.dot_dimension_numbers<[1], [0], [0], [1], [0, 0, 1, 1], [], []>} : vector<64x32xbf16>, vector<32x32xbf16>, vector<64x32xf32> -> vector<64x32xf32>
    %128 = arith.addf %117, %127 : vector<64x32xf32>
    %129 = vector.extract_strided_slice %1 {offsets = [1, 4, 0], sizes = [8, 8, 32], strides = [1, 1, 1]} : vector<11x14x32xf32> to vector<8x8x32xf32>
    %130 = vector.shape_cast %129 : vector<8x8x32xf32> to vector<64x32xf32>
    %131 = arith.truncf %130 : vector<64x32xf32> to vector<64x32xbf16>
    %c11 = arith.constant 11 : index
    %c0_88 = arith.constant 0 : index
    %c0_89 = arith.constant 0 : index
    %132 = vector.load %arg3[%c11, %c0_88, %c0_89] : memref<21x32x32xbf16, #tpu.memory_space<vmem>>, vector<1x32x32xbf16>
    %133 = vector.shape_cast %132 : vector<1x32x32xbf16> to vector<32x32xbf16>
    %cst_90 = arith.constant dense<0.000000e+00> : vector<64x32xf32>
    %134 = tpu.matmul %131, %133, %cst_90 {dimension_numbers = #tpu.dot_dimension_numbers<[1], [0], [0], [1], [0, 0, 1, 1], [], []>} : vector<64x32xbf16>, vector<32x32xbf16>, vector<64x32xf32> -> vector<64x32xf32>
    %135 = arith.addf %124, %134 : vector<64x32xf32>
    %c11_91 = arith.constant 11 : index
    %c0_92 = arith.constant 0 : index
    %c0_93 = arith.constant 0 : index
    %136 = vector.load %arg4[%c11_91, %c0_92, %c0_93] : memref<21x32x32xbf16, #tpu.memory_space<vmem>>, vector<1x32x32xbf16>
    %137 = vector.shape_cast %136 : vector<1x32x32xbf16> to vector<32x32xbf16>
    %cst_94 = arith.constant dense<0.000000e+00> : vector<64x32xf32>
    %138 = tpu.matmul %131, %137, %cst_94 {dimension_numbers = #tpu.dot_dimension_numbers<[1], [0], [0], [1], [0, 0, 1, 1], [], []>} : vector<64x32xbf16>, vector<32x32xbf16>, vector<64x32xf32> -> vector<64x32xf32>
    %139 = arith.addf %128, %138 : vector<64x32xf32>
    %140 = vector.extract_strided_slice %1 {offsets = [1, 5, 0], sizes = [8, 8, 32], strides = [1, 1, 1]} : vector<11x14x32xf32> to vector<8x8x32xf32>
    %141 = vector.shape_cast %140 : vector<8x8x32xf32> to vector<64x32xf32>
    %142 = arith.truncf %141 : vector<64x32xf32> to vector<64x32xbf16>
    %c12 = arith.constant 12 : index
    %c0_95 = arith.constant 0 : index
    %c0_96 = arith.constant 0 : index
    %143 = vector.load %arg3[%c12, %c0_95, %c0_96] : memref<21x32x32xbf16, #tpu.memory_space<vmem>>, vector<1x32x32xbf16>
    %144 = vector.shape_cast %143 : vector<1x32x32xbf16> to vector<32x32xbf16>
    %cst_97 = arith.constant dense<0.000000e+00> : vector<64x32xf32>
    %145 = tpu.matmul %142, %144, %cst_97 {dimension_numbers = #tpu.dot_dimension_numbers<[1], [0], [0], [1], [0, 0, 1, 1], [], []>} : vector<64x32xbf16>, vector<32x32xbf16>, vector<64x32xf32> -> vector<64x32xf32>
    %146 = arith.addf %135, %145 : vector<64x32xf32>
    %c12_98 = arith.constant 12 : index
    %c0_99 = arith.constant 0 : index
    %c0_100 = arith.constant 0 : index
    %147 = vector.load %arg4[%c12_98, %c0_99, %c0_100] : memref<21x32x32xbf16, #tpu.memory_space<vmem>>, vector<1x32x32xbf16>
    %148 = vector.shape_cast %147 : vector<1x32x32xbf16> to vector<32x32xbf16>
    %cst_101 = arith.constant dense<0.000000e+00> : vector<64x32xf32>
    %149 = tpu.matmul %142, %148, %cst_101 {dimension_numbers = #tpu.dot_dimension_numbers<[1], [0], [0], [1], [0, 0, 1, 1], [], []>} : vector<64x32xbf16>, vector<32x32xbf16>, vector<64x32xf32> -> vector<64x32xf32>
    %150 = arith.addf %139, %149 : vector<64x32xf32>
    %151 = vector.extract_strided_slice %1 {offsets = [1, 6, 0], sizes = [8, 8, 32], strides = [1, 1, 1]} : vector<11x14x32xf32> to vector<8x8x32xf32>
    %152 = vector.shape_cast %151 : vector<8x8x32xf32> to vector<64x32xf32>
    %153 = arith.truncf %152 : vector<64x32xf32> to vector<64x32xbf16>
    %c13 = arith.constant 13 : index
    %c0_102 = arith.constant 0 : index
    %c0_103 = arith.constant 0 : index
    %154 = vector.load %arg3[%c13, %c0_102, %c0_103] : memref<21x32x32xbf16, #tpu.memory_space<vmem>>, vector<1x32x32xbf16>
    %155 = vector.shape_cast %154 : vector<1x32x32xbf16> to vector<32x32xbf16>
    %cst_104 = arith.constant dense<0.000000e+00> : vector<64x32xf32>
    %156 = tpu.matmul %153, %155, %cst_104 {dimension_numbers = #tpu.dot_dimension_numbers<[1], [0], [0], [1], [0, 0, 1, 1], [], []>} : vector<64x32xbf16>, vector<32x32xbf16>, vector<64x32xf32> -> vector<64x32xf32>
    %157 = arith.addf %146, %156 : vector<64x32xf32>
    %c13_105 = arith.constant 13 : index
    %c0_106 = arith.constant 0 : index
    %c0_107 = arith.constant 0 : index
    %158 = vector.load %arg4[%c13_105, %c0_106, %c0_107] : memref<21x32x32xbf16, #tpu.memory_space<vmem>>, vector<1x32x32xbf16>
    %159 = vector.shape_cast %158 : vector<1x32x32xbf16> to vector<32x32xbf16>
    %cst_108 = arith.constant dense<0.000000e+00> : vector<64x32xf32>
    %160 = tpu.matmul %153, %159, %cst_108 {dimension_numbers = #tpu.dot_dimension_numbers<[1], [0], [0], [1], [0, 0, 1, 1], [], []>} : vector<64x32xbf16>, vector<32x32xbf16>, vector<64x32xf32> -> vector<64x32xf32>
    %161 = arith.addf %150, %160 : vector<64x32xf32>
    %162 = vector.extract_strided_slice %1 {offsets = [2, 0, 0], sizes = [8, 8, 32], strides = [1, 1, 1]} : vector<11x14x32xf32> to vector<8x8x32xf32>
    %163 = vector.shape_cast %162 : vector<8x8x32xf32> to vector<64x32xf32>
    %164 = arith.truncf %163 : vector<64x32xf32> to vector<64x32xbf16>
    %c14 = arith.constant 14 : index
    %c0_109 = arith.constant 0 : index
    %c0_110 = arith.constant 0 : index
    %165 = vector.load %arg3[%c14, %c0_109, %c0_110] : memref<21x32x32xbf16, #tpu.memory_space<vmem>>, vector<1x32x32xbf16>
    %166 = vector.shape_cast %165 : vector<1x32x32xbf16> to vector<32x32xbf16>
    %cst_111 = arith.constant dense<0.000000e+00> : vector<64x32xf32>
    %167 = tpu.matmul %164, %166, %cst_111 {dimension_numbers = #tpu.dot_dimension_numbers<[1], [0], [0], [1], [0, 0, 1, 1], [], []>} : vector<64x32xbf16>, vector<32x32xbf16>, vector<64x32xf32> -> vector<64x32xf32>
    %168 = arith.addf %157, %167 : vector<64x32xf32>
    %c14_112 = arith.constant 14 : index
    %c0_113 = arith.constant 0 : index
    %c0_114 = arith.constant 0 : index
    %169 = vector.load %arg4[%c14_112, %c0_113, %c0_114] : memref<21x32x32xbf16, #tpu.memory_space<vmem>>, vector<1x32x32xbf16>
    %170 = vector.shape_cast %169 : vector<1x32x32xbf16> to vector<32x32xbf16>
    %cst_115 = arith.constant dense<0.000000e+00> : vector<64x32xf32>
    %171 = tpu.matmul %164, %170, %cst_115 {dimension_numbers = #tpu.dot_dimension_numbers<[1], [0], [0], [1], [0, 0, 1, 1], [], []>} : vector<64x32xbf16>, vector<32x32xbf16>, vector<64x32xf32> -> vector<64x32xf32>
    %172 = arith.addf %161, %171 : vector<64x32xf32>
    %173 = vector.extract_strided_slice %1 {offsets = [2, 1, 0], sizes = [8, 8, 32], strides = [1, 1, 1]} : vector<11x14x32xf32> to vector<8x8x32xf32>
    %174 = vector.shape_cast %173 : vector<8x8x32xf32> to vector<64x32xf32>
    %175 = arith.truncf %174 : vector<64x32xf32> to vector<64x32xbf16>
    %c15 = arith.constant 15 : index
    %c0_116 = arith.constant 0 : index
    %c0_117 = arith.constant 0 : index
    %176 = vector.load %arg3[%c15, %c0_116, %c0_117] : memref<21x32x32xbf16, #tpu.memory_space<vmem>>, vector<1x32x32xbf16>
    %177 = vector.shape_cast %176 : vector<1x32x32xbf16> to vector<32x32xbf16>
    %cst_118 = arith.constant dense<0.000000e+00> : vector<64x32xf32>
    %178 = tpu.matmul %175, %177, %cst_118 {dimension_numbers = #tpu.dot_dimension_numbers<[1], [0], [0], [1], [0, 0, 1, 1], [], []>} : vector<64x32xbf16>, vector<32x32xbf16>, vector<64x32xf32> -> vector<64x32xf32>
    %179 = arith.addf %168, %178 : vector<64x32xf32>
    %c15_119 = arith.constant 15 : index
    %c0_120 = arith.constant 0 : index
    %c0_121 = arith.constant 0 : index
    %180 = vector.load %arg4[%c15_119, %c0_120, %c0_121] : memref<21x32x32xbf16, #tpu.memory_space<vmem>>, vector<1x32x32xbf16>
    %181 = vector.shape_cast %180 : vector<1x32x32xbf16> to vector<32x32xbf16>
    %cst_122 = arith.constant dense<0.000000e+00> : vector<64x32xf32>
    %182 = tpu.matmul %175, %181, %cst_122 {dimension_numbers = #tpu.dot_dimension_numbers<[1], [0], [0], [1], [0, 0, 1, 1], [], []>} : vector<64x32xbf16>, vector<32x32xbf16>, vector<64x32xf32> -> vector<64x32xf32>
    %183 = arith.addf %172, %182 : vector<64x32xf32>
    %184 = vector.extract_strided_slice %1 {offsets = [2, 2, 0], sizes = [8, 8, 32], strides = [1, 1, 1]} : vector<11x14x32xf32> to vector<8x8x32xf32>
    %185 = vector.shape_cast %184 : vector<8x8x32xf32> to vector<64x32xf32>
    %186 = arith.truncf %185 : vector<64x32xf32> to vector<64x32xbf16>
    %c16 = arith.constant 16 : index
    %c0_123 = arith.constant 0 : index
    %c0_124 = arith.constant 0 : index
    %187 = vector.load %arg3[%c16, %c0_123, %c0_124] : memref<21x32x32xbf16, #tpu.memory_space<vmem>>, vector<1x32x32xbf16>
    %188 = vector.shape_cast %187 : vector<1x32x32xbf16> to vector<32x32xbf16>
    %cst_125 = arith.constant dense<0.000000e+00> : vector<64x32xf32>
    %189 = tpu.matmul %186, %188, %cst_125 {dimension_numbers = #tpu.dot_dimension_numbers<[1], [0], [0], [1], [0, 0, 1, 1], [], []>} : vector<64x32xbf16>, vector<32x32xbf16>, vector<64x32xf32> -> vector<64x32xf32>
    %190 = arith.addf %179, %189 : vector<64x32xf32>
    %c16_126 = arith.constant 16 : index
    %c0_127 = arith.constant 0 : index
    %c0_128 = arith.constant 0 : index
    %191 = vector.load %arg4[%c16_126, %c0_127, %c0_128] : memref<21x32x32xbf16, #tpu.memory_space<vmem>>, vector<1x32x32xbf16>
    %192 = vector.shape_cast %191 : vector<1x32x32xbf16> to vector<32x32xbf16>
    %cst_129 = arith.constant dense<0.000000e+00> : vector<64x32xf32>
    %193 = tpu.matmul %186, %192, %cst_129 {dimension_numbers = #tpu.dot_dimension_numbers<[1], [0], [0], [1], [0, 0, 1, 1], [], []>} : vector<64x32xbf16>, vector<32x32xbf16>, vector<64x32xf32> -> vector<64x32xf32>
    %194 = arith.addf %183, %193 : vector<64x32xf32>
    %195 = vector.extract_strided_slice %1 {offsets = [2, 3, 0], sizes = [8, 8, 32], strides = [1, 1, 1]} : vector<11x14x32xf32> to vector<8x8x32xf32>
    %196 = vector.shape_cast %195 : vector<8x8x32xf32> to vector<64x32xf32>
    %197 = arith.truncf %196 : vector<64x32xf32> to vector<64x32xbf16>
    %c17 = arith.constant 17 : index
    %c0_130 = arith.constant 0 : index
    %c0_131 = arith.constant 0 : index
    %198 = vector.load %arg3[%c17, %c0_130, %c0_131] : memref<21x32x32xbf16, #tpu.memory_space<vmem>>, vector<1x32x32xbf16>
    %199 = vector.shape_cast %198 : vector<1x32x32xbf16> to vector<32x32xbf16>
    %cst_132 = arith.constant dense<0.000000e+00> : vector<64x32xf32>
    %200 = tpu.matmul %197, %199, %cst_132 {dimension_numbers = #tpu.dot_dimension_numbers<[1], [0], [0], [1], [0, 0, 1, 1], [], []>} : vector<64x32xbf16>, vector<32x32xbf16>, vector<64x32xf32> -> vector<64x32xf32>
    %201 = arith.addf %190, %200 : vector<64x32xf32>
    %c17_133 = arith.constant 17 : index
    %c0_134 = arith.constant 0 : index
    %c0_135 = arith.constant 0 : index
    %202 = vector.load %arg4[%c17_133, %c0_134, %c0_135] : memref<21x32x32xbf16, #tpu.memory_space<vmem>>, vector<1x32x32xbf16>
    %203 = vector.shape_cast %202 : vector<1x32x32xbf16> to vector<32x32xbf16>
    %cst_136 = arith.constant dense<0.000000e+00> : vector<64x32xf32>
    %204 = tpu.matmul %197, %203, %cst_136 {dimension_numbers = #tpu.dot_dimension_numbers<[1], [0], [0], [1], [0, 0, 1, 1], [], []>} : vector<64x32xbf16>, vector<32x32xbf16>, vector<64x32xf32> -> vector<64x32xf32>
    %205 = arith.addf %194, %204 : vector<64x32xf32>
    %206 = vector.extract_strided_slice %1 {offsets = [2, 4, 0], sizes = [8, 8, 32], strides = [1, 1, 1]} : vector<11x14x32xf32> to vector<8x8x32xf32>
    %207 = vector.shape_cast %206 : vector<8x8x32xf32> to vector<64x32xf32>
    %208 = arith.truncf %207 : vector<64x32xf32> to vector<64x32xbf16>
    %c18 = arith.constant 18 : index
    %c0_137 = arith.constant 0 : index
    %c0_138 = arith.constant 0 : index
    %209 = vector.load %arg3[%c18, %c0_137, %c0_138] : memref<21x32x32xbf16, #tpu.memory_space<vmem>>, vector<1x32x32xbf16>
    %210 = vector.shape_cast %209 : vector<1x32x32xbf16> to vector<32x32xbf16>
    %cst_139 = arith.constant dense<0.000000e+00> : vector<64x32xf32>
    %211 = tpu.matmul %208, %210, %cst_139 {dimension_numbers = #tpu.dot_dimension_numbers<[1], [0], [0], [1], [0, 0, 1, 1], [], []>} : vector<64x32xbf16>, vector<32x32xbf16>, vector<64x32xf32> -> vector<64x32xf32>
    %212 = arith.addf %201, %211 : vector<64x32xf32>
    %c18_140 = arith.constant 18 : index
    %c0_141 = arith.constant 0 : index
    %c0_142 = arith.constant 0 : index
    %213 = vector.load %arg4[%c18_140, %c0_141, %c0_142] : memref<21x32x32xbf16, #tpu.memory_space<vmem>>, vector<1x32x32xbf16>
    %214 = vector.shape_cast %213 : vector<1x32x32xbf16> to vector<32x32xbf16>
    %cst_143 = arith.constant dense<0.000000e+00> : vector<64x32xf32>
    %215 = tpu.matmul %208, %214, %cst_143 {dimension_numbers = #tpu.dot_dimension_numbers<[1], [0], [0], [1], [0, 0, 1, 1], [], []>} : vector<64x32xbf16>, vector<32x32xbf16>, vector<64x32xf32> -> vector<64x32xf32>
    %216 = arith.addf %205, %215 : vector<64x32xf32>
    %217 = vector.extract_strided_slice %1 {offsets = [2, 5, 0], sizes = [8, 8, 32], strides = [1, 1, 1]} : vector<11x14x32xf32> to vector<8x8x32xf32>
    %218 = vector.shape_cast %217 : vector<8x8x32xf32> to vector<64x32xf32>
    %219 = arith.truncf %218 : vector<64x32xf32> to vector<64x32xbf16>
    %c19 = arith.constant 19 : index
    %c0_144 = arith.constant 0 : index
    %c0_145 = arith.constant 0 : index
    %220 = vector.load %arg3[%c19, %c0_144, %c0_145] : memref<21x32x32xbf16, #tpu.memory_space<vmem>>, vector<1x32x32xbf16>
    %221 = vector.shape_cast %220 : vector<1x32x32xbf16> to vector<32x32xbf16>
    %cst_146 = arith.constant dense<0.000000e+00> : vector<64x32xf32>
    %222 = tpu.matmul %219, %221, %cst_146 {dimension_numbers = #tpu.dot_dimension_numbers<[1], [0], [0], [1], [0, 0, 1, 1], [], []>} : vector<64x32xbf16>, vector<32x32xbf16>, vector<64x32xf32> -> vector<64x32xf32>
    %223 = arith.addf %212, %222 : vector<64x32xf32>
    %c19_147 = arith.constant 19 : index
    %c0_148 = arith.constant 0 : index
    %c0_149 = arith.constant 0 : index
    %224 = vector.load %arg4[%c19_147, %c0_148, %c0_149] : memref<21x32x32xbf16, #tpu.memory_space<vmem>>, vector<1x32x32xbf16>
    %225 = vector.shape_cast %224 : vector<1x32x32xbf16> to vector<32x32xbf16>
    %cst_150 = arith.constant dense<0.000000e+00> : vector<64x32xf32>
    %226 = tpu.matmul %219, %225, %cst_150 {dimension_numbers = #tpu.dot_dimension_numbers<[1], [0], [0], [1], [0, 0, 1, 1], [], []>} : vector<64x32xbf16>, vector<32x32xbf16>, vector<64x32xf32> -> vector<64x32xf32>
    %227 = arith.addf %216, %226 : vector<64x32xf32>
    %228 = vector.extract_strided_slice %1 {offsets = [2, 6, 0], sizes = [8, 8, 32], strides = [1, 1, 1]} : vector<11x14x32xf32> to vector<8x8x32xf32>
    %229 = vector.shape_cast %228 : vector<8x8x32xf32> to vector<64x32xf32>
    %230 = arith.truncf %229 : vector<64x32xf32> to vector<64x32xbf16>
    %c20 = arith.constant 20 : index
    %c0_151 = arith.constant 0 : index
    %c0_152 = arith.constant 0 : index
    %231 = vector.load %arg3[%c20, %c0_151, %c0_152] : memref<21x32x32xbf16, #tpu.memory_space<vmem>>, vector<1x32x32xbf16>
    %232 = vector.shape_cast %231 : vector<1x32x32xbf16> to vector<32x32xbf16>
    %cst_153 = arith.constant dense<0.000000e+00> : vector<64x32xf32>
    %233 = tpu.matmul %230, %232, %cst_153 {dimension_numbers = #tpu.dot_dimension_numbers<[1], [0], [0], [1], [0, 0, 1, 1], [], []>} : vector<64x32xbf16>, vector<32x32xbf16>, vector<64x32xf32> -> vector<64x32xf32>
    %234 = arith.addf %223, %233 : vector<64x32xf32>
    %c20_154 = arith.constant 20 : index
    %c0_155 = arith.constant 0 : index
    %c0_156 = arith.constant 0 : index
    %235 = vector.load %arg4[%c20_154, %c0_155, %c0_156] : memref<21x32x32xbf16, #tpu.memory_space<vmem>>, vector<1x32x32xbf16>
    %236 = vector.shape_cast %235 : vector<1x32x32xbf16> to vector<32x32xbf16>
    %cst_157 = arith.constant dense<0.000000e+00> : vector<64x32xf32>
    %237 = tpu.matmul %230, %236, %cst_157 {dimension_numbers = #tpu.dot_dimension_numbers<[1], [0], [0], [1], [0, 0, 1, 1], [], []>} : vector<64x32xbf16>, vector<32x32xbf16>, vector<64x32xf32> -> vector<64x32xf32>
    %238 = arith.addf %227, %237 : vector<64x32xf32>
    %c0_158 = arith.constant 0 : index
    %c0_159 = arith.constant 0 : index
    %c0_160 = arith.constant 0 : index
    %239 = vector.load %arg19[%c0_158, %c0_159, %c0_160] : memref<1x1x32xf32, #tpu.memory_space<vmem>>, vector<1x1x32xf32>
    %240 = vector.shape_cast %239 : vector<1x1x32xf32> to vector<1x32xf32>
    %c0_161 = arith.constant 0 : index
    %c0_162 = arith.constant 0 : index
    %c0_163 = arith.constant 0 : index
    %241 = vector.load %arg20[%c0_161, %c0_162, %c0_163] : memref<1x1x32xf32, #tpu.memory_space<vmem>>, vector<1x1x32xf32>
    %242 = vector.shape_cast %241 : vector<1x1x32xf32> to vector<1x32xf32>
    %243 = vector.broadcast %240 : vector<1x32xf32> to vector<64x32xf32>
    %244 = arith.addf %234, %243 : vector<64x32xf32>
    %245 = math.tanh %244 : vector<64x32xf32>
    %246 = vector.broadcast %242 : vector<1x32xf32> to vector<64x32xf32>
    %247 = arith.addf %238, %246 : vector<64x32xf32>
    %248 = arith.negf %247 : vector<64x32xf32>
    %249 = math.exp %248 : vector<64x32xf32>
    %cst_164 = arith.constant 1.000000e+00 : f32
    %250 = vector.broadcast %cst_164 : f32 to vector<64x32xf32>
    %251 = arith.addf %250, %249 : vector<64x32xf32>
    %252 = arith.divf %250, %251 : vector<64x32xf32>
    %253 = arith.mulf %245, %252 : vector<64x32xf32>
    %254 = vector.shape_cast %253 : vector<64x32xf32> to vector<8x8x32xf32>
    %c0_165 = arith.constant 0 : index
    %c0_166 = arith.constant 0 : index
    %c0_167 = arith.constant 0 : index
    %c0_168 = arith.constant 0 : index
    %255 = vector.load %arg21[%c0_165, %c0_166, %c0_167, %c0_168] : memref<1x8x8x32xf32, #tpu.memory_space<vmem>>, vector<1x8x8x32xf32>
    %256 = vector.shape_cast %255 : vector<1x8x8x32xf32> to vector<8x8x32xf32>
    %257 = vector.shape_cast %254 : vector<8x8x32xf32> to vector<1x8x8x32xf32>
    tpu.vector_store %arg21[%c0_165, %c0_166, %c0_167, %c0_168], %257 {strides = array<i32>} : memref<1x8x8x32xf32, #tpu.memory_space<vmem>>, vector<1x8x8x32xf32>,
    %258 = arith.truncf %234 : vector<64x32xf32> to vector<64x32xbf16>
    %259 = arith.truncf %238 : vector<64x32xf32> to vector<64x32xbf16>
    %c0_169 = arith.constant 0 : index
    %c0_170 = arith.constant 0 : index
    %260 = vector.load %arg7[%c0_169, %c0_170] : memref<32x32xbf16, #tpu.memory_space<vmem>>, vector<32x32xbf16>
    %cst_171 = arith.constant dense<0.000000e+00> : vector<64x32xf32>
    %261 = tpu.matmul %258, %260, %cst_171 {dimension_numbers = #tpu.dot_dimension_numbers<[1], [0], [0], [1], [0, 0, 1, 1], [], []>} : vector<64x32xbf16>, vector<32x32xbf16>, vector<64x32xf32> -> vector<64x32xf32>
    %c0_172 = arith.constant 0 : index
    %c0_173 = arith.constant 0 : index
    %262 = vector.load %arg8[%c0_172, %c0_173] : memref<32x32xbf16, #tpu.memory_space<vmem>>, vector<32x32xbf16>
    %cst_174 = arith.constant dense<0.000000e+00> : vector<64x32xf32>
    %263 = tpu.matmul %259, %262, %cst_174 {dimension_numbers = #tpu.dot_dimension_numbers<[1], [0], [0], [1], [0, 0, 1, 1], [], []>} : vector<64x32xbf16>, vector<32x32xbf16>, vector<64x32xf32> -> vector<64x32xf32>
    %264 = arith.addf %261, %263 : vector<64x32xf32>
    %c0_175 = arith.constant 0 : index
    %c0_176 = arith.constant 0 : index
    %265 = vector.load %arg11[%c0_175, %c0_176] : memref<1x32xf32, #tpu.memory_space<vmem>>, vector<1x32xf32>
    %266 = vector.broadcast %265 : vector<1x32xf32> to vector<64x32xf32>
    %267 = arith.addf %264, %266 : vector<64x32xf32>
    %c0_177 = arith.constant 0 : index
    %c0_178 = arith.constant 0 : index
    %268 = vector.load %arg9[%c0_177, %c0_178] : memref<32x32xbf16, #tpu.memory_space<vmem>>, vector<32x32xbf16>
    %cst_179 = arith.constant dense<0.000000e+00> : vector<64x32xf32>
    %269 = tpu.matmul %258, %268, %cst_179 {dimension_numbers = #tpu.dot_dimension_numbers<[1], [0], [0], [1], [0, 0, 1, 1], [], []>} : vector<64x32xbf16>, vector<32x32xbf16>, vector<64x32xf32> -> vector<64x32xf32>
    %c0_180 = arith.constant 0 : index
    %c0_181 = arith.constant 0 : index
    %270 = vector.load %arg10[%c0_180, %c0_181] : memref<32x32xbf16, #tpu.memory_space<vmem>>, vector<32x32xbf16>
    %cst_182 = arith.constant dense<0.000000e+00> : vector<64x32xf32>
    %271 = tpu.matmul %259, %270, %cst_182 {dimension_numbers = #tpu.dot_dimension_numbers<[1], [0], [0], [1], [0, 0, 1, 1], [], []>} : vector<64x32xbf16>, vector<32x32xbf16>, vector<64x32xf32> -> vector<64x32xf32>
    %272 = arith.addf %269, %271 : vector<64x32xf32>
    %c0_183 = arith.constant 0 : index
    %c0_184 = arith.constant 0 : index
    %273 = vector.load %arg12[%c0_183, %c0_184] : memref<1x32xf32, #tpu.memory_space<vmem>>, vector<1x32xf32>
    %274 = vector.broadcast %273 : vector<1x32xf32> to vector<64x32xf32>
    %275 = arith.addf %272, %274 : vector<64x32xf32>
    %c0_185 = arith.constant 0 : index
    %c0_186 = arith.constant 0 : index
    %276 = vector.load %arg15[%c0_185, %c0_186] : memref<1x32xf32, #tpu.memory_space<vmem>>, vector<1x32xf32>
    %c0_187 = arith.constant 0 : index
    %c0_188 = arith.constant 0 : index
    %277 = vector.load %arg16[%c0_187, %c0_188] : memref<1x32xf32, #tpu.memory_space<vmem>>, vector<1x32xf32>
    %278 = vector.extract_strided_slice %3 {offsets = [0, 0, 0], sizes = [8, 8, 32], strides = [1, 1, 1]} : vector<8x11x32xf32> to vector<8x8x32xf32>
    %279 = vector.shape_cast %278 : vector<8x8x32xf32> to vector<64x32xf32>
    %280 = arith.truncf %279 : vector<64x32xf32> to vector<64x32xbf16>
    %c0_189 = arith.constant 0 : index
    %c0_190 = arith.constant 0 : index
    %c0_191 = arith.constant 0 : index
    %281 = vector.load %arg13[%c0_189, %c0_190, %c0_191] : memref<3x32x32xbf16, #tpu.memory_space<vmem>>, vector<1x32x32xbf16>
    %282 = vector.shape_cast %281 : vector<1x32x32xbf16> to vector<32x32xbf16>
    %cst_192 = arith.constant dense<0.000000e+00> : vector<64x32xf32>
    %283 = tpu.matmul %280, %282, %cst_192 {dimension_numbers = #tpu.dot_dimension_numbers<[1], [0], [0], [1], [0, 0, 1, 1], [], []>} : vector<64x32xbf16>, vector<32x32xbf16>, vector<64x32xf32> -> vector<64x32xf32>
    %284 = vector.broadcast %276 : vector<1x32xf32> to vector<64x32xf32>
    %285 = arith.addf %284, %283 : vector<64x32xf32>
    %c0_193 = arith.constant 0 : index
    %c0_194 = arith.constant 0 : index
    %c0_195 = arith.constant 0 : index
    %286 = vector.load %arg14[%c0_193, %c0_194, %c0_195] : memref<3x32x32xbf16, #tpu.memory_space<vmem>>, vector<1x32x32xbf16>
    %287 = vector.shape_cast %286 : vector<1x32x32xbf16> to vector<32x32xbf16>
    %cst_196 = arith.constant dense<0.000000e+00> : vector<64x32xf32>
    %288 = tpu.matmul %280, %287, %cst_196 {dimension_numbers = #tpu.dot_dimension_numbers<[1], [0], [0], [1], [0, 0, 1, 1], [], []>} : vector<64x32xbf16>, vector<32x32xbf16>, vector<64x32xf32> -> vector<64x32xf32>
    %289 = vector.broadcast %277 : vector<1x32xf32> to vector<64x32xf32>
    %290 = arith.addf %289, %288 : vector<64x32xf32>
    %291 = vector.extract_strided_slice %3 {offsets = [0, 1, 0], sizes = [8, 8, 32], strides = [1, 1, 1]} : vector<8x11x32xf32> to vector<8x8x32xf32>
    %292 = vector.shape_cast %291 : vector<8x8x32xf32> to vector<64x32xf32>
    %293 = arith.truncf %292 : vector<64x32xf32> to vector<64x32xbf16>
    %c1_197 = arith.constant 1 : index
    %c0_198 = arith.constant 0 : index
    %c0_199 = arith.constant 0 : index
    %294 = vector.load %arg13[%c1_197, %c0_198, %c0_199] : memref<3x32x32xbf16, #tpu.memory_space<vmem>>, vector<1x32x32xbf16>
    %295 = vector.shape_cast %294 : vector<1x32x32xbf16> to vector<32x32xbf16>
    %cst_200 = arith.constant dense<0.000000e+00> : vector<64x32xf32>
    %296 = tpu.matmul %293, %295, %cst_200 {dimension_numbers = #tpu.dot_dimension_numbers<[1], [0], [0], [1], [0, 0, 1, 1], [], []>} : vector<64x32xbf16>, vector<32x32xbf16>, vector<64x32xf32> -> vector<64x32xf32>
    %297 = arith.addf %285, %296 : vector<64x32xf32>
    %c1_201 = arith.constant 1 : index
    %c0_202 = arith.constant 0 : index
    %c0_203 = arith.constant 0 : index
    %298 = vector.load %arg14[%c1_201, %c0_202, %c0_203] : memref<3x32x32xbf16, #tpu.memory_space<vmem>>, vector<1x32x32xbf16>
    %299 = vector.shape_cast %298 : vector<1x32x32xbf16> to vector<32x32xbf16>
    %cst_204 = arith.constant dense<0.000000e+00> : vector<64x32xf32>
    %300 = tpu.matmul %293, %299, %cst_204 {dimension_numbers = #tpu.dot_dimension_numbers<[1], [0], [0], [1], [0, 0, 1, 1], [], []>} : vector<64x32xbf16>, vector<32x32xbf16>, vector<64x32xf32> -> vector<64x32xf32>
    %301 = arith.addf %290, %300 : vector<64x32xf32>
    %302 = vector.extract_strided_slice %3 {offsets = [0, 2, 0], sizes = [8, 8, 32], strides = [1, 1, 1]} : vector<8x11x32xf32> to vector<8x8x32xf32>
    %303 = vector.shape_cast %302 : vector<8x8x32xf32> to vector<64x32xf32>
    %304 = arith.truncf %303 : vector<64x32xf32> to vector<64x32xbf16>
    %c2_205 = arith.constant 2 : index
    %c0_206 = arith.constant 0 : index
    %c0_207 = arith.constant 0 : index
    %305 = vector.load %arg13[%c2_205, %c0_206, %c0_207] : memref<3x32x32xbf16, #tpu.memory_space<vmem>>, vector<1x32x32xbf16>
    %306 = vector.shape_cast %305 : vector<1x32x32xbf16> to vector<32x32xbf16>
    %cst_208 = arith.constant dense<0.000000e+00> : vector<64x32xf32>
    %307 = tpu.matmul %304, %306, %cst_208 {dimension_numbers = #tpu.dot_dimension_numbers<[1], [0], [0], [1], [0, 0, 1, 1], [], []>} : vector<64x32xbf16>, vector<32x32xbf16>, vector<64x32xf32> -> vector<64x32xf32>
    %308 = arith.addf %297, %307 : vector<64x32xf32>
    %c2_209 = arith.constant 2 : index
    %c0_210 = arith.constant 0 : index
    %c0_211 = arith.constant 0 : index
    %309 = vector.load %arg14[%c2_209, %c0_210, %c0_211] : memref<3x32x32xbf16, #tpu.memory_space<vmem>>, vector<1x32x32xbf16>
    %310 = vector.shape_cast %309 : vector<1x32x32xbf16> to vector<32x32xbf16>
    %cst_212 = arith.constant dense<0.000000e+00> : vector<64x32xf32>
    %311 = tpu.matmul %304, %310, %cst_212 {dimension_numbers = #tpu.dot_dimension_numbers<[1], [0], [0], [1], [0, 0, 1, 1], [], []>} : vector<64x32xbf16>, vector<32x32xbf16>, vector<64x32xf32> -> vector<64x32xf32>
    %312 = arith.addf %301, %311 : vector<64x32xf32>
    %313 = arith.addf %308, %267 : vector<64x32xf32>
    %314 = vector.broadcast %240 : vector<1x32xf32> to vector<64x32xf32>
    %315 = arith.addf %313, %314 : vector<64x32xf32>
    %316 = math.tanh %315 : vector<64x32xf32>
    %317 = arith.addf %312, %275 : vector<64x32xf32>
    %318 = vector.broadcast %242 : vector<1x32xf32> to vector<64x32xf32>
    %319 = arith.addf %317, %318 : vector<64x32xf32>
    %320 = arith.negf %319 : vector<64x32xf32>
    %321 = math.exp %320 : vector<64x32xf32>
    %cst_213 = arith.constant 1.000000e+00 : f32
    %322 = vector.broadcast %cst_213 : f32 to vector<64x32xf32>
    %323 = arith.addf %322, %321 : vector<64x32xf32>
    %324 = arith.divf %322, %323 : vector<64x32xf32>
    %325 = arith.mulf %316, %324 : vector<64x32xf32>
    %326 = arith.truncf %325 : vector<64x32xf32> to vector<64x32xbf16>
    %c0_214 = arith.constant 0 : index
    %c0_215 = arith.constant 0 : index
    %327 = vector.load %arg17[%c0_214, %c0_215] : memref<32x32xbf16, #tpu.memory_space<vmem>>, vector<32x32xbf16>
    %cst_216 = arith.constant dense<0.000000e+00> : vector<64x32xf32>
    %328 = tpu.matmul %326, %327, %cst_216 {dimension_numbers = #tpu.dot_dimension_numbers<[1], [0], [0], [1], [0, 0, 1, 1], [], []>} : vector<64x32xbf16>, vector<32x32xbf16>, vector<64x32xf32> -> vector<64x32xf32>
    %c0_217 = arith.constant 0 : index
    %c0_218 = arith.constant 0 : index
    %329 = vector.load %arg18[%c0_217, %c0_218] : memref<1x32xf32, #tpu.memory_space<vmem>>, vector<1x32xf32>
    %330 = vector.broadcast %329 : vector<1x32xf32> to vector<64x32xf32>
    %331 = arith.addf %328, %330 : vector<64x32xf32>
    %332 = vector.shape_cast %331 : vector<64x32xf32> to vector<8x8x32xf32>
    %c0_219 = arith.constant 0 : index
    %c0_220 = arith.constant 0 : index
    %c0_221 = arith.constant 0 : index
    %c0_222 = arith.constant 0 : index
    %333 = vector.load %arg22[%c0_219, %c0_220, %c0_221, %c0_222] : memref<1x8x8x32xf32, #tpu.memory_space<vmem>>, vector<1x8x8x32xf32>
    %334 = vector.shape_cast %333 : vector<1x8x8x32xf32> to vector<8x8x32xf32>
    %335 = vector.shape_cast %332 : vector<8x8x32xf32> to vector<1x8x8x32xf32>
    tpu.vector_store %arg22[%c0_219, %c0_220, %c0_221, %c0_222], %335 {strides = array<i32>} : memref<1x8x8x32xf32, #tpu.memory_space<vmem>>, vector<1x8x8x32xf32>,
    return
  }
  func.func @transform_0(%arg0: i32) -> (i32, i32, i32, i32) {
    %c0_i32 = arith.constant 0 : i32
    %c0_i32_0 = arith.constant 0 : i32
    %c0_i32_1 = arith.constant 0 : i32
    %c0_i32_2 = arith.constant 0 : i32
    return %arg0, %c0_i32, %c0_i32_0, %c0_i32_1 : i32, i32, i32, i32
  }
  func.func @transform_1(%arg0: i32) -> (i32, i32, i32, i32) {
    %c0_i32 = arith.constant 0 : i32
    %c0_i32_0 = arith.constant 0 : i32
    %c0_i32_1 = arith.constant 0 : i32
    %c0_i32_2 = arith.constant 0 : i32
    return %arg0, %c0_i32, %c0_i32_0, %c0_i32_1 : i32, i32, i32, i32
  }
  func.func @transform_2(%arg0: i32) -> (i32, i32, i32) {
    %c0_i32 = arith.constant 0 : i32
    %c0_i32_0 = arith.constant 0 : i32
    %c0_i32_1 = arith.constant 0 : i32
    %c0_i32_2 = arith.constant 0 : i32
    return %c0_i32, %c0_i32_0, %c0_i32_1 : i32, i32, i32
  }
  func.func @transform_3(%arg0: i32) -> (i32, i32, i32) {
    %c0_i32 = arith.constant 0 : i32
    %c0_i32_0 = arith.constant 0 : i32
    %c0_i32_1 = arith.constant 0 : i32
    %c0_i32_2 = arith.constant 0 : i32
    return %c0_i32, %c0_i32_0, %c0_i32_1 : i32, i32, i32
  }
  func.func @transform_4(%arg0: i32) -> (i32, i32) {
    %c0_i32 = arith.constant 0 : i32
    %c0_i32_0 = arith.constant 0 : i32
    %c0_i32_1 = arith.constant 0 : i32
    return %c0_i32, %c0_i32_0 : i32, i32
  }
  func.func @transform_5(%arg0: i32) -> (i32, i32) {
    %c0_i32 = arith.constant 0 : i32
    %c0_i32_0 = arith.constant 0 : i32
    %c0_i32_1 = arith.constant 0 : i32
    return %c0_i32, %c0_i32_0 : i32, i32
  }
  func.func @transform_6(%arg0: i32) -> (i32, i32) {
    %c0_i32 = arith.constant 0 : i32
    %c0_i32_0 = arith.constant 0 : i32
    %c0_i32_1 = arith.constant 0 : i32
    return %c0_i32, %c0_i32_0 : i32, i32
  }
  func.func @transform_7(%arg0: i32) -> (i32, i32) {
    %c0_i32 = arith.constant 0 : i32
    %c0_i32_0 = arith.constant 0 : i32
    %c0_i32_1 = arith.constant 0 : i32
    return %c0_i32, %c0_i32_0 : i32, i32
  }
  func.func @transform_8(%arg0: i32) -> (i32, i32) {
    %c0_i32 = arith.constant 0 : i32
    %c0_i32_0 = arith.constant 0 : i32
    %c0_i32_1 = arith.constant 0 : i32
    return %c0_i32, %c0_i32_0 : i32, i32
  }
  func.func @transform_9(%arg0: i32) -> (i32, i32) {
    %c0_i32 = arith.constant 0 : i32
    %c0_i32_0 = arith.constant 0 : i32
    %c0_i32_1 = arith.constant 0 : i32
    return %c0_i32, %c0_i32_0 : i32, i32
  }
  func.func @transform_10(%arg0: i32) -> (i32, i32) {
    %c0_i32 = arith.constant 0 : i32
    %c0_i32_0 = arith.constant 0 : i32
    %c0_i32_1 = arith.constant 0 : i32
    return %c0_i32, %c0_i32_0 : i32, i32
  }
  func.func @transform_11(%arg0: i32) -> (i32, i32) {
    %c0_i32 = arith.constant 0 : i32
    %c0_i32_0 = arith.constant 0 : i32
    %c0_i32_1 = arith.constant 0 : i32
    return %c0_i32, %c0_i32_0 : i32, i32
  }
  func.func @transform_12(%arg0: i32) -> (i32, i32, i32) {
    %c0_i32 = arith.constant 0 : i32
    %c0_i32_0 = arith.constant 0 : i32
    %c0_i32_1 = arith.constant 0 : i32
    %c0_i32_2 = arith.constant 0 : i32
    return %c0_i32, %c0_i32_0, %c0_i32_1 : i32, i32, i32
  }
  func.func @transform_13(%arg0: i32) -> (i32, i32, i32) {
    %c0_i32 = arith.constant 0 : i32
    %c0_i32_0 = arith.constant 0 : i32
    %c0_i32_1 = arith.constant 0 : i32
    %c0_i32_2 = arith.constant 0 : i32
    return %c0_i32, %c0_i32_0, %c0_i32_1 : i32, i32, i32
  }
  func.func @transform_14(%arg0: i32) -> (i32, i32) {
    %c0_i32 = arith.constant 0 : i32
    %c0_i32_0 = arith.constant 0 : i32
    %c0_i32_1 = arith.constant 0 : i32
    return %c0_i32, %c0_i32_0 : i32, i32
  }
  func.func @transform_15(%arg0: i32) -> (i32, i32) {
    %c0_i32 = arith.constant 0 : i32
    %c0_i32_0 = arith.constant 0 : i32
    %c0_i32_1 = arith.constant 0 : i32
    return %c0_i32, %c0_i32_0 : i32, i32
  }
  func.func @transform_16(%arg0: i32) -> (i32, i32) {
    %c0_i32 = arith.constant 0 : i32
    %c0_i32_0 = arith.constant 0 : i32
    %c0_i32_1 = arith.constant 0 : i32
    return %c0_i32, %c0_i32_0 : i32, i32
  }
  func.func @transform_17(%arg0: i32) -> (i32, i32) {
    %c0_i32 = arith.constant 0 : i32
    %c0_i32_0 = arith.constant 0 : i32
    %c0_i32_1 = arith.constant 0 : i32
    return %c0_i32, %c0_i32_0 : i32, i32
  }
  func.func @transform_18(%arg0: i32) -> (i32, i32, i32) {
    %c0_i32 = arith.constant 0 : i32
    %c0_i32_0 = arith.constant 0 : i32
    %c0_i32_1 = arith.constant 0 : i32
    return %arg0, %c0_i32, %c0_i32_0 : i32, i32, i32
  }
  func.func @transform_19(%arg0: i32) -> (i32, i32, i32) {
    %c0_i32 = arith.constant 0 : i32
    %c0_i32_0 = arith.constant 0 : i32
    %c0_i32_1 = arith.constant 0 : i32
    return %arg0, %c0_i32, %c0_i32_0 : i32, i32, i32
  }
  func.func @transform_20(%arg0: i32) -> (i32, i32, i32, i32) {
    %c0_i32 = arith.constant 0 : i32
    %c0_i32_0 = arith.constant 0 : i32
    %c0_i32_1 = arith.constant 0 : i32
    %c0_i32_2 = arith.constant 0 : i32
    return %arg0, %c0_i32, %c0_i32_0, %c0_i32_1 : i32, i32, i32, i32
  }
  func.func @transform_21(%arg0: i32) -> (i32, i32, i32, i32) {
    %c0_i32 = arith.constant 0 : i32
    %c0_i32_0 = arith.constant 0 : i32
    %c0_i32_1 = arith.constant 0 : i32
    %c0_i32_2 = arith.constant 0 : i32
    return %arg0, %c0_i32, %c0_i32_0, %c0_i32_1 : i32, i32, i32, i32
  }
}

module attributes {stable_mosaic.version = 11 : i64} {
  func.func @kernel(%arg0: i32, %arg1: memref<1x9x10x32xf32, #tpu.memory_space<vmem>>, %arg2: memref<1x8x9x32xf32, #tpu.memory_space<vmem>>, %arg3: memref<3x32x32xbf16, #tpu.memory_space<vmem>>, %arg4: memref<3x32x32xbf16, #tpu.memory_space<vmem>>, %arg5: memref<1x32xf32, #tpu.memory_space<vmem>>, %arg6: memref<1x32xf32, #tpu.memory_space<vmem>>, %arg7: memref<32x32xbf16, #tpu.memory_space<vmem>>, %arg8: memref<32x32xbf16, #tpu.memory_space<vmem>>, %arg9: memref<32x32xbf16, #tpu.memory_space<vmem>>, %arg10: memref<32x32xbf16, #tpu.memory_space<vmem>>, %arg11: memref<1x32xf32, #tpu.memory_space<vmem>>, %arg12: memref<1x32xf32, #tpu.memory_space<vmem>>, %arg13: memref<2x32x32xbf16, #tpu.memory_space<vmem>>, %arg14: memref<2x32x32xbf16, #tpu.memory_space<vmem>>, %arg15: memref<1x32xf32, #tpu.memory_space<vmem>>, %arg16: memref<1x32xf32, #tpu.memory_space<vmem>>, %arg17: memref<32x32xbf16, #tpu.memory_space<vmem>>, %arg18: memref<1x32xf32, #tpu.memory_space<vmem>>, %arg19: memref<1x1x32xf32, #tpu.memory_space<vmem>>, %arg20: memref<1x1x32xf32, #tpu.memory_space<vmem>>, %arg21: memref<1x8x8x32xf32, #tpu.memory_space<vmem>>, %arg22: memref<1x8x8x32xf32, #tpu.memory_space<vmem>>) attributes {dimension_semantics = [#tpu.dimension_semantics<parallel>], iteration_bounds = array<i64: 2>, scalar_prefetch = 0 : i64, scratch_operands = 0 : i64, tpu.core_type = #tpu.core_type<tc>, window_params = [{transform_indices = @transform_0, window_bounds = array<i64: 1, 9, 10, 32>}, {transform_indices = @transform_1, window_bounds = array<i64: 1, 8, 9, 32>}, {pipeline_mode = #tpu.pipeline_mode<synchronous>, transform_indices = @transform_2, window_bounds = array<i64: 3, 32, 32>}, {pipeline_mode = #tpu.pipeline_mode<synchronous>, transform_indices = @transform_3, window_bounds = array<i64: 3, 32, 32>}, {pipeline_mode = #tpu.pipeline_mode<synchronous>, transform_indices = @transform_4, window_bounds = array<i64: 1, 32>}, {pipeline_mode = #tpu.pipeline_mode<synchronous>, transform_indices = @transform_5, window_bounds = array<i64: 1, 32>}, {pipeline_mode = #tpu.pipeline_mode<synchronous>, transform_indices = @transform_6, window_bounds = array<i64: 32, 32>}, {pipeline_mode = #tpu.pipeline_mode<synchronous>, transform_indices = @transform_7, window_bounds = array<i64: 32, 32>}, {pipeline_mode = #tpu.pipeline_mode<synchronous>, transform_indices = @transform_8, window_bounds = array<i64: 32, 32>}, {pipeline_mode = #tpu.pipeline_mode<synchronous>, transform_indices = @transform_9, window_bounds = array<i64: 32, 32>}, {pipeline_mode = #tpu.pipeline_mode<synchronous>, transform_indices = @transform_10, window_bounds = array<i64: 1, 32>}, {pipeline_mode = #tpu.pipeline_mode<synchronous>, transform_indices = @transform_11, window_bounds = array<i64: 1, 32>}, {pipeline_mode = #tpu.pipeline_mode<synchronous>, transform_indices = @transform_12, window_bounds = array<i64: 2, 32, 32>}, {pipeline_mode = #tpu.pipeline_mode<synchronous>, transform_indices = @transform_13, window_bounds = array<i64: 2, 32, 32>}, {pipeline_mode = #tpu.pipeline_mode<synchronous>, transform_indices = @transform_14, window_bounds = array<i64: 1, 32>}, {pipeline_mode = #tpu.pipeline_mode<synchronous>, transform_indices = @transform_15, window_bounds = array<i64: 1, 32>}, {pipeline_mode = #tpu.pipeline_mode<synchronous>, transform_indices = @transform_16, window_bounds = array<i64: 32, 32>}, {pipeline_mode = #tpu.pipeline_mode<synchronous>, transform_indices = @transform_17, window_bounds = array<i64: 1, 32>}, {transform_indices = @transform_18, window_bounds = array<i64: 1, 1, 32>}, {transform_indices = @transform_19, window_bounds = array<i64: 1, 1, 32>}, {transform_indices = @transform_20, window_bounds = array<i64: 1, 8, 8, 32>}, {transform_indices = @transform_21, window_bounds = array<i64: 1, 8, 8, 32>}]} {
    %c0 = arith.constant 0 : index
    %c0_0 = arith.constant 0 : index
    %c0_1 = arith.constant 0 : index
    %c0_2 = arith.constant 0 : index
    %0 = vector.load %arg1[%c0, %c0_0, %c0_1, %c0_2] : memref<1x9x10x32xf32, #tpu.memory_space<vmem>>, vector<1x9x10x32xf32>
    %1 = vector.shape_cast %0 : vector<1x9x10x32xf32> to vector<9x10x32xf32>
    %c0_3 = arith.constant 0 : index
    %c0_4 = arith.constant 0 : index
    %c0_5 = arith.constant 0 : index
    %c0_6 = arith.constant 0 : index
    %2 = vector.load %arg2[%c0_3, %c0_4, %c0_5, %c0_6] : memref<1x8x9x32xf32, #tpu.memory_space<vmem>>, vector<1x8x9x32xf32>
    %3 = vector.shape_cast %2 : vector<1x8x9x32xf32> to vector<8x9x32xf32>
    %c0_7 = arith.constant 0 : index
    %c0_8 = arith.constant 0 : index
    %4 = vector.load %arg5[%c0_7, %c0_8] : memref<1x32xf32, #tpu.memory_space<vmem>>, vector<1x32xf32>
    %c0_9 = arith.constant 0 : index
    %c0_10 = arith.constant 0 : index
    %5 = vector.load %arg6[%c0_9, %c0_10] : memref<1x32xf32, #tpu.memory_space<vmem>>, vector<1x32xf32>
    %6 = vector.extract_strided_slice %1 {offsets = [0, 0, 0], sizes = [8, 8, 32], strides = [1, 1, 1]} : vector<9x10x32xf32> to vector<8x8x32xf32>
    %7 = vector.shape_cast %6 : vector<8x8x32xf32> to vector<64x32xf32>
    %8 = arith.truncf %7 : vector<64x32xf32> to vector<64x32xbf16>
    %c0_11 = arith.constant 0 : index
    %c0_12 = arith.constant 0 : index
    %c0_13 = arith.constant 0 : index
    %9 = vector.load %arg3[%c0_11, %c0_12, %c0_13] : memref<3x32x32xbf16, #tpu.memory_space<vmem>>, vector<1x32x32xbf16>
    %10 = vector.shape_cast %9 : vector<1x32x32xbf16> to vector<32x32xbf16>
    %cst = arith.constant dense<0.000000e+00> : vector<64x32xf32>
    %11 = tpu.matmul %8, %10, %cst {dimension_numbers = #tpu.dot_dimension_numbers<[1], [0], [0], [1], [0, 0, 1, 1], [], []>} : vector<64x32xbf16>, vector<32x32xbf16>, vector<64x32xf32> -> vector<64x32xf32>
    %12 = vector.broadcast %4 : vector<1x32xf32> to vector<64x32xf32>
    %13 = arith.addf %12, %11 : vector<64x32xf32>
    %c0_14 = arith.constant 0 : index
    %c0_15 = arith.constant 0 : index
    %c0_16 = arith.constant 0 : index
    %14 = vector.load %arg4[%c0_14, %c0_15, %c0_16] : memref<3x32x32xbf16, #tpu.memory_space<vmem>>, vector<1x32x32xbf16>
    %15 = vector.shape_cast %14 : vector<1x32x32xbf16> to vector<32x32xbf16>
    %cst_17 = arith.constant dense<0.000000e+00> : vector<64x32xf32>
    %16 = tpu.matmul %8, %15, %cst_17 {dimension_numbers = #tpu.dot_dimension_numbers<[1], [0], [0], [1], [0, 0, 1, 1], [], []>} : vector<64x32xbf16>, vector<32x32xbf16>, vector<64x32xf32> -> vector<64x32xf32>
    %17 = vector.broadcast %5 : vector<1x32xf32> to vector<64x32xf32>
    %18 = arith.addf %17, %16 : vector<64x32xf32>
    %19 = vector.extract_strided_slice %1 {offsets = [0, 1, 0], sizes = [8, 8, 32], strides = [1, 1, 1]} : vector<9x10x32xf32> to vector<8x8x32xf32>
    %20 = vector.shape_cast %19 : vector<8x8x32xf32> to vector<64x32xf32>
    %21 = arith.truncf %20 : vector<64x32xf32> to vector<64x32xbf16>
    %c1 = arith.constant 1 : index
    %c0_18 = arith.constant 0 : index
    %c0_19 = arith.constant 0 : index
    %22 = vector.load %arg3[%c1, %c0_18, %c0_19] : memref<3x32x32xbf16, #tpu.memory_space<vmem>>, vector<1x32x32xbf16>
    %23 = vector.shape_cast %22 : vector<1x32x32xbf16> to vector<32x32xbf16>
    %cst_20 = arith.constant dense<0.000000e+00> : vector<64x32xf32>
    %24 = tpu.matmul %21, %23, %cst_20 {dimension_numbers = #tpu.dot_dimension_numbers<[1], [0], [0], [1], [0, 0, 1, 1], [], []>} : vector<64x32xbf16>, vector<32x32xbf16>, vector<64x32xf32> -> vector<64x32xf32>
    %25 = arith.addf %13, %24 : vector<64x32xf32>
    %c1_21 = arith.constant 1 : index
    %c0_22 = arith.constant 0 : index
    %c0_23 = arith.constant 0 : index
    %26 = vector.load %arg4[%c1_21, %c0_22, %c0_23] : memref<3x32x32xbf16, #tpu.memory_space<vmem>>, vector<1x32x32xbf16>
    %27 = vector.shape_cast %26 : vector<1x32x32xbf16> to vector<32x32xbf16>
    %cst_24 = arith.constant dense<0.000000e+00> : vector<64x32xf32>
    %28 = tpu.matmul %21, %27, %cst_24 {dimension_numbers = #tpu.dot_dimension_numbers<[1], [0], [0], [1], [0, 0, 1, 1], [], []>} : vector<64x32xbf16>, vector<32x32xbf16>, vector<64x32xf32> -> vector<64x32xf32>
    %29 = arith.addf %18, %28 : vector<64x32xf32>
    %30 = vector.extract_strided_slice %1 {offsets = [0, 2, 0], sizes = [8, 8, 32], strides = [1, 1, 1]} : vector<9x10x32xf32> to vector<8x8x32xf32>
    %31 = vector.shape_cast %30 : vector<8x8x32xf32> to vector<64x32xf32>
    %32 = arith.truncf %31 : vector<64x32xf32> to vector<64x32xbf16>
    %c2 = arith.constant 2 : index
    %c0_25 = arith.constant 0 : index
    %c0_26 = arith.constant 0 : index
    %33 = vector.load %arg3[%c2, %c0_25, %c0_26] : memref<3x32x32xbf16, #tpu.memory_space<vmem>>, vector<1x32x32xbf16>
    %34 = vector.shape_cast %33 : vector<1x32x32xbf16> to vector<32x32xbf16>
    %cst_27 = arith.constant dense<0.000000e+00> : vector<64x32xf32>
    %35 = tpu.matmul %32, %34, %cst_27 {dimension_numbers = #tpu.dot_dimension_numbers<[1], [0], [0], [1], [0, 0, 1, 1], [], []>} : vector<64x32xbf16>, vector<32x32xbf16>, vector<64x32xf32> -> vector<64x32xf32>
    %36 = arith.addf %25, %35 : vector<64x32xf32>
    %c2_28 = arith.constant 2 : index
    %c0_29 = arith.constant 0 : index
    %c0_30 = arith.constant 0 : index
    %37 = vector.load %arg4[%c2_28, %c0_29, %c0_30] : memref<3x32x32xbf16, #tpu.memory_space<vmem>>, vector<1x32x32xbf16>
    %38 = vector.shape_cast %37 : vector<1x32x32xbf16> to vector<32x32xbf16>
    %cst_31 = arith.constant dense<0.000000e+00> : vector<64x32xf32>
    %39 = tpu.matmul %32, %38, %cst_31 {dimension_numbers = #tpu.dot_dimension_numbers<[1], [0], [0], [1], [0, 0, 1, 1], [], []>} : vector<64x32xbf16>, vector<32x32xbf16>, vector<64x32xf32> -> vector<64x32xf32>
    %40 = arith.addf %29, %39 : vector<64x32xf32>
    %c0_32 = arith.constant 0 : index
    %c0_33 = arith.constant 0 : index
    %c0_34 = arith.constant 0 : index
    %41 = vector.load %arg19[%c0_32, %c0_33, %c0_34] : memref<1x1x32xf32, #tpu.memory_space<vmem>>, vector<1x1x32xf32>
    %42 = vector.shape_cast %41 : vector<1x1x32xf32> to vector<1x32xf32>
    %c0_35 = arith.constant 0 : index
    %c0_36 = arith.constant 0 : index
    %c0_37 = arith.constant 0 : index
    %43 = vector.load %arg20[%c0_35, %c0_36, %c0_37] : memref<1x1x32xf32, #tpu.memory_space<vmem>>, vector<1x1x32xf32>
    %44 = vector.shape_cast %43 : vector<1x1x32xf32> to vector<1x32xf32>
    %45 = vector.broadcast %42 : vector<1x32xf32> to vector<64x32xf32>
    %46 = arith.addf %36, %45 : vector<64x32xf32>
    %47 = math.tanh %46 : vector<64x32xf32>
    %48 = vector.broadcast %44 : vector<1x32xf32> to vector<64x32xf32>
    %49 = arith.addf %40, %48 : vector<64x32xf32>
    %50 = arith.negf %49 : vector<64x32xf32>
    %51 = math.exp %50 : vector<64x32xf32>
    %cst_38 = arith.constant 1.000000e+00 : f32
    %52 = vector.broadcast %cst_38 : f32 to vector<64x32xf32>
    %53 = arith.addf %52, %51 : vector<64x32xf32>
    %54 = arith.divf %52, %53 : vector<64x32xf32>
    %55 = arith.mulf %47, %54 : vector<64x32xf32>
    %56 = vector.shape_cast %55 : vector<64x32xf32> to vector<8x8x32xf32>
    %c0_39 = arith.constant 0 : index
    %c0_40 = arith.constant 0 : index
    %c0_41 = arith.constant 0 : index
    %c0_42 = arith.constant 0 : index
    %57 = vector.load %arg21[%c0_39, %c0_40, %c0_41, %c0_42] : memref<1x8x8x32xf32, #tpu.memory_space<vmem>>, vector<1x8x8x32xf32>
    %58 = vector.shape_cast %57 : vector<1x8x8x32xf32> to vector<8x8x32xf32>
    %59 = vector.shape_cast %56 : vector<8x8x32xf32> to vector<1x8x8x32xf32>
    tpu.vector_store %arg21[%c0_39, %c0_40, %c0_41, %c0_42], %59 {strides = array<i32>} : memref<1x8x8x32xf32, #tpu.memory_space<vmem>>, vector<1x8x8x32xf32>,
    %60 = arith.truncf %36 : vector<64x32xf32> to vector<64x32xbf16>
    %61 = arith.truncf %40 : vector<64x32xf32> to vector<64x32xbf16>
    %c0_43 = arith.constant 0 : index
    %c0_44 = arith.constant 0 : index
    %62 = vector.load %arg7[%c0_43, %c0_44] : memref<32x32xbf16, #tpu.memory_space<vmem>>, vector<32x32xbf16>
    %cst_45 = arith.constant dense<0.000000e+00> : vector<64x32xf32>
    %63 = tpu.matmul %60, %62, %cst_45 {dimension_numbers = #tpu.dot_dimension_numbers<[1], [0], [0], [1], [0, 0, 1, 1], [], []>} : vector<64x32xbf16>, vector<32x32xbf16>, vector<64x32xf32> -> vector<64x32xf32>
    %c0_46 = arith.constant 0 : index
    %c0_47 = arith.constant 0 : index
    %64 = vector.load %arg8[%c0_46, %c0_47] : memref<32x32xbf16, #tpu.memory_space<vmem>>, vector<32x32xbf16>
    %cst_48 = arith.constant dense<0.000000e+00> : vector<64x32xf32>
    %65 = tpu.matmul %61, %64, %cst_48 {dimension_numbers = #tpu.dot_dimension_numbers<[1], [0], [0], [1], [0, 0, 1, 1], [], []>} : vector<64x32xbf16>, vector<32x32xbf16>, vector<64x32xf32> -> vector<64x32xf32>
    %66 = arith.addf %63, %65 : vector<64x32xf32>
    %c0_49 = arith.constant 0 : index
    %c0_50 = arith.constant 0 : index
    %67 = vector.load %arg11[%c0_49, %c0_50] : memref<1x32xf32, #tpu.memory_space<vmem>>, vector<1x32xf32>
    %68 = vector.broadcast %67 : vector<1x32xf32> to vector<64x32xf32>
    %69 = arith.addf %66, %68 : vector<64x32xf32>
    %c0_51 = arith.constant 0 : index
    %c0_52 = arith.constant 0 : index
    %70 = vector.load %arg9[%c0_51, %c0_52] : memref<32x32xbf16, #tpu.memory_space<vmem>>, vector<32x32xbf16>
    %cst_53 = arith.constant dense<0.000000e+00> : vector<64x32xf32>
    %71 = tpu.matmul %60, %70, %cst_53 {dimension_numbers = #tpu.dot_dimension_numbers<[1], [0], [0], [1], [0, 0, 1, 1], [], []>} : vector<64x32xbf16>, vector<32x32xbf16>, vector<64x32xf32> -> vector<64x32xf32>
    %c0_54 = arith.constant 0 : index
    %c0_55 = arith.constant 0 : index
    %72 = vector.load %arg10[%c0_54, %c0_55] : memref<32x32xbf16, #tpu.memory_space<vmem>>, vector<32x32xbf16>
    %cst_56 = arith.constant dense<0.000000e+00> : vector<64x32xf32>
    %73 = tpu.matmul %61, %72, %cst_56 {dimension_numbers = #tpu.dot_dimension_numbers<[1], [0], [0], [1], [0, 0, 1, 1], [], []>} : vector<64x32xbf16>, vector<32x32xbf16>, vector<64x32xf32> -> vector<64x32xf32>
    %74 = arith.addf %71, %73 : vector<64x32xf32>
    %c0_57 = arith.constant 0 : index
    %c0_58 = arith.constant 0 : index
    %75 = vector.load %arg12[%c0_57, %c0_58] : memref<1x32xf32, #tpu.memory_space<vmem>>, vector<1x32xf32>
    %76 = vector.broadcast %75 : vector<1x32xf32> to vector<64x32xf32>
    %77 = arith.addf %74, %76 : vector<64x32xf32>
    %c0_59 = arith.constant 0 : index
    %c0_60 = arith.constant 0 : index
    %78 = vector.load %arg15[%c0_59, %c0_60] : memref<1x32xf32, #tpu.memory_space<vmem>>, vector<1x32xf32>
    %c0_61 = arith.constant 0 : index
    %c0_62 = arith.constant 0 : index
    %79 = vector.load %arg16[%c0_61, %c0_62] : memref<1x32xf32, #tpu.memory_space<vmem>>, vector<1x32xf32>
    %80 = vector.extract_strided_slice %3 {offsets = [0, 0, 0], sizes = [8, 8, 32], strides = [1, 1, 1]} : vector<8x9x32xf32> to vector<8x8x32xf32>
    %81 = vector.shape_cast %80 : vector<8x8x32xf32> to vector<64x32xf32>
    %82 = arith.truncf %81 : vector<64x32xf32> to vector<64x32xbf16>
    %c0_63 = arith.constant 0 : index
    %c0_64 = arith.constant 0 : index
    %c0_65 = arith.constant 0 : index
    %83 = vector.load %arg13[%c0_63, %c0_64, %c0_65] : memref<2x32x32xbf16, #tpu.memory_space<vmem>>, vector<1x32x32xbf16>
    %84 = vector.shape_cast %83 : vector<1x32x32xbf16> to vector<32x32xbf16>
    %cst_66 = arith.constant dense<0.000000e+00> : vector<64x32xf32>
    %85 = tpu.matmul %82, %84, %cst_66 {dimension_numbers = #tpu.dot_dimension_numbers<[1], [0], [0], [1], [0, 0, 1, 1], [], []>} : vector<64x32xbf16>, vector<32x32xbf16>, vector<64x32xf32> -> vector<64x32xf32>
    %86 = vector.broadcast %78 : vector<1x32xf32> to vector<64x32xf32>
    %87 = arith.addf %86, %85 : vector<64x32xf32>
    %c0_67 = arith.constant 0 : index
    %c0_68 = arith.constant 0 : index
    %c0_69 = arith.constant 0 : index
    %88 = vector.load %arg14[%c0_67, %c0_68, %c0_69] : memref<2x32x32xbf16, #tpu.memory_space<vmem>>, vector<1x32x32xbf16>
    %89 = vector.shape_cast %88 : vector<1x32x32xbf16> to vector<32x32xbf16>
    %cst_70 = arith.constant dense<0.000000e+00> : vector<64x32xf32>
    %90 = tpu.matmul %82, %89, %cst_70 {dimension_numbers = #tpu.dot_dimension_numbers<[1], [0], [0], [1], [0, 0, 1, 1], [], []>} : vector<64x32xbf16>, vector<32x32xbf16>, vector<64x32xf32> -> vector<64x32xf32>
    %91 = vector.broadcast %79 : vector<1x32xf32> to vector<64x32xf32>
    %92 = arith.addf %91, %90 : vector<64x32xf32>
    %93 = vector.extract_strided_slice %3 {offsets = [0, 1, 0], sizes = [8, 8, 32], strides = [1, 1, 1]} : vector<8x9x32xf32> to vector<8x8x32xf32>
    %94 = vector.shape_cast %93 : vector<8x8x32xf32> to vector<64x32xf32>
    %95 = arith.truncf %94 : vector<64x32xf32> to vector<64x32xbf16>
    %c1_71 = arith.constant 1 : index
    %c0_72 = arith.constant 0 : index
    %c0_73 = arith.constant 0 : index
    %96 = vector.load %arg13[%c1_71, %c0_72, %c0_73] : memref<2x32x32xbf16, #tpu.memory_space<vmem>>, vector<1x32x32xbf16>
    %97 = vector.shape_cast %96 : vector<1x32x32xbf16> to vector<32x32xbf16>
    %cst_74 = arith.constant dense<0.000000e+00> : vector<64x32xf32>
    %98 = tpu.matmul %95, %97, %cst_74 {dimension_numbers = #tpu.dot_dimension_numbers<[1], [0], [0], [1], [0, 0, 1, 1], [], []>} : vector<64x32xbf16>, vector<32x32xbf16>, vector<64x32xf32> -> vector<64x32xf32>
    %99 = arith.addf %87, %98 : vector<64x32xf32>
    %c1_75 = arith.constant 1 : index
    %c0_76 = arith.constant 0 : index
    %c0_77 = arith.constant 0 : index
    %100 = vector.load %arg14[%c1_75, %c0_76, %c0_77] : memref<2x32x32xbf16, #tpu.memory_space<vmem>>, vector<1x32x32xbf16>
    %101 = vector.shape_cast %100 : vector<1x32x32xbf16> to vector<32x32xbf16>
    %cst_78 = arith.constant dense<0.000000e+00> : vector<64x32xf32>
    %102 = tpu.matmul %95, %101, %cst_78 {dimension_numbers = #tpu.dot_dimension_numbers<[1], [0], [0], [1], [0, 0, 1, 1], [], []>} : vector<64x32xbf16>, vector<32x32xbf16>, vector<64x32xf32> -> vector<64x32xf32>
    %103 = arith.addf %92, %102 : vector<64x32xf32>
    %104 = arith.addf %99, %69 : vector<64x32xf32>
    %105 = vector.broadcast %42 : vector<1x32xf32> to vector<64x32xf32>
    %106 = arith.addf %104, %105 : vector<64x32xf32>
    %107 = math.tanh %106 : vector<64x32xf32>
    %108 = arith.addf %103, %77 : vector<64x32xf32>
    %109 = vector.broadcast %44 : vector<1x32xf32> to vector<64x32xf32>
    %110 = arith.addf %108, %109 : vector<64x32xf32>
    %111 = arith.negf %110 : vector<64x32xf32>
    %112 = math.exp %111 : vector<64x32xf32>
    %cst_79 = arith.constant 1.000000e+00 : f32
    %113 = vector.broadcast %cst_79 : f32 to vector<64x32xf32>
    %114 = arith.addf %113, %112 : vector<64x32xf32>
    %115 = arith.divf %113, %114 : vector<64x32xf32>
    %116 = arith.mulf %107, %115 : vector<64x32xf32>
    %117 = arith.truncf %116 : vector<64x32xf32> to vector<64x32xbf16>
    %c0_80 = arith.constant 0 : index
    %c0_81 = arith.constant 0 : index
    %118 = vector.load %arg17[%c0_80, %c0_81] : memref<32x32xbf16, #tpu.memory_space<vmem>>, vector<32x32xbf16>
    %cst_82 = arith.constant dense<0.000000e+00> : vector<64x32xf32>
    %119 = tpu.matmul %117, %118, %cst_82 {dimension_numbers = #tpu.dot_dimension_numbers<[1], [0], [0], [1], [0, 0, 1, 1], [], []>} : vector<64x32xbf16>, vector<32x32xbf16>, vector<64x32xf32> -> vector<64x32xf32>
    %c0_83 = arith.constant 0 : index
    %c0_84 = arith.constant 0 : index
    %120 = vector.load %arg18[%c0_83, %c0_84] : memref<1x32xf32, #tpu.memory_space<vmem>>, vector<1x32xf32>
    %121 = vector.broadcast %120 : vector<1x32xf32> to vector<64x32xf32>
    %122 = arith.addf %119, %121 : vector<64x32xf32>
    %123 = vector.extract_strided_slice %3 {offsets = [0, 1, 0], sizes = [8, 8, 32], strides = [1, 1, 1]} : vector<8x9x32xf32> to vector<8x8x32xf32>
    %124 = vector.shape_cast %123 : vector<8x8x32xf32> to vector<64x32xf32>
    %125 = arith.addf %122, %124 : vector<64x32xf32>
    %126 = vector.shape_cast %125 : vector<64x32xf32> to vector<8x8x32xf32>
    %c0_85 = arith.constant 0 : index
    %c0_86 = arith.constant 0 : index
    %c0_87 = arith.constant 0 : index
    %c0_88 = arith.constant 0 : index
    %127 = vector.load %arg22[%c0_85, %c0_86, %c0_87, %c0_88] : memref<1x8x8x32xf32, #tpu.memory_space<vmem>>, vector<1x8x8x32xf32>
    %128 = vector.shape_cast %127 : vector<1x8x8x32xf32> to vector<8x8x32xf32>
    %129 = vector.shape_cast %126 : vector<8x8x32xf32> to vector<1x8x8x32xf32>
    tpu.vector_store %arg22[%c0_85, %c0_86, %c0_87, %c0_88], %129 {strides = array<i32>} : memref<1x8x8x32xf32, #tpu.memory_space<vmem>>, vector<1x8x8x32xf32>,
    return
  }
  func.func @transform_0(%arg0: i32) -> (i32, i32, i32, i32) {
    %c0_i32 = arith.constant 0 : i32
    %c0_i32_0 = arith.constant 0 : i32
    %c0_i32_1 = arith.constant 0 : i32
    %c0_i32_2 = arith.constant 0 : i32
    return %arg0, %c0_i32, %c0_i32_0, %c0_i32_1 : i32, i32, i32, i32
  }
  func.func @transform_1(%arg0: i32) -> (i32, i32, i32, i32) {
    %c0_i32 = arith.constant 0 : i32
    %c0_i32_0 = arith.constant 0 : i32
    %c0_i32_1 = arith.constant 0 : i32
    %c0_i32_2 = arith.constant 0 : i32
    return %arg0, %c0_i32, %c0_i32_0, %c0_i32_1 : i32, i32, i32, i32
  }
  func.func @transform_2(%arg0: i32) -> (i32, i32, i32) {
    %c0_i32 = arith.constant 0 : i32
    %c0_i32_0 = arith.constant 0 : i32
    %c0_i32_1 = arith.constant 0 : i32
    %c0_i32_2 = arith.constant 0 : i32
    return %c0_i32, %c0_i32_0, %c0_i32_1 : i32, i32, i32
  }
  func.func @transform_3(%arg0: i32) -> (i32, i32, i32) {
    %c0_i32 = arith.constant 0 : i32
    %c0_i32_0 = arith.constant 0 : i32
    %c0_i32_1 = arith.constant 0 : i32
    %c0_i32_2 = arith.constant 0 : i32
    return %c0_i32, %c0_i32_0, %c0_i32_1 : i32, i32, i32
  }
  func.func @transform_4(%arg0: i32) -> (i32, i32) {
    %c0_i32 = arith.constant 0 : i32
    %c0_i32_0 = arith.constant 0 : i32
    %c0_i32_1 = arith.constant 0 : i32
    return %c0_i32, %c0_i32_0 : i32, i32
  }
  func.func @transform_5(%arg0: i32) -> (i32, i32) {
    %c0_i32 = arith.constant 0 : i32
    %c0_i32_0 = arith.constant 0 : i32
    %c0_i32_1 = arith.constant 0 : i32
    return %c0_i32, %c0_i32_0 : i32, i32
  }
  func.func @transform_6(%arg0: i32) -> (i32, i32) {
    %c0_i32 = arith.constant 0 : i32
    %c0_i32_0 = arith.constant 0 : i32
    %c0_i32_1 = arith.constant 0 : i32
    return %c0_i32, %c0_i32_0 : i32, i32
  }
  func.func @transform_7(%arg0: i32) -> (i32, i32) {
    %c0_i32 = arith.constant 0 : i32
    %c0_i32_0 = arith.constant 0 : i32
    %c0_i32_1 = arith.constant 0 : i32
    return %c0_i32, %c0_i32_0 : i32, i32
  }
  func.func @transform_8(%arg0: i32) -> (i32, i32) {
    %c0_i32 = arith.constant 0 : i32
    %c0_i32_0 = arith.constant 0 : i32
    %c0_i32_1 = arith.constant 0 : i32
    return %c0_i32, %c0_i32_0 : i32, i32
  }
  func.func @transform_9(%arg0: i32) -> (i32, i32) {
    %c0_i32 = arith.constant 0 : i32
    %c0_i32_0 = arith.constant 0 : i32
    %c0_i32_1 = arith.constant 0 : i32
    return %c0_i32, %c0_i32_0 : i32, i32
  }
  func.func @transform_10(%arg0: i32) -> (i32, i32) {
    %c0_i32 = arith.constant 0 : i32
    %c0_i32_0 = arith.constant 0 : i32
    %c0_i32_1 = arith.constant 0 : i32
    return %c0_i32, %c0_i32_0 : i32, i32
  }
  func.func @transform_11(%arg0: i32) -> (i32, i32) {
    %c0_i32 = arith.constant 0 : i32
    %c0_i32_0 = arith.constant 0 : i32
    %c0_i32_1 = arith.constant 0 : i32
    return %c0_i32, %c0_i32_0 : i32, i32
  }
  func.func @transform_12(%arg0: i32) -> (i32, i32, i32) {
    %c0_i32 = arith.constant 0 : i32
    %c0_i32_0 = arith.constant 0 : i32
    %c0_i32_1 = arith.constant 0 : i32
    %c0_i32_2 = arith.constant 0 : i32
    return %c0_i32, %c0_i32_0, %c0_i32_1 : i32, i32, i32
  }
  func.func @transform_13(%arg0: i32) -> (i32, i32, i32) {
    %c0_i32 = arith.constant 0 : i32
    %c0_i32_0 = arith.constant 0 : i32
    %c0_i32_1 = arith.constant 0 : i32
    %c0_i32_2 = arith.constant 0 : i32
    return %c0_i32, %c0_i32_0, %c0_i32_1 : i32, i32, i32
  }
  func.func @transform_14(%arg0: i32) -> (i32, i32) {
    %c0_i32 = arith.constant 0 : i32
    %c0_i32_0 = arith.constant 0 : i32
    %c0_i32_1 = arith.constant 0 : i32
    return %c0_i32, %c0_i32_0 : i32, i32
  }
  func.func @transform_15(%arg0: i32) -> (i32, i32) {
    %c0_i32 = arith.constant 0 : i32
    %c0_i32_0 = arith.constant 0 : i32
    %c0_i32_1 = arith.constant 0 : i32
    return %c0_i32, %c0_i32_0 : i32, i32
  }
  func.func @transform_16(%arg0: i32) -> (i32, i32) {
    %c0_i32 = arith.constant 0 : i32
    %c0_i32_0 = arith.constant 0 : i32
    %c0_i32_1 = arith.constant 0 : i32
    return %c0_i32, %c0_i32_0 : i32, i32
  }
  func.func @transform_17(%arg0: i32) -> (i32, i32) {
    %c0_i32 = arith.constant 0 : i32
    %c0_i32_0 = arith.constant 0 : i32
    %c0_i32_1 = arith.constant 0 : i32
    return %c0_i32, %c0_i32_0 : i32, i32
  }
  func.func @transform_18(%arg0: i32) -> (i32, i32, i32) {
    %c0_i32 = arith.constant 0 : i32
    %c0_i32_0 = arith.constant 0 : i32
    %c0_i32_1 = arith.constant 0 : i32
    return %arg0, %c0_i32, %c0_i32_0 : i32, i32, i32
  }
  func.func @transform_19(%arg0: i32) -> (i32, i32, i32) {
    %c0_i32 = arith.constant 0 : i32
    %c0_i32_0 = arith.constant 0 : i32
    %c0_i32_1 = arith.constant 0 : i32
    return %arg0, %c0_i32, %c0_i32_0 : i32, i32, i32
  }
  func.func @transform_20(%arg0: i32) -> (i32, i32, i32, i32) {
    %c0_i32 = arith.constant 0 : i32
    %c0_i32_0 = arith.constant 0 : i32
    %c0_i32_1 = arith.constant 0 : i32
    %c0_i32_2 = arith.constant 0 : i32
    return %arg0, %c0_i32, %c0_i32_0, %c0_i32_1 : i32, i32, i32, i32
  }
  func.func @transform_21(%arg0: i32) -> (i32, i32, i32, i32) {
    %c0_i32 = arith.constant 0 : i32
    %c0_i32_0 = arith.constant 0 : i32
    %c0_i32_1 = arith.constant 0 : i32
    %c0_i32_2 = arith.constant 0 : i32
    return %arg0, %c0_i32, %c0_i32_0, %c0_i32_1 : i32, i32, i32, i32
  }
}

module attributes {stable_mosaic.version = 11 : i64} {
  func.func @kernel(%arg0: i32, %arg1: memref<1x9x10x32xf32, #tpu.memory_space<vmem>>, %arg2: memref<1x8x9x32xf32, #tpu.memory_space<vmem>>, %arg3: memref<3x32x32xbf16, #tpu.memory_space<vmem>>, %arg4: memref<3x32x32xbf16, #tpu.memory_space<vmem>>, %arg5: memref<1x32xf32, #tpu.memory_space<vmem>>, %arg6: memref<1x32xf32, #tpu.memory_space<vmem>>, %arg7: memref<32x32xbf16, #tpu.memory_space<vmem>>, %arg8: memref<32x32xbf16, #tpu.memory_space<vmem>>, %arg9: memref<32x32xbf16, #tpu.memory_space<vmem>>, %arg10: memref<32x32xbf16, #tpu.memory_space<vmem>>, %arg11: memref<1x32xf32, #tpu.memory_space<vmem>>, %arg12: memref<1x32xf32, #tpu.memory_space<vmem>>, %arg13: memref<2x32x32xbf16, #tpu.memory_space<vmem>>, %arg14: memref<2x32x32xbf16, #tpu.memory_space<vmem>>, %arg15: memref<1x32xf32, #tpu.memory_space<vmem>>, %arg16: memref<1x32xf32, #tpu.memory_space<vmem>>, %arg17: memref<32x32xbf16, #tpu.memory_space<vmem>>, %arg18: memref<1x32xf32, #tpu.memory_space<vmem>>, %arg19: memref<1x1x32xf32, #tpu.memory_space<vmem>>, %arg20: memref<1x1x32xf32, #tpu.memory_space<vmem>>, %arg21: memref<32x512xbf16, #tpu.memory_space<vmem>>, %arg22: memref<1x512xf32, #tpu.memory_space<vmem>>, %arg23: memref<512x64xbf16, #tpu.memory_space<vmem>>, %arg24: memref<1x64xf32, #tpu.memory_space<vmem>>, %arg25: memref<1x64x64xf32, #tpu.memory_space<vmem>>) attributes {dimension_semantics = [#tpu.dimension_semantics<parallel>], iteration_bounds = array<i64: 2>, scalar_prefetch = 0 : i64, scratch_operands = 0 : i64, tpu.core_type = #tpu.core_type<tc>, window_params = [{transform_indices = @transform_0, window_bounds = array<i64: 1, 9, 10, 32>}, {transform_indices = @transform_1, window_bounds = array<i64: 1, 8, 9, 32>}, {pipeline_mode = #tpu.pipeline_mode<synchronous>, transform_indices = @transform_2, window_bounds = array<i64: 3, 32, 32>}, {pipeline_mode = #tpu.pipeline_mode<synchronous>, transform_indices = @transform_3, window_bounds = array<i64: 3, 32, 32>}, {pipeline_mode = #tpu.pipeline_mode<synchronous>, transform_indices = @transform_4, window_bounds = array<i64: 1, 32>}, {pipeline_mode = #tpu.pipeline_mode<synchronous>, transform_indices = @transform_5, window_bounds = array<i64: 1, 32>}, {pipeline_mode = #tpu.pipeline_mode<synchronous>, transform_indices = @transform_6, window_bounds = array<i64: 32, 32>}, {pipeline_mode = #tpu.pipeline_mode<synchronous>, transform_indices = @transform_7, window_bounds = array<i64: 32, 32>}, {pipeline_mode = #tpu.pipeline_mode<synchronous>, transform_indices = @transform_8, window_bounds = array<i64: 32, 32>}, {pipeline_mode = #tpu.pipeline_mode<synchronous>, transform_indices = @transform_9, window_bounds = array<i64: 32, 32>}, {pipeline_mode = #tpu.pipeline_mode<synchronous>, transform_indices = @transform_10, window_bounds = array<i64: 1, 32>}, {pipeline_mode = #tpu.pipeline_mode<synchronous>, transform_indices = @transform_11, window_bounds = array<i64: 1, 32>}, {pipeline_mode = #tpu.pipeline_mode<synchronous>, transform_indices = @transform_12, window_bounds = array<i64: 2, 32, 32>}, {pipeline_mode = #tpu.pipeline_mode<synchronous>, transform_indices = @transform_13, window_bounds = array<i64: 2, 32, 32>}, {pipeline_mode = #tpu.pipeline_mode<synchronous>, transform_indices = @transform_14, window_bounds = array<i64: 1, 32>}, {pipeline_mode = #tpu.pipeline_mode<synchronous>, transform_indices = @transform_15, window_bounds = array<i64: 1, 32>}, {pipeline_mode = #tpu.pipeline_mode<synchronous>, transform_indices = @transform_16, window_bounds = array<i64: 32, 32>}, {pipeline_mode = #tpu.pipeline_mode<synchronous>, transform_indices = @transform_17, window_bounds = array<i64: 1, 32>}, {transform_indices = @transform_18, window_bounds = array<i64: 1, 1, 32>}, {transform_indices = @transform_19, window_bounds = array<i64: 1, 1, 32>}, {pipeline_mode = #tpu.pipeline_mode<synchronous>, transform_indices = @transform_20, window_bounds = array<i64: 32, 512>}, {pipeline_mode = #tpu.pipeline_mode<synchronous>, transform_indices = @transform_21, window_bounds = array<i64: 1, 512>}, {pipeline_mode = #tpu.pipeline_mode<synchronous>, transform_indices = @transform_22, window_bounds = array<i64: 512, 64>}, {pipeline_mode = #tpu.pipeline_mode<synchronous>, transform_indices = @transform_23, window_bounds = array<i64: 1, 64>}, {transform_indices = @transform_24, window_bounds = array<i64: 1, 64, 64>}]} {
    %c0 = arith.constant 0 : index
    %c0_0 = arith.constant 0 : index
    %c0_1 = arith.constant 0 : index
    %c0_2 = arith.constant 0 : index
    %0 = vector.load %arg1[%c0, %c0_0, %c0_1, %c0_2] : memref<1x9x10x32xf32, #tpu.memory_space<vmem>>, vector<1x9x10x32xf32>
    %1 = vector.shape_cast %0 : vector<1x9x10x32xf32> to vector<9x10x32xf32>
    %c0_3 = arith.constant 0 : index
    %c0_4 = arith.constant 0 : index
    %c0_5 = arith.constant 0 : index
    %c0_6 = arith.constant 0 : index
    %2 = vector.load %arg2[%c0_3, %c0_4, %c0_5, %c0_6] : memref<1x8x9x32xf32, #tpu.memory_space<vmem>>, vector<1x8x9x32xf32>
    %3 = vector.shape_cast %2 : vector<1x8x9x32xf32> to vector<8x9x32xf32>
    %c0_7 = arith.constant 0 : index
    %c0_8 = arith.constant 0 : index
    %4 = vector.load %arg5[%c0_7, %c0_8] : memref<1x32xf32, #tpu.memory_space<vmem>>, vector<1x32xf32>
    %c0_9 = arith.constant 0 : index
    %c0_10 = arith.constant 0 : index
    %5 = vector.load %arg6[%c0_9, %c0_10] : memref<1x32xf32, #tpu.memory_space<vmem>>, vector<1x32xf32>
    %6 = vector.extract_strided_slice %1 {offsets = [0, 0, 0], sizes = [8, 8, 32], strides = [1, 1, 1]} : vector<9x10x32xf32> to vector<8x8x32xf32>
    %7 = vector.shape_cast %6 : vector<8x8x32xf32> to vector<64x32xf32>
    %8 = arith.truncf %7 : vector<64x32xf32> to vector<64x32xbf16>
    %c0_11 = arith.constant 0 : index
    %c0_12 = arith.constant 0 : index
    %c0_13 = arith.constant 0 : index
    %9 = vector.load %arg3[%c0_11, %c0_12, %c0_13] : memref<3x32x32xbf16, #tpu.memory_space<vmem>>, vector<1x32x32xbf16>
    %10 = vector.shape_cast %9 : vector<1x32x32xbf16> to vector<32x32xbf16>
    %cst = arith.constant dense<0.000000e+00> : vector<64x32xf32>
    %11 = tpu.matmul %8, %10, %cst {dimension_numbers = #tpu.dot_dimension_numbers<[1], [0], [0], [1], [0, 0, 1, 1], [], []>} : vector<64x32xbf16>, vector<32x32xbf16>, vector<64x32xf32> -> vector<64x32xf32>
    %12 = vector.broadcast %4 : vector<1x32xf32> to vector<64x32xf32>
    %13 = arith.addf %12, %11 : vector<64x32xf32>
    %c0_14 = arith.constant 0 : index
    %c0_15 = arith.constant 0 : index
    %c0_16 = arith.constant 0 : index
    %14 = vector.load %arg4[%c0_14, %c0_15, %c0_16] : memref<3x32x32xbf16, #tpu.memory_space<vmem>>, vector<1x32x32xbf16>
    %15 = vector.shape_cast %14 : vector<1x32x32xbf16> to vector<32x32xbf16>
    %cst_17 = arith.constant dense<0.000000e+00> : vector<64x32xf32>
    %16 = tpu.matmul %8, %15, %cst_17 {dimension_numbers = #tpu.dot_dimension_numbers<[1], [0], [0], [1], [0, 0, 1, 1], [], []>} : vector<64x32xbf16>, vector<32x32xbf16>, vector<64x32xf32> -> vector<64x32xf32>
    %17 = vector.broadcast %5 : vector<1x32xf32> to vector<64x32xf32>
    %18 = arith.addf %17, %16 : vector<64x32xf32>
    %19 = vector.extract_strided_slice %1 {offsets = [0, 1, 0], sizes = [8, 8, 32], strides = [1, 1, 1]} : vector<9x10x32xf32> to vector<8x8x32xf32>
    %20 = vector.shape_cast %19 : vector<8x8x32xf32> to vector<64x32xf32>
    %21 = arith.truncf %20 : vector<64x32xf32> to vector<64x32xbf16>
    %c1 = arith.constant 1 : index
    %c0_18 = arith.constant 0 : index
    %c0_19 = arith.constant 0 : index
    %22 = vector.load %arg3[%c1, %c0_18, %c0_19] : memref<3x32x32xbf16, #tpu.memory_space<vmem>>, vector<1x32x32xbf16>
    %23 = vector.shape_cast %22 : vector<1x32x32xbf16> to vector<32x32xbf16>
    %cst_20 = arith.constant dense<0.000000e+00> : vector<64x32xf32>
    %24 = tpu.matmul %21, %23, %cst_20 {dimension_numbers = #tpu.dot_dimension_numbers<[1], [0], [0], [1], [0, 0, 1, 1], [], []>} : vector<64x32xbf16>, vector<32x32xbf16>, vector<64x32xf32> -> vector<64x32xf32>
    %25 = arith.addf %13, %24 : vector<64x32xf32>
    %c1_21 = arith.constant 1 : index
    %c0_22 = arith.constant 0 : index
    %c0_23 = arith.constant 0 : index
    %26 = vector.load %arg4[%c1_21, %c0_22, %c0_23] : memref<3x32x32xbf16, #tpu.memory_space<vmem>>, vector<1x32x32xbf16>
    %27 = vector.shape_cast %26 : vector<1x32x32xbf16> to vector<32x32xbf16>
    %cst_24 = arith.constant dense<0.000000e+00> : vector<64x32xf32>
    %28 = tpu.matmul %21, %27, %cst_24 {dimension_numbers = #tpu.dot_dimension_numbers<[1], [0], [0], [1], [0, 0, 1, 1], [], []>} : vector<64x32xbf16>, vector<32x32xbf16>, vector<64x32xf32> -> vector<64x32xf32>
    %29 = arith.addf %18, %28 : vector<64x32xf32>
    %30 = vector.extract_strided_slice %1 {offsets = [0, 2, 0], sizes = [8, 8, 32], strides = [1, 1, 1]} : vector<9x10x32xf32> to vector<8x8x32xf32>
    %31 = vector.shape_cast %30 : vector<8x8x32xf32> to vector<64x32xf32>
    %32 = arith.truncf %31 : vector<64x32xf32> to vector<64x32xbf16>
    %c2 = arith.constant 2 : index
    %c0_25 = arith.constant 0 : index
    %c0_26 = arith.constant 0 : index
    %33 = vector.load %arg3[%c2, %c0_25, %c0_26] : memref<3x32x32xbf16, #tpu.memory_space<vmem>>, vector<1x32x32xbf16>
    %34 = vector.shape_cast %33 : vector<1x32x32xbf16> to vector<32x32xbf16>
    %cst_27 = arith.constant dense<0.000000e+00> : vector<64x32xf32>
    %35 = tpu.matmul %32, %34, %cst_27 {dimension_numbers = #tpu.dot_dimension_numbers<[1], [0], [0], [1], [0, 0, 1, 1], [], []>} : vector<64x32xbf16>, vector<32x32xbf16>, vector<64x32xf32> -> vector<64x32xf32>
    %36 = arith.addf %25, %35 : vector<64x32xf32>
    %c2_28 = arith.constant 2 : index
    %c0_29 = arith.constant 0 : index
    %c0_30 = arith.constant 0 : index
    %37 = vector.load %arg4[%c2_28, %c0_29, %c0_30] : memref<3x32x32xbf16, #tpu.memory_space<vmem>>, vector<1x32x32xbf16>
    %38 = vector.shape_cast %37 : vector<1x32x32xbf16> to vector<32x32xbf16>
    %cst_31 = arith.constant dense<0.000000e+00> : vector<64x32xf32>
    %39 = tpu.matmul %32, %38, %cst_31 {dimension_numbers = #tpu.dot_dimension_numbers<[1], [0], [0], [1], [0, 0, 1, 1], [], []>} : vector<64x32xbf16>, vector<32x32xbf16>, vector<64x32xf32> -> vector<64x32xf32>
    %40 = arith.addf %29, %39 : vector<64x32xf32>
    %c0_32 = arith.constant 0 : index
    %c0_33 = arith.constant 0 : index
    %c0_34 = arith.constant 0 : index
    %41 = vector.load %arg19[%c0_32, %c0_33, %c0_34] : memref<1x1x32xf32, #tpu.memory_space<vmem>>, vector<1x1x32xf32>
    %42 = vector.shape_cast %41 : vector<1x1x32xf32> to vector<1x32xf32>
    %c0_35 = arith.constant 0 : index
    %c0_36 = arith.constant 0 : index
    %c0_37 = arith.constant 0 : index
    %43 = vector.load %arg20[%c0_35, %c0_36, %c0_37] : memref<1x1x32xf32, #tpu.memory_space<vmem>>, vector<1x1x32xf32>
    %44 = vector.shape_cast %43 : vector<1x1x32xf32> to vector<1x32xf32>
    %45 = arith.truncf %36 : vector<64x32xf32> to vector<64x32xbf16>
    %46 = arith.truncf %40 : vector<64x32xf32> to vector<64x32xbf16>
    %c0_38 = arith.constant 0 : index
    %c0_39 = arith.constant 0 : index
    %47 = vector.load %arg7[%c0_38, %c0_39] : memref<32x32xbf16, #tpu.memory_space<vmem>>, vector<32x32xbf16>
    %cst_40 = arith.constant dense<0.000000e+00> : vector<64x32xf32>
    %48 = tpu.matmul %45, %47, %cst_40 {dimension_numbers = #tpu.dot_dimension_numbers<[1], [0], [0], [1], [0, 0, 1, 1], [], []>} : vector<64x32xbf16>, vector<32x32xbf16>, vector<64x32xf32> -> vector<64x32xf32>
    %c0_41 = arith.constant 0 : index
    %c0_42 = arith.constant 0 : index
    %49 = vector.load %arg8[%c0_41, %c0_42] : memref<32x32xbf16, #tpu.memory_space<vmem>>, vector<32x32xbf16>
    %cst_43 = arith.constant dense<0.000000e+00> : vector<64x32xf32>
    %50 = tpu.matmul %46, %49, %cst_43 {dimension_numbers = #tpu.dot_dimension_numbers<[1], [0], [0], [1], [0, 0, 1, 1], [], []>} : vector<64x32xbf16>, vector<32x32xbf16>, vector<64x32xf32> -> vector<64x32xf32>
    %51 = arith.addf %48, %50 : vector<64x32xf32>
    %c0_44 = arith.constant 0 : index
    %c0_45 = arith.constant 0 : index
    %52 = vector.load %arg11[%c0_44, %c0_45] : memref<1x32xf32, #tpu.memory_space<vmem>>, vector<1x32xf32>
    %53 = vector.broadcast %52 : vector<1x32xf32> to vector<64x32xf32>
    %54 = arith.addf %51, %53 : vector<64x32xf32>
    %c0_46 = arith.constant 0 : index
    %c0_47 = arith.constant 0 : index
    %55 = vector.load %arg9[%c0_46, %c0_47] : memref<32x32xbf16, #tpu.memory_space<vmem>>, vector<32x32xbf16>
    %cst_48 = arith.constant dense<0.000000e+00> : vector<64x32xf32>
    %56 = tpu.matmul %45, %55, %cst_48 {dimension_numbers = #tpu.dot_dimension_numbers<[1], [0], [0], [1], [0, 0, 1, 1], [], []>} : vector<64x32xbf16>, vector<32x32xbf16>, vector<64x32xf32> -> vector<64x32xf32>
    %c0_49 = arith.constant 0 : index
    %c0_50 = arith.constant 0 : index
    %57 = vector.load %arg10[%c0_49, %c0_50] : memref<32x32xbf16, #tpu.memory_space<vmem>>, vector<32x32xbf16>
    %cst_51 = arith.constant dense<0.000000e+00> : vector<64x32xf32>
    %58 = tpu.matmul %46, %57, %cst_51 {dimension_numbers = #tpu.dot_dimension_numbers<[1], [0], [0], [1], [0, 0, 1, 1], [], []>} : vector<64x32xbf16>, vector<32x32xbf16>, vector<64x32xf32> -> vector<64x32xf32>
    %59 = arith.addf %56, %58 : vector<64x32xf32>
    %c0_52 = arith.constant 0 : index
    %c0_53 = arith.constant 0 : index
    %60 = vector.load %arg12[%c0_52, %c0_53] : memref<1x32xf32, #tpu.memory_space<vmem>>, vector<1x32xf32>
    %61 = vector.broadcast %60 : vector<1x32xf32> to vector<64x32xf32>
    %62 = arith.addf %59, %61 : vector<64x32xf32>
    %c0_54 = arith.constant 0 : index
    %c0_55 = arith.constant 0 : index
    %63 = vector.load %arg15[%c0_54, %c0_55] : memref<1x32xf32, #tpu.memory_space<vmem>>, vector<1x32xf32>
    %c0_56 = arith.constant 0 : index
    %c0_57 = arith.constant 0 : index
    %64 = vector.load %arg16[%c0_56, %c0_57] : memref<1x32xf32, #tpu.memory_space<vmem>>, vector<1x32xf32>
    %65 = vector.extract_strided_slice %3 {offsets = [0, 0, 0], sizes = [8, 8, 32], strides = [1, 1, 1]} : vector<8x9x32xf32> to vector<8x8x32xf32>
    %66 = vector.shape_cast %65 : vector<8x8x32xf32> to vector<64x32xf32>
    %67 = arith.truncf %66 : vector<64x32xf32> to vector<64x32xbf16>
    %c0_58 = arith.constant 0 : index
    %c0_59 = arith.constant 0 : index
    %c0_60 = arith.constant 0 : index
    %68 = vector.load %arg13[%c0_58, %c0_59, %c0_60] : memref<2x32x32xbf16, #tpu.memory_space<vmem>>, vector<1x32x32xbf16>
    %69 = vector.shape_cast %68 : vector<1x32x32xbf16> to vector<32x32xbf16>
    %cst_61 = arith.constant dense<0.000000e+00> : vector<64x32xf32>
    %70 = tpu.matmul %67, %69, %cst_61 {dimension_numbers = #tpu.dot_dimension_numbers<[1], [0], [0], [1], [0, 0, 1, 1], [], []>} : vector<64x32xbf16>, vector<32x32xbf16>, vector<64x32xf32> -> vector<64x32xf32>
    %71 = vector.broadcast %63 : vector<1x32xf32> to vector<64x32xf32>
    %72 = arith.addf %71, %70 : vector<64x32xf32>
    %c0_62 = arith.constant 0 : index
    %c0_63 = arith.constant 0 : index
    %c0_64 = arith.constant 0 : index
    %73 = vector.load %arg14[%c0_62, %c0_63, %c0_64] : memref<2x32x32xbf16, #tpu.memory_space<vmem>>, vector<1x32x32xbf16>
    %74 = vector.shape_cast %73 : vector<1x32x32xbf16> to vector<32x32xbf16>
    %cst_65 = arith.constant dense<0.000000e+00> : vector<64x32xf32>
    %75 = tpu.matmul %67, %74, %cst_65 {dimension_numbers = #tpu.dot_dimension_numbers<[1], [0], [0], [1], [0, 0, 1, 1], [], []>} : vector<64x32xbf16>, vector<32x32xbf16>, vector<64x32xf32> -> vector<64x32xf32>
    %76 = vector.broadcast %64 : vector<1x32xf32> to vector<64x32xf32>
    %77 = arith.addf %76, %75 : vector<64x32xf32>
    %78 = vector.extract_strided_slice %3 {offsets = [0, 1, 0], sizes = [8, 8, 32], strides = [1, 1, 1]} : vector<8x9x32xf32> to vector<8x8x32xf32>
    %79 = vector.shape_cast %78 : vector<8x8x32xf32> to vector<64x32xf32>
    %80 = arith.truncf %79 : vector<64x32xf32> to vector<64x32xbf16>
    %c1_66 = arith.constant 1 : index
    %c0_67 = arith.constant 0 : index
    %c0_68 = arith.constant 0 : index
    %81 = vector.load %arg13[%c1_66, %c0_67, %c0_68] : memref<2x32x32xbf16, #tpu.memory_space<vmem>>, vector<1x32x32xbf16>
    %82 = vector.shape_cast %81 : vector<1x32x32xbf16> to vector<32x32xbf16>
    %cst_69 = arith.constant dense<0.000000e+00> : vector<64x32xf32>
    %83 = tpu.matmul %80, %82, %cst_69 {dimension_numbers = #tpu.dot_dimension_numbers<[1], [0], [0], [1], [0, 0, 1, 1], [], []>} : vector<64x32xbf16>, vector<32x32xbf16>, vector<64x32xf32> -> vector<64x32xf32>
    %84 = arith.addf %72, %83 : vector<64x32xf32>
    %c1_70 = arith.constant 1 : index
    %c0_71 = arith.constant 0 : index
    %c0_72 = arith.constant 0 : index
    %85 = vector.load %arg14[%c1_70, %c0_71, %c0_72] : memref<2x32x32xbf16, #tpu.memory_space<vmem>>, vector<1x32x32xbf16>
    %86 = vector.shape_cast %85 : vector<1x32x32xbf16> to vector<32x32xbf16>
    %cst_73 = arith.constant dense<0.000000e+00> : vector<64x32xf32>
    %87 = tpu.matmul %80, %86, %cst_73 {dimension_numbers = #tpu.dot_dimension_numbers<[1], [0], [0], [1], [0, 0, 1, 1], [], []>} : vector<64x32xbf16>, vector<32x32xbf16>, vector<64x32xf32> -> vector<64x32xf32>
    %88 = arith.addf %77, %87 : vector<64x32xf32>
    %89 = arith.addf %84, %54 : vector<64x32xf32>
    %90 = vector.broadcast %42 : vector<1x32xf32> to vector<64x32xf32>
    %91 = arith.addf %89, %90 : vector<64x32xf32>
    %92 = math.tanh %91 : vector<64x32xf32>
    %93 = arith.addf %88, %62 : vector<64x32xf32>
    %94 = vector.broadcast %44 : vector<1x32xf32> to vector<64x32xf32>
    %95 = arith.addf %93, %94 : vector<64x32xf32>
    %96 = arith.negf %95 : vector<64x32xf32>
    %97 = math.exp %96 : vector<64x32xf32>
    %cst_74 = arith.constant 1.000000e+00 : f32
    %98 = vector.broadcast %cst_74 : f32 to vector<64x32xf32>
    %99 = arith.addf %98, %97 : vector<64x32xf32>
    %100 = arith.divf %98, %99 : vector<64x32xf32>
    %101 = arith.mulf %92, %100 : vector<64x32xf32>
    %102 = arith.truncf %101 : vector<64x32xf32> to vector<64x32xbf16>
    %c0_75 = arith.constant 0 : index
    %c0_76 = arith.constant 0 : index
    %103 = vector.load %arg17[%c0_75, %c0_76] : memref<32x32xbf16, #tpu.memory_space<vmem>>, vector<32x32xbf16>
    %cst_77 = arith.constant dense<0.000000e+00> : vector<64x32xf32>
    %104 = tpu.matmul %102, %103, %cst_77 {dimension_numbers = #tpu.dot_dimension_numbers<[1], [0], [0], [1], [0, 0, 1, 1], [], []>} : vector<64x32xbf16>, vector<32x32xbf16>, vector<64x32xf32> -> vector<64x32xf32>
    %c0_78 = arith.constant 0 : index
    %c0_79 = arith.constant 0 : index
    %105 = vector.load %arg18[%c0_78, %c0_79] : memref<1x32xf32, #tpu.memory_space<vmem>>, vector<1x32xf32>
    %106 = vector.broadcast %105 : vector<1x32xf32> to vector<64x32xf32>
    %107 = arith.addf %104, %106 : vector<64x32xf32>
    %108 = vector.extract_strided_slice %3 {offsets = [0, 1, 0], sizes = [8, 8, 32], strides = [1, 1, 1]} : vector<8x9x32xf32> to vector<8x8x32xf32>
    %109 = vector.shape_cast %108 : vector<8x8x32xf32> to vector<64x32xf32>
    %110 = arith.addf %107, %109 : vector<64x32xf32>
    %111 = arith.truncf %110 : vector<64x32xf32> to vector<64x32xbf16>
    %c0_80 = arith.constant 0 : index
    %c0_81 = arith.constant 0 : index
    %112 = vector.load %arg21[%c0_80, %c0_81] : memref<32x512xbf16, #tpu.memory_space<vmem>>, vector<32x512xbf16>
    %cst_82 = arith.constant dense<0.000000e+00> : vector<64x512xf32>
    %113 = tpu.matmul %111, %112, %cst_82 {dimension_numbers = #tpu.dot_dimension_numbers<[1], [0], [0], [1], [0, 0, 1, 1], [], []>} : vector<64x32xbf16>, vector<32x512xbf16>, vector<64x512xf32> -> vector<64x512xf32>
    %c0_83 = arith.constant 0 : index
    %c0_84 = arith.constant 0 : index
    %114 = vector.load %arg22[%c0_83, %c0_84] : memref<1x512xf32, #tpu.memory_space<vmem>>, vector<1x512xf32>
    %115 = vector.broadcast %114 : vector<1x512xf32> to vector<64x512xf32>
    %116 = arith.addf %113, %115 : vector<64x512xf32>
    %cst_85 = arith.constant 0.000000e+00 : f32
    %117 = vector.broadcast %cst_85 : f32 to vector<64x512xf32>
    %118 = arith.maximumf %116, %117 : vector<64x512xf32>
    %119 = arith.truncf %118 : vector<64x512xf32> to vector<64x512xbf16>
    %c0_86 = arith.constant 0 : index
    %c0_87 = arith.constant 0 : index
    %120 = vector.load %arg23[%c0_86, %c0_87] : memref<512x64xbf16, #tpu.memory_space<vmem>>, vector<512x64xbf16>
    %cst_88 = arith.constant dense<0.000000e+00> : vector<64x64xf32>
    %121 = tpu.matmul %119, %120, %cst_88 {dimension_numbers = #tpu.dot_dimension_numbers<[1], [0], [0], [1], [0, 0, 1, 1], [], []>} : vector<64x512xbf16>, vector<512x64xbf16>, vector<64x64xf32> -> vector<64x64xf32>
    %c0_89 = arith.constant 0 : index
    %c0_90 = arith.constant 0 : index
    %122 = vector.load %arg24[%c0_89, %c0_90] : memref<1x64xf32, #tpu.memory_space<vmem>>, vector<1x64xf32>
    %123 = vector.broadcast %122 : vector<1x64xf32> to vector<64x64xf32>
    %124 = arith.addf %121, %123 : vector<64x64xf32>
    %c0_91 = arith.constant 0 : index
    %c0_92 = arith.constant 0 : index
    %c0_93 = arith.constant 0 : index
    %125 = vector.load %arg25[%c0_91, %c0_92, %c0_93] : memref<1x64x64xf32, #tpu.memory_space<vmem>>, vector<1x64x64xf32>
    %126 = vector.shape_cast %125 : vector<1x64x64xf32> to vector<64x64xf32>
    %127 = vector.shape_cast %124 : vector<64x64xf32> to vector<1x64x64xf32>
    tpu.vector_store %arg25[%c0_91, %c0_92, %c0_93], %127 {strides = array<i32>} : memref<1x64x64xf32, #tpu.memory_space<vmem>>, vector<1x64x64xf32>,
    return
  }
  func.func @transform_0(%arg0: i32) -> (i32, i32, i32, i32) {
    %c0_i32 = arith.constant 0 : i32
    %c0_i32_0 = arith.constant 0 : i32
    %c0_i32_1 = arith.constant 0 : i32
    %c0_i32_2 = arith.constant 0 : i32
    return %arg0, %c0_i32, %c0_i32_0, %c0_i32_1 : i32, i32, i32, i32
  }
  func.func @transform_1(%arg0: i32) -> (i32, i32, i32, i32) {
    %c0_i32 = arith.constant 0 : i32
    %c0_i32_0 = arith.constant 0 : i32
    %c0_i32_1 = arith.constant 0 : i32
    %c0_i32_2 = arith.constant 0 : i32
    return %arg0, %c0_i32, %c0_i32_0, %c0_i32_1 : i32, i32, i32, i32
  }
  func.func @transform_2(%arg0: i32) -> (i32, i32, i32) {
    %c0_i32 = arith.constant 0 : i32
    %c0_i32_0 = arith.constant 0 : i32
    %c0_i32_1 = arith.constant 0 : i32
    %c0_i32_2 = arith.constant 0 : i32
    return %c0_i32, %c0_i32_0, %c0_i32_1 : i32, i32, i32
  }
  func.func @transform_3(%arg0: i32) -> (i32, i32, i32) {
    %c0_i32 = arith.constant 0 : i32
    %c0_i32_0 = arith.constant 0 : i32
    %c0_i32_1 = arith.constant 0 : i32
    %c0_i32_2 = arith.constant 0 : i32
    return %c0_i32, %c0_i32_0, %c0_i32_1 : i32, i32, i32
  }
  func.func @transform_4(%arg0: i32) -> (i32, i32) {
    %c0_i32 = arith.constant 0 : i32
    %c0_i32_0 = arith.constant 0 : i32
    %c0_i32_1 = arith.constant 0 : i32
    return %c0_i32, %c0_i32_0 : i32, i32
  }
  func.func @transform_5(%arg0: i32) -> (i32, i32) {
    %c0_i32 = arith.constant 0 : i32
    %c0_i32_0 = arith.constant 0 : i32
    %c0_i32_1 = arith.constant 0 : i32
    return %c0_i32, %c0_i32_0 : i32, i32
  }
  func.func @transform_6(%arg0: i32) -> (i32, i32) {
    %c0_i32 = arith.constant 0 : i32
    %c0_i32_0 = arith.constant 0 : i32
    %c0_i32_1 = arith.constant 0 : i32
    return %c0_i32, %c0_i32_0 : i32, i32
  }
  func.func @transform_7(%arg0: i32) -> (i32, i32) {
    %c0_i32 = arith.constant 0 : i32
    %c0_i32_0 = arith.constant 0 : i32
    %c0_i32_1 = arith.constant 0 : i32
    return %c0_i32, %c0_i32_0 : i32, i32
  }
  func.func @transform_8(%arg0: i32) -> (i32, i32) {
    %c0_i32 = arith.constant 0 : i32
    %c0_i32_0 = arith.constant 0 : i32
    %c0_i32_1 = arith.constant 0 : i32
    return %c0_i32, %c0_i32_0 : i32, i32
  }
  func.func @transform_9(%arg0: i32) -> (i32, i32) {
    %c0_i32 = arith.constant 0 : i32
    %c0_i32_0 = arith.constant 0 : i32
    %c0_i32_1 = arith.constant 0 : i32
    return %c0_i32, %c0_i32_0 : i32, i32
  }
  func.func @transform_10(%arg0: i32) -> (i32, i32) {
    %c0_i32 = arith.constant 0 : i32
    %c0_i32_0 = arith.constant 0 : i32
    %c0_i32_1 = arith.constant 0 : i32
    return %c0_i32, %c0_i32_0 : i32, i32
  }
  func.func @transform_11(%arg0: i32) -> (i32, i32) {
    %c0_i32 = arith.constant 0 : i32
    %c0_i32_0 = arith.constant 0 : i32
    %c0_i32_1 = arith.constant 0 : i32
    return %c0_i32, %c0_i32_0 : i32, i32
  }
  func.func @transform_12(%arg0: i32) -> (i32, i32, i32) {
    %c0_i32 = arith.constant 0 : i32
    %c0_i32_0 = arith.constant 0 : i32
    %c0_i32_1 = arith.constant 0 : i32
    %c0_i32_2 = arith.constant 0 : i32
    return %c0_i32, %c0_i32_0, %c0_i32_1 : i32, i32, i32
  }
  func.func @transform_13(%arg0: i32) -> (i32, i32, i32) {
    %c0_i32 = arith.constant 0 : i32
    %c0_i32_0 = arith.constant 0 : i32
    %c0_i32_1 = arith.constant 0 : i32
    %c0_i32_2 = arith.constant 0 : i32
    return %c0_i32, %c0_i32_0, %c0_i32_1 : i32, i32, i32
  }
  func.func @transform_14(%arg0: i32) -> (i32, i32) {
    %c0_i32 = arith.constant 0 : i32
    %c0_i32_0 = arith.constant 0 : i32
    %c0_i32_1 = arith.constant 0 : i32
    return %c0_i32, %c0_i32_0 : i32, i32
  }
  func.func @transform_15(%arg0: i32) -> (i32, i32) {
    %c0_i32 = arith.constant 0 : i32
    %c0_i32_0 = arith.constant 0 : i32
    %c0_i32_1 = arith.constant 0 : i32
    return %c0_i32, %c0_i32_0 : i32, i32
  }
  func.func @transform_16(%arg0: i32) -> (i32, i32) {
    %c0_i32 = arith.constant 0 : i32
    %c0_i32_0 = arith.constant 0 : i32
    %c0_i32_1 = arith.constant 0 : i32
    return %c0_i32, %c0_i32_0 : i32, i32
  }
  func.func @transform_17(%arg0: i32) -> (i32, i32) {
    %c0_i32 = arith.constant 0 : i32
    %c0_i32_0 = arith.constant 0 : i32
    %c0_i32_1 = arith.constant 0 : i32
    return %c0_i32, %c0_i32_0 : i32, i32
  }
  func.func @transform_18(%arg0: i32) -> (i32, i32, i32) {
    %c0_i32 = arith.constant 0 : i32
    %c0_i32_0 = arith.constant 0 : i32
    %c0_i32_1 = arith.constant 0 : i32
    return %arg0, %c0_i32, %c0_i32_0 : i32, i32, i32
  }
  func.func @transform_19(%arg0: i32) -> (i32, i32, i32) {
    %c0_i32 = arith.constant 0 : i32
    %c0_i32_0 = arith.constant 0 : i32
    %c0_i32_1 = arith.constant 0 : i32
    return %arg0, %c0_i32, %c0_i32_0 : i32, i32, i32
  }
  func.func @transform_20(%arg0: i32) -> (i32, i32) {
    %c0_i32 = arith.constant 0 : i32
    %c0_i32_0 = arith.constant 0 : i32
    %c0_i32_1 = arith.constant 0 : i32
    return %c0_i32, %c0_i32_0 : i32, i32
  }
  func.func @transform_21(%arg0: i32) -> (i32, i32) {
    %c0_i32 = arith.constant 0 : i32
    %c0_i32_0 = arith.constant 0 : i32
    %c0_i32_1 = arith.constant 0 : i32
    return %c0_i32, %c0_i32_0 : i32, i32
  }
  func.func @transform_22(%arg0: i32) -> (i32, i32) {
    %c0_i32 = arith.constant 0 : i32
    %c0_i32_0 = arith.constant 0 : i32
    %c0_i32_1 = arith.constant 0 : i32
    return %c0_i32, %c0_i32_0 : i32, i32
  }
  func.func @transform_23(%arg0: i32) -> (i32, i32) {
    %c0_i32 = arith.constant 0 : i32
    %c0_i32_0 = arith.constant 0 : i32
    %c0_i32_1 = arith.constant 0 : i32
    return %c0_i32, %c0_i32_0 : i32, i32
  }
  func.func @transform_24(%arg0: i32) -> (i32, i32, i32) {
    %c0_i32 = arith.constant 0 : i32
    %c0_i32_0 = arith.constant 0 : i32
    %c0_i32_1 = arith.constant 0 : i32
    return %arg0, %c0_i32, %c0_i32_0 : i32, i32, i32
  }
}

</mosaic_0001>

<bundles_post_ra>
// kernel: _lambda_.4
= control target key start
LH: loop header
LB: loop body
LE: loop exit
PB: predicated region body
PF: predicated region fallthrough
CT: control target
= control target key end

     0   :  { %s4096_s0 = inlined_call_operand.vmem [shape: f32[2,9,10,32], index: 0, kind: input, shape index: {}]   ;;  %s4097_s1 = inlined_call_operand.vmem [shape: f32[2,8,9,32], index: 1, kind: input, shape index: {}]   ;;  %s4098_s2 = inlined_call_operand.vmem [shape: bf16[3,32,32], index: 2, kind: input, shape index: {}]   ;;  %s4099_s3 = inlined_call_operand.vmem [shape: bf16[3,32,32], index: 3, kind: input, shape index: {}]   ;;  %s4100_s4 = inlined_call_operand.vmem [shape: f32[1,32], index: 4, kind: input, shape index: {}]   ;;  %s4101_s5 = inlined_call_operand.vmem [shape: f32[1,32], index: 5, kind: input, shape index: {}]   ;;  %s4102_s6 = inlined_call_operand.vmem [shape: bf16[32,32], index: 6, kind: input, shape index: {}]   ;;  %s4103_s7 = inlined_call_operand.vmem [shape: bf16[32,32], index: 7, kind: input, shape index: {}]   ;;  %s4104_s8 = inlined_call_operand.vmem [shape: bf16[32,32], index: 8, kind: input, shape index: {}]   ;;  %s4105_s9 = inlined_call_operand.vmem [shape: bf16[32,32], index: 9, kind: input, shape index: {}]   ;;  %s4106_s10 = inlined_call_operand.vmem [shape: f32[1,32], index: 10, kind: input, shape index: {}]   ;;  %s4107_s11 = inlined_call_operand.vmem [shape: f32[1,32], index: 11, kind: input, shape index: {}]   ;;  %s4108_s12 = inlined_call_operand.vmem [shape: bf16[2,32,32], index: 12, kind: input, shape index: {}]   ;;  %s4109_s13 = inlined_call_operand.vmem [shape: bf16[2,32,32], index: 13, kind: input, shape index: {}]   ;;  %s4110_s14 = inlined_call_operand.vmem [shape: f32[1,32], index: 14, kind: input, shape index: {}]   ;;  %s4111_s15 = inlined_call_operand.vmem [shape: f32[1,32], index: 15, kind: input, shape index: {}]   ;;  %s4112_s16 = inlined_call_operand.vmem [shape: bf16[32,32], index: 16, kind: input, shape index: {}]   ;;  %s4113_s17 = inlined_call_operand.vmem [shape: f32[1,32], index: 17, kind: input, shape index: {}]   ;;  %s4114_s18 = inlined_call_operand.vmem [shape: f32[2,1,32], index: 18, kind: input, shape index: {}]   ;;  %s4115_s19 = inlined_call_operand.vmem [shape: f32[2,1,32], index: 19, kind: input, shape index: {}]   ;;  %s4116_s20 = inlined_call_operand.vmem [shape: f32[2,8,8,32], index: 20, kind: output, shape index: {0}]   ;;  %s4117_s21 = inlined_call_operand.vmem [shape: f32[2,8,8,32], index: 21, kind: output, shape index: {1}]  }
   0x1   :  { %4123 = sst [smem:[#allocation5_spill]] %s4096_s0 }
   0x2   :  { %4124 = sst [smem:[#allocation6_spill]] %s4097_s1 }
   0x3   :  { %4125 = sst [smem:[#allocation7_spill]] %s4098_s2  ;;  %s3391_s2 = smov 0  }
   0x4   :  { %4126 = sst [smem:[#allocation8_spill]] %s4099_s3 }
   0x5   :  { %4127 = sst [smem:[#allocation9_spill]] %s4100_s4 }
   0x6   :  { %4128 = sst [smem:[#allocation10_spill]] %s4101_s5 }
   0x7 LB: > { %s2708_s25 = sadd.s32 4294967295, %s3279_s2   ;;  %p2712_p0 = scmp.ge.s32.totalorder %s3279_s2, 1  ;;  %s3279_s2 = sphi %s3391_s2, %s32_s2  }
   0x8   : > { %p616_p1 = scmp.lt.s32.totalorder %s3279_s2, 3 }
   0xa   : > { %p617_p2 = pnand %p2712_p0, %p616_p1 }
   0xc   : > { %620 = sbr.rel (%p617_p2) target bundleno = 763 (0x2fb), region = 100 }
  0x11   : > { %s4129_s3 = sld [smem:[#allocation7_spill]]  ;;  %p692_p3 = scmp.lt.s32.totalorder %s2708_s25, 1  ;;  %vm773_vm0 = vcmask 261120   ;;  %vm976_vm1 = vcmask 1046528   ;;  %vm1205_vm2 = vcmask 1045504  }
  0x12   : > { %s4130_s30 = sld [smem:[#allocation8_spill]] }
  0x13   : > { %s4142_s25 = smov (!%p692_p3, %s2708_s25), 1  ;;  %s4131_s26 = sld [smem:[#allocation5_spill]] }
  0x14   : > { %s3138_s5 = smul.u32 144, %s4142_s25  ;;  %s4132_s24 = sld [smem:[#allocation9_spill]] }
  0x15   : > { %s4133_s0 = sld [smem:[#allocation10_spill]]  ;;  %s707_s22 = scalar_lea.vmem %s4115_s19, %s4142_s25 }
  0x16   : > { %s704_s23 = scalar_lea.vmem %s4114_s18, %s4142_s25 }
  0x17   : > { %v3147_v0 = vld [vmem:[%s4129_s3 + $0x8] sm:$0xff]   ;;  %v3148_v1 = vld [vmem:[%s4129_s3] sm:$0xff]   ;;  %v3150_v3 = vld [vmem:[%s4129_s3 + $0x18] sm:$0xff]  }
  0x18   : > { %2954 = vmatprep.subr.bf16.mxu0 %v3147_v0  ;;  %3134 = vmatprep.subr.bf16.mxu1 %v3147_v0  ;;  %v3149_v2 = vld [vmem:[%s4130_s30 + $0x8] sm:$0xff]   ;;  %v3152_v16 = vld [vmem:[%s4129_s3 + $0x10] sm:$0xff]   ;;  %v3151_v31 = vld [vmem:[%s4130_s30] sm:$0xff]  }
  0x19   : > { %2955 = vmatpush3.bf16.msra.mxu0 %v3147_v0  ;;  %3136 = vmatpush3.bf16.msra.mxu1 %v3147_v0  ;;  %s3417_s27 = scalar_lea.vmem %s4131_s26, %s3138_s5  ;;  %v3153_v40 = vld [vmem:[%s4129_s3 + $0x28] sm:$0xff]   ;;  %v3154_v48 = vld [vmem:[%s4130_s30 + $0x18] sm:$0xff]   ;;  %v3155_v61 = vld [vmem:[%s4129_s3 + $0x20] sm:$0xff]  }
  0x1a   : > { %2956 = vmatprep.subr.bf16.mxu0 %v3148_v1  ;;  %3135 = vmatprep.subr.bf16.mxu1 %v3148_v1  ;;  %v3420_v4 = vld [vmem:[%s3417_s27] sm:$0xff]  ;;  %v3423_v5 = vld [vmem:[%s3417_s27 + $0x10] sm:$0xff]  ;;  %v3457_v20 = vld [vmem:[%s3417_s27 + $0x28] sm:$0x3] }
  0x1b   : > { %v3426_v6 = vld [vmem:[%s3417_s27 + $0x40] sm:$0xff]  ;;  %v753_v7 = vpack.c.bf16 %v3423_v5, %v3420_v4  ;;  %v3431_v8 = vld [vmem:[%s3417_s27 + $0x50] sm:$0xff]  ;;  %v977_v11 = vrot.slane %v3420_v4, 1  ;;  %v980_v12 = vrot.slane %v3423_v5, 1  ;;  %v1206_v13 = vrot.slane %v3420_v4, 2 }
  0x1c   : > { %v3434_v9 = vld [vmem:[%s3417_s27 + $0x20] sm:$0xff]  ;;  %v3437_v10 = vld [vmem:[%s3417_s27 + $0x30] sm:$0xff]  ;;  %v3444_v14 = vpack.c.bf16 %v3431_v8, %v3426_v6  ;;  %v1209_v17 = vrot.slane %v3423_v5, 2  ;;  %v989_v18 = vrot.slane %v3426_v6, 1  ;;  %v992_v19 = vrot.slane %v3431_v8, 1 }
  0x1d   : > { %2957 = vmatpush3.bf16.msra.mxu0 %v3148_v1  ;;  %3137 = vmatpush3.bf16.msra.mxu1 %v3148_v1  ;;  %v3447_v15 = vld [vmem:[%s3417_s27 + $0x60] sm:$0xff]  ;;  %v3461_v21 = vpack.c.bf16 %v3437_v10, %v3434_v9  ;;  %v3464_v22 = vld [vmem:[%s3417_s27 + $0x70] sm:$0xff]  ;;  %v1218_v23 = vrot.slane %v3426_v6, 2  ;;  %v1221_v24 = vrot.slane %v3431_v8, 2  ;;  %v3471_v25 = vld [vmem:[%s3417_s27 + $0x38] sm:$0x3] }
  0x1e   : > { %2966 = vmatprep.subr.bf16.mxu1 %v3149_v2  ;;  %2978 = vmatprep.subr.bf16.mxu0 %v3150_v3  ;;  %v720_v26 = vld [vmem:[%s3417_s27 + $0x8] sm:$0x3]  ;;  %v983_v27 = vrot.slane %v3434_v9, 1  ;;  %v986_v28 = vrot.slane %v3437_v10, 1  ;;  %v1212_v29 = vrot.slane %v3434_v9, 2  ;;  %v3481_v30 = vpack.c.bf16 %v3464_v22, %v3447_v15  ;;  %v3156_v0 = vld [vmem:[%s4130_s30 + $0x10] sm:$0xff]  }
  0x1f   : > { %2958 = vmatprep.mubr.msk.bf16.mxu0 %vm773_vm0, %v753_v7  ;;  %2962 = vmatprep.mubr.msk.bf16.mxu1 %vm773_vm0, %v3444_v14  ;;  %v722_v32 = vld [vmem:[%s3417_s27 + $0x18] sm:$0x3]  ;;  %v1213_v33 = vrot.slane %v3457_v20, 2  ;;  %v995_v34 = vrot.slane %v3447_v15, 1  ;;  %v998_v35 = vrot.slane %v3464_v22, 1  ;;  %v978_v36 = vrot.slane %v720_v26, 1 }
  0x20   : > { %2959 = vmatmul.mubr.msk.bf16.vlgmr.msra.gmra.mxu0 %vm773_vm0, %v3461_v21  ;;  %2963 = vmatmul.mubr.msk.bf16.vlgmr.msra.gmra.mxu1 %vm773_vm0, %v3481_v30  ;;  %v981_v37 = vrot.slane %v722_v32, 1  ;;  %v984_v38 = vrot.slane %v3457_v20, 1  ;;  %v987_v39 = vrot.slane %v3471_v25, 1  ;;  %v728_v42 = vld [vmem:[%s3417_s27 + $0x48] sm:$0x3]  ;;  %v1207_v57 = vrot.slane %v720_v26, 2 }
  0x21   : > { %2979 = vmatpush3.bf16.msra.mxu0 %v3150_v3  ;;  %2967 = vmatpush3.bf16.msra.mxu1 %v3149_v2  ;;  %v979_v41 = vsel %vm976_vm1, %v977_v11, %v978_v36  ;;  %v730_v43 = vld [vmem:[%s3417_s27 + $0x58] sm:$0x3]  ;;  %v3502_v44 = vld [vmem:[%s3417_s27 + $0x68] sm:$0x3]  ;;  %v990_v49 = vrot.slane %v728_v42, 1  ;;  %v1210_v58 = vrot.slane %v722_v32, 2  ;;  %v1214_v5 = vsel %vm1205_vm2, %v1212_v29, %v1213_v33 }
  0x22   : > { %2980 = vmatprep.subr.bf16.mxu0 %v3152_v16  ;;  %2970 = vmatprep.mubr.msk.bf16.mxu1 %vm773_vm0, %v753_v7  ;;  %v982_v45 = vsel %vm976_vm1, %v980_v12, %v981_v37  ;;  %v985_v46 = vsel %vm976_vm1, %v983_v27, %v984_v38  ;;  %v988_v47 = vsel %vm976_vm1, %v986_v28, %v987_v39  ;;  %v734_v50 = vld [vmem:[%s3417_s27 + $0x78] sm:$0x3]  ;;  %v993_v53 = vrot.slane %v730_v43, 1  ;;  %v3157_v12 = vld [vmem:[%s4130_s30 + $0x28] sm:$0xff]   ;;  %v3164_v28 = vld [vmem:[%s4103_s7] sm:$0xff]  }
  0x23   : > { %2968 = vmatprep.subr.bf16.mxu1 %v3151_v31  ;;  %v1009_v51 = vpack.c.bf16 %v982_v45, %v979_v41  ;;  %v1010_v52 = vpack.c.bf16 %v988_v47, %v985_v46  ;;  %v996_v54 = vrot.slane %v3502_v44, 1  ;;  %v991_v55 = vsel %vm976_vm1, %v989_v18, %v990_v49  ;;  %v3584_v26 = vld [vmem:[%s4104_s8 + $0x8] sm:$0xff]  }
  0x24   : > { %v999_v56 = vrot.slane %v734_v50, 1  ;;  %v1215_v59 = vrot.slane %v3437_v10, 2  ;;  %v994_v60 = vsel %vm976_vm1, %v992_v19, %v993_v53  ;;  %v1216_v62 = vrot.slane %v3471_v25, 2  ;;  %v3160_v25 = vld [vmem:[%s4102_s6] sm:$0xff]   ;;  %v3162_v27 = vld [vmem:[%s4103_s7 + $0x8] sm:$0xff]  }
  0x25   : > { %2981 = vmatpush3.bf16.msra.mxu0 %v3152_v16  ;;  %2969 = vmatpush3.bf16.msra.mxu1 %v3151_v31  ;;  %v1011_v63 = vpack.c.bf16 %v994_v60, %v991_v55  ;;  %v1224_v1 = vrot.slane %v3447_v15, 2  ;;  %v1227_v2 = vrot.slane %v3464_v22, 2  ;;  %v997_v3 = vsel %vm976_vm1, %v995_v34, %v996_v54  ;;  %v3158_v22 = vld [vmem:[%s4130_s30 + $0x20] sm:$0xff]   ;;  %v3596_v29 = vld [vmem:[%s4105_s9 + $0x8] sm:$0xff]  }
  0x26   : > { %3002 = vmatprep.subr.bf16.mxu0 %v3153_v40  ;;  %2982 = vmatprep.mubr.msk.bf16.mxu0 %vm773_vm0, %v1009_v51  ;;  %v1000_v7 = vsel %vm976_vm1, %v998_v35, %v999_v56  ;;  %v1208_v10 = vsel %vm1205_vm2, %v1206_v13, %v1207_v57  ;;  %v1211_v11 = vsel %vm1205_vm2, %v1209_v17, %v1210_v58  ;;  %v1219_v15 = vrot.slane %v728_v42, 2  ;;  %v2726_v55 = vld [vmem:[%s4132_s24] ss:$0 sm:$0xff]  ;;  %s2861_s24 = sshll.u32 %s4142_s25, 7 }
  0x27   : > { %2990 = vmatprep.subr.bf16.mxu1 %v3154_v48  ;;  %v1222_v16 = vrot.slane %v730_v43, 2  ;;  %v1012_v18 = vpack.c.bf16 %v1000_v7, %v997_v3  ;;  %v1238_v4 = vpack.c.bf16 %v1211_v11, %v1208_v10  ;;  %v1217_v13 = vsel %vm1205_vm2, %v1215_v59, %v1216_v62 }
  0x28   : > { %2983 = vmatmul.mubr.msk.bf16.vlgmr.msra.gmra.mxu0 %vm773_vm0, %v1010_v52  ;;  %2971 = vmatmul.mubr.msk.bf16.vlgmr.msra.gmra.mxu1 %vm773_vm0, %v3461_v21  ;;  %v1239_v9 = vpack.c.bf16 %v1217_v13, %v1214_v5  ;;  %v1225_v20 = vrot.slane %v3502_v44, 2  ;;  %v1228_v21 = vrot.slane %v734_v50, 2 }
  0x29   : > { %3003 = vmatpush3.bf16.msra.mxu0 %v3153_v40  ;;  %2986 = vmatprep.mubr.msk.bf16.mxu0 %vm773_vm0, %v1011_v63  ;;  %v1223_v17 = vsel %vm1205_vm2, %v1221_v24, %v1222_v16  ;;  %v3159_v24 = vld [vmem:[%s4102_s6 + $0x8] sm:$0xff]  }
  0x2a   : > { %2991 = vmatpush3.bf16.msra.mxu1 %v3154_v48  ;;  %2974 = vmatprep.mubr.msk.bf16.mxu1 %vm773_vm0, %v3444_v14  ;;  %v1220_v14 = vsel %vm1205_vm2, %v1218_v23, %v1219_v15  ;;  %v1226_v6 = vsel %vm1205_vm2, %v1224_v1, %v1225_v20  ;;  %v1229_v8 = vsel %vm1205_vm2, %v1227_v2, %v1228_v21 }
  0x2b   : > { %3004 = vmatprep.subr.bf16.mxu0 %v3155_v61  ;;  %2992 = vmatprep.subr.bf16.mxu1 %v3156_v0  ;;  %v1240_v19 = vpack.c.bf16 %v1223_v17, %v1220_v14  ;;  %v1241_v23 = vpack.c.bf16 %v1229_v8, %v1226_v6 }
  0x2d   : > { %3005 = vmatpush3.bf16.msra.mxu0 %v3155_v61 }
  0x2e   : > { %2993 = vmatpush3.bf16.msra.mxu1 %v3156_v0  ;;  %3026 = vmatprep.subr.bf16.mxu0 %v3162_v27 }
  0x2f   : > { %3014 = vmatprep.subr.bf16.mxu1 %v3157_v12 }
  0x30   : > { %2987 = vmatmul.mubr.msk.bf16.gmra.mxu0 %vm773_vm0, %v1012_v18  ;;  %2975 = vmatmul.mubr.msk.bf16.gmra.mxu1 %vm773_vm0, %v3481_v30 }
  0x31   : > { %3006 = vmatprep.mubr.msk.bf16.mxu0 %vm773_vm0, %v1238_v4  ;;  %2994 = vmatprep.mubr.msk.bf16.mxu1 %vm773_vm0, %v1009_v51 }
  0x38   : > { %3007 = vmatmul.mubr.msk.bf16.vlgmr.msra.gmra.mxu0 %vm773_vm0, %v1239_v9  ;;  %2995 = vmatmul.mubr.msk.bf16.vlgmr.msra.gmra.mxu1 %vm773_vm0, %v1010_v52 }
  0x39   : > { %3010 = vmatprep.mubr.msk.bf16.mxu0 %vm773_vm0, %v1240_v19  ;;  %3015 = vmatpush3.bf16.msra.mxu1 %v3157_v12 }
  0x3a   : > { %2998 = vmatprep.mubr.msk.bf16.mxu1 %vm773_vm0, %v1011_v63  ;;  %3016 = vmatprep.subr.bf16.mxu1 %v3158_v22 }
  0x3b   : > { %3027 = vmatpush3.bf16.msra.mxu0 %v3162_v27 }
  0x3c   : > { %3028 = vmatprep.subr.bf16.mxu0 %v3164_v28 }
  0x3d   : > { %3017 = vmatpush3.bf16.msra.mxu1 %v3158_v22  ;;  %v3636_v22 = vld [vmem:[%s4133_s0] ss:$0 sm:$0xff]  ;;  %s4134_s0 = sld [smem:[#allocation6_spill]] }
  0x3e   : > { %3038 = vmatprep.subr.bf16.mxu1 %v3159_v24 }
  0x3f   : > { %3029 = vmatpush3.bf16.msra.mxu0 %v3164_v28 }
  0x40   : > { %3011 = vmatmul.mubr.msk.bf16.gmra.mxu0 %vm773_vm0, %v1241_v23  ;;  %2999 = vmatmul.mubr.msk.bf16.gmra.mxu1 %vm773_vm0, %v1012_v18 }
  0x41   : > { %3018 = vmatprep.mubr.msk.bf16.mxu1 %vm773_vm0, %v1238_v4  ;;  %3050 = vmatprep.subr.bf16.mxu0 %v3596_v29 }
  0x43   : > { %s3700_s4 = scalar_lea.vmem %s4134_s0, %s2861_s24  ;;  %s2862_s24 = sshll.u32 %s4142_s25, 6 }
  0x44   : > { %s3868_s29 = scalar_lea.vmem %s4116_s20, %s2862_s24  ;;  %s717_s28 = scalar_lea.vmem %s4117_s21, %s2862_s24 }
  0x48   : > { %3019 = vmatmul.mubr.msk.bf16.vlgmr.msra.gmra.mxu1 %vm773_vm0, %v1239_v9 }
  0x49   : > { %3022 = vmatprep.mubr.msk.bf16.mxu1 %vm773_vm0, %v1240_v19  ;;  %3039 = vmatpush3.bf16.msra.mxu1 %v3159_v24  ;;  %v3163_v19 = vld [vmem:[%s4104_s8] sm:$0xff]  }
  0x4a   : > { %3040 = vmatprep.subr.bf16.mxu1 %v3160_v25 }
  0x4d   : > { %3041 = vmatpush3.bf16.msra.mxu1 %v3160_v25 }
  0x4e   : > { %3062 = vmatprep.subr.bf16.mxu1 %v3584_v26 }
  0x50   : > { %3023 = vmatmul.mubr.msk.bf16.gmra.mxu1 %vm773_vm0, %v1241_v23 }
  0xe0   : > { %v2960_v30 = vpop.f32.mrf.mxu0  ;;  %v2964_v31 = vpop.f32.mrf.mxu1 }
  0xe1   : > { %v859_v63 = vadd.f32 %v2960_v30, %v2726_v55  ;;  %v863_v23 = vadd.f32 %v2964_v31, %v2726_v55  ;;  %v3652_v31 = vld [vmem:[%s4109_s13 + $0x8] sm:$0xff]  }
  0xe2   : > { %v820_v32 = vpop.f32.mrf.mxu0  ;;  %v836_v33 = vpop.f32.mrf.mxu1 }
  0xe3   : > { %v857_v59 = vadd.f32 %v2726_v55, %v820_v32  ;;  %v861_v20 = vadd.f32 %v2726_v55, %v836_v33 }
  0xe4   : > { %v2961_v34 = vpop.f32.mrf.mxu0  ;;  %v2965_v35 = vpop.f32.mrf.mxu1 }
  0xe5   : > { %v860_v58 = vadd.f32 %v2961_v34, %v2726_v55  ;;  %v864_v17 = vadd.f32 %v2965_v35, %v2726_v55 }
  0xe6   : > { %v823_v36 = vpop.f32.mrf.mxu0  ;;  %v839_v37 = vpop.f32.mrf.mxu1 }
  0xe7   : > { %v858_v60 = vadd.f32 %v2726_v55, %v823_v36  ;;  %v862_v21 = vadd.f32 %v2726_v55, %v839_v37 }
  0xe8   : > { %v2984_v38 = vpop.f32.mrf.mxu0  ;;  %v2972_v39 = vpop.f32.mrf.mxu1 }
  0xe9   : > { %v1109_v10 = vadd.f32 %v2984_v38, %v859_v63  ;;  %v954_v32 = vadd.f32 %v2972_v39, %v3636_v22 }
  0xea   : > { %v1076_v40 = vpop.f32.mrf.mxu0  ;;  %v3599_v41 = vpop.f32.mrf.mxu1 }
  0xeb   : > { %v1107_v1 = vadd.f32 %v1076_v40, %v857_v59  ;;  %v952_v37 = vadd.f32 %v3636_v22, %v3599_v41 }
  0xec   : > { %v2985_v42 = vpop.f32.mrf.mxu0  ;;  %v3601_v43 = vpop.f32.mrf.mxu1 }
  0xed   : > { %v1110_v0 = vadd.f32 %v2985_v42, %v860_v58 }
  0xee   : > { %v1079_v44 = vpop.f32.mrf.mxu0  ;;  %v3603_v45 = vpop.f32.mrf.mxu1 }
  0xef   : > { %v1108_v2 = vadd.f32 %v1079_v44, %v858_v60  ;;  %v3666_v44 = vld [vmem:[%s707_s22] ss:$0 sm:$0xff] }
  0xf0   : > { %v2988_v46 = vpop.f32.mrf.mxu0  ;;  %v3605_v47 = vpop.f32.mrf.mxu1 }
  0xf1   : > { %v1113_v33 = vadd.f32 %v2988_v46, %v863_v23  ;;  %v955_v46 = vadd.f32 %v3601_v43, %v3636_v22  ;;  %v953_v43 = vadd.f32 %v3636_v22, %v3603_v45  ;;  %v958_v58 = vadd.f32 %v3605_v47, %v3636_v22 }
  0xf2   : > { %v1092_v48 = vpop.f32.mrf.mxu0  ;;  %v3607_v49 = vpop.f32.mrf.mxu1 }
  0xf3   : > { %v1111_v25 = vadd.f32 %v1092_v48, %v861_v20 }
  0xf4   : > { %v2989_v50 = vpop.f32.mrf.mxu0  ;;  %v3609_v51 = vpop.f32.mrf.mxu1 }
  0xf5   : > { %v1114_v24 = vadd.f32 %v2989_v50, %v864_v17  ;;  %v3167_v17 = vld [vmem:[%s4109_s13] sm:$0xff]  }
  0xf6   : > { %v1095_v52 = vpop.f32.mrf.mxu0  ;;  %v3611_v53 = vpop.f32.mrf.mxu1 }
  0xf7   : > { %v1112_v27 = vadd.f32 %v1095_v52, %v862_v21  ;;  %v3168_v21 = vld [vmem:[%s4105_s9] sm:$0xff]  }
  0xf8   : > { %v3008_v54 = vpop.f32.mrf.mxu0  ;;  %v2996_v56 = vpop.f32.mrf.mxu1 }
  0xf9   : > { %v3622_v4 = vadd.f32 %v3008_v54, %v1109_v10  ;;  %v1199_v38 = vadd.f32 %v2996_v56, %v954_v32  ;;  %v3736_v32 = vld [vmem:[%s4109_s13 + $0x18] sm:$0xff]  }
  0xfa   : > { %v1305_v57 = vpop.f32.mrf.mxu0  ;;  %v1166_v61 = vpop.f32.mrf.mxu1 }
  0xfb   : > { %v3618_v12 = vadd.f32 %v1305_v57, %v1107_v1  ;;  %v1197_v48 = vadd.f32 %v1166_v61, %v952_v37 }
  0xfc   : > { %v3009_v62 = vpop.f32.mrf.mxu0  ;;  %v2997_v3 = vpop.f32.mrf.mxu1 }
  0xfd   : > { %v3616_v11 = vadd.f32 %v3009_v62, %v1110_v0  ;;  %v1200_v54 = vadd.f32 %v2997_v3, %v955_v46  ;;  %v956_v62 = vadd.f32 %v3636_v22, %v3607_v49  ;;  %v959_v3 = vadd.f32 %v3609_v51, %v3636_v22 }
  0xfe   : > { %v1308_v7 = vpop.f32.mrf.mxu0  ;;  %v1169_v15 = vpop.f32.mrf.mxu1 }
  0xff   : > { %v3620_v16 = vadd.f32 %v1308_v7, %v1108_v2  ;;  %v3628_v9 = vpack.c.bf16 %v3616_v11, %v3622_v4  ;;  %v1198_v63 = vadd.f32 %v1169_v15, %v953_v43 }
 0x100   : > { %v3012_v18 = vpop.f32.mrf.mxu0  ;;  %v3000_v13 = vpop.f32.mrf.mxu1 }
 0x101   : > { %v1536_v5 = vpack.c.bf16 %v3620_v16, %v3618_v12  ;;  %v3662_v39 = vadd.f32 %v3012_v18, %v1113_v33  ;;  %v1203_v1 = vadd.f32 %v3000_v13, %v958_v58  ;;  %v738_v58 = vld [vmem:[%s3700_s4 + $0x18] sm:$0x1] }
 0x102   : > { %v1321_v14 = vpop.f32.mrf.mxu0  ;;  %v1182_v6 = vpop.f32.mrf.mxu1 }
 0x103   : > { %3042 = vmatprep.mubr.msk.bf16.mxu1 %vm773_vm0, %v1536_v5  ;;  %v3654_v35 = vadd.f32 %v1321_v14, %v1111_v25  ;;  %v1201_v10 = vadd.f32 %v1182_v6, %v956_v62  ;;  %v957_v6 = vadd.f32 %v3636_v22, %v3611_v53  ;;  %v3729_v53 = vld [vmem:[%s704_s23] ss:$0 sm:$0xff] }
 0x104   : > { %v3013_v8 = vpop.f32.mrf.mxu0  ;;  %3043 = vmatmul.mubr.msk.bf16.vlgmr.msra.gmra.mxu1 %vm773_vm0, %v3628_v9  ;;  %v3001_v28 = vpop.f32.mrf.mxu1 }
 0x105   : > { %3063 = vmatpush3.bf16.msra.mxu1 %v3584_v26  ;;  %v3643_v34 = vadd.f32 %v3013_v8, %v1114_v24  ;;  %v1204_v14 = vadd.f32 %v3001_v28, %v959_v3  ;;  %v3727_v28 = vld [vmem:[%s3700_s4 + $0x10] sm:$0xff]  ;;  %v1448_v3 = vadd.f32 %v3729_v53, %v3662_v39 }
 0x106   : > { %v1324_v30 = vpop.f32.mrf.mxu0  ;;  %3064 = vmatprep.subr.bf16.mxu1 %v3163_v19  ;;  %v3656_v36 = vpop.f32.mrf.mxu1 }
 0x107   : > { %v3658_v26 = vadd.f32 %v1324_v30, %v1112_v27  ;;  %v3672_v50 = vpack.c.bf16 %v3643_v34, %v3662_v39  ;;  %v1202_v22 = vadd.f32 %v3656_v36, %v957_v6  ;;  %v3742_v36 = vld [vmem:[%s4108_s12 + $0x8] sm:$0xff]  }
 0x108   : > { %v3020_v42 = vpop.f32.mrf.mxu1  ;;  %v744_v6 = vld [vmem:[%s3700_s4 + $0x48] sm:$0x1] }
 0x109   : > { %v1538_v40 = vpack.c.bf16 %v3658_v26, %v3654_v35  ;;  %3065 = vmatpush3.bf16.msra.mxu1 %v3163_v19  ;;  %v1428_v52 = vadd.f32 %v3020_v42, %v1199_v38  ;;  %v1444_v38 = vadd.f32 %v3729_v53, %v3622_v4  ;;  %v3762_v4 = vld [vmem:[%s3700_s4 + $0x30] sm:$0xff] }
 0x10a   : > { %3086 = vmatprep.subr.bf16.mxu1 %v3652_v31  ;;  %v1395_v41 = vpop.f32.mrf.mxu1 }
 0x10b   : > { %3046 = vmatprep.mubr.msk.bf16.mxu1 %vm773_vm0, %v1538_v40  ;;  %v1466_v55 = vadd.f32 %v3666_v44, %v1428_v52  ;;  %v1426_v56 = vadd.f32 %v1395_v41, %v1197_v48  ;;  %v3754_v48 = vld [vmem:[%s3700_s4 + $0x20] sm:$0xff] }
 0x10c   : > { %3047 = vmatmul.mubr.msk.bf16.gmra.mxu1 %vm773_vm0, %v3672_v50  ;;  %v3021_v57 = vpop.f32.mrf.mxu1  ;;  %v3766_v41 = vld [vmem:[%s3700_s4 + $0x40] sm:$0xff] }
 0x10d   : > { %3066 = vmatprep.mubr.msk.bf16.mxu1 %vm773_vm0, %v1536_v5  ;;  %v2778_v59 = vmul.f32 -1.442695, %v1466_v55  ;;  %v1464_v60 = vadd.f32 %v3666_v44, %v1426_v56  ;;  %v1429_v61 = vadd.f32 %v3021_v57, %v1200_v54  ;;  %v3769_v54 = vld [vmem:[%s3700_s4 + $0x50] sm:$0xff] }
 0x10e   : > { %v1398_v0 = vpop.f32.mrf.mxu1 }
 0x10f   : > { %3177 = vpow2.f32 %v2778_v59  ;;  %v2776_v2 = vmul.f32 -1.442695, %v1464_v60  ;;  %v1467_v45 = vadd.f32 %v3666_v44, %v1429_v61  ;;  %v1427_v47 = vadd.f32 %v1398_v0, %v1198_v63 }
 0x110   : > { %v3024_v7 = vpop.f32.mrf.mxu1  ;;  %v3706_v51 = vpack.c.bf16 %v1429_v61, %v1428_v52  ;;  %v1445_v60 = vadd.f32 %v3729_v53, %v3616_v11  ;;  %v3791_v61 = vpack.c.bf16 %v3769_v54, %v3766_v41 }
 0x111   : > { %3179 = vpow2.f32 %v2776_v2  ;;  %v2779_v18 = vmul.f32 -1.442695, %v1467_v45  ;;  %v1432_v5 = vadd.f32 %v3024_v7, %v1203_v1  ;;  %v1465_v49 = vadd.f32 %v3666_v44, %v1427_v47  ;;  %v3171_v7 = vld [vmem:[%s4109_s13 + $0x10] sm:$0xff]  }
 0x112   : > { %v3692_v15 = vpack.c.bf16 %v1427_v47, %v1426_v56  ;;  %v1411_v13 = vpop.f32.mrf.mxu1  ;;  %v1442_v56 = vadd.f32 %v3729_v53, %v3618_v12  ;;  %v3787_v12 = vpack.c.bf16 %v3762_v4, %v3754_v48  ;;  %v1443_v1 = vadd.f32 %v3729_v53, %v3620_v16  ;;  %v3172_v16 = vld [vmem:[%s4108_s12] sm:$0xff]  }
 0x113   : > { %3181 = vpow2.f32 %v2779_v18  ;;  %v1470_v19 = vadd.f32 %v3666_v44, %v1432_v5  ;;  %v1430_v20 = vadd.f32 %v1411_v13, %v1201_v10  ;;  %v2777_v8 = vmul.f32 -1.442695, %v1465_v49  ;;  %v3803_v10 = vld [vmem:[%s3700_s4 + $0x60] sm:$0xff]  ;;  %v3806_v18 = vld [vmem:[%s3700_s4 + $0x70] sm:$0xff] }
 0x114   : > { %3067 = vmatmul.mubr.msk.bf16.vlgmr.msra.gmra.mxu1 %vm773_vm0, %v3628_v9  ;;  %3030 = vmatprep.mubr.msk.bf16.mxu0 %vm773_vm0, %v3692_v15  ;;  %v3025_v23 = vpop.f32.mrf.mxu1  ;;  %v3724_v9 = vld [vmem:[%s3700_s4] sm:$0xff]  ;;  %v2149_v2 = vrot.slane %v3727_v28, 1  ;;  %v2150_v45 = vrot.slane %v738_v58, 1 }
 0x115   : > { %3070 = vmatprep.mubr.msk.bf16.mxu1 %vm773_vm0, %v1538_v40  ;;  %v2782_v24 = vmul.f32 -1.442695, %v1470_v19  ;;  %v1468_v25 = vadd.f32 %v3666_v44, %v1430_v20  ;;  %v1433_v27 = vadd.f32 %v3025_v23, %v1204_v14  ;;  %3031 = vmatmul.mubr.msk.bf16.vlgmr.msra.gmra.mxu0 %vm773_vm0, %v3706_v51  ;;  %3183 = vpow2.f32 %v2777_v8  ;;  %v740_v14 = vld [vmem:[%s3700_s4 + $0x28] sm:$0x1]  ;;  %v742_v19 = vld [vmem:[%s3700_s4 + $0x38] sm:$0x1] }
 0x116   : > { %3087 = vmatpush3.bf16.msra.mxu1 %v3652_v31  ;;  %v1414_v30 = vpop.f32.mrf.mxu1  ;;  %3051 = vmatpush3.bf16.msra.mxu0 %v3596_v29  ;;  %v3746_v29 = vpack.c.bf16 %v3727_v28, %v3724_v9  ;;  %v2146_v63 = vrot.slane %v3724_v9, 1  ;;  %v1449_v23 = vadd.f32 %v3729_v53, %v3643_v34  ;;  %v2156_v28 = vrot.slane %v742_v19, 1  ;;  %v3173_v34 = vld [vmem:[%s4108_s12 + $0x18] sm:$0xff]  }
 0x117   : > { %3088 = vmatprep.subr.bf16.mxu1 %v3167_v17  ;;  %3185 = vpow2.f32 %v2782_v24  ;;  %v2780_v33 = vmul.f32 -1.442695, %v1468_v25  ;;  %v1471_v31 = vadd.f32 %v3666_v44, %v1433_v27  ;;  %3052 = vmatprep.subr.bf16.mxu0 %v3168_v21  ;;  %v1431_v37 = vadd.f32 %v1414_v30, %v1202_v22  ;;  %v746_v25 = vld [vmem:[%s3700_s4 + $0x58] sm:$0x1] }
 0x118   : > { %v3757_v52 = vpack.c.bf16 %v1433_v27, %v1432_v5  ;;  %v2155_v24 = vrot.slane %v3762_v4, 1  ;;  %v2158_v30 = vrot.slane %v3766_v41, 1 }
 0x119   : > { %3187 = vpow2.f32 %v2780_v33  ;;  %v2783_v40 = vmul.f32 -1.442695, %v1471_v31  ;;  %v1469_v42 = vadd.f32 %v3666_v44, %v1431_v37  ;;  %v3751_v46 = vpack.c.bf16 %v1431_v37, %v1430_v20 }
 0x11a   : > { %3089 = vmatpush3.bf16.msra.mxu1 %v3167_v17  ;;  %3053 = vmatpush3.bf16.msra.mxu0 %v3168_v21  ;;  %v3823_v17 = vsel %vm976_vm1, %v2149_v2, %v2150_v45  ;;  %v2152_v21 = vrot.slane %v3754_v48, 1  ;;  %v2159_v33 = vrot.slane %v744_v6, 1  ;;  %v1447_v31 = vadd.f32 %v3729_v53, %v3658_v26  ;;  %v3175_v6 = vld [vmem:[%s4112_s16 + $0x8] sm:$0xff]  }
 0x11b   : > { %3110 = vmatprep.subr.bf16.mxu1 %v3736_v32  ;;  %3189 = vpow2.f32 %v2783_v40  ;;  %3074 = vmatprep.subr.bf16.mxu0 %v3742_v36  ;;  %v2781_v43 = vmul.f32 -1.442695, %v1469_v42  ;;  %v2162_v37 = vrot.slane %v746_v25, 1  ;;  %v3861_v48 = vsel %vm976_vm1, %v2155_v24, %v2156_v28 }
 0x11c   : > { %3071 = vmatmul.mubr.msk.bf16.gmra.mxu1 %vm773_vm0, %v3672_v50  ;;  %v3178_v55 = vpop.eup %3177  ;;  %3034 = vmatprep.mubr.msk.bf16.mxu0 %vm773_vm0, %v3751_v46  ;;  %v736_v50 = vld [vmem:[%s3700_s4 + $0x8] sm:$0x1]  ;;  %3191 = vtanh.f32 %v1444_v38 }
 0x11d   : > { %3090 = vmatprep.mubr.msk.bf16.mxu1 %vm773_vm0, %v3746_v29  ;;  %v1498_v57 = vadd.f32 1.0, %v3178_v55  ;;  %3035 = vmatmul.mubr.msk.bf16.gmra.mxu0 %vm773_vm0, %v3757_v52  ;;  %3193 = vpow2.f32 %v2781_v43  ;;  %v2147_v0 = vrot.slane %v736_v50, 1  ;;  %v750_v43 = vld [vmem:[%s3700_s4 + $0x78] sm:$0x1] }
 0x11e   : > { %v3180_v59 = vpop.eup %3179  ;;  %3054 = vmatprep.mubr.msk.bf16.mxu0 %vm773_vm0, %v3692_v15  ;;  %v1446_v15 = vadd.f32 %v3729_v53, %v3654_v35  ;;  %v3831_v35 = vpack.c.bf16 %v3806_v18, %v3803_v10 }
 0x11f   : > { %3195 = vrcp.f32 %v1498_v57  ;;  %v1496_v62 = vadd.f32 1.0, %v3180_v59  ;;  %v3814_v39 = vsel %vm976_vm1, %v2146_v63, %v2147_v0  ;;  %v2164_v59 = vrot.slane %v3803_v10, 1 }
 0x120   : > { %v3182_v11 = vpop.eup %3181  ;;  %3197 = vtanh.f32 %v1442_v56  ;;  %v3843_v9 = vpack.c.bf16 %v3823_v17, %v3814_v39  ;;  %v748_v56 = vld [vmem:[%s3700_s4 + $0x68] sm:$0x1] }
 0x121   : > { %3199 = vrcp.f32 %v1496_v62  ;;  %v1499_v47 = vadd.f32 1.0, %v3182_v11  ;;  %v2167_v62 = vrot.slane %v3806_v18, 1  ;;  %v2165_v0 = vrot.slane %v748_v56, 1 }
 0x122   : > { %3201 = vtanh.f32 %v1445_v60  ;;  %v3184_v5 = vpop.eup %3183  ;;  %v2168_v11 = vrot.slane %v750_v43, 1 }
 0x123   : > { %3203 = vrcp.f32 %v1499_v47  ;;  %v1497_v13 = vadd.f32 1.0, %v3184_v5  ;;  %v3900_v10 = vsel %vm976_vm1, %v2164_v59, %v2165_v0 }
 0x124   : > { %3091 = vmatmul.mubr.msk.bf16.vlgmr.msra.gmra.mxu1 %vm773_vm0, %v3787_v12  ;;  %v3186_v49 = vpop.eup %3185  ;;  %3205 = vtanh.f32 %v1443_v1  ;;  %v3903_v18 = vsel %vm976_vm1, %v2167_v62, %v2168_v11 }
 0x125   : > { %3111 = vmatpush3.bf16.msra.mxu1 %v3736_v32  ;;  %3094 = vmatprep.mubr.msk.bf16.mxu1 %vm773_vm0, %v3791_v61  ;;  %3207 = vtanh.f32 %v1448_v3  ;;  %v1502_v20 = vadd.f32 1.0, %v3186_v49  ;;  %v2161_v32 = vrot.slane %v3769_v54, 1  ;;  %v3873_v54 = vsel %vm976_vm1, %v2158_v30, %v2159_v33  ;;  %v3174_v3 = vld [vmem:[%s4108_s12 + $0x10] sm:$0xff]   ;;  %4137 = vst [vmem:[#allocation4_spill] sm:$0xff] %v3903_v18 }
 0x126   : > { %3055 = vmatmul.mubr.msk.bf16.vlgmr.msra.gmra.mxu0 %vm773_vm0, %v3706_v51  ;;  %3112 = vmatprep.subr.bf16.mxu1 %v3171_v7  ;;  %v3188_v8 = vpop.eup %3187  ;;  %3209 = vrcp.f32 %v1497_v13  ;;  %v2153_v51 = vrot.slane %v740_v14, 1  ;;  %4135 = vst [vmem:[#allocation2_spill] sm:$0xff] %v3873_v54  ;;  %v2181_v13 = vpack.c.bf16 %v3903_v18, %v3900_v10 }
 0x127   : > { %3058 = vmatprep.mubr.msk.bf16.mxu0 %vm773_vm0, %v3751_v46  ;;  %3075 = vmatpush3.bf16.msra.mxu0 %v3742_v36  ;;  %3211 = vrcp.f32 %v1502_v20  ;;  %v1500_v27 = vadd.f32 1.0, %v3188_v8  ;;  %v3876_v55 = vsel %vm976_vm1, %v2161_v32, %v2162_v37  ;;  %v3176_v8 = vld [vmem:[%s4112_s16] sm:$0xff]  }
 0x128   : > { %3076 = vmatprep.subr.bf16.mxu0 %v3172_v16  ;;  %v3190_v22 = vpop.eup %3189  ;;  %3213 = vtanh.f32 %v1446_v15  ;;  %v3858_v26 = vsel %vm976_vm1, %v2152_v21, %v2153_v51  ;;  %4136 = vst [vmem:[#allocation3_spill] sm:$0xff] %v3876_v55  ;;  %v2180_v63 = vpack.c.bf16 %v3876_v55, %v3873_v54 }
 0x129   : > { %3113 = vmatpush3.bf16.msra.mxu1 %v3171_v7  ;;  %3215 = vrcp.f32 %v1500_v27  ;;  %v1503_v36 = vadd.f32 1.0, %v3190_v22  ;;  %v3192_v38 = vpop.eup %3191 }
 0x12a   : > { %3217 = vtanh.f32 %v1449_v23  ;;  %v3194_v40 = vpop.eup %3193 }
 0x12b   : > { %3077 = vmatpush3.bf16.msra.mxu0 %v3172_v16  ;;  %3219 = vrcp.f32 %v1503_v36  ;;  %v1501_v46 = vadd.f32 1.0, %v3194_v40 }
 0x12c   : > { %3095 = vmatmul.mubr.msk.bf16.gmra.mxu1 %vm773_vm0, %v3831_v35  ;;  %3098 = vmatprep.subr.bf16.mxu0 %v3173_v34  ;;  %v3196_v42 = vpop.eup %3195  ;;  %3221 = vtanh.f32 %v1447_v31 }
 0x12d   : > { %3114 = vmatprep.mubr.msk.bf16.mxu1 %vm773_vm0, %v3843_v9  ;;  %v3198_v4 = vpop.eup %3197  ;;  %v1522_v41 = vmul.f32 %v3196_v42, %v3192_v38  ;;  %3223 = vrcp.f32 %v1501_v46 }
 0x12e   : > { %3059 = vmatmul.mubr.msk.bf16.gmra.mxu0 %vm773_vm0, %v3757_v52  ;;  %v3200_v50 = vpop.eup %3199  ;;  %v2179_v52 = vpack.c.bf16 %v3861_v48, %v3858_v26 }
 0x12f   : > { %3078 = vmatprep.mubr.msk.bf16.mxu0 %vm773_vm0, %v3746_v29  ;;  %v3202_v57 = vpop.eup %3201  ;;  %v1520_v58 = vmul.f32 %v3200_v50, %v3198_v4  ;;  %1530 = vst.msk [vmem:[%s3868_s29 + $0x10] sm:$0xff] %vm773_vm0, %v1522_v41 }
 0x130   : > { %v3204_v60 = vpop.eup %3203 }
 0x131   : > { %v3206_v1 = vpop.eup %3205  ;;  %v1523_v29 = vmul.f32 %v3204_v60, %v3202_v57  ;;  %1528 = vst.msk [vmem:[%s3868_s29] sm:$0xff] %vm773_vm0, %v1520_v58 }
 0x132   : > { %v3208_v2 = vpop.eup %3207 }
 0x133   : > { %v3210_v45 = vpop.eup %3209  ;;  %1531 = vst.msk [vmem:[%s3868_s29 + $0x18] sm:$0xff] %vm773_vm0, %v1523_v29  ;;  %v2823_v29 = vld [vmem:[%s4111_s15] ss:$0 sm:$0xff] }
 0x134   : > { %3115 = vmatmul.mubr.msk.bf16.vlgmr.msra.gmra.mxu1 %vm773_vm0, %v2179_v52  ;;  %v3212_v47 = vpop.eup %3211  ;;  %v1521_v7 = vmul.f32 %v3210_v45, %v3206_v1 }
 0x135   : > { %3118 = vmatprep.mubr.msk.bf16.mxu1 %vm773_vm0, %v2180_v63  ;;  %v3214_v5 = vpop.eup %3213  ;;  %v1526_v16 = vmul.f32 %v3212_v47, %v3208_v2  ;;  %v3975_v47 = vld [vmem:[%s4107_s11] ss:$0 sm:$0xff] }
 0x136   : > { %3079 = vmatmul.mubr.msk.bf16.vlgmr.msra.gmra.mxu0 %vm773_vm0, %v3787_v12  ;;  %v3216_v14 = vpop.eup %3215  ;;  %1529 = vst.msk [vmem:[%s3868_s29 + $0x8] sm:$0xff] %vm773_vm0, %v1521_v7 }
 0x137   : > { %3099 = vmatpush3.bf16.msra.mxu0 %v3173_v34  ;;  %3082 = vmatprep.mubr.msk.bf16.mxu0 %vm773_vm0, %v3791_v61  ;;  %v3218_v49 = vpop.eup %3217  ;;  %v1524_v15 = vmul.f32 %v3216_v14, %v3214_v5  ;;  %1534 = vst.msk [vmem:[%s3868_s29 + $0x30] sm:$0xff] %vm773_vm0, %v1526_v16 }
 0x138   : > { %3100 = vmatprep.subr.bf16.mxu0 %v3174_v3  ;;  %v3220_v19 = vpop.eup %3219 }
 0x139   : > { %v1527_v20 = vmul.f32 %v3220_v19, %v3218_v49  ;;  %1532 = vst.msk [vmem:[%s3868_s29 + $0x20] sm:$0xff] %vm773_vm0, %v1524_v15  ;;  %v3222_v12 = vpop.eup %3221 }
 0x13a   : > { %v3224_v21 = vpop.eup %3223 }
 0x13b   : > { %3101 = vmatpush3.bf16.msra.mxu0 %v3174_v3  ;;  %1535 = vst.msk [vmem:[%s3868_s29 + $0x38] sm:$0xff] %vm773_vm0, %v1527_v20  ;;  %v1525_v61 = vmul.f32 %v3224_v21, %v3222_v12 }
 0x13c   : > { %3119 = vmatmul.mubr.msk.bf16.gmra.mxu1 %vm773_vm0, %v2181_v13  ;;  %3122 = vmatprep.subr.bf16.mxu0 %v3175_v6 }
 0x13d   : > { %1533 = vst.msk [vmem:[%s3868_s29 + $0x28] sm:$0xff] %vm773_vm0, %v1525_v61 }
 0x13e   : > { %3083 = vmatmul.mubr.msk.bf16.gmra.mxu0 %vm773_vm0, %v3831_v35 }
 0x13f   : > { %3102 = vmatprep.mubr.msk.bf16.mxu0 %vm773_vm0, %v3843_v9 }
 0x146   : > { %3103 = vmatmul.mubr.msk.bf16.vlgmr.msra.gmra.mxu0 %vm773_vm0, %v2179_v52 }
 0x147   : > { %3106 = vmatprep.mubr.msk.bf16.mxu0 %vm773_vm0, %v2180_v63  ;;  %3123 = vmatpush3.bf16.msra.mxu0 %v3175_v6 }
 0x148   : > { %3124 = vmatprep.subr.bf16.mxu0 %v3176_v8 }
 0x14b   : > { %3125 = vmatpush3.bf16.msra.mxu0 %v3176_v8 }
 0x14e   : > { %3107 = vmatmul.mubr.msk.bf16.gmra.mxu0 %vm773_vm0, %v2181_v13 }
 0x1c4   : > { %v3935_v35 = vpop.f32.mrf.mxu1 }
 0x1c6   : > { %v3937_v23 = vpop.f32.mrf.mxu1 }
 0x1c8   : > { %v3939_v24 = vpop.f32.mrf.mxu1 }
 0x1ca   : > { %v3941_v51 = vpop.f32.mrf.mxu1 }
 0x1cc   : > { %v3943_v25 = vpop.f32.mrf.mxu1 }
 0x1ce   : > { %v3945_v27 = vpop.f32.mrf.mxu1 }
 0x1d0   : > { %v3947_v9 = vpop.f32.mrf.mxu1 }
 0x1d2   : > { %v3949_v28 = vpop.f32.mrf.mxu1 }
 0x1d4   : > { %v3068_v34 = vpop.f32.mrf.mxu1 }
 0x1d5   : > { %v3951_v22 = vpop.f32.mrf.mxu0 }
 0x1d6   : > { %v1876_v30 = vpop.f32.mrf.mxu1 }
 0x1d7   : > { %v3953_v32 = vpop.f32.mrf.mxu0 }
 0x1d8   : > { %v3069_v33 = vpop.f32.mrf.mxu1 }
 0x1d9   : > { %v3955_v31 = vpop.f32.mrf.mxu0 }
 0x1da   : > { %v1879_v36 = vpop.f32.mrf.mxu1 }
 0x1db   : > { %v3957_v37 = vpop.f32.mrf.mxu0 }
 0x1dc   : > { %v3072_v38 = vpop.f32.mrf.mxu1 }
 0x1dd   : > { %v3959_v40 = vpop.f32.mrf.mxu0 }
 0x1de   : > { %v1892_v42 = vpop.f32.mrf.mxu1 }
 0x1df   : > { %v3961_v46 = vpop.f32.mrf.mxu0 }
 0x1e0   : > { %v3073_v4 = vpop.f32.mrf.mxu1 }
 0x1e1   : > { %v3963_v41 = vpop.f32.mrf.mxu0 }
 0x1e2   : > { %v3965_v56 = vpop.f32.mrf.mxu1 }
 0x1e3   : > { %v3967_v43 = vpop.f32.mrf.mxu0 }
 0x1e4   : > { %v3092_v50 = vpop.f32.mrf.mxu1 }
 0x1e5   : > { %v2124_v16 = vadd.f32 %v3092_v50, %v2823_v29 }
 0x1e6   : > { %v3056_v57 = vpop.f32.mrf.mxu0  ;;  %v2085_v58 = vpop.f32.mrf.mxu1 }
 0x1e7   : > { %v1885_v3 = vadd.f32 %v3068_v34, %v3056_v57  ;;  %v2122_v19 = vadd.f32 %v2823_v29, %v2085_v58 }
 0x1e8   : > { %v1799_v59 = vpop.f32.mrf.mxu0  ;;  %v3093_v52 = vpop.f32.mrf.mxu1 }
 0x1e9   : > { %v1877_v14 = vadd.f32 %v1876_v30, %v1799_v59  ;;  %v1916_v13 = vadd.f32 %v3975_v47, %v1885_v3  ;;  %v2125_v8 = vadd.f32 %v3093_v52, %v2823_v29 }
 0x1ea   : > { %v3057_v60 = vpop.f32.mrf.mxu0  ;;  %v2088_v62 = vpop.f32.mrf.mxu1 }
 0x1eb   : > { %v1888_v20 = vadd.f32 %v3069_v33, %v3057_v60  ;;  %v1914_v6 = vadd.f32 %v3975_v47, %v1877_v14  ;;  %v2123_v60 = vadd.f32 %v2823_v29, %v2088_v62 }
 0x1ec   : > { %v1802_v63 = vpop.f32.mrf.mxu0  ;;  %v3096_v0 = vpop.f32.mrf.mxu1 }
 0x1ed   : > { %v1880_v55 = vadd.f32 %v1879_v36, %v1802_v63  ;;  %v1917_v50 = vadd.f32 %v3975_v47, %v1888_v20  ;;  %v2128_v14 = vadd.f32 %v3096_v0, %v2823_v29 }
 0x1ee   : > { %v3060_v11 = vpop.f32.mrf.mxu0  ;;  %v2101_v1 = vpop.f32.mrf.mxu1 }
 0x1ef   : > { %v1901_v18 = vadd.f32 %v3072_v38, %v3060_v11  ;;  %v1915_v38 = vadd.f32 %v3975_v47, %v1880_v55  ;;  %v2126_v11 = vadd.f32 %v2823_v29, %v2101_v1 }
 0x1f0   : > { %v1815_v2 = vpop.f32.mrf.mxu0  ;;  %v3097_v45 = vpop.f32.mrf.mxu1 }
 0x1f1   : > { %v1893_v3 = vadd.f32 %v1892_v42, %v1815_v2  ;;  %v1920_v63 = vadd.f32 %v3975_v47, %v1901_v18  ;;  %v2129_v2 = vadd.f32 %v3097_v45, %v2823_v29 }
 0x1f2   : > { %v3061_v7 = vpop.f32.mrf.mxu0  ;;  %v2104_v5 = vpop.f32.mrf.mxu1 }
 0x1f3   : > { %v1918_v0 = vadd.f32 %v3975_v47, %v1893_v3 }
 0x1f4   : > { %v1818_v49 = vpop.f32.mrf.mxu0  ;;  %v3116_v15 = vpop.f32.mrf.mxu1 }
 0x1f5   : > { %v2368_v12 = vadd.f32 %v3116_v15, %v2124_v16  ;;  %v1896_v18 = vadd.f32 %v3965_v56, %v1818_v49 }
 0x1f6   : > { %v3978_v21 = vpop.f32.mrf.mxu0  ;;  %v2335_v61 = vpop.f32.mrf.mxu1 }
 0x1f7   : > { %v2400_v34 = vadd.f32 %v2368_v12, %v1916_v13  ;;  %v2366_v57 = vadd.f32 %v2335_v61, %v2122_v19  ;;  %v1904_v61 = vadd.f32 %v3073_v4, %v3061_v7  ;;  %v1708_v4 = vadd.f32 %v3935_v35, %v3951_v22  ;;  %v4011_v35 = vld [vmem:[%s4110_s14] ss:$0 sm:$0xff] }
 0x1f8   : > { %v3981_v54 = vpop.f32.mrf.mxu0  ;;  %v3117_v30 = vpop.f32.mrf.mxu1  ;;  %v2127_v7 = vadd.f32 %v2823_v29, %v2104_v5  ;;  %v1919_v3 = vadd.f32 %v3975_v47, %v1896_v18 }
 0x1f9   : > { %v2408_v59 = vadd.f32 %v3666_v44, %v2400_v34  ;;  %v2398_v58 = vadd.f32 %v2366_v57, %v1914_v6  ;;  %v2369_v33 = vadd.f32 %v3117_v30, %v2125_v8  ;;  %v1921_v56 = vadd.f32 %v3975_v47, %v1904_v61 }
 0x1fa   : > { %v3985_v16 = vpop.f32.mrf.mxu0  ;;  %v2338_v15 = vpop.f32.mrf.mxu1  ;;  %v1711_v61 = vadd.f32 %v3939_v24, %v3955_v31 }
 0x1fb   : > { %v2846_v52 = vmul.f32 -1.442695, %v2408_v59  ;;  %v2406_v13 = vadd.f32 %v3666_v44, %v2398_v58  ;;  %v2401_v36 = vadd.f32 %v2369_v33, %v1917_v50  ;;  %v2367_v20 = vadd.f32 %v2338_v15, %v2123_v60  ;;  %v4005_v58 = vld [vmem:[%s4106_s10] ss:$0 sm:$0xff] }
 0x1fc   : > { %v3990_v19 = vpop.f32.mrf.mxu0  ;;  %v3120_v12 = vpop.f32.mrf.mxu1  ;;  %v2030_v18 = vadd.f32 %v3985_v16, %v4011_v35 }
 0x1fd   : > { %3225 = vpow2.f32 %v2846_v52  ;;  %v2844_v42 = vmul.f32 -1.442695, %v2406_v13  ;;  %v2409_v62 = vadd.f32 %v3666_v44, %v2401_v36  ;;  %v2399_v6 = vadd.f32 %v2367_v20, %v1915_v38 }
 0x1fe   : > { %v3994_v8 = vpop.f32.mrf.mxu0  ;;  %v2372_v34 = vadd.f32 %v3120_v12, %v2128_v14  ;;  %v2351_v55 = vpop.f32.mrf.mxu1  ;;  %v1739_v13 = vadd.f32 %v4005_v58, %v1708_v4  ;;  %v1700_v36 = vadd.f32 %v3937_v23, %v3953_v32  ;;  %v2027_v23 = vadd.f32 %v4011_v35, %v3981_v54 }
 0x1ff   : > { %3227 = vpow2.f32 %v2844_v42  ;;  %v2847_v1 = vmul.f32 -1.442695, %v2409_v62  ;;  %v2370_v57 = vadd.f32 %v2351_v55, %v2126_v11  ;;  %v2407_v30 = vadd.f32 %v3666_v44, %v2399_v6 }
 0x200   : > { %v2404_v50 = vadd.f32 %v2372_v34, %v1920_v63  ;;  %v4000_v59 = vpop.f32.mrf.mxu0  ;;  %v3121_v45 = vpop.f32.mrf.mxu1  ;;  %v2029_v11 = vadd.f32 %v3978_v21, %v4011_v35  ;;  %v1703_v42 = vadd.f32 %v3941_v51, %v3957_v37  ;;  %v1724_v6 = vadd.f32 %v3943_v25, %v3959_v40 }
 0x201   : > { %3229 = vpow2.f32 %v2847_v1  ;;  %v2402_v49 = vadd.f32 %v2370_v57, %v1918_v0  ;;  %v2373_v33 = vadd.f32 %v3121_v45, %v2129_v2  ;;  %v2845_v22 = vmul.f32 -1.442695, %v2407_v30 }
 0x202   : > { %v2412_v29 = vadd.f32 %v3666_v44, %v2404_v50  ;;  %v3085_v5 = vpop.f32.mrf.mxu0  ;;  %v2354_v60 = vpop.f32.mrf.mxu1  ;;  %v1737_v2 = vadd.f32 %v4005_v58, %v1700_v36  ;;  %v1740_v54 = vadd.f32 %v4005_v58, %v1711_v61  ;;  %v1738_v55 = vadd.f32 %v4005_v58, %v1703_v42 }
 0x203   : > { %v2410_v15 = vadd.f32 %v3666_v44, %v2402_v49  ;;  %v2405_v14 = vadd.f32 %v2373_v33, %v1921_v56  ;;  %v2371_v52 = vadd.f32 %v2354_v60, %v2127_v7  ;;  %3231 = vpow2.f32 %v2845_v22 }
 0x204   : > { %v2850_v38 = vmul.f32 -1.442695, %v2412_v29  ;;  %v4019_v63 = vpop.f32.mrf.mxu0  ;;  %v1743_v7 = vadd.f32 %v4005_v58, %v1724_v6  ;;  %v1716_v30 = vadd.f32 %v3945_v27, %v3961_v46  ;;  %v2033_v50 = vadd.f32 %v3994_v8, %v4011_v35 }
 0x205   : > { %v2848_v20 = vmul.f32 -1.442695, %v2410_v15  ;;  %v2413_v12 = vadd.f32 %v3666_v44, %v2405_v14  ;;  %v2403_v47 = vadd.f32 %v2371_v52, %v1919_v3  ;;  %v1727_v22 = vadd.f32 %v3947_v9, %v3963_v41 }
 0x206   : > { %3233 = vpow2.f32 %v2850_v38  ;;  %v3104_v32 = vpop.f32.mrf.mxu0  ;;  %v2031_v29 = vadd.f32 %v4011_v35, %v4000_v59  ;;  %v1741_v15 = vadd.f32 %v4005_v58, %v1716_v30  ;;  %v2034_v14 = vadd.f32 %v3085_v5, %v4011_v35 }
 0x207   : > { %3235 = vpow2.f32 %v2848_v20  ;;  %v2851_v62 = vmul.f32 -1.442695, %v2413_v12  ;;  %v2411_v0 = vadd.f32 %v3666_v44, %v2403_v47  ;;  %v2278_v21 = vadd.f32 %v3104_v32, %v2029_v11 }
 0x208   : > { %v2245_v34 = vpop.f32.mrf.mxu0  ;;  %v2028_v44 = vadd.f32 %v4011_v35, %v3990_v19  ;;  %v1744_v38 = vadd.f32 %v4005_v58, %v1727_v22  ;;  %v1719_v11 = vadd.f32 %v3949_v28, %v3967_v43 }
 0x209   : > { %3237 = vpow2.f32 %v2851_v62  ;;  %v2849_v24 = vmul.f32 -1.442695, %v2411_v0  ;;  %v2376_v31 = vadd.f32 %v2278_v21, %v1739_v13  ;;  %v2276_v51 = vadd.f32 %v2245_v34, %v2027_v23 }
 0x20a   : > { %v3226_v37 = vpop.eup %3225  ;;  %v3105_v1 = vpop.f32.mrf.mxu0  ;;  %v2032_v62 = vadd.f32 %v4011_v35, %v4019_v63  ;;  %v1742_v6 = vadd.f32 %v4005_v58, %v1719_v11 }
 0x20b   : > { %v2440_v57 = vadd.f32 1.0, %v3226_v37  ;;  %3239 = vpow2.f32 %v2849_v24  ;;  %v2384_v25 = vadd.f32 %v3729_v53, %v2376_v31  ;;  %v2374_v40 = vadd.f32 %v2276_v51, %v1737_v2 }
 0x20c   : > { %v3228_v4 = vpop.eup %3227  ;;  %v2279_v45 = vadd.f32 %v3105_v1, %v2030_v18  ;;  %v2248_v16 = vpop.f32.mrf.mxu0 }
 0x20d   : > { %3241 = vrcp.f32 %v2440_v57  ;;  %v2438_v56 = vadd.f32 1.0, %v3228_v4  ;;  %v2382_v19 = vadd.f32 %v3729_v53, %v2374_v40  ;;  %v2277_v49 = vadd.f32 %v2248_v16, %v2028_v44 }
 0x20e   : > { %v3230_v33 = vpop.eup %3229  ;;  %3243 = vtanh.f32 %v2384_v25  ;;  %v2377_v60 = vadd.f32 %v2279_v45, %v1740_v54  ;;  %v3108_v27 = vpop.f32.mrf.mxu0 }
 0x20f   : > { %3245 = vrcp.f32 %v2438_v56  ;;  %v2441_v46 = vadd.f32 1.0, %v3230_v33  ;;  %v2375_v8 = vadd.f32 %v2277_v49, %v1738_v55  ;;  %v2282_v3 = vadd.f32 %v3108_v27, %v2033_v50 }
 0x210   : > { %3247 = vtanh.f32 %v2382_v19  ;;  %v2385_v52 = vadd.f32 %v3729_v53, %v2377_v60  ;;  %v2261_v13 = vpop.f32.mrf.mxu0  ;;  %v3232_v36 = vpop.eup %3231 }
 0x211   : > { %3249 = vrcp.f32 %v2441_v46  ;;  %v2383_v9 = vadd.f32 %v3729_v53, %v2375_v8  ;;  %v2380_v41 = vadd.f32 %v2282_v3, %v1743_v7  ;;  %v2280_v59 = vadd.f32 %v2261_v13, %v2031_v29 }
 0x212   : > { %v2439_v20 = vadd.f32 1.0, %v3232_v36  ;;  %3251 = vtanh.f32 %v2385_v52  ;;  %v3109_v12 = vpop.f32.mrf.mxu0 }
 0x213   : > { %v3234_v47 = vpop.eup %3233  ;;  %3253 = vtanh.f32 %v2383_v9  ;;  %v2388_v5 = vadd.f32 %v3729_v53, %v2380_v41  ;;  %v2378_v61 = vadd.f32 %v2280_v59, %v1741_v15  ;;  %v2283_v42 = vadd.f32 %v3109_v12, %v2034_v14  ;;  %v2852_v14 = vld [vmem:[%s4113_s17] ss:$0 sm:$0xff] }
 0x214   : > { %v3236_v23 = vpop.eup %3235  ;;  %3255 = vrcp.f32 %v2439_v20  ;;  %v2444_v32 = vadd.f32 1.0, %v3234_v47  ;;  %v2264_v0 = vpop.f32.mrf.mxu0 }
 0x215   : > { %v2442_v21 = vadd.f32 1.0, %v3236_v23  ;;  %3257 = vtanh.f32 %v2388_v5  ;;  %v2386_v28 = vadd.f32 %v3729_v53, %v2378_v61  ;;  %v2381_v43 = vadd.f32 %v2283_v42, %v1744_v38 }
 0x216   : > { %v3238_v2 = vpop.eup %3237  ;;  %3259 = vrcp.f32 %v2444_v32  ;;  %v2281_v34 = vadd.f32 %v2264_v0, %v2032_v62  ;;  %v4138_v62 = vld [vmem:[#allocation2_spill] sm:$0xff] }
 0x217   : > { %3261 = vrcp.f32 %v2442_v21  ;;  %v2445_v24 = vadd.f32 1.0, %v3238_v2  ;;  %v2389_v31 = vadd.f32 %v3729_v53, %v2381_v43 }
 0x218   : > { %v3240_v51 = vpop.eup %3239  ;;  %3263 = vtanh.f32 %v2386_v28  ;;  %v2379_v37 = vadd.f32 %v2281_v34, %v1742_v6  ;;  %v4139_v28 = vld [vmem:[#allocation4_spill] sm:$0xff] }
 0x219   : > { %3265 = vrcp.f32 %v2445_v24  ;;  %v2443_v35 = vadd.f32 1.0, %v3240_v51 }
 0x21a   : > { %v3242_v63 = vpop.eup %3241  ;;  %3267 = vtanh.f32 %v2389_v31  ;;  %v2387_v54 = vadd.f32 %v3729_v53, %v2379_v37 }
 0x21b   : > { %v3244_v55 = vpop.eup %3243  ;;  %3269 = vrcp.f32 %v2443_v35 }
 0x21c   : > { %v3246_v18 = vpop.eup %3245  ;;  %3271 = vtanh.f32 %v2387_v54  ;;  %v2464_v25 = vmul.f32 %v3244_v55, %v3242_v63 }
 0x21d   : > { %v3248_v58 = vpop.eup %3247 }
 0x21e   : > { %v3250_v44 = vpop.eup %3249  ;;  %v2462_v30 = vmul.f32 %v3248_v58, %v3246_v18 }
 0x21f   : > { %v3252_v1 = vpop.eup %3251 }
 0x220   : > { %v3254_v57 = vpop.eup %3253  ;;  %v2465_v40 = vmul.f32 %v3252_v1, %v3250_v44 }
 0x221   : > { %v3256_v4 = vpop.eup %3255 }
 0x222   : > { %v3258_v7 = vpop.eup %3257  ;;  %v2463_v50 = vmul.f32 %v3256_v4, %v3254_v57  ;;  %v2471_v45 = vpack.c.bf16 %v2465_v40, %v2464_v25 }
 0x223   : > { %v3260_v16 = vpop.eup %3259 }
 0x224   : > { %v3262_v56 = vpop.eup %3261  ;;  %v2470_v19 = vpack.c.bf16 %v2463_v50, %v2462_v30  ;;  %v2468_v29 = vmul.f32 %v3260_v16, %v3258_v7 }
 0x225   : > { %v3264_v49 = vpop.eup %3263 }
 0x226   : > { %v3266_v53 = vpop.eup %3265  ;;  %3126 = vmatprep.mubr.msk.bf16.mxu0 %vm773_vm0, %v2470_v19  ;;  %v2466_v46 = vmul.f32 %v3264_v49, %v3262_v56 }
 0x227   : > { %v3268_v33 = vpop.eup %3267  ;;  %3127 = vmatmul.mubr.msk.bf16.vlgmr.msra.gmra.mxu0 %vm773_vm0, %v2471_v45 }
 0x228   : > { %v3270_v22 = vpop.eup %3269  ;;  %v2469_v60 = vmul.f32 %v3268_v33, %v3266_v53 }
 0x229   : > { %v3272_v27 = vpop.eup %3271 }
 0x22a   : > { %v2467_v8 = vmul.f32 %v3272_v27, %v3270_v22  ;;  %v2473_v3 = vpack.c.bf16 %v2469_v60, %v2468_v29 }
 0x22c   : > { %v2472_v15 = vpack.c.bf16 %v2467_v8, %v2466_v46 }
 0x22e   : > { %3130 = vmatprep.mubr.msk.bf16.mxu0 %vm773_vm0, %v2472_v15 }
 0x22f   : > { %3131 = vmatmul.mubr.msk.bf16.gmra.mxu0 %vm773_vm0, %v2473_v3 }
 0x2e7   : > { %v3128_v52 = vpop.f32.mrf.mxu0 }
 0x2e8   : > { %v2552_v13 = vadd.f32 %v3128_v52, %v2852_v14 }
 0x2e9   : > { %v2543_v36 = vpop.f32.mrf.mxu0 }
 0x2ea   : > { %v2576_v9 = vadd.f32 %v2552_v13, %v3858_v26  ;;  %v2544_v41 = vadd.f32 %v2852_v14, %v2543_v36 }
 0x2eb   : > { %v3129_v59 = vpop.f32.mrf.mxu0 }
 0x2ec   : > { %2584 = vst.msk [vmem:[%s717_s28 + $0x10] sm:$0xff] %vm773_vm0, %v2576_v9  ;;  %v2574_v38 = vadd.f32 %v2544_v41, %v3814_v39  ;;  %v2555_v11 = vadd.f32 %v3129_v59, %v2852_v14 }
 0x2ed   : > { %v2546_v20 = vpop.f32.mrf.mxu0 }
 0x2ee   : > { %2582 = vst.msk [vmem:[%s717_s28] sm:$0xff] %vm773_vm0, %v2574_v38  ;;  %v2577_v12 = vadd.f32 %v2555_v11, %v3861_v48  ;;  %v2547_v47 = vadd.f32 %v2852_v14, %v2546_v20 }
 0x2ef   : > { %v3132_v5 = vpop.f32.mrf.mxu0 }
 0x2f0   : > { %2585 = vst.msk [vmem:[%s717_s28 + $0x18] sm:$0xff] %vm773_vm0, %v2577_v12  ;;  %v2575_v61 = vadd.f32 %v2547_v47, %v3823_v17  ;;  %v2568_v42 = vadd.f32 %v3132_v5, %v2852_v14  ;;  %v4140_v17 = vld [vmem:[#allocation3_spill] sm:$0xff] }
 0x2f1   : > { %v2559_v26 = vpop.f32.mrf.mxu0 }
 0x2f2   : > { %2583 = vst.msk [vmem:[%s717_s28 + $0x8] sm:$0xff] %vm773_vm0, %v2575_v61  ;;  %v2580_v23 = vadd.f32 %v2568_v42, %v3900_v10  ;;  %v2560_v32 = vadd.f32 %v2852_v14, %v2559_v26 }
 0x2f3   : > { %v3133_v39 = vpop.f32.mrf.mxu0 }
 0x2f4   : > { %2588 = vst.msk [vmem:[%s717_s28 + $0x30] sm:$0xff] %vm773_vm0, %v2580_v23  ;;  %v2578_v0 = vadd.f32 %v2560_v32, %v4138_v62  ;;  %v2571_v21 = vadd.f32 %v3133_v39, %v2852_v14 }
 0x2f5   : > { %v2562_v48 = vpop.f32.mrf.mxu0 }
 0x2f6   : > { %2586 = vst.msk [vmem:[%s717_s28 + $0x20] sm:$0xff] %vm773_vm0, %v2578_v0  ;;  %v2581_v43 = vadd.f32 %v2571_v21, %v4139_v28  ;;  %v2563_v2 = vadd.f32 %v2852_v14, %v2562_v48 }
 0x2f8   : > { %2589 = vst.msk [vmem:[%s717_s28 + $0x38] sm:$0xff] %vm773_vm0, %v2581_v43  ;;  %v2579_v6 = vadd.f32 %v2563_v2, %v4140_v17 }
 0x2fa   : > { %2587 = vst.msk [vmem:[%s717_s28 + $0x28] sm:$0xff] %vm773_vm0, %v2579_v6 }
 0x2fb PF: > { %s32_s2 = sadd.s32 1, %s3279_s2  }
 0x2fc   : > { %p29_p4 = scmp.ge.s32.totalorder %s32_s2, 4  }
 0x2fe   :  { %31 = sbr.rel (!%p29_p4) target bundleno = 7 (0x7), region = 157 }

// kernel: _lambda_.5
= control target key start
LH: loop header
LB: loop body
LE: loop exit
PB: predicated region body
PF: predicated region fallthrough
CT: control target
= control target key end

     0   :  { %s5105_s0 = inlined_call_operand.vmem [shape: f32[2,9,10,32], index: 0, kind: input, shape index: {}]   ;;  %s5106_s1 = inlined_call_operand.vmem [shape: f32[2,8,9,32], index: 1, kind: input, shape index: {}]   ;;  %s5107_s2 = inlined_call_operand.vmem [shape: bf16[3,32,32], index: 2, kind: input, shape index: {}]   ;;  %s5108_s3 = inlined_call_operand.vmem [shape: bf16[3,32,32], index: 3, kind: input, shape index: {}]   ;;  %s5109_s4 = inlined_call_operand.vmem [shape: f32[1,32], index: 4, kind: input, shape index: {}]   ;;  %s5110_s5 = inlined_call_operand.vmem [shape: f32[1,32], index: 5, kind: input, shape index: {}]   ;;  %s5111_s6 = inlined_call_operand.vmem [shape: bf16[32,32], index: 6, kind: input, shape index: {}]   ;;  %s5112_s7 = inlined_call_operand.vmem [shape: bf16[32,32], index: 7, kind: input, shape index: {}]   ;;  %s5113_s8 = inlined_call_operand.vmem [shape: bf16[32,32], index: 8, kind: input, shape index: {}]   ;;  %s5114_s9 = inlined_call_operand.vmem [shape: bf16[32,32], index: 9, kind: input, shape index: {}]   ;;  %s5115_s10 = inlined_call_operand.vmem [shape: f32[1,32], index: 10, kind: input, shape index: {}]   ;;  %s5116_s11 = inlined_call_operand.vmem [shape: f32[1,32], index: 11, kind: input, shape index: {}]   ;;  %s5117_s12 = inlined_call_operand.vmem [shape: bf16[2,32,32], index: 12, kind: input, shape index: {}]   ;;  %s5118_s13 = inlined_call_operand.vmem [shape: bf16[2,32,32], index: 13, kind: input, shape index: {}]   ;;  %s5119_s14 = inlined_call_operand.vmem [shape: f32[1,32], index: 14, kind: input, shape index: {}]   ;;  %s5120_s15 = inlined_call_operand.vmem [shape: f32[1,32], index: 15, kind: input, shape index: {}]   ;;  %s5121_s16 = inlined_call_operand.vmem [shape: bf16[32,32], index: 16, kind: input, shape index: {}]   ;;  %s5122_s17 = inlined_call_operand.vmem [shape: f32[1,32], index: 17, kind: input, shape index: {}]   ;;  %s5123_s18 = inlined_call_operand.vmem [shape: f32[2,1,32], index: 18, kind: input, shape index: {}]   ;;  %s5124_s19 = inlined_call_operand.vmem [shape: f32[2,1,32], index: 19, kind: input, shape index: {}]   ;;  %s5125_s20 = inlined_call_operand.vmem [shape: bf16[32,512], index: 20, kind: input, shape index: {}]   ;;  %s5126_s21 = inlined_call_operand.vmem [shape: f32[1,512], index: 21, kind: input, shape index: {}]   ;;  %s5127_s22 = inlined_call_operand.vmem [shape: bf16[512,64], index: 22, kind: input, shape index: {}]   ;;  %s5128_s23 = inlined_call_operand.vmem [shape: f32[1,64], index: 23, kind: input, shape index: {}]   ;;  %s5129_s24 = inlined_call_operand.hbm [shape: f32[2,64,64], index: 24, kind: output, shape index: {}]  }
   0x1   :  { %5147 = sst [smem:[#allocation13_spill]] %s5105_s0 }
   0x2   :  { %5148 = sst [smem:[#allocation14_spill]] %s5106_s1 }
   0x3   :  { %5149 = sst [smem:[#allocation15_spill]] %s5107_s2 }
   0x4   :  { %5150 = sst [smem:[#allocation16_spill]] %s5108_s3 }
   0x5   :  { %5151 = sst [smem:[#allocation17_spill]] %s5109_s4 }
   0x6   :  { %5152 = sst [smem:[#allocation18_spill]] %s5110_s5 }
   0x7   :  { %5153 = sst [smem:[#allocation19_spill]] %s5111_s6 }
   0x8   :  { %5154 = sst [smem:[#allocation20_spill]] %s5112_s7 }
   0x9   :  { %5155 = sst [smem:[#allocation21_spill]] %s5113_s8 }
   0xa   :  { %5156 = sst [smem:[#allocation22_spill]] %s5114_s9 }
   0xb   :  { %5157 = sst [smem:[#allocation23_spill]] %s5115_s10 }
   0xc   :  { %5158 = sst [smem:[#allocation24_spill]] %s5129_s24 }
   0xd   :  { %29 = vsyncpa [#allocation3], 0 }
   0xe   :  { %31 = vsyncpa [#allocation3 + $0x1], 0  ;;  %s4253_s5 = smov 0   ;;  %s4255_s26 = smov 0  }
   0xf   :  { %s4257_s27 = smov 0   ;;  %s4259_s28 = smov 0  }
  0x10 LB: > { %5159 = sst [smem:[#allocation5_spill]] %s4110_s5  ;;  %s4274_s6 = sadd.s32 4294967295, %s4122_s28   ;;  %s4122_s28 = sphi %s4259_s28, %s5188_s28   ;;  %s4118_s27 = sphi %s4257_s27, %s5193_s27   ;;  %s4114_s26 = sphi %s4255_s26, %s5192_s26   ;;  %s4110_s5 = sphi %s4253_s5, %s5191_s5  }
  0x11   : > { %5160 = sst [smem:[#allocation6_spill]] %s4118_s27  ;;  %s3348_s2 = sadd.s32 4294967294, %s4122_s28  }
  0x12   : > { %5161 = sst [smem:[#allocation7_spill]] %s4122_s28  ;;  %s4278_s29 = sadd.s32 1, %s4122_s28  }
  0x13   : > { %5162 = sst [smem:[#allocation8_spill]] %s4278_s29  ;;  %s568_s0 = sadd.s32 1, %s4118_s27 }
  0x14   : > { %s565_s7 = ssub.s32 %s4122_s28, %s4278_s29  ;;  %p578_p0 = scmp.ne.s32.totalorder %s4118_s27, %s4114_s26 }
  0x15   : > { %p566_p1 = scmp.eq.s32.totalorder %s565_s7, 0  ;;  %p579_p2 = scmp.eq.s32.totalorder %s4274_s6, 1 }
  0x16   : > { %p584_p3 = scmp.ne.s32.totalorder %s4114_s26, %s4110_s5  ;;  %p585_p4 = scmp.eq.s32.totalorder %s3348_s2, 1 }
  0x17   : > { %s4289_s30 = scalar_select %p566_p1, %s4118_s27, %s568_s0  }
  0x18   : > { %p4291_p5 = por %p579_p2, %p578_p0  ;;  %p4295_p6 = por %p585_p4, %p584_p3 }
  0x19   : > { %5163 = sst [smem:[#allocation9_spill]] %s4289_s30  ;;  %p3351_p7 = scmp.ge.s32.totalorder %s4122_s28, 1 }
  0x1a   : > { %s5165_s25 = scalar_select %p4295_p6, 1, 0 }
  0x1b   : > { %p691_p8 = scmp.lt.s32.totalorder %s4122_s28, 3 }
  0x1c   : > { %5166 = sst [smem:[#allocation10_spill]] %s5165_s25 }
  0x1d   : > { %p692_p9 = pnand %p3351_p7, %p691_p8 }
  0x1f   : > { %695 = sbr.rel (%p692_p9) target bundleno = 1224 (0x4c8), region = 116 }
  0x24   : > { %s5167_s1 = sld [smem:[#allocation15_spill]]  ;;  %p768_p10 = scmp.lt.s32.totalorder %s4274_s6, 1  ;;  %vm839_vm0 = vcmask 261120   ;;  %vm1042_vm1 = vcmask 1046528   ;;  %vm1271_vm2 = vcmask 1045504   ;;  %vm3233_vm3 = vcmask 523264  }
  0x25   : > { %s5168_s29 = sld [smem:[#allocation16_spill]]  ;;  %s765_s27 = sand.u32 1, %s4114_s26  }
  0x26   : > { %s4309_s7 = scalar_select %p768_p10, %s4274_s6, 1 }
  0x27   : > { %s5169_s5 = sld [smem:[#allocation13_spill]]  ;;  %s3542_s4 = sshll.u32 %s4274_s6, 10 }
  0x28   : > { %s3897_s8 = smul.u32 144, %s4309_s7  ;;  %s5172_s2 = sld [smem:[#allocation21_spill]] }
  0x29   : > { %s5173_s24 = sld [smem:[#allocation20_spill]]  ;;  %s5065_s6 = scalar_lea.sflag [#allocation3], %s765_s27 }
  0x2a   : > { %v3940_v0 = vld [vmem:[%s5167_s1 + $0x8] sm:$0xff]   ;;  %v3941_v1 = vld [vmem:[%s5167_s1] sm:$0xff]   ;;  %v3943_v3 = vld [vmem:[%s5167_s1 + $0x18] sm:$0xff]   ;;  %s5174_s9 = sld [smem:[#allocation22_spill]] }
  0x2b   : > { %3713 = vmatprep.subr.bf16.mxu0 %v3940_v0  ;;  %3893 = vmatprep.subr.bf16.mxu1 %v3940_v0  ;;  %v3942_v2 = vld [vmem:[%s5168_s29 + $0x8] sm:$0xff]   ;;  %v3945_v18 = vld [vmem:[%s5167_s1 + $0x10] sm:$0xff]   ;;  %v3944_v33 = vld [vmem:[%s5168_s29] sm:$0xff]   ;;  %s5175_s25 = sld [smem:[#allocation17_spill]] }
  0x2c   : > { %3714 = vmatpush3.bf16.msra.mxu0 %v3940_v0  ;;  %3895 = vmatpush3.bf16.msra.mxu1 %v3940_v0  ;;  %v3946_v42 = vld [vmem:[%s5167_s1 + $0x28] sm:$0xff]   ;;  %v3947_v50 = vld [vmem:[%s5168_s29 + $0x18] sm:$0xff]   ;;  %v3948_v63 = vld [vmem:[%s5167_s1 + $0x20] sm:$0xff]   ;;  %s3541_s1 = sshll.u32 %s4309_s7, 7  ;;  %s5180_s10 = sld [smem:[#allocation23_spill]] }
  0x2d   : > { %3715 = vmatprep.subr.bf16.mxu0 %v3941_v1  ;;  %3894 = vmatprep.subr.bf16.mxu1 %v3941_v1  ;;  %s4321_s28 = scalar_lea.vmem %s5169_s5, %s3897_s8  ;;  %s5170_s5 = sld [smem:[#allocation19_spill]] }
  0x2e   : > { %v4324_v4 = vld [vmem:[%s4321_s28] sm:$0xff]  ;;  %v4327_v5 = vld [vmem:[%s4321_s28 + $0x10] sm:$0xff]  ;;  %v4363_v22 = vld [vmem:[%s4321_s28 + $0x28] sm:$0x3] }
  0x2f   : > { %v4330_v6 = vld [vmem:[%s4321_s28 + $0x40] sm:$0xff]  ;;  %v819_v7 = vpack.c.bf16 %v4327_v5, %v4324_v4  ;;  %v1043_v8 = vrot.slane %v4324_v4, 1  ;;  %v1046_v9 = vrot.slane %v4327_v5, 1  ;;  %v4337_v10 = vld [vmem:[%s4321_s28 + $0x50] sm:$0xff]  ;;  %v1272_v13 = vrot.slane %v4324_v4, 2 }
  0x30   : > { %3716 = vmatpush3.bf16.msra.mxu0 %v3941_v1  ;;  %3896 = vmatpush3.bf16.msra.mxu1 %v3941_v1  ;;  %v4340_v11 = vld [vmem:[%s4321_s28 + $0x20] sm:$0xff]  ;;  %v4343_v12 = vld [vmem:[%s4321_s28 + $0x30] sm:$0xff]  ;;  %v1275_v14 = vrot.slane %v4327_v5, 2  ;;  %v4349_v15 = vpack.c.bf16 %v4337_v10, %v4330_v6  ;;  %v1055_v16 = vrot.slane %v4330_v6, 1  ;;  %v1058_v19 = vrot.slane %v4337_v10, 1 }
  0x31   : > { %3725 = vmatprep.subr.bf16.mxu1 %v3942_v2  ;;  %3737 = vmatprep.subr.bf16.mxu0 %v3943_v3  ;;  %v4353_v17 = vld [vmem:[%s4321_s28 + $0x60] sm:$0xff]  ;;  %v1284_v20 = vrot.slane %v4330_v6, 2  ;;  %v1287_v21 = vrot.slane %v4337_v10, 2  ;;  %v4367_v23 = vpack.c.bf16 %v4343_v12, %v4340_v11  ;;  %v4370_v24 = vld [vmem:[%s4321_s28 + $0x70] sm:$0xff]  ;;  %v4375_v25 = vld [vmem:[%s4321_s28 + $0x38] sm:$0x3] }
  0x32   : > { %3717 = vmatprep.mubr.msk.bf16.mxu0 %vm839_vm0, %v819_v7  ;;  %3721 = vmatprep.mubr.msk.bf16.mxu1 %vm839_vm0, %v4349_v15  ;;  %v1049_v26 = vrot.slane %v4340_v11, 1  ;;  %v1052_v27 = vrot.slane %v4343_v12, 1  ;;  %v786_v28 = vld [vmem:[%s4321_s28 + $0x8] sm:$0x3]  ;;  %v1278_v29 = vrot.slane %v4340_v11, 2  ;;  %v1279_v30 = vrot.slane %v4363_v22, 2 }
  0x33   : > { %3718 = vmatmul.mubr.msk.bf16.vlgmr.msra.gmra.mxu0 %vm839_vm0, %v4367_v23  ;;  %v1281_v31 = vrot.slane %v4343_v12, 2  ;;  %v4387_v32 = vpack.c.bf16 %v4370_v24, %v4353_v17  ;;  %v788_v34 = vld [vmem:[%s4321_s28 + $0x18] sm:$0x3]  ;;  %v1282_v35 = vrot.slane %v4375_v25, 2  ;;  %v1061_v36 = vrot.slane %v4353_v17, 1  ;;  %s5171_s30 = smov %s5170_s5 }
  0x34   : > { %v1064_v37 = vrot.slane %v4370_v24, 1  ;;  %3738 = vmatpush3.bf16.msra.mxu0 %v3943_v3  ;;  %v1044_v38 = vrot.slane %v786_v28, 1  ;;  %v1047_v39 = vrot.slane %v788_v34, 1  ;;  %v1050_v40 = vrot.slane %v4363_v22, 1  ;;  %v794_v44 = vld [vmem:[%s4321_s28 + $0x48] sm:$0x3] }
  0x35   : > { %3722 = vmatmul.mubr.msk.bf16.vlgmr.msra.gmra.mxu1 %vm839_vm0, %v4387_v32  ;;  %3739 = vmatprep.subr.bf16.mxu0 %v3945_v18  ;;  %v1053_v41 = vrot.slane %v4375_v25, 1  ;;  %v796_v45 = vld [vmem:[%s4321_s28 + $0x58] sm:$0x3]  ;;  %v4408_v46 = vld [vmem:[%s4321_s28 + $0x68] sm:$0x3]  ;;  %v1056_v51 = vrot.slane %v794_v44, 1  ;;  %v1280_v5 = vsel %vm1271_vm2, %v1278_v29, %v1279_v30 }
  0x36   : > { %3726 = vmatpush3.bf16.msra.mxu1 %v3942_v2  ;;  %3729 = vmatprep.mubr.msk.bf16.mxu1 %vm839_vm0, %v819_v7  ;;  %v1045_v43 = vsel %vm1042_vm1, %v1043_v8, %v1044_v38  ;;  %v1048_v47 = vsel %vm1042_vm1, %v1046_v9, %v1047_v39  ;;  %v1051_v48 = vsel %vm1042_vm1, %v1049_v26, %v1050_v40  ;;  %v800_v52 = vld [vmem:[%s4321_s28 + $0x78] sm:$0x3]  ;;  %v1059_v55 = vrot.slane %v796_v45, 1  ;;  %v3949_v2 = vld [vmem:[%s5168_s29 + $0x10] sm:$0xff]   ;;  %v3953_v25 = vld [vmem:[%s5171_s30] sm:$0xff]   ;;  %s5177_s28 = sld [smem:[#allocation14_spill]] }
  0x37   : > { %3727 = vmatprep.subr.bf16.mxu1 %v3944_v33  ;;  %v1054_v49 = vsel %vm1042_vm1, %v1052_v27, %v1053_v41  ;;  %v1075_v53 = vpack.c.bf16 %v1048_v47, %v1045_v43  ;;  %v1062_v56 = vrot.slane %v4408_v46, 1  ;;  %v1057_v57 = vsel %vm1042_vm1, %v1055_v16, %v1056_v51  ;;  %v4492_v26 = vld [vmem:[%s5172_s2 + $0x8] sm:$0xff]  }
  0x38   : > { %3740 = vmatpush3.bf16.msra.mxu0 %v3945_v18  ;;  %v1076_v54 = vpack.c.bf16 %v1054_v49, %v1051_v48  ;;  %v1065_v58 = vrot.slane %v800_v52, 1  ;;  %v1273_v59 = vrot.slane %v786_v28, 2  ;;  %v1276_v60 = vrot.slane %v788_v34, 2  ;;  %v3950_v18 = vld [vmem:[%s5168_s29 + $0x28] sm:$0xff]   ;;  %v3957_v28 = vld [vmem:[%s5173_s24] sm:$0xff]  }
  0x39   : > { %3761 = vmatprep.subr.bf16.mxu0 %v3946_v42  ;;  %v1290_v61 = vrot.slane %v4353_v17, 2  ;;  %3741 = vmatprep.mubr.msk.bf16.mxu0 %vm839_vm0, %v1075_v53  ;;  %v1060_v62 = vsel %vm1042_vm1, %v1058_v19, %v1059_v55  ;;  %v1293_v0 = vrot.slane %v4370_v24, 2  ;;  %v1063_v3 = vsel %vm1042_vm1, %v1061_v36, %v1062_v56  ;;  %v3951_v24 = vld [vmem:[%s5168_s29 + $0x20] sm:$0xff]   ;;  %v3955_v27 = vld [vmem:[%s5173_s24 + $0x8] sm:$0xff]   ;;  %s5176_s29 = sld [smem:[#allocation18_spill]] }
  0x3a   : > { %3728 = vmatpush3.bf16.msra.mxu1 %v3944_v33  ;;  %v1077_v1 = vpack.c.bf16 %v1060_v62, %v1057_v57  ;;  %v1066_v7 = vsel %vm1042_vm1, %v1064_v37, %v1065_v58  ;;  %v1285_v8 = vrot.slane %v794_v44, 2  ;;  %v1288_v9 = vrot.slane %v796_v45, 2  ;;  %v4504_v29 = vld [vmem:[%s5174_s9 + $0x8] sm:$0xff]   ;;  %v3362_v55 = vld [vmem:[%s5175_s25] ss:$0 sm:$0xff]  ;;  %s3352_s25 = sshll.u32 %s765_s27, 6 }
  0x3b   : > { %3742 = vmatmul.mubr.msk.bf16.vlgmr.msra.gmra.mxu0 %vm839_vm0, %v1076_v54  ;;  %3749 = vmatprep.subr.bf16.mxu1 %v3947_v50  ;;  %v1274_v16 = vsel %vm1271_vm2, %v1272_v13, %v1273_v59  ;;  %v1277_v17 = vsel %vm1271_vm2, %v1275_v14, %v1276_v60  ;;  %v1291_v19 = vrot.slane %v4408_v46, 2  ;;  %v1283_v13 = vsel %vm1271_vm2, %v1281_v31, %v1282_v35  ;;  %s5029_s8 = scalar_lea.vmem [#allocation2], %s3352_s25  ;;  %s4125_s25 = smov [#allocation2]  }
  0x3c   : > { %3762 = vmatpush3.bf16.msra.mxu0 %v3946_v42  ;;  %3745 = vmatprep.mubr.msk.bf16.mxu0 %vm839_vm0, %v1077_v1  ;;  %v1304_v4 = vpack.c.bf16 %v1277_v17, %v1274_v16  ;;  %v1286_v14 = vsel %vm1271_vm2, %v1284_v20, %v1285_v8  ;;  %v1289_v11 = vsel %vm1271_vm2, %v1287_v21, %v1288_v9  ;;  %v1294_v12 = vrot.slane %v800_v52, 2  ;;  %v3952_v21 = vld [vmem:[%s5170_s5 + $0x8] sm:$0xff]   ;;  %s4557_s5 = scalar_lea.vmem %s5177_s28, %s3541_s1  ;;  %s783_s1 = scalar_lea.vmem %s5124_s19, %s4309_s7 }
  0x3d   : > { %3730 = vmatmul.mubr.msk.bf16.vlgmr.msra.gmra.mxu1 %vm839_vm0, %v4367_v23  ;;  %v1078_v23 = vpack.c.bf16 %v1066_v7, %v1063_v3  ;;  %3763 = vmatprep.subr.bf16.mxu0 %v3948_v63  ;;  %v1306_v22 = vpack.c.bf16 %v1289_v11, %v1286_v14  ;;  %v1292_v6 = vsel %vm1271_vm2, %v1290_v61, %v1291_v19  ;;  %s780_s28 = scalar_lea.vmem %s5123_s18, %s4309_s7 }
  0x3e   : > { %3750 = vmatpush3.bf16.msra.mxu1 %v3947_v50  ;;  %3733 = vmatprep.mubr.msk.bf16.mxu1 %vm839_vm0, %v4349_v15  ;;  %v1305_v15 = vpack.c.bf16 %v1283_v13, %v1280_v5  ;;  %v1295_v20 = vsel %vm1271_vm2, %v1293_v0, %v1294_v12 }
  0x3f   : > { %3751 = vmatprep.subr.bf16.mxu1 %v3949_v2  ;;  %v1307_v10 = vpack.c.bf16 %v1295_v20, %v1292_v6 }
  0x40   : > { %3764 = vmatpush3.bf16.msra.mxu0 %v3948_v63 }
  0x41   : > { %3785 = vmatprep.subr.bf16.mxu0 %v3955_v27 }
  0x42   : > { %3752 = vmatpush3.bf16.msra.mxu1 %v3949_v2 }
  0x43   : > { %3746 = vmatmul.mubr.msk.bf16.gmra.mxu0 %vm839_vm0, %v1078_v23  ;;  %3773 = vmatprep.subr.bf16.mxu1 %v3950_v18 }
  0x44   : > { %3765 = vmatprep.mubr.msk.bf16.mxu0 %vm839_vm0, %v1304_v4 }
  0x45   : > { %3734 = vmatmul.mubr.msk.bf16.gmra.mxu1 %vm839_vm0, %v4387_v32 }
  0x46   : > { %3753 = vmatprep.mubr.msk.bf16.mxu1 %vm839_vm0, %v1075_v53 }
  0x4b   : > { %3766 = vmatmul.mubr.msk.bf16.vlgmr.msra.gmra.mxu0 %vm839_vm0, %v1305_v15 }
  0x4c   : > { %3769 = vmatprep.mubr.msk.bf16.mxu0 %vm839_vm0, %v1306_v22  ;;  %3786 = vmatpush3.bf16.msra.mxu0 %v3955_v27 }
  0x4d   : > { %3754 = vmatmul.mubr.msk.bf16.vlgmr.msra.gmra.mxu1 %vm839_vm0, %v1076_v54  ;;  %3787 = vmatprep.subr.bf16.mxu0 %v3957_v28 }
  0x4e   : > { %3774 = vmatpush3.bf16.msra.mxu1 %v3950_v18  ;;  %3757 = vmatprep.mubr.msk.bf16.mxu1 %vm839_vm0, %v1077_v1 }
  0x4f   : > { %3775 = vmatprep.subr.bf16.mxu1 %v3951_v24 }
  0x50   : > { %3788 = vmatpush3.bf16.msra.mxu0 %v3957_v28 }
  0x51   : > { %3809 = vmatprep.subr.bf16.mxu0 %v4504_v29 }
  0x52   : > { %3776 = vmatpush3.bf16.msra.mxu1 %v3951_v24 }
  0x53   : > { %3770 = vmatmul.mubr.msk.bf16.gmra.mxu0 %vm839_vm0, %v1307_v10  ;;  %3797 = vmatprep.subr.bf16.mxu1 %v3952_v21 }
  0x55   : > { %3758 = vmatmul.mubr.msk.bf16.gmra.mxu1 %vm839_vm0, %v1078_v23 }
  0x56   : > { %3777 = vmatprep.mubr.msk.bf16.mxu1 %vm839_vm0, %v1304_v4 }
  0x5d   : > { %3778 = vmatmul.mubr.msk.bf16.vlgmr.msra.gmra.mxu1 %vm839_vm0, %v1305_v15  ;;  %v3956_v15 = vld [vmem:[%s5172_s2] sm:$0xff]   ;;  %s3256_s2 = sshll.u32 %s5029_s8, 4  ;;  %s5059_s2 = int_to_ptr.vmem [resolvable:$true] %s3256_s2 }
  0x5e   : > { %3781 = vmatprep.mubr.msk.bf16.mxu1 %vm839_vm0, %v1306_v22  ;;  %3798 = vmatpush3.bf16.msra.mxu1 %v3952_v21 }
  0x5f   : > { %3799 = vmatprep.subr.bf16.mxu1 %v3953_v25 }
  0x62   : > { %3800 = vmatpush3.bf16.msra.mxu1 %v3953_v25 }
  0x63   : > { %3821 = vmatprep.subr.bf16.mxu1 %v4492_v26 }
  0x65   : > { %3782 = vmatmul.mubr.msk.bf16.gmra.mxu1 %vm839_vm0, %v1307_v10 }
  0xf3   : > { %v3719_v30 = vpop.f32.mrf.mxu0 }
  0xf4   : > { %v925_v61 = vadd.f32 %v3719_v30, %v3362_v55 }
  0xf5   : > { %v3723_v31 = vpop.f32.mrf.mxu1  ;;  %v886_v32 = vpop.f32.mrf.mxu0 }
  0xf6   : > { %v923_v59 = vadd.f32 %v3362_v55, %v886_v32  ;;  %v929_v24 = vadd.f32 %v3723_v31, %v3362_v55 }
  0xf7   : > { %v902_v33 = vpop.f32.mrf.mxu1  ;;  %v3720_v34 = vpop.f32.mrf.mxu0 }
  0xf8   : > { %v926_v56 = vadd.f32 %v3720_v34, %v3362_v55  ;;  %v927_v22 = vadd.f32 %v3362_v55, %v902_v33  ;;  %v3958_v33 = vld [vmem:[%s5118_s13 + $0x8] sm:$0xff]  }
  0xf9   : > { %v3724_v35 = vpop.f32.mrf.mxu1  ;;  %v889_v36 = vpop.f32.mrf.mxu0 }
  0xfa   : > { %v924_v60 = vadd.f32 %v3362_v55, %v889_v36  ;;  %v930_v5 = vadd.f32 %v3724_v35, %v3362_v55 }
  0xfb   : > { %v905_v37 = vpop.f32.mrf.mxu1  ;;  %v3743_v38 = vpop.f32.mrf.mxu0 }
  0xfc   : > { %v1175_v3 = vadd.f32 %v3743_v38, %v925_v61  ;;  %v928_v12 = vadd.f32 %v3362_v55, %v905_v37  ;;  %v3369_v38 = vld [vmem:[%s5176_s29] ss:$0 sm:$0xff] }
  0xfd   : > { %v4507_v39 = vpop.f32.mrf.mxu1  ;;  %v1142_v40 = vpop.f32.mrf.mxu0 }
  0xfe   : > { %v1173_v1 = vadd.f32 %v1142_v40, %v923_v59 }
  0xff   : > { %v4509_v41 = vpop.f32.mrf.mxu1  ;;  %v3744_v42 = vpop.f32.mrf.mxu0 }
 0x100   : > { %v1176_v62 = vadd.f32 %v3744_v42, %v926_v56 }
 0x101   : > { %v4511_v43 = vpop.f32.mrf.mxu1  ;;  %v1145_v44 = vpop.f32.mrf.mxu0 }
 0x102   : > { %v1174_v2 = vadd.f32 %v1145_v44, %v924_v60  ;;  %v1021_v42 = vadd.f32 %v4511_v43, %v3369_v38 }
 0x103   : > { %v4513_v45 = vpop.f32.mrf.mxu1  ;;  %v3747_v46 = vpop.f32.mrf.mxu0 }
 0x104   : > { %v1179_v27 = vadd.f32 %v3747_v46, %v929_v24  ;;  %v1018_v46 = vadd.f32 %v3369_v38, %v4509_v41  ;;  %v811_v24 = vld [vmem:[%s4557_s5 + $0x50] sm:$0xff] }
 0x105   : > { %v4515_v47 = vpop.f32.mrf.mxu1  ;;  %v1158_v48 = vpop.f32.mrf.mxu0 }
 0x106   : > { %v1177_v21 = vadd.f32 %v1158_v48, %v927_v22  ;;  %v1019_v48 = vadd.f32 %v3369_v38, %v4513_v45  ;;  %v3960_v45 = vld [vmem:[%s5118_s13] sm:$0xff]   ;;  %v807_v22 = vld [vmem:[%s4557_s5 + $0x30] sm:$0xff] }
 0x107   : > { %v4517_v49 = vpop.f32.mrf.mxu1  ;;  %v3748_v50 = vpop.f32.mrf.mxu0 }
 0x108   : > { %v1180_v6 = vadd.f32 %v3748_v50, %v930_v5  ;;  %v1020_v50 = vadd.f32 %v4507_v39, %v3369_v38 }
 0x109   : > { %v4519_v51 = vpop.f32.mrf.mxu1  ;;  %v1161_v52 = vpop.f32.mrf.mxu0 }
 0x10a   : > { %v1178_v25 = vadd.f32 %v1161_v52, %v928_v12  ;;  %v1025_v39 = vadd.f32 %v4519_v51, %v3369_v38  ;;  %v809_v12 = vld [vmem:[%s4557_s5 + $0x40] sm:$0xff] }
 0x10b   : > { %v4521_v53 = vpop.f32.mrf.mxu1  ;;  %v3767_v54 = vpop.f32.mrf.mxu0 }
 0x10c   : > { %v1404_v18 = vadd.f32 %v3767_v54, %v1175_v3  ;;  %v1023_v3 = vadd.f32 %v3369_v38, %v4521_v53 }
 0x10d   : > { %v4526_v57 = vpop.f32.mrf.mxu1  ;;  %v1371_v58 = vpop.f32.mrf.mxu0 }
 0x10e   : > { %v1402_v16 = vadd.f32 %v1371_v58, %v1173_v1  ;;  %v1265_v58 = vadd.f32 %v4526_v57, %v1020_v50  ;;  %v3961_v1 = vld [vmem:[%s5174_s9] sm:$0xff]  }
 0x10f   : > { %v1232_v63 = vpop.f32.mrf.mxu1  ;;  %v3768_v0 = vpop.f32.mrf.mxu0 }
 0x110   : > { %v1405_v8 = vadd.f32 %v3768_v0, %v1176_v62  ;;  %v1263_v55 = vadd.f32 %v1232_v63, %v1018_v46  ;;  %v3966_v46 = vld [vmem:[%s5117_s12 + $0x18] sm:$0xff]  }
 0x111   : > { %v3756_v7 = vpop.f32.mrf.mxu1  ;;  %v1374_v9 = vpop.f32.mrf.mxu0 }
 0x112   : > { %v1403_v17 = vadd.f32 %v1374_v9, %v1174_v2  ;;  %v1503_v13 = vpack.c.bf16 %v1405_v8, %v1404_v18  ;;  %v1266_v52 = vadd.f32 %v3756_v7, %v1021_v42  ;;  %v1022_v2 = vadd.f32 %v3369_v38, %v4517_v49  ;;  %v801_v9 = vld [vmem:[%s4557_s5] sm:$0xff]  ;;  %v3962_v49 = vld [vmem:[%s5118_s13 + $0x18] sm:$0xff]  }
 0x113   : > { %v1235_v19 = vpop.f32.mrf.mxu1  ;;  %v3771_v23 = vpop.f32.mrf.mxu0  ;;  %v1024_v7 = vadd.f32 %v4515_v47, %v3369_v38  ;;  %v808_v38 = vld [vmem:[%s4557_s5 + $0x38] sm:$0x1] }
 0x114   : > { %v1502_v4 = vpack.c.bf16 %v1403_v17, %v1402_v16  ;;  %v1408_v35 = vadd.f32 %v3771_v23, %v1179_v27  ;;  %v1264_v56 = vadd.f32 %v1235_v19, %v1019_v48  ;;  %v803_v16 = vld [vmem:[%s4557_s5 + $0x10] sm:$0xff]  ;;  %v3963_v23 = vld [vmem:[%s5117_s12 + $0x8] sm:$0xff]   ;;  %v2121_v48 = vrot.slane %v807_v22, 1 }
 0x115   : > { %v4528_v14 = vpop.f32.mrf.mxu1  ;;  %v1387_v11 = vpop.f32.mrf.mxu0  ;;  %v2115_v27 = vrot.slane %v803_v16, 1 }
 0x116   : > { %3801 = vmatprep.mubr.msk.bf16.mxu1 %vm839_vm0, %v1502_v4  ;;  %v1406_v34 = vadd.f32 %v1387_v11, %v1177_v21  ;;  %v1269_v53 = vadd.f32 %v4528_v14, %v1024_v7  ;;  %v1892_v21 = vpack.c.bf16 %v811_v24, %v809_v12 }
 0x117   : > { %v1248_v20 = vpop.f32.mrf.mxu1  ;;  %v3772_v10 = vpop.f32.mrf.mxu0  ;;  %3802 = vmatmul.mubr.msk.bf16.vlgmr.msra.gmra.mxu1 %vm839_vm0, %v1503_v13 }
 0x118   : > { %3822 = vmatpush3.bf16.msra.mxu1 %v4492_v26  ;;  %v1409_v30 = vadd.f32 %v3772_v10, %v1180_v6  ;;  %v1267_v17 = vadd.f32 %v1248_v20, %v1022_v2  ;;  %v802_v6 = vld [vmem:[%s4557_s5 + $0x8] sm:$0x1]  ;;  %v804_v20 = vld [vmem:[%s4557_s5 + $0x18] sm:$0x1] }
 0x119   : > { %v3760_v28 = vpop.f32.mrf.mxu1  ;;  %v1390_v32 = vpop.f32.mrf.mxu0  ;;  %3823 = vmatprep.subr.bf16.mxu1 %v3956_v15 }
 0x11a   : > { %v1407_v31 = vadd.f32 %v1390_v32, %v1178_v25  ;;  %v1505_v26 = vpack.c.bf16 %v1409_v30, %v1408_v35  ;;  %v1270_v8 = vadd.f32 %v3760_v28, %v1025_v39  ;;  %v2112_v25 = vrot.slane %v801_v9, 1  ;;  %v3964_v28 = vld [vmem:[%s5118_s13 + $0x10] sm:$0xff]  }
 0x11b   : > { %v1251_v36 = vpop.f32.mrf.mxu1  ;;  %v2113_v30 = vrot.slane %v802_v6, 1  ;;  %v2116_v32 = vrot.slane %v804_v20, 1 }
 0x11c   : > { %v1504_v37 = vpack.c.bf16 %v1407_v31, %v1406_v34  ;;  %3824 = vmatpush3.bf16.msra.mxu1 %v3956_v15  ;;  %v1268_v18 = vadd.f32 %v1251_v36, %v1023_v3  ;;  %v805_v15 = vld [vmem:[%s4557_s5 + $0x20] sm:$0xff]  ;;  %v815_v31 = vld [vmem:[%s4557_s5 + $0x70] sm:$0xff] }
 0x11d   : > { %v3779_v40 = vpop.f32.mrf.mxu1  ;;  %3845 = vmatprep.subr.bf16.mxu1 %v3958_v33  ;;  %v1891_v10 = vpack.c.bf16 %v807_v22, %v805_v15  ;;  %v813_v34 = vld [vmem:[%s4557_s5 + $0x60] sm:$0xff]  ;;  %v4606_v35 = vsel %vm1042_vm1, %v2112_v25, %v2113_v30  ;;  %v4609_v36 = vsel %vm1042_vm1, %v2115_v27, %v2116_v32  ;;  %v2118_v42 = vrot.slane %v805_v15, 1  ;;  %v3967_v3 = vld [vmem:[%s5117_s12 + $0x10] sm:$0xff]  }
 0x11e   : > { %3805 = vmatprep.mubr.msk.bf16.mxu1 %vm839_vm0, %v1504_v37  ;;  %v1494_v62 = vadd.f32 %v3779_v40, %v1265_v58  ;;  %v812_v40 = vld [vmem:[%s4557_s5 + $0x58] sm:$0x1]  ;;  %v2144_v50 = vpack.c.bf16 %v4609_v36, %v4606_v35 }
 0x11f   : > { %v1461_v44 = vpop.f32.mrf.mxu1  ;;  %3806 = vmatmul.mubr.msk.bf16.gmra.mxu1 %vm839_vm0, %v1505_v26 }
 0x120   : > { %3825 = vmatprep.mubr.msk.bf16.mxu1 %vm839_vm0, %v1502_v4  ;;  %v1492_v43 = vadd.f32 %v1461_v44, %v1263_v55  ;;  %v1893_v44 = vpack.c.bf16 %v815_v31, %v813_v34  ;;  %v2124_v55 = vrot.slane %v809_v12, 1 }
 0x121   : > { %v3780_v54 = vpop.f32.mrf.mxu1 }
 0x122   : > { %v1495_v59 = vadd.f32 %v3780_v54, %v1266_v52  ;;  %v2122_v54 = vrot.slane %v808_v38, 1 }
 0x123   : > { %v1464_v60 = vpop.f32.mrf.mxu1 }
 0x124   : > { %v1493_v61 = vadd.f32 %v1464_v60, %v1264_v56  ;;  %v1507_v57 = vpack.c.bf16 %v1495_v59, %v1494_v62  ;;  %v2127_v56 = vrot.slane %v811_v24, 1  ;;  %v2128_v59 = vrot.slane %v812_v40, 1 }
 0x125   : > { %v3783_v0 = vpop.f32.mrf.mxu1 }
 0x126   : > { %v1506_v41 = vpack.c.bf16 %v1493_v61, %v1492_v43  ;;  %v4627_v43 = vsel %vm1042_vm1, %v2121_v48, %v2122_v54  ;;  %v4634_v62 = vsel %vm1042_vm1, %v2127_v56, %v2128_v59 }
 0x127   : > { %v1477_v63 = vpop.f32.mrf.mxu1  ;;  %3826 = vmatmul.mubr.msk.bf16.vlgmr.msra.gmra.mxu1 %vm839_vm0, %v1503_v13  ;;  %v1498_v13 = vadd.f32 %v3783_v0, %v1269_v53  ;;  %v814_v0 = vld [vmem:[%s4557_s5 + $0x68] sm:$0x1] }
 0x128   : > { %3789 = vmatprep.mubr.msk.bf16.mxu0 %vm839_vm0, %v1506_v41  ;;  %3829 = vmatprep.mubr.msk.bf16.mxu1 %vm839_vm0, %v1504_v37  ;;  %v1496_v4 = vadd.f32 %v1477_v63, %v1267_v17  ;;  %v806_v37 = vld [vmem:[%s4557_s5 + $0x28] sm:$0x1]  ;;  %v3970_v17 = vld [vmem:[%s5125_s20 + $0x20] ss:$16 sps:$4 sm:$0xff]  }
 0x129   : > { %v3784_v51 = vpop.f32.mrf.mxu1  ;;  %3790 = vmatmul.mubr.msk.bf16.vlgmr.msra.gmra.mxu0 %vm839_vm0, %v1507_v57  ;;  %3846 = vmatpush3.bf16.msra.mxu1 %v3958_v33  ;;  %v3965_v33 = vld [vmem:[%s5117_s12] sm:$0xff]   ;;  %v2119_v52 = vrot.slane %v806_v37, 1 }
 0x12a   : > { %3810 = vmatpush3.bf16.msra.mxu0 %v4504_v29  ;;  %3847 = vmatprep.subr.bf16.mxu1 %v3960_v45  ;;  %v1499_v19 = vadd.f32 %v3784_v51, %v1270_v8  ;;  %v4580_v29 = vpack.c.bf16 %v803_v16, %v801_v9  ;;  %v3968_v9 = vld [vmem:[%s5121_s16 + $0x8] sm:$0xff]   ;;  %v3969_v16 = vld [vmem:[%s5121_s16] sm:$0xff]  }
 0x12b   : > { %v1480_v47 = vpop.f32.mrf.mxu1  ;;  %3811 = vmatprep.subr.bf16.mxu0 %v3961_v1  ;;  %v4624_v60 = vsel %vm1042_vm1, %v2118_v42, %v2119_v52  ;;  %v3449_v52 = vld [vmem:[%s5120_s15] ss:$0 sm:$0xff] }
 0x12c   : > { %v1497_v5 = vadd.f32 %v1480_v47, %v1268_v18  ;;  %v1509_v11 = vpack.c.bf16 %v1499_v19, %v1498_v13  ;;  %v2145_v39 = vpack.c.bf16 %v4627_v43, %v4624_v60  ;;  %v3972_v18 = vld [vmem:[%s5125_s20 + $0x24] ss:$16 sps:$4 sm:$0xff]  }
 0x12d   : > { %3848 = vmatpush3.bf16.msra.mxu1 %v3960_v45  ;;  %v2130_v45 = vrot.slane %v813_v34, 1 }
 0x12e   : > { %v1508_v14 = vpack.c.bf16 %v1497_v5, %v1496_v4  ;;  %3812 = vmatpush3.bf16.msra.mxu0 %v3961_v1  ;;  %3869 = vmatprep.subr.bf16.mxu1 %v3962_v49  ;;  %v2131_v1 = vrot.slane %v814_v0, 1 }
 0x12f   : > { %3830 = vmatmul.mubr.msk.bf16.gmra.mxu1 %vm839_vm0, %v1505_v26  ;;  %3833 = vmatprep.subr.bf16.mxu0 %v3963_v23  ;;  %v810_v26 = vld [vmem:[%s4557_s5 + $0x48] sm:$0x1] }
 0x130   : > { %3793 = vmatprep.mubr.msk.bf16.mxu0 %vm839_vm0, %v1508_v14  ;;  %3849 = vmatprep.mubr.msk.bf16.mxu1 %vm839_vm0, %v4580_v29  ;;  %v2125_v58 = vrot.slane %v810_v26, 1  ;;  %v4650_v7 = vsel %vm1042_vm1, %v2130_v45, %v2131_v1 }
 0x131   : > { %3794 = vmatmul.mubr.msk.bf16.gmra.mxu0 %vm839_vm0, %v1509_v11  ;;  %5178 = vst [vmem:[#allocation11_spill] sm:$0xff] %v4650_v7 }
 0x132   : > { %3813 = vmatprep.mubr.msk.bf16.mxu0 %vm839_vm0, %v1506_v41  ;;  %v4631_v61 = vsel %vm1042_vm1, %v2124_v55, %v2125_v58  ;;  %v816_v41 = vld [vmem:[%s4557_s5 + $0x78] sm:$0x1]  ;;  %v4720_v58 = vld [vmem:[%s5116_s11] ss:$0 sm:$0xff]  ;;  %s4066_s5 = sshll.u32 %s4125_s25, 4  ;;  %s4067_s5 = int_to_ptr.vmem [resolvable:$false] %s4066_s5 }
 0x133   : > { %v2146_v63 = vpack.c.bf16 %v4634_v62, %v4631_v61  ;;  %v2134_v2 = vrot.slane %v816_v41, 1  ;;  %p4069_p0 = scmp.lt.s32.totalorder %s5059_s2, %s4067_s5 }
 0x137   : > { %3850 = vmatmul.mubr.msk.bf16.vlgmr.msra.gmra.mxu1 %vm839_vm0, %v1891_v10 }
 0x138   : > { %3870 = vmatpush3.bf16.msra.mxu1 %v3962_v49  ;;  %3853 = vmatprep.mubr.msk.bf16.mxu1 %vm839_vm0, %v1892_v21  ;;  %v3975_v49 = vld [vmem:[%s5125_s20 + $0x2c] ss:$16 sps:$4 sm:$0xff]  }
 0x139   : > { %3814 = vmatmul.mubr.msk.bf16.vlgmr.msra.gmra.mxu0 %vm839_vm0, %v1507_v57  ;;  %3871 = vmatprep.subr.bf16.mxu1 %v3964_v28  ;;  %v2133_v57 = vrot.slane %v815_v31, 1 }
 0x13a   : > { %3817 = vmatprep.mubr.msk.bf16.mxu0 %vm839_vm0, %v1508_v14  ;;  %3834 = vmatpush3.bf16.msra.mxu0 %v3963_v23 }
 0x13b   : > { %3835 = vmatprep.subr.bf16.mxu0 %v3965_v33  ;;  %v4653_v8 = vsel %vm1042_vm1, %v2133_v57, %v2134_v2 }
 0x13c   : > { %3872 = vmatpush3.bf16.msra.mxu1 %v3964_v28  ;;  %5179 = vst [vmem:[#allocation12_spill] sm:$0xff] %v4653_v8  ;;  %v2147_v51 = vpack.c.bf16 %v4653_v8, %v4650_v7 }
 0x13d   : > { %2658 = vmatprep.subr.bf16.mxu1 %v3972_v18 }
 0x13e   : > { %3836 = vmatpush3.bf16.msra.mxu0 %v3965_v33 }
 0x13f   : > { %3854 = vmatmul.mubr.msk.bf16.gmra.mxu1 %vm839_vm0, %v1893_v44  ;;  %3857 = vmatprep.subr.bf16.mxu0 %v3966_v46 }
 0x140   : > { %3873 = vmatprep.mubr.msk.bf16.mxu1 %vm839_vm0, %v2144_v50 }
 0x141   : > { %3818 = vmatmul.mubr.msk.bf16.gmra.mxu0 %vm839_vm0, %v1509_v11 }
 0x142   : > { %3837 = vmatprep.mubr.msk.bf16.mxu0 %vm839_vm0, %v4580_v29 }
 0x147   : > { %3874 = vmatmul.mubr.msk.bf16.vlgmr.msra.gmra.mxu1 %vm839_vm0, %v2145_v39 }
 0x148   : > { %3877 = vmatprep.mubr.msk.bf16.mxu1 %vm839_vm0, %v2146_v63  ;;  %2659 = vmatpush1.bf16.msra.mxu1 %v3970_v17 }
 0x149   : > { %3838 = vmatmul.mubr.msk.bf16.vlgmr.msra.gmra.mxu0 %vm839_vm0, %v1891_v10 }
 0x14a   : > { %3858 = vmatpush3.bf16.msra.mxu0 %v3966_v46  ;;  %3841 = vmatprep.mubr.msk.bf16.mxu0 %vm839_vm0, %v1892_v21 }
 0x14b   : > { %3859 = vmatprep.subr.bf16.mxu0 %v3967_v3 }
 0x14e   : > { %3860 = vmatpush3.bf16.msra.mxu0 %v3967_v3 }
 0x14f   : > { %3878 = vmatmul.mubr.msk.bf16.gmra.mxu1 %vm839_vm0, %v2147_v51  ;;  %3881 = vmatprep.subr.bf16.mxu0 %v3968_v9 }
 0x151   : > { %3842 = vmatmul.mubr.msk.bf16.gmra.mxu0 %vm839_vm0, %v1893_v44 }
 0x152   : > { %3861 = vmatprep.mubr.msk.bf16.mxu0 %vm839_vm0, %v2144_v50 }
 0x159   : > { %3862 = vmatmul.mubr.msk.bf16.vlgmr.msra.gmra.mxu0 %vm839_vm0, %v2145_v39 }
 0x15a   : > { %3865 = vmatprep.mubr.msk.bf16.mxu0 %vm839_vm0, %v2146_v63  ;;  %3882 = vmatpush3.bf16.msra.mxu0 %v3968_v9  ;;  %v4729_v9 = vld [vmem:[%s783_s1] ss:$0 sm:$0xff]  ;;  %s4062_s1 = scalar_lea.vmem %s5059_s2, 1024 }
 0x15b   : > { %3883 = vmatprep.subr.bf16.mxu0 %v3969_v16  ;;  %p4063_p11 = scmp.ne.s32.totalorder %s5059_s2, %s4062_s1 }
 0x15d   : > { %p4064_p12 = pnand %p4063_p11, %p4291_p5 }
 0x15e   : > { %3884 = vmatpush3.bf16.msra.mxu0 %v3969_v16 }
 0x15f   : > { %2731 = vmatprep.subr.bf16.mxu0 %v3975_v49  ;;  %p4065_p13 = pneg %p4064_p12 }
 0x161   : > { %3866 = vmatmul.mubr.msk.bf16.gmra.mxu0 %vm839_vm0, %v2147_v51 }
 0x1d7   : > { %v4680_v53 = vpop.f32.mrf.mxu1 }
 0x1d9   : > { %v4682_v19 = vpop.f32.mrf.mxu1 }
 0x1db   : > { %v4684_v47 = vpop.f32.mrf.mxu1 }
 0x1dd   : > { %v4686_v23 = vpop.f32.mrf.mxu1 }
 0x1df   : > { %v4688_v4 = vpop.f32.mrf.mxu1 }
 0x1e1   : > { %v4690_v5 = vpop.f32.mrf.mxu1 }
 0x1e3   : > { %v4692_v29 = vpop.f32.mrf.mxu1 }
 0x1e5   : > { %v4694_v13 = vpop.f32.mrf.mxu1 }
 0x1e7   : > { %v3827_v14 = vpop.f32.mrf.mxu1 }
 0x1e9   : > { %v4696_v11 = vpop.f32.mrf.mxu0  ;;  %v1842_v15 = vpop.f32.mrf.mxu1 }
 0x1eb   : > { %v4698_v22 = vpop.f32.mrf.mxu0  ;;  %v3828_v12 = vpop.f32.mrf.mxu1 }
 0x1ed   : > { %v4700_v24 = vpop.f32.mrf.mxu0  ;;  %v1845_v6 = vpop.f32.mrf.mxu1 }
 0x1ef   : > { %v4702_v20 = vpop.f32.mrf.mxu0  ;;  %v3831_v10 = vpop.f32.mrf.mxu1 }
 0x1f1   : > { %v4704_v21 = vpop.f32.mrf.mxu0  ;;  %v1858_v25 = vpop.f32.mrf.mxu1 }
 0x1f3   : > { %v4706_v27 = vpop.f32.mrf.mxu0  ;;  %v3832_v28 = vpop.f32.mrf.mxu1 }
 0x1f5   : > { %v4708_v30 = vpop.f32.mrf.mxu0  ;;  %v4710_v32 = vpop.f32.mrf.mxu1 }
 0x1f7   : > { %v4712_v33 = vpop.f32.mrf.mxu0  ;;  %v3851_v34 = vpop.f32.mrf.mxu1 }
 0x1f8   : > { %v2090_v41 = vadd.f32 %v3851_v34, %v3449_v52 }
 0x1f9   : > { %v3815_v31 = vpop.f32.mrf.mxu0  ;;  %v2051_v37 = vpop.f32.mrf.mxu1 }
 0x1fa   : > { %v1851_v56 = vadd.f32 %v3827_v14, %v3815_v31  ;;  %v2088_v1 = vadd.f32 %v3449_v52, %v2051_v37 }
 0x1fb   : > { %v1765_v38 = vpop.f32.mrf.mxu0  ;;  %v3852_v26 = vpop.f32.mrf.mxu1 }
 0x1fc   : > { %v1843_v45 = vadd.f32 %v1842_v15, %v1765_v38  ;;  %v1882_v63 = vadd.f32 %v4720_v58, %v1851_v56  ;;  %v2091_v18 = vadd.f32 %v3852_v26, %v3449_v52 }
 0x1fd   : > { %v3816_v40 = vpop.f32.mrf.mxu0  ;;  %v2054_v42 = vpop.f32.mrf.mxu1 }
 0x1fe   : > { %v1854_v2 = vadd.f32 %v3828_v12, %v3816_v40  ;;  %v1880_v17 = vadd.f32 %v4720_v58, %v1843_v45 }
 0x1ff   : > { %v1768_v44 = vpop.f32.mrf.mxu0  ;;  %v3855_v46 = vpop.f32.mrf.mxu1 }
 0x200   : > { %v1846_v15 = vadd.f32 %v1845_v6, %v1768_v44  ;;  %v1883_v56 = vadd.f32 %v4720_v58, %v1854_v2  ;;  %v2094_v45 = vadd.f32 %v3855_v46, %v3449_v52 }
 0x201   : > { %v3819_v48 = vpop.f32.mrf.mxu0  ;;  %v2067_v50 = vpop.f32.mrf.mxu1 }
 0x202   : > { %v1867_v34 = vadd.f32 %v3831_v10, %v3819_v48  ;;  %v1881_v10 = vadd.f32 %v4720_v58, %v1846_v15  ;;  %v2092_v48 = vadd.f32 %v3449_v52, %v2067_v50 }
 0x203   : > { %v1781_v54 = vpop.f32.mrf.mxu0  ;;  %v3856_v55 = vpop.f32.mrf.mxu1 }
 0x204   : > { %v1886_v44 = vadd.f32 %v4720_v58, %v1867_v34 }
 0x205   : > { %v3820_v59 = vpop.f32.mrf.mxu0  ;;  %v2070_v0 = vpop.f32.mrf.mxu1 }
 0x207   : > { %v1784_v39 = vpop.f32.mrf.mxu0  ;;  %v3875_v57 = vpop.f32.mrf.mxu1 }
 0x208   : > { %v2334_v3 = vadd.f32 %v3875_v57, %v2090_v41  ;;  %v2089_v41 = vadd.f32 %v3449_v52, %v2054_v42  ;;  %v1859_v57 = vadd.f32 %v1858_v25, %v1781_v54  ;;  %v2095_v54 = vadd.f32 %v3856_v55, %v3449_v52 }
 0x209   : > { %v4727_v51 = vpop.f32.mrf.mxu0  ;;  %v2301_v16 = vpop.f32.mrf.mxu1  ;;  %v1862_v15 = vadd.f32 %v4710_v32, %v1784_v39 }
 0x20a   : > { %v2372_v49 = vadd.f32 %v2334_v3, %v1882_v63  ;;  %v2332_v14 = vadd.f32 %v2301_v16, %v2088_v1  ;;  %v1870_v16 = vadd.f32 %v3832_v28, %v3820_v59  ;;  %v1884_v46 = vadd.f32 %v4720_v58, %v1859_v57 }
 0x20b   : > { %v4732_v31 = vpop.f32.mrf.mxu0  ;;  %v3876_v38 = vpop.f32.mrf.mxu1  ;;  %v2093_v28 = vadd.f32 %v3449_v52, %v2070_v0 }
 0x20c   : > { %v2386_v12 = vadd.f32 %v4729_v9, %v2372_v49  ;;  %v2370_v37 = vadd.f32 %v2332_v14, %v1880_v17  ;;  %v2335_v40 = vadd.f32 %v3876_v38, %v2091_v18  ;;  %v1887_v32 = vadd.f32 %v4720_v58, %v1870_v16 }
 0x20d   : > { %v4736_v7 = vpop.f32.mrf.mxu0  ;;  %v2304_v8 = vpop.f32.mrf.mxu1  ;;  %v1677_v16 = vadd.f32 %v4684_v47, %v4700_v24 }
 0x20e   : > { %v3474_v26 = vmul.f32 -1.442695, %v2386_v12  ;;  %v2384_v63 = vadd.f32 %v4729_v9, %v2370_v37  ;;  %v2373_v6 = vadd.f32 %v2335_v40, %v1883_v56  ;;  %v2333_v2 = vadd.f32 %v2304_v8, %v2089_v41  ;;  %v4756_v12 = vld [vmem:[%s5180_s10] ss:$0 sm:$0xff] }
 0x20f   : > { %v4741_v1 = vpop.f32.mrf.mxu0  ;;  %v3879_v3 = vpop.f32.mrf.mxu1  ;;  %v1674_v8 = vadd.f32 %v4680_v53, %v4696_v11  ;;  %v4762_v53 = vld [vmem:[%s5119_s14] ss:$0 sm:$0xff]  ;;  %v1885_v41 = vadd.f32 %v4720_v58, %v1862_v15 }
 0x210   : > { %4014 = vpow2.f32 %v3474_v26  ;;  %v3472_v25 = vmul.f32 -1.442695, %v2384_v63  ;;  %v2387_v42 = vadd.f32 %v4729_v9, %v2373_v6  ;;  %v2371_v17 = vadd.f32 %v2333_v2, %v1881_v10 }
 0x211   : > { %v4745_v18 = vpop.f32.mrf.mxu0  ;;  %v2338_v49 = vadd.f32 %v3879_v3, %v2094_v45  ;;  %v2317_v14 = vpop.f32.mrf.mxu1  ;;  %v1705_v63 = vadd.f32 %v4756_v12, %v1674_v8  ;;  %v1666_v6 = vadd.f32 %v4682_v19, %v4698_v22  ;;  %v1669_v19 = vadd.f32 %v4686_v23, %v4702_v20 }
 0x212   : > { %4016 = vpow2.f32 %v3472_v25  ;;  %v3475_v50 = vmul.f32 -1.442695, %v2387_v42  ;;  %v2336_v34 = vadd.f32 %v2317_v14, %v2092_v48  ;;  %v2385_v59 = vadd.f32 %v4729_v9, %v2371_v17 }
 0x213   : > { %v2376_v38 = vadd.f32 %v2338_v49, %v1886_v44  ;;  %v4751_v56 = vpop.f32.mrf.mxu0  ;;  %v3880_v55 = vpop.f32.mrf.mxu1  ;;  %v1995_v48 = vadd.f32 %v4727_v51, %v4762_v53  ;;  %v1993_v22 = vadd.f32 %v4762_v53, %v4732_v31  ;;  %v1690_v17 = vadd.f32 %v4688_v4, %v4704_v21  ;;  %v4791_v49 = vld [vmem:[%s780_s28] ss:$0 sm:$0xff]  ;;  %s5183_s28 = sld [smem:[#allocation24_spill]] }
 0x214   : > { %4018 = vpow2.f32 %v3475_v50  ;;  %v2374_v39 = vadd.f32 %v2336_v34, %v1884_v46  ;;  %v2339_v37 = vadd.f32 %v3880_v55, %v2095_v54  ;;  %v3473_v11 = vmul.f32 -1.442695, %v2385_v59 }
 0x215   : > { %v2390_v52 = vadd.f32 %v4729_v9, %v2376_v38  ;;  %v4765_v0 = vpop.f32.mrf.mxu0  ;;  %v2320_v40 = vpop.f32.mrf.mxu1  ;;  %v1703_v54 = vadd.f32 %v4756_v12, %v1666_v6  ;;  %v1706_v14 = vadd.f32 %v4756_v12, %v1677_v16  ;;  %v1704_v15 = vadd.f32 %v4756_v12, %v1669_v19 }
 0x216   : > { %v2388_v57 = vadd.f32 %v4729_v9, %v2374_v39  ;;  %v2377_v45 = vadd.f32 %v2339_v37, %v1887_v32  ;;  %v2337_v26 = vadd.f32 %v2320_v40, %v2093_v28  ;;  %4020 = vpow2.f32 %v3473_v11 }
 0x217   : > { %v3478_v10 = vmul.f32 -1.442695, %v2390_v52  ;;  %v4772_v44 = vpop.f32.mrf.mxu0  ;;  %v1994_v50 = vadd.f32 %v4762_v53, %v4741_v1  ;;  %v1709_v59 = vadd.f32 %v4756_v12, %v1690_v17  ;;  %v1682_v38 = vadd.f32 %v4690_v5, %v4706_v27 }
 0x218   : > { %v3476_v2 = vmul.f32 -1.442695, %v2388_v57  ;;  %v2391_v3 = vadd.f32 %v4729_v9, %v2377_v45  ;;  %v2375_v58 = vadd.f32 %v2337_v26, %v1885_v41  ;;  %v1999_v55 = vadd.f32 %v4745_v18, %v4762_v53 }
 0x219   : > { %4022 = vpow2.f32 %v3478_v10  ;;  %v3863_v25 = vpop.f32.mrf.mxu0  ;;  %v1693_v52 = vadd.f32 %v4692_v29, %v4708_v30  ;;  %v1997_v40 = vadd.f32 %v4762_v53, %v4751_v56  ;;  %v1707_v45 = vadd.f32 %v4756_v12, %v1682_v38  ;;  %s5184_s7 = smov %s5183_s28  ;;  %s5057_s29 = scalar_lea.hbm %s5183_s28, %s3542_s4 }
 0x21a   : > { %4024 = vpow2.f32 %v3476_v2  ;;  %v3479_v51 = vmul.f32 -1.442695, %v2391_v3  ;;  %v2389_v42 = vadd.f32 %v4729_v9, %v2375_v58  ;;  %v2244_v46 = vadd.f32 %v3863_v25, %v1995_v48  ;;  %s4068_s4 = scalar_lea.vmem %s4067_s5, 2048 }
 0x21b   : > { %v2211_v47 = vpop.f32.mrf.mxu0  ;;  %v1996_v9 = vadd.f32 %v4736_v7, %v4762_v53  ;;  %v2000_v26 = vadd.f32 %v4765_v0, %v4762_v53  ;;  %v1710_v48 = vadd.f32 %v4756_v12, %v1693_v52  ;;  %v1685_v2 = vadd.f32 %v4694_v13, %v4712_v33  ;;  %p4070_p1 = scmp.lt.s32.totalorder %s4068_s4, %s4062_s1 }
 0x21c   : > { %4026 = vpow2.f32 %v3479_v51  ;;  %v3477_v23 = vmul.f32 -1.442695, %v2389_v42  ;;  %v2342_v24 = vadd.f32 %v2244_v46, %v1705_v63  ;;  %v2242_v20 = vadd.f32 %v2211_v47, %v1993_v22 }
 0x21d   : > { %v4015_v31 = vpop.eup %4014  ;;  %v3864_v34 = vpop.f32.mrf.mxu0  ;;  %v1998_v42 = vadd.f32 %v4762_v53, %v4772_v44  ;;  %v1708_v47 = vadd.f32 %v4756_v12, %v1685_v2  ;;  %v3983_v2 = vld [vmem:[%s5127_s22 + $0xf8] sm:$0xff]   ;;  %p4071_p2 = por %p4070_p1, %p4069_p0 }
 0x21e   : > { %v2418_v4 = vadd.f32 1.0, %v4015_v31  ;;  %4028 = vpow2.f32 %v3477_v23  ;;  %v2356_v21 = vadd.f32 %v4791_v49, %v2342_v24  ;;  %v2340_v8 = vadd.f32 %v2242_v20, %v1703_v54 }
 0x21f   : > { %v4017_v28 = vpop.eup %4016  ;;  %v2245_v32 = vadd.f32 %v3864_v34, %v1996_v9  ;;  %v2214_v7 = vpop.f32.mrf.mxu0  ;;  %p4072_p3 = pnand %p4071_p2, %p4065_p13 }
 0x220   : > { %4030 = vrcp.f32 %v2418_v4  ;;  %v2416_v39 = vadd.f32 1.0, %v4017_v28  ;;  %v2354_v1 = vadd.f32 %v4791_v49, %v2340_v8  ;;  %v2243_v37 = vadd.f32 %v2214_v7, %v1994_v50 }
 0x221   : > { %v4019_v11 = vpop.eup %4018  ;;  %4032 = vtanh.f32 %v2356_v21  ;;  %v2343_v41 = vadd.f32 %v2245_v32, %v1706_v14  ;;  %v3867_v5 = vpop.f32.mrf.mxu0 }
 0x222   : > { %4034 = vrcp.f32 %v2416_v39  ;;  %v2419_v27 = vadd.f32 1.0, %v4019_v11  ;;  %v2341_v18 = vadd.f32 %v2243_v37, %v1704_v15  ;;  %v2248_v57 = vadd.f32 %v3867_v5, %v1999_v55 }
 0x223   : > { %4036 = vtanh.f32 %v2354_v1  ;;  %v2357_v63 = vadd.f32 %v4791_v49, %v2343_v41  ;;  %v2227_v6 = vpop.f32.mrf.mxu0  ;;  %v4021_v29 = vpop.eup %4020 }
 0x224   : > { %4038 = vrcp.f32 %v2419_v27  ;;  %v2355_v30 = vadd.f32 %v4791_v49, %v2341_v18  ;;  %v2346_v56 = vadd.f32 %v2248_v57, %v1709_v59  ;;  %v2246_v10 = vadd.f32 %v2227_v6, %v1997_v40  ;;  %v3976_v6 = vld [vmem:[%s5125_s20] ss:$16 sps:$4 sm:$0xff]  }
 0x225   : > { %v2417_v3 = vadd.f32 1.0, %v4021_v29  ;;  %4040 = vtanh.f32 %v2357_v63  ;;  %v3868_v58 = vpop.f32.mrf.mxu0  ;;  %v3978_v29 = vld [vmem:[%s5125_s20 + $0x4] ss:$16 sps:$4 sm:$0xff]  }
 0x226   : > { %v4023_v16 = vpop.eup %4022  ;;  %4042 = vtanh.f32 %v2355_v30  ;;  %v2360_v0 = vadd.f32 %v4791_v49, %v2346_v56  ;;  %v2344_v19 = vadd.f32 %v2246_v10, %v1707_v45  ;;  %v2249_v22 = vadd.f32 %v3868_v58, %v2000_v26  ;;  %v3981_v30 = vld [vmem:[%s5125_s20 + $0xc] ss:$16 sps:$4 sm:$0xff]   ;;  %v3979_v56 = vld [vmem:[%s5125_s20 + $0x8] ss:$16 sps:$4 sm:$0xff]   ;;  %2660 = vmatprep.subr.bf16.mxu1 %v3978_v29  ;;  %v4011_v29 = vld [vmem:[%s5127_s22 + $0xc0] sm:$0xff]  }
 0x227   : > { %v4025_v25 = vpop.eup %4024  ;;  %4044 = vrcp.f32 %v2417_v3  ;;  %v2422_v51 = vadd.f32 1.0, %v4023_v16  ;;  %v2230_v46 = vpop.f32.mrf.mxu0  ;;  %2661 = vmatpush1.bf16.msra.mxu1 %v3976_v6  ;;  %v4124_v10 = vmov 0   ;;  %v4855_v16 = vld [vmem:[%s5122_s17] ss:$0 sm:$0xff] }
 0x228   : > { %v2420_v54 = vadd.f32 1.0, %v4025_v25  ;;  %4046 = vtanh.f32 %v2360_v0  ;;  %v2358_v13 = vadd.f32 %v4791_v49, %v2344_v19  ;;  %v2347_v33 = vadd.f32 %v2249_v22, %v1710_v48  ;;  %2678 = vmatprep.mubr.bf16.mxu1 %v4124_v10  ;;  %v3982_v48 = vld [vmem:[%s5127_s22 + $0x78] sm:$0xff]   ;;  %v4010_v6 = vld [vmem:[%s5127_s22 + $0x40] sm:$0xff]  }
 0x229   : > { %v4027_v17 = vpop.eup %4026  ;;  %4048 = vrcp.f32 %v2422_v51  ;;  %v2247_v23 = vadd.f32 %v2230_v46, %v1998_v42  ;;  %3633 = vmatprep.subr.bf16.mxu1 %v3982_v48 }
 0x22a   : > { %4050 = vrcp.f32 %v2420_v54  ;;  %v2423_v24 = vadd.f32 1.0, %v4027_v17  ;;  %v2361_v20 = vadd.f32 %v4791_v49, %v2347_v33  ;;  %v3984_v17 = vld [vmem:[%s5127_s22 + $0x38] sm:$0xff]  }
 0x22b   : > { %v4029_v31 = vpop.eup %4028  ;;  %4052 = vtanh.f32 %v2358_v13  ;;  %v2345_v14 = vadd.f32 %v2247_v23, %v1708_v47  ;;  %v3985_v47 = vld [vmem:[%s5127_s22 + $0xb8] sm:$0xff]  }
 0x22c   : > { %4054 = vrcp.f32 %v2423_v24  ;;  %v2421_v53 = vadd.f32 1.0, %v4029_v31  ;;  %v3986_v24 = vld [vmem:[%s5127_s22 + $0x70] sm:$0xff]  }
 0x22d   : > { %v4031_v44 = vpop.eup %4030  ;;  %4056 = vtanh.f32 %v2361_v20  ;;  %v2359_v15 = vadd.f32 %v4791_v49, %v2345_v14  ;;  %v3973_v49 = vld [vmem:[%s5125_s20 + $0x28] ss:$16 sps:$4 sm:$0xff]   ;;  %v3988_v31 = vld [vmem:[%s5127_s22 + $0x30] sm:$0xff]  }
 0x22e   : > { %v4033_v9 = vpop.eup %4032  ;;  %4058 = vrcp.f32 %v2421_v53  ;;  %v3989_v14 = vld [vmem:[%s5127_s22 + $0xb0] sm:$0xff]  }
 0x22f   : > { %v4035_v50 = vpop.eup %4034  ;;  %4060 = vtanh.f32 %v2359_v15  ;;  %v2442_v8 = vmul.f32 %v4033_v9, %v4031_v44  ;;  %v3990_v44 = vld [vmem:[%s5127_s22 + $0x68] sm:$0xff]  }
 0x230   : > { %v4037_v12 = vpop.eup %4036 }
 0x231   : > { %v4039_v34 = vpop.eup %4038  ;;  %v2440_v55 = vmul.f32 %v4037_v12, %v4035_v50  ;;  %v3992_v12 = vld [vmem:[%s5127_s22 + $0x28] sm:$0xff]  }
 0x232   : > { %v4041_v4 = vpop.eup %4040 }
 0x233   : > { %v4043_v21 = vpop.eup %4042  ;;  %v2443_v28 = vmul.f32 %v4041_v4, %v4039_v34  ;;  %v3993_v34 = vld [vmem:[%s5127_s22 + $0xa8] sm:$0xff]   ;;  %v3994_v4 = vld [vmem:[%s5127_s22 + $0x60] sm:$0xff]  }
 0x234   : > { %v4045_v59 = vpop.eup %4044 }
 0x235   : > { %v4047_v38 = vpop.eup %4046  ;;  %v2441_v32 = vmul.f32 %v4045_v59, %v4043_v21  ;;  %v2449_v7 = vpack.c.bf16 %v2443_v28, %v2442_v8  ;;  %v3996_v28 = vld [vmem:[%s5127_s22 + $0x20] sm:$0xff]  }
 0x236   : > { %v4049_v39 = vpop.eup %4048  ;;  %v3997_v59 = vld [vmem:[%s5127_s22 + $0xa0] sm:$0xff]  }
 0x237   : > { %v4051_v1 = vpop.eup %4050  ;;  %v2448_v37 = vpack.c.bf16 %v2441_v32, %v2440_v55  ;;  %v2446_v5 = vmul.f32 %v4049_v39, %v4047_v38  ;;  %v3998_v38 = vld [vmem:[%s5127_s22 + $0x58] sm:$0xff]  }
 0x238   : > { %v4053_v11 = vpop.eup %4052  ;;  %v4000_v39 = vld [vmem:[%s5127_s22 + $0x18] sm:$0xff]  }
 0x239   : > { %v4055_v52 = vpop.eup %4054  ;;  %3885 = vmatprep.mubr.msk.bf16.mxu0 %vm839_vm0, %v2448_v37  ;;  %v2444_v57 = vmul.f32 %v4053_v11, %v4051_v1  ;;  %v4001_v1 = vld [vmem:[%s5127_s22 + $0x98] sm:$0xff]   ;;  %v5182_v11 = vld [vmem:[#allocation11_spill] sm:$0xff] }
 0x23a   : > { %v4057_v40 = vpop.eup %4056  ;;  %3886 = vmatmul.mubr.msk.bf16.vlgmr.msra.gmra.mxu0 %vm839_vm0, %v2449_v7 }
 0x23b   : > { %v4059_v41 = vpop.eup %4058  ;;  %v2447_v27 = vmul.f32 %v4057_v40, %v4055_v52  ;;  %2732 = vmatpush1.bf16.msra.mxu0 %v3973_v49 }
 0x23c   : > { %v4061_v18 = vpop.eup %4060  ;;  %2733 = vmatprep.subr.bf16.mxu0 %v3981_v30  ;;  %v4012_v30 = vld [vmem:[%s5127_s22] sm:$0xff]  }
 0x23d   : > { %v2445_v45 = vmul.f32 %v4061_v18, %v4059_v41  ;;  %v2451_v26 = vpack.c.bf16 %v2447_v27, %v2446_v5  ;;  %v4002_v41 = vld [vmem:[%s5127_s22 + $0x50] sm:$0xff]  }
 0x23e   : > { %v4003_v5 = vld [vmem:[%s5127_s22 + $0xd0] sm:$0xff]  }
 0x23f   : > { %v2450_v63 = vpack.c.bf16 %v2445_v45, %v2444_v57  ;;  %2734 = vmatpush1.bf16.msra.mxu0 %v3979_v56  ;;  %v4004_v27 = vld [vmem:[%s5127_s22 + $0x10] sm:$0xff]   ;;  %v4006_v57 = vld [vmem:[%s5127_s22 + $0x48] sm:$0xff]   ;;  %v4013_v56 = vld [vmem:[%s5127_s22 + $0x80] sm:$0xff]  }
 0x240   : > { %3673 = vmatprep.subr.bf16.mxu0 %v3983_v2  ;;  %v4005_v18 = vld [vmem:[%s5127_s22 + $0x90] sm:$0xff]   ;;  %v4007_v45 = vld [vmem:[%s5127_s22 + $0xc8] sm:$0xff]  }
 0x241   : > { %3889 = vmatprep.mubr.msk.bf16.mxu0 %vm839_vm0, %v2450_v63  ;;  %v4009_v63 = vld [vmem:[%s5127_s22 + $0x88] sm:$0xff]  }
 0x242   : > { %3890 = vmatmul.mubr.msk.bf16.gmra.mxu0 %vm839_vm0, %v2451_v26  ;;  %v4008_v26 = vld [vmem:[%s5127_s22 + $0x8] sm:$0xff]  }
 0x243   : > { %2751 = vmatprep.mubr.bf16.mxu0 %v4124_v10 }
 0x2fa   : > { %v3887_v3 = vpop.f32.mrf.mxu0 }
 0x2fc   : > { %v2521_v58 = vpop.f32.mrf.mxu0 }
 0x2fd   : > { %v2522_v19 = vadd.f32 %v4855_v16, %v2521_v58 }
 0x2fe   : > { %v3888_v0 = vpop.f32.mrf.mxu0 }
 0x2ff   : > { %v2552_v42 = vadd.f32 %v2522_v19, %v4606_v35  ;;  %v2533_v13 = vadd.f32 %v3888_v0, %v4855_v16  ;;  %v3987_v35 = vld [vmem:[%s5127_s22 + $0xf0] sm:$0xff]   ;;  %v2572_v0 = vld [vmem:[%s5126_s21] sm:$0xf] }
 0x300   : > { %v2524_v22 = vpop.f32.mrf.mxu0 }
 0x301   : > { %v2525_v25 = vadd.f32 %v4855_v16, %v2524_v22  ;;  %v2555_v20 = vadd.f32 %v2533_v13, %v4627_v43  ;;  %v3991_v43 = vld [vmem:[%s5127_s22 + $0xe8] sm:$0xff]  }
 0x302   : > { %v3891_v51 = vpop.f32.mrf.mxu0 }
 0x303   : > { %v2553_v46 = vadd.f32 %v2525_v25, %v4609_v36  ;;  %v2530_v36 = vadd.f32 %v3887_v3, %v4855_v16  ;;  %v2546_v37 = vadd.f32 %v3891_v51, %v4855_v16 }
 0x304   : > { %v2537_v54 = vpop.f32.mrf.mxu0 }
 0x305   : > { %v2560_v33 = vpack.c.bf16 %v2553_v46, %v2552_v42  ;;  %v2554_v15 = vadd.f32 %v2530_v36, %v4624_v60  ;;  %v3995_v60 = vld [vmem:[%s5127_s22 + $0xe0] sm:$0xff]   ;;  %v2538_v21 = vadd.f32 %v4855_v16, %v2537_v54  ;;  %v2558_v52 = vadd.f32 %v2546_v37, %v5182_v11 }
 0x306   : > { %v3892_v23 = vpop.f32.mrf.mxu0 }
 0x307   : > { %3495 = vmatmul.mubr.msk.bf16.vlgmr.msra.gmra.mxu1 %vm839_vm0, %v2560_v33  ;;  %3499 = vmatmul.mubr.msk.bf16.vlgmr.msra.gmra.mxu0 %vm839_vm0, %v2560_v33  ;;  %v2561_v9 = vpack.c.bf16 %v2555_v20, %v2554_v15  ;;  %v2556_v55 = vadd.f32 %v2538_v21, %v4631_v61  ;;  %v2549_v32 = vadd.f32 %v3892_v23, %v4855_v16  ;;  %v5181_v61 = vld [vmem:[#allocation12_spill] sm:$0xff] }
 0x308   : > { %2688 = vmatprep.mubr.bf16.mxu1 %v4124_v10  ;;  %2761 = vmatprep.mubr.bf16.mxu0 %v4124_v10  ;;  %v2540_v53 = vpop.f32.mrf.mxu0 }
 0x309   : > { %3634 = vmatpush3.bf16.msra.mxu1 %v3984_v17  ;;  %3674 = vmatpush3.bf16.msra.mxu0 %v3985_v47  ;;  %v2541_v50 = vadd.f32 %v4855_v16, %v2540_v53  ;;  %v2559_v49 = vadd.f32 %v2549_v32, %v5181_v61 }
 0x30a   : > { %3635 = vmatprep.subr.bf16.mxu1 %v3986_v24  ;;  %3675 = vmatprep.subr.bf16.mxu0 %v3987_v35 }
 0x30b   : > { %v2557_v8 = vadd.f32 %v2541_v50, %v4634_v62  ;;  %v3999_v62 = vld [vmem:[%s5127_s22 + $0xd8] sm:$0xff]   ;;  %v2563_v40 = vpack.c.bf16 %v2559_v49, %v2558_v52 }
 0x30d   : > { %3636 = vmatpush3.bf16.msra.mxu1 %v3988_v31  ;;  %3676 = vmatpush3.bf16.msra.mxu0 %v3989_v14  ;;  %v2562_v7 = vpack.c.bf16 %v2557_v8, %v2556_v55 }
 0x30e   : > { %3637 = vmatprep.subr.bf16.mxu1 %v3990_v44  ;;  %3677 = vmatprep.subr.bf16.mxu0 %v3991_v43 }
 0x30f   : > { %3496 = vmatmul.mubr.msk.bf16.gmra.mxu1 %vm839_vm0, %v2561_v9  ;;  %3500 = vmatmul.mubr.msk.bf16.gmra.mxu0 %vm839_vm0, %v2561_v9 }
 0x310   : > { %2698 = vmatprep.mubr.bf16.mxu1 %v4124_v10  ;;  %2771 = vmatprep.mubr.bf16.mxu0 %v4124_v10 }
 0x311   : > { %3638 = vmatpush3.bf16.msra.mxu1 %v3992_v12  ;;  %3678 = vmatpush3.bf16.msra.mxu0 %v3993_v34 }
 0x312   : > { %3639 = vmatprep.subr.bf16.mxu1 %v3994_v4  ;;  %3679 = vmatprep.subr.bf16.mxu0 %v3995_v60 }
 0x315   : > { %3640 = vmatpush3.bf16.msra.mxu1 %v3996_v28  ;;  %3680 = vmatpush3.bf16.msra.mxu0 %v3997_v59 }
 0x316   : > { %3641 = vmatprep.subr.bf16.mxu1 %v3998_v38  ;;  %3681 = vmatprep.subr.bf16.mxu0 %v3999_v62 }
 0x317   : > { %3497 = vmatmul.mubr.msk.bf16.gmra.mxu1 %vm839_vm0, %v2562_v7  ;;  %3501 = vmatmul.mubr.msk.bf16.gmra.mxu0 %vm839_vm0, %v2562_v7 }
 0x318   : > { %2708 = vmatprep.mubr.bf16.mxu1 %v4124_v10  ;;  %2781 = vmatprep.mubr.bf16.mxu0 %v4124_v10  ;;  %v2574_v10 = vlaneseq }
 0x319   : > { %3642 = vmatpush3.bf16.msra.mxu1 %v4000_v39  ;;  %3682 = vmatpush3.bf16.msra.mxu0 %v4001_v1 }
 0x31a   : > { %3643 = vmatprep.subr.bf16.mxu1 %v4002_v41  ;;  %3683 = vmatprep.subr.bf16.mxu0 %v4003_v5  ;;  %v2575_v48 = vshrl.u32 %v2574_v10, 7 }
 0x31c   : > { %v2580_v2 = vsub.s32 1, %v2575_v48  ;;  %v2588_v3 = vsub.s32 3, %v2575_v48  ;;  %v2576_v58 = vsub.s32 0, %v2575_v48  ;;  %v2584_v16 = vsub.s32 2, %v2575_v48 }
 0x31d   : > { %3644 = vmatpush3.bf16.msra.mxu1 %v4004_v27  ;;  %3684 = vmatpush3.bf16.msra.mxu0 %v4005_v18 }
 0x31e   : > { %3645 = vmatprep.subr.bf16.mxu1 %v4006_v57  ;;  %3685 = vmatprep.subr.bf16.mxu0 %v4007_v45  ;;  %v4980_v25 = vrot.slane %v2572_v0, %v2580_v2  ;;  %v4982_v51 = vrot.slane %v2572_v0, %v2588_v3  ;;  %v4984_v42 = vrot.slane %v2572_v0, %v2576_v58 }
 0x31f   : > { %3498 = vmatmul.mubr.msk.bf16.gmra.mxu1 %vm839_vm0, %v2563_v40  ;;  %3502 = vmatmul.mubr.msk.bf16.gmra.mxu0 %vm839_vm0, %v2563_v40  ;;  %v4986_v46 = vrot.slane %v2572_v0, %v2584_v16 }
 0x321   : > { %3646 = vmatpush3.bf16.msra.mxu1 %v4008_v26  ;;  %3686 = vmatpush3.bf16.msra.mxu0 %v4009_v63 }
 0x322   : > { %3647 = vmatprep.subr.bf16.mxu1 %v4010_v6  ;;  %3687 = vmatprep.subr.bf16.mxu0 %v4011_v29 }
 0x325   : > { %3648 = vmatpush3.bf16.msra.mxu1 %v4012_v30  ;;  %3688 = vmatpush3.bf16.msra.mxu0 %v4013_v56 }
 0x3c7   : > { %v2680_v19 = vpop.f32.mrf.mxu1  ;;  %v2753_v22 = vpop.f32.mrf.mxu0 }
 0x3c8   : > { %v2681_v36 = vadd.f32 %v2680_v19, %v4984_v42  ;;  %v2754_v20 = vadd.f32 %v2753_v22, %v4986_v46 }
 0x3c9   : > { %v2682_v54 = vpop.f32.mrf.mxu1  ;;  %v2755_v13 = vpop.f32.mrf.mxu0 }
 0x3ca   : > { %v2683_v47 = vadd.f32 %v2682_v54, %v4980_v25  ;;  %v2756_v23 = vadd.f32 %v2755_v13, %v4982_v51  ;;  %v2792_v21 = vmax.f32 %v2681_v36, 0.0  ;;  %v2794_v8 = vmax.f32 %v2754_v20, 0.0 }
 0x3cb   : > { %v2684_v33 = vpop.f32.mrf.mxu1  ;;  %v2757_v17 = vpop.f32.mrf.mxu0 }
 0x3cc   : > { %v2685_v24 = vadd.f32 %v2684_v33, %v4984_v42  ;;  %v2758_v35 = vadd.f32 %v2757_v17, %v4986_v46  ;;  %v2793_v12 = vmax.f32 %v2683_v47, 0.0  ;;  %v2795_v34 = vmax.f32 %v2756_v23, 0.0 }
 0x3cd   : > { %v2686_v31 = vpop.f32.mrf.mxu1  ;;  %v2759_v14 = vpop.f32.mrf.mxu0 }
 0x3ce   : > { %v2687_v53 = vadd.f32 %v2686_v31, %v4980_v25  ;;  %v2760_v44 = vadd.f32 %v2759_v14, %v4982_v51  ;;  %v2796_v43 = vmax.f32 %v2685_v24, 0.0  ;;  %v2798_v15 = vmax.f32 %v2758_v35, 0.0 }
 0x3cf   : > { %v2690_v9 = vpop.f32.mrf.mxu1  ;;  %v2763_v50 = vpop.f32.mrf.mxu0 }
 0x3d0   : > { %v2797_v4 = vmax.f32 %v2687_v53, 0.0  ;;  %v2799_v60 = vmax.f32 %v2760_v44, 0.0  ;;  %v2824_v55 = vpack.c.bf16 %v2796_v43, %v2792_v21  ;;  %v2826_v32 = vpack.c.bf16 %v2798_v15, %v2794_v8 }
 0x3d1   : > { %v2692_v28 = vpop.f32.mrf.mxu1  ;;  %v2765_v59 = vpop.f32.mrf.mxu0  ;;  %v2691_v11 = vadd.f32 %v2690_v9, %v4984_v42  ;;  %v2764_v52 = vadd.f32 %v2763_v50, %v4986_v46 }
 0x3d2   : > { %v2825_v38 = vpack.c.bf16 %v2797_v4, %v2793_v12  ;;  %v2827_v62 = vpack.c.bf16 %v2799_v60, %v2795_v34  ;;  %v2693_v7 = vadd.f32 %v2692_v28, %v4980_v25  ;;  %v2766_v37 = vadd.f32 %v2765_v59, %v4982_v51 }
 0x3d3   : > { %v2694_v39 = vpop.f32.mrf.mxu1  ;;  %v2767_v1 = vpop.f32.mrf.mxu0  ;;  %v2800_v56 = vmax.f32 %v2691_v11, 0.0  ;;  %v2802_v10 = vmax.f32 %v2764_v52, 0.0 }
 0x3d4   : > { %v2695_v61 = vadd.f32 %v2694_v39, %v4984_v42  ;;  %v2768_v49 = vadd.f32 %v2767_v1, %v4986_v46  ;;  %3135 = vmatprep.mubr.bf16.mxu1 %v2825_v38  ;;  %3200 = vmatprep.mubr.bf16.mxu0 %v2827_v62  ;;  %v2801_v63 = vmax.f32 %v2693_v7, 0.0  ;;  %v2803_v6 = vmax.f32 %v2766_v37, 0.0 }
 0x3d5   : > { %v2696_v40 = vpop.f32.mrf.mxu1  ;;  %v2769_v41 = vpop.f32.mrf.mxu0  ;;  %3136 = vmatmul.mubr.bf16.vlgmr.msra.gmra.mxu1 %v2824_v55  ;;  %3201 = vmatmul.mubr.bf16.vlgmr.msra.gmra.mxu0 %v2826_v32 }
 0x3d6   : > { %v2697_v5 = vadd.f32 %v2696_v40, %v4980_v25  ;;  %v2770_v27 = vadd.f32 %v2769_v41, %v4982_v51  ;;  %v2804_v18 = vmax.f32 %v2695_v61, 0.0  ;;  %v2806_v57 = vmax.f32 %v2768_v49, 0.0 }
 0x3d7   : > { %v2700_v45 = vpop.f32.mrf.mxu1  ;;  %v2773_v26 = vpop.f32.mrf.mxu0 }
 0x3d8   : > { %v2805_v29 = vmax.f32 %v2697_v5, 0.0  ;;  %v2807_v30 = vmax.f32 %v2770_v27, 0.0  ;;  %v2828_v16 = vpack.c.bf16 %v2804_v18, %v2800_v56  ;;  %v2830_v0 = vpack.c.bf16 %v2806_v57, %v2802_v10 }
 0x3d9   : > { %v2702_v48 = vpop.f32.mrf.mxu1  ;;  %v2775_v2 = vpop.f32.mrf.mxu0  ;;  %v2701_v47 = vadd.f32 %v2700_v45, %v4984_v42  ;;  %v2774_v23 = vadd.f32 %v2773_v26, %v4986_v46 }
 0x3da   : > { %v2829_v3 = vpack.c.bf16 %v2805_v29, %v2801_v63  ;;  %v2831_v58 = vpack.c.bf16 %v2807_v30, %v2803_v6  ;;  %v2703_v19 = vadd.f32 %v2702_v48, %v4980_v25  ;;  %v2776_v13 = vadd.f32 %v2775_v2, %v4982_v51  ;;  %v5024_v29 = vld [vmem:[%s5128_s23] ss:$0 sm:$0xff] }
 0x3db   : > { %v2704_v22 = vpop.f32.mrf.mxu1  ;;  %v2777_v54 = vpop.f32.mrf.mxu0  ;;  %v2808_v12 = vmax.f32 %v2701_v47, 0.0  ;;  %v2810_v34 = vmax.f32 %v2774_v23, 0.0 }
 0x3dc   : > { %v2705_v33 = vadd.f32 %v2704_v22, %v4984_v42  ;;  %v2778_v17 = vadd.f32 %v2777_v54, %v4986_v46  ;;  %3143 = vmatprep.mubr.bf16.mxu1 %v2829_v3  ;;  %3208 = vmatprep.mubr.bf16.mxu0 %v2831_v58  ;;  %v2809_v43 = vmax.f32 %v2703_v19, 0.0  ;;  %v2811_v15 = vmax.f32 %v2776_v13, 0.0 }
 0x3dd   : > { %v2706_v24 = vpop.f32.mrf.mxu1  ;;  %v2779_v35 = vpop.f32.mrf.mxu0  ;;  %3144 = vmatmul.mubr.bf16.gmra.mxu1 %v2828_v16  ;;  %3209 = vmatmul.mubr.bf16.gmra.mxu0 %v2830_v0 }
 0x3de   : > { %v2707_v36 = vadd.f32 %v2706_v24, %v4980_v25  ;;  %v2780_v20 = vadd.f32 %v2779_v35, %v4982_v51  ;;  %v2812_v31 = vmax.f32 %v2705_v33, 0.0  ;;  %v2814_v14 = vmax.f32 %v2778_v17, 0.0 }
 0x3df   : > { %v2710_v53 = vpop.f32.mrf.mxu1  ;;  %v2783_v44 = vpop.f32.mrf.mxu0 }
 0x3e0   : > { %v2813_v9 = vmax.f32 %v2707_v36, 0.0  ;;  %v2815_v50 = vmax.f32 %v2780_v20, 0.0  ;;  %v2832_v28 = vpack.c.bf16 %v2812_v31, %v2808_v12  ;;  %v2834_v59 = vpack.c.bf16 %v2814_v14, %v2810_v34 }
 0x3e1   : > { %v2712_v4 = vpop.f32.mrf.mxu1  ;;  %v2785_v60 = vpop.f32.mrf.mxu0  ;;  %v2711_v1 = vadd.f32 %v2710_v53, %v4984_v42  ;;  %v2784_v37 = vadd.f32 %v2783_v44, %v4986_v46 }
 0x3e2   : > { %v2833_v21 = vpack.c.bf16 %v2813_v9, %v2809_v43  ;;  %v2835_v8 = vpack.c.bf16 %v2815_v50, %v2811_v15  ;;  %v2713_v38 = vadd.f32 %v2712_v4, %v4980_v25  ;;  %v2786_v32 = vadd.f32 %v2785_v60, %v4982_v51 }
 0x3e3   : > { %v2714_v62 = vpop.f32.mrf.mxu1  ;;  %v2787_v55 = vpop.f32.mrf.mxu0  ;;  %v2816_v45 = vmax.f32 %v2711_v1, 0.0  ;;  %v2818_v26 = vmax.f32 %v2784_v37, 0.0 }
 0x3e4   : > { %v2715_v7 = vadd.f32 %v2714_v62, %v4984_v42  ;;  %v2788_v39 = vadd.f32 %v2787_v55, %v4986_v46  ;;  %3151 = vmatprep.mubr.bf16.mxu1 %v2833_v21  ;;  %3216 = vmatprep.mubr.bf16.mxu0 %v2835_v8  ;;  %v2817_v5 = vmax.f32 %v2713_v38, 0.0  ;;  %v2819_v27 = vmax.f32 %v2786_v32, 0.0 }
 0x3e5   : > { %v2716_v61 = vpop.f32.mrf.mxu1  ;;  %v2789_v49 = vpop.f32.mrf.mxu0  ;;  %3152 = vmatmul.mubr.bf16.gmra.mxu1 %v2832_v28  ;;  %3217 = vmatmul.mubr.bf16.gmra.mxu0 %v2834_v59 }
 0x3e6   : > { %v2717_v11 = vadd.f32 %v2716_v61, %v4980_v25  ;;  %v2790_v52 = vadd.f32 %v2789_v49, %v4982_v51  ;;  %v2820_v40 = vmax.f32 %v2715_v7, 0.0  ;;  %v2822_v41 = vmax.f32 %v2788_v39, 0.0 }
 0x3e8   : > { %v2821_v18 = vmax.f32 %v2717_v11, 0.0  ;;  %v2823_v57 = vmax.f32 %v2790_v52, 0.0  ;;  %v2836_v63 = vpack.c.bf16 %v2820_v40, %v2816_v45  ;;  %v2838_v6 = vpack.c.bf16 %v2822_v41, %v2818_v26 }
 0x3ea   : > { %v2837_v42 = vpack.c.bf16 %v2821_v18, %v2817_v5  ;;  %v2839_v46 = vpack.c.bf16 %v2823_v57, %v2819_v27 }
 0x3ec   : > { %3159 = vmatprep.mubr.bf16.mxu1 %v2837_v42  ;;  %3224 = vmatprep.mubr.bf16.mxu0 %v2839_v46 }
 0x3ed   : > { %3160 = vmatmul.mubr.bf16.gmra.mxu1 %v2836_v63  ;;  %3225 = vmatmul.mubr.bf16.gmra.mxu0 %v2838_v6 }
 0x495   : > { %v3649_v25 = vpop.f32.mrf.mxu1  ;;  %v3689_v51 = vpop.f32.mrf.mxu0 }
 0x497   : > { %v3650_v30 = vpop.f32.mrf.mxu1  ;;  %v3690_v56 = vpop.f32.mrf.mxu0 }
 0x498   : > { %v3651_v10 = vadd.f32 %v3650_v30, %v3649_v25  ;;  %v3691_v58 = vadd.f32 %v3690_v56, %v3689_v51 }
 0x499   : > { %v3652_v48 = vpop.f32.mrf.mxu1  ;;  %v3692_v2 = vpop.f32.mrf.mxu0 }
 0x49a   : > { %v3138_v3 = vadd.f32 %v3651_v10, %v5024_v29 }
 0x49b   : > { %v3653_v16 = vpop.f32.mrf.mxu1  ;;  %v3693_v0 = vpop.f32.mrf.mxu0 }
 0x49c   : > { %v3203_v19 = vadd.f32 %v3691_v58, %v3138_v3  ;;  %v3654_v22 = vadd.f32 %v3653_v16, %v3652_v48  ;;  %v3694_v17 = vadd.f32 %v3693_v0, %v3692_v2 }
 0x49d   : > { %v3655_v54 = vpop.f32.mrf.mxu1  ;;  %v3695_v13 = vpop.f32.mrf.mxu0 }
 0x49e   : > { %3234 = vst.msk [vmem:[%s5029_s8] sm:$0xff] %vm3233_vm3, %v3203_v19  ;;  %v3141_v33 = vadd.f32 %v3654_v22, %v5024_v29 }
 0x49f   : > { %v3656_v47 = vpop.f32.mrf.mxu1  ;;  %v3696_v23 = vpop.f32.mrf.mxu0 }
 0x4a0   : > { %v3206_v24 = vadd.f32 %v3694_v17, %v3141_v33  ;;  %v3657_v35 = vadd.f32 %v3656_v47, %v3655_v54  ;;  %v3697_v14 = vadd.f32 %v3696_v23, %v3695_v13 }
 0x4a1   : > { %v3658_v36 = vpop.f32.mrf.mxu1  ;;  %v3698_v20 = vpop.f32.mrf.mxu0 }
 0x4a2   : > { %3235 = vst.msk [vmem:[%s5029_s8 + $0x8] sm:$0xff] %vm3233_vm3, %v3206_v24  ;;  %v3146_v31 = vadd.f32 %v3657_v35, %v5024_v29 }
 0x4a3   : > { %v3659_v53 = vpop.f32.mrf.mxu1  ;;  %v3699_v44 = vpop.f32.mrf.mxu0 }
 0x4a4   : > { %v3211_v43 = vadd.f32 %v3697_v14, %v3146_v31  ;;  %v3660_v15 = vadd.f32 %v3659_v53, %v3658_v36  ;;  %v3700_v34 = vadd.f32 %v3699_v44, %v3698_v20 }
 0x4a5   : > { %v3661_v9 = vpop.f32.mrf.mxu1  ;;  %v3701_v50 = vpop.f32.mrf.mxu0 }
 0x4a6   : > { %3236 = vst.msk [vmem:[%s5029_s8 + $0x10] sm:$0xff] %vm3233_vm3, %v3211_v43  ;;  %v3149_v12 = vadd.f32 %v3660_v15, %v5024_v29 }
 0x4a7   : > { %v3662_v4 = vpop.f32.mrf.mxu1  ;;  %v3702_v60 = vpop.f32.mrf.mxu0 }
 0x4a8   : > { %v3214_v21 = vadd.f32 %v3700_v34, %v3149_v12  ;;  %v3663_v8 = vadd.f32 %v3662_v4, %v3661_v9  ;;  %v3703_v62 = vadd.f32 %v3702_v60, %v3701_v50 }
 0x4a9   : > { %v3664_v28 = vpop.f32.mrf.mxu1  ;;  %v3704_v59 = vpop.f32.mrf.mxu0 }
 0x4aa   : > { %3237 = vst.msk [vmem:[%s5029_s8 + $0x18] sm:$0xff] %vm3233_vm3, %v3214_v21  ;;  %v3154_v38 = vadd.f32 %v3663_v8, %v5024_v29 }
 0x4ab   : > { %v3665_v55 = vpop.f32.mrf.mxu1  ;;  %v3705_v32 = vpop.f32.mrf.mxu0 }
 0x4ac   : > { %v3219_v7 = vadd.f32 %v3703_v62, %v3154_v38  ;;  %v3666_v39 = vadd.f32 %v3665_v55, %v3664_v28  ;;  %v3706_v49 = vadd.f32 %v3705_v32, %v3704_v59 }
 0x4ad   : > { %v3667_v1 = vpop.f32.mrf.mxu1  ;;  %v3707_v37 = vpop.f32.mrf.mxu0 }
 0x4ae   : > { %3238 = vst.msk [vmem:[%s5029_s8 + $0x20] sm:$0xff] %vm3233_vm3, %v3219_v7  ;;  %v3157_v61 = vadd.f32 %v3666_v39, %v5024_v29 }
 0x4af   : > { %v3668_v11 = vpop.f32.mrf.mxu1  ;;  %v3708_v52 = vpop.f32.mrf.mxu0 }
 0x4b0   : > { %v3222_v40 = vadd.f32 %v3706_v49, %v3157_v61  ;;  %v3669_v41 = vadd.f32 %v3668_v11, %v3667_v1  ;;  %v3709_v57 = vadd.f32 %v3708_v52, %v3707_v37 }
 0x4b1   : > { %v3670_v5 = vpop.f32.mrf.mxu1  ;;  %v3710_v27 = vpop.f32.mrf.mxu0 }
 0x4b2   : > { %3239 = vst.msk [vmem:[%s5029_s8 + $0x28] sm:$0xff] %vm3233_vm3, %v3222_v40  ;;  %v3162_v18 = vadd.f32 %v3669_v41, %v5024_v29 }
 0x4b3   : > { %v3671_v45 = vpop.f32.mrf.mxu1  ;;  %v3711_v26 = vpop.f32.mrf.mxu0 }
 0x4b4   : > { %v3227_v42 = vadd.f32 %v3709_v57, %v3162_v18  ;;  %v3672_v46 = vadd.f32 %v3671_v45, %v3670_v5  ;;  %v3712_v6 = vadd.f32 %v3711_v26, %v3710_v27 }
 0x4b6   : > { %3240 = vst.msk [vmem:[%s5029_s8 + $0x30] sm:$0xff] %vm3233_vm3, %v3227_v42  ;;  %v3165_v63 = vadd.f32 %v3672_v46, %v5024_v29 }
 0x4b8   : > { %v3230_v25 = vadd.f32 %v3712_v6, %v3165_v63 }
 0x4ba   : > { %3241 = vst.msk [vmem:[%s5029_s8 + $0x38] sm:$0xff] %vm3233_vm3, %v3230_v25 }
 0x4bb   : > { %4075 = shalt.err (!%p4072_p3)
}
 0x4bc   : > { %s4076_s27 = scalar_lea.hbm %s5057_s29, 1024  ;;  %s4080_s28 = scalar_lea.hbm %s5184_s7, 2048 }
 0x4bd   : > { %p4077_p4 = scmp.ne.s32.totalorder %s5057_s29, %s4076_s27  ;;  %p4081_p9 = scmp.lt.s32.totalorder %s5057_s29, %s5184_s7 }
 0x4be   : > { %p4082_p10 = scmp.lt.s32.totalorder %s4080_s28, %s4076_s27 }
 0x4bf   : > { %p4078_p7 = pnand %p4077_p4, %p4291_p5 }
 0x4c0   : > { %p4083_p11 = por %p4082_p10, %p4081_p9 }
 0x4c1   : > { %p4079_p8 = pneg %p4078_p7 }
 0x4c3   : > { %p4084_p12 = pnand %p4083_p11, %p4079_p8 }
 0x4c5   : > { %4087 = shalt.err (!%p4084_p12)
}
 0x4c6   : > { %s4126_s1 = smov 128   ;;  %s4127_s5 = smov 8  }
 0x4c7   : > { %3898 = dma.vmem_to_hbm [thread:$0]  (%p4291_p5), %s5059_s2, 1024, %s5057_s29, %s5065_s6, %s4126_s1, %s4126_s1, %s4127_s5  }
 0x4c8 PF: > { %s5185_s4 = sld [smem:[#allocation7_spill]] }
 0x4c9   : > { %s5186_s8 = sld [smem:[#allocation5_spill]] }
 0x4ce   : > { %p3904_p13 = scmp.ge.s32.totalorder %s5185_s4, 2 }
 0x4cf   : > { %s3271_s10 = sand.u32 1, %s5186_s8  }
 0x4d0   : > { %p3901_p0 = pnand %p3904_p13, %p4295_p6  ;;  %s3272_s9 = scalar_lea.sflag [#allocation3], %s3271_s10 }
 0x4d2   : > { %p3902_p1 = pneg %p3901_p0 }
 0x4d4   : > { %4105 = dma.done.wait (%p3902_p1), %s3272_s9, 1024  }
 0x4d5   : > { %4107 = vsyncadd (%p3902_p1), %s3272_s9, 4294966272  ;;  %s5188_s28 = sld [smem:[#allocation8_spill]]  ;;  %s5191_s5 = smov %s4114_s26 }
 0x4d6   : > { %s5189_s27 = sld [smem:[#allocation6_spill]] }
 0x4d7   : > { %s5190_s25 = sld [smem:[#allocation9_spill]] }
 0x4db   : > { %p34_p2 = scmp.ge.s32.totalorder %s5188_s28, 4  }
 0x4dc   : > { %s5192_s26 = smov %s5189_s27 }
 0x4dd   : > { %s5193_s27 = smov %s5190_s25  ;;  %36 = sbr.rel (!%p34_p2) target bundleno = 16 (0x10), region = 166 }
 0x4e2   :  { %3277 = vsyncpa [#allocation3], 1 }
 0x4e3   :  { %3279 = vsyncpa [#allocation3 + $0x1], 1 }

// kernel: _lambda_.3
= control target key start
LH: loop header
LB: loop body
LE: loop exit
PB: predicated region body
PF: predicated region fallthrough
CT: control target
= control target key end

     0   :  { %s10328_s0 = inlined_call_operand.vmem [shape: f32[2,11,14,32], index: 0, kind: input, shape index: {}]   ;;  %s10329_s1 = inlined_call_operand.vmem [shape: f32[2,8,11,32], index: 1, kind: input, shape index: {}]   ;;  %s10330_s2 = inlined_call_operand.vmem [shape: bf16[21,32,32], index: 2, kind: input, shape index: {}]   ;;  %s10331_s3 = inlined_call_operand.vmem [shape: bf16[21,32,32], index: 3, kind: input, shape index: {}]   ;;  %s10332_s4 = inlined_call_operand.vmem [shape: f32[1,32], index: 4, kind: input, shape index: {}]   ;;  %s10333_s5 = inlined_call_operand.vmem [shape: f32[1,32], index: 5, kind: input, shape index: {}]   ;;  %s10334_s6 = inlined_call_operand.vmem [shape: bf16[32,32], index: 6, kind: input, shape index: {}]   ;;  %s10335_s7 = inlined_call_operand.vmem [shape: bf16[32,32], index: 7, kind: input, shape index: {}]   ;;  %s10336_s8 = inlined_call_operand.vmem [shape: bf16[32,32], index: 8, kind: input, shape index: {}]   ;;  %s10337_s9 = inlined_call_operand.vmem [shape: bf16[32,32], index: 9, kind: input, shape index: {}]   ;;  %s10338_s10 = inlined_call_operand.vmem [shape: f32[1,32], index: 10, kind: input, shape index: {}]   ;;  %s10339_s11 = inlined_call_operand.vmem [shape: f32[1,32], index: 11, kind: input, shape index: {}]   ;;  %s10340_s12 = inlined_call_operand.vmem [shape: bf16[3,32,32], index: 12, kind: input, shape index: {}]   ;;  %s10341_s13 = inlined_call_operand.vmem [shape: bf16[3,32,32], index: 13, kind: input, shape index: {}]   ;;  %s10342_s14 = inlined_call_operand.vmem [shape: f32[1,32], index: 14, kind: input, shape index: {}]   ;;  %s10343_s15 = inlined_call_operand.vmem [shape: f32[1,32], index: 15, kind: input, shape index: {}]   ;;  %s10344_s16 = inlined_call_operand.vmem [shape: bf16[32,32], index: 16, kind: input, shape index: {}]   ;;  %s10345_s17 = inlined_call_operand.vmem [shape: f32[1,32], index: 17, kind: input, shape index: {}]   ;;  %s10346_s18 = inlined_call_operand.vmem [shape: f32[2,1,32], index: 18, kind: input, shape index: {}]   ;;  %s10347_s19 = inlined_call_operand.vmem [shape: f32[2,1,32], index: 19, kind: input, shape index: {}]   ;;  %s10348_s20 = inlined_call_operand.vmem [shape: f32[2,8,8,32], index: 20, kind: output, shape index: {0}]   ;;  %s10349_s21 = inlined_call_operand.vmem [shape: f32[2,8,8,32], index: 21, kind: output, shape index: {1}]  }
   0x1   :  { %10379 = sst [smem:[#allocation25_spill]] %s10328_s0 }
   0x2   :  { %10380 = sst [smem:[#allocation26_spill]] %s10329_s1 }
   0x3   :  { %10381 = sst [smem:[#allocation27_spill]] %s10330_s2  ;;  %s8383_s2 = smov 0  }
   0x4   :  { %10382 = sst [smem:[#allocation28_spill]] %s10331_s3 }
   0x5   :  { %10383 = sst [smem:[#allocation29_spill]] %s10332_s4 }
   0x6   :  { %10384 = sst [smem:[#allocation30_spill]] %s10333_s5 }
   0x7 LB: > { %s6560_s25 = sadd.s32 4294967295, %s8271_s2   ;;  %p6564_p0 = scmp.ge.s32.totalorder %s8271_s2, 1  ;;  %s8271_s2 = sphi %s8383_s2, %s32_s2  }
   0x8   : > { %p616_p1 = scmp.lt.s32.totalorder %s8271_s2, 3 }
   0xa   : > { %p617_p2 = pnand %p6564_p0, %p616_p1 }
   0xc   : > { %620 = sbr.rel (%p617_p2) target bundleno = 1065 (0x429), region = 100 }
  0x11   : > { %s10385_s3 = sld [smem:[#allocation27_spill]]  ;;  %p692_p3 = scmp.lt.s32.totalorder %s6560_s25, 1  ;;  %vm777_vm0 = vcmask 261120   ;;  %vm980_vm1 = vcmask 1046528   ;;  %vm1209_vm2 = vcmask 1045504   ;;  %vm1438_vm3 = vcmask 1044480  }
  0x12   : > { %s10386_s30 = sld [smem:[#allocation28_spill]]  ;;  %vm1667_vm4 = vcmask 1043456   ;;  %vm1896_vm5 = vcmask 1042432   ;;  %vm2125_vm6 = vcmask 1041408  }
  0x13   : > { %s10487_s25 = smov (!%p692_p3, %s6560_s25), 1  ;;  %s10387_s26 = sld [smem:[#allocation25_spill]] }
  0x14   : > { %s8054_s5 = smul.u32 176, %s10487_s25  ;;  %s707_s24 = scalar_lea.vmem %s10347_s19, %s10487_s25 }
  0x15   : > { %s7093_s29 = sshll.u32 %s10487_s25, 7  ;;  %s10476_s22 = sld [smem:[#allocation26_spill]] }
  0x16   : > { %s7094_s4 = sshll.u32 %s10487_s25, 6 }
  0x17   : > { %v8063_v0 = vld [vmem:[%s10385_s3 + $0x8] sm:$0xff]   ;;  %v8064_v1 = vld [vmem:[%s10385_s3] sm:$0xff]   ;;  %v8066_v3 = vld [vmem:[%s10385_s3 + $0x18] sm:$0xff]   ;;  %s10041_s1 = scalar_lea.vmem %s10348_s20, %s7094_s4 }
  0x18   : > { %7414 = vmatprep.subr.bf16.mxu0 %v8063_v0  ;;  %8050 = vmatprep.subr.bf16.mxu1 %v8063_v0  ;;  %v8065_v2 = vld [vmem:[%s10386_s30 + $0x8] sm:$0xff]   ;;  %v8068_v7 = vld [vmem:[%s10385_s3 + $0x10] sm:$0xff]   ;;  %v8067_v23 = vld [vmem:[%s10386_s30] sm:$0xff]  }
  0x19   : > { %7415 = vmatpush3.bf16.msra.mxu0 %v8063_v0  ;;  %8052 = vmatpush3.bf16.msra.mxu1 %v8063_v0  ;;  %s8409_s27 = scalar_lea.vmem %s10387_s26, %s8054_s5  ;;  %v8069_v32 = vld [vmem:[%s10385_s3 + $0x28] sm:$0xff]   ;;  %v8070_v36 = vld [vmem:[%s10386_s30 + $0x18] sm:$0xff]   ;;  %v8071_v62 = vld [vmem:[%s10385_s3 + $0x20] sm:$0xff]   ;;  %s10422_s26 = sld [smem:[#allocation29_spill]] }
  0x1a   : > { %7416 = vmatprep.subr.bf16.mxu0 %v8064_v1  ;;  %8051 = vmatprep.subr.bf16.mxu1 %v8064_v1  ;;  %v8412_v4 = vld [vmem:[%s8409_s27] sm:$0xff]  ;;  %v8415_v5 = vld [vmem:[%s8409_s27 + $0x10] sm:$0xff]  ;;  %v8452_v19 = vld [vmem:[%s8409_s27 + $0x8] sm:$0x3f] }
  0x1b   : > { %v8418_v6 = vld [vmem:[%s8409_s27 + $0x40] sm:$0xff]  ;;  %v757_v8 = vpack.c.bf16 %v8415_v5, %v8412_v4  ;;  %v8426_v9 = vld [vmem:[%s8409_s27 + $0x50] sm:$0xff]  ;;  %v981_v12 = vrot.slane %v8412_v4, 1  ;;  %v984_v13 = vrot.slane %v8415_v5, 1  ;;  %v8465_v24 = vld [vmem:[%s8409_s27 + $0x18] sm:$0x3f]  ;;  %s9858_s23 = scalar_lea.vmem %s10476_s22, %s7093_s29 }
  0x1c   : > { %v8429_v10 = vld [vmem:[%s8409_s27 + $0x20] sm:$0xff]  ;;  %v8432_v11 = vld [vmem:[%s8409_s27 + $0x30] sm:$0xff]  ;;  %v993_v14 = vrot.slane %v8418_v6, 1  ;;  %v8439_v15 = vpack.c.bf16 %v8426_v9, %v8418_v6  ;;  %v982_v25 = vrot.slane %v8452_v19, 1  ;;  %v8469_v26 = vld [vmem:[%s8409_s27 + $0x28] sm:$0x3f] }
  0x1d   : > { %7417 = vmatpush3.bf16.msra.mxu0 %v8064_v1  ;;  %8053 = vmatpush3.bf16.msra.mxu1 %v8064_v1  ;;  %v8443_v16 = vpack.c.bf16 %v8432_v11, %v8429_v10  ;;  %v8446_v17 = vld [vmem:[%s8409_s27 + $0x60] sm:$0xff]  ;;  %v8449_v18 = vld [vmem:[%s8409_s27 + $0x70] sm:$0xff]  ;;  %v987_v20 = vrot.slane %v8429_v10, 1  ;;  %v990_v21 = vrot.slane %v8432_v11, 1  ;;  %v8473_v27 = vpack.c.bf16 %v8429_v10, %v8415_v5  ;;  %v8485_v30 = vld [vmem:[%s8409_s27 + $0x38] sm:$0x3f] }
  0x1e   : > { %7426 = vmatprep.subr.bf16.mxu1 %v8065_v2  ;;  %7438 = vmatprep.subr.bf16.mxu0 %v8066_v3  ;;  %10388 = vst [vmem:[#allocation2_spill] sm:$0xff] %v8439_v15  ;;  %v8459_v22 = vpack.c.bf16 %v8449_v18, %v8446_v17  ;;  %v8477_v28 = vpack.c.bf16 %v8418_v6, %v8432_v11  ;;  %v985_v29 = vrot.slane %v8465_v24, 1  ;;  %v988_v31 = vrot.slane %v8469_v26, 1  ;;  %v8503_v37 = vld [vmem:[%s8409_s27 + $0x48] sm:$0x3f] }
  0x1f   : > { %10389 = vst [vmem:[#allocation3_spill] sm:$0xff] %v8443_v16  ;;  %7418 = vmatprep.mubr.msk.bf16.mxu0 %vm777_vm0, %v757_v8  ;;  %10391 = vst [vmem:[#allocation5_spill] sm:$0xff] %v8473_v27  ;;  %7422 = vmatprep.mubr.msk.bf16.mxu1 %vm777_vm0, %v8439_v15  ;;  %v8493_v33 = vpack.c.bf16 %v8446_v17, %v8426_v9  ;;  %v983_v34 = vsel %vm980_vm1, %v981_v12, %v982_v25  ;;  %v991_v35 = vrot.slane %v8485_v30, 1  ;;  %v8513_v41 = vld [vmem:[%s8409_s27 + $0x58] sm:$0x3f] }
  0x20   : > { %10390 = vst [vmem:[#allocation4_spill] sm:$0xff] %v8459_v22  ;;  %10392 = vst [vmem:[#allocation6_spill] sm:$0xff] %v8477_v28  ;;  %7419 = vmatmul.mubr.msk.bf16.vlgmr.msra.gmra.mxu0 %vm777_vm0, %v8443_v16  ;;  %7423 = vmatmul.mubr.msk.bf16.vlgmr.msra.gmra.mxu1 %vm777_vm0, %v8459_v22  ;;  %v996_v38 = vrot.slane %v8426_v9, 1  ;;  %v8507_v39 = vsel %vm980_vm1, %v984_v13, %v985_v29  ;;  %v8510_v40 = vsel %vm980_vm1, %v987_v20, %v988_v31  ;;  %v8517_v43 = vld [vmem:[%s8409_s27 + $0x68] sm:$0x3f] }
  0x21   : > { %10393 = vst [vmem:[#allocation7_spill] sm:$0xff] %v8493_v33  ;;  %7439 = vmatpush3.bf16.msra.mxu0 %v8066_v3  ;;  %7427 = vmatpush3.bf16.msra.mxu1 %v8065_v2  ;;  %v994_v42 = vrot.slane %v8503_v37, 1  ;;  %v999_v44 = vrot.slane %v8446_v17, 1  ;;  %v8522_v45 = vpack.c.bf16 %v8507_v39, %v983_v34  ;;  %v992_v46 = vsel %vm980_vm1, %v990_v21, %v991_v35  ;;  %v8527_v48 = vld [vmem:[%s8409_s27 + $0x78] sm:$0x3f]  ;;  %v8072_v2 = vld [vmem:[%s10386_s30 + $0x10] sm:$0xff]  }
  0x22   : > { %7440 = vmatprep.subr.bf16.mxu0 %v8068_v7  ;;  %7428 = vmatprep.subr.bf16.mxu1 %v8067_v23  ;;  %v997_v47 = vrot.slane %v8513_v41, 1  ;;  %v1000_v49 = vrot.slane %v8517_v43, 1  ;;  %v8531_v50 = vpack.c.bf16 %v992_v46, %v8510_v40  ;;  %v1002_v52 = vrot.slane %v8449_v18, 1  ;;  %v8585_v21 = vld [vmem:[%s10385_s3 + $0x38] sm:$0xff]   ;;  %v8596_v29 = vld [vmem:[%s10386_s30 + $0x28] sm:$0xff]  }
  0x23   : > { %7430 = vmatprep.mubr.msk.bf16.mxu1 %vm777_vm0, %v757_v8  ;;  %v995_v51 = vsel %vm980_vm1, %v993_v14, %v994_v42  ;;  %v1003_v53 = vrot.slane %v8527_v48, 1  ;;  %7442 = vmatprep.mubr.msk.bf16.mxu0 %vm777_vm0, %v8522_v45  ;;  %v1210_v56 = vrot.slane %v8412_v4, 2  ;;  %v1211_v59 = vrot.slane %v8452_v19, 2 }
  0x24   : > { %10394 = vst [vmem:[#allocation8_spill] sm:$0xff] %v8531_v50  ;;  %v8539_v54 = vsel %vm980_vm1, %v996_v38, %v997_v47  ;;  %v8541_v55 = vpack.c.bf16 %v995_v51, %v992_v46  ;;  %v8548_v58 = vsel %vm980_vm1, %v999_v44, %v1000_v49  ;;  %v1213_v60 = vrot.slane %v8415_v5, 2 }
  0x25   : > { %7441 = vmatpush3.bf16.msra.mxu0 %v8068_v7  ;;  %7429 = vmatpush3.bf16.msra.mxu1 %v8067_v23  ;;  %v8545_v57 = vpack.c.bf16 %v8539_v54, %v995_v51  ;;  %v8553_v61 = vsel %vm980_vm1, %v1002_v52, %v1003_v53  ;;  %v1214_v63 = vrot.slane %v8465_v24, 2  ;;  %v1216_v0 = vrot.slane %v8429_v10, 2 }
  0x26   : > { %10395 = vst [vmem:[#allocation9_spill] sm:$0xff] %v8541_v55  ;;  %7462 = vmatprep.subr.bf16.mxu0 %v8069_v32  ;;  %7450 = vmatprep.subr.bf16.mxu1 %v8070_v36  ;;  %v1217_v1 = vrot.slane %v8469_v26, 2  ;;  %v1219_v3 = vrot.slane %v8432_v11, 2  ;;  %v1220_v7 = vrot.slane %v8485_v30, 2  ;;  %v1222_v8 = vrot.slane %v8418_v6, 2 }
  0x27   : > { %10396 = vst [vmem:[#allocation10_spill] sm:$0xff] %v8545_v57  ;;  %v1212_v12 = vsel %vm1209_vm2, %v1210_v56, %v1211_v59  ;;  %v8573_v13 = vsel %vm1209_vm2, %v1213_v60, %v1214_v63  ;;  %v1223_v14 = vrot.slane %v8503_v37, 2  ;;  %v8580_v20 = vpack.c.bf16 %v8553_v61, %v8548_v58 }
  0x28   : > { %7443 = vmatmul.mubr.msk.bf16.vlgmr.msra.gmra.mxu0 %vm777_vm0, %v8531_v50  ;;  %7431 = vmatmul.mubr.msk.bf16.vlgmr.msra.gmra.mxu1 %vm777_vm0, %v8443_v16  ;;  %v8590_v23 = vsel %vm1209_vm2, %v1216_v0, %v1217_v1  ;;  %v1221_v25 = vsel %vm1209_vm2, %v1219_v3, %v1220_v7  ;;  %v1225_v34 = vrot.slane %v8426_v9, 2  ;;  %v1226_v35 = vrot.slane %v8513_v41, 2 }
  0x29   : > { %7463 = vmatpush3.bf16.msra.mxu0 %v8069_v32  ;;  %7451 = vmatpush3.bf16.msra.mxu1 %v8070_v36  ;;  %10397 = vst [vmem:[#allocation11_spill] sm:$0xff] %v8580_v20  ;;  %v1224_v31 = vsel %vm1209_vm2, %v1222_v8, %v1223_v14  ;;  %v8600_v32 = vpack.c.bf16 %v8573_v13, %v1212_v12  ;;  %v1228_v38 = vrot.slane %v8446_v17, 2  ;;  %v1229_v42 = vrot.slane %v8517_v43, 2 }
  0x2a   : > { %7434 = vmatprep.mubr.msk.bf16.mxu1 %vm777_vm0, %v8439_v15  ;;  %7446 = vmatprep.mubr.msk.bf16.mxu0 %vm777_vm0, %v8545_v57  ;;  %v8604_v36 = vpack.c.bf16 %v1224_v31, %v1221_v25  ;;  %v1231_v44 = vrot.slane %v8449_v18, 2  ;;  %v1232_v46 = vrot.slane %v8527_v48, 2  ;;  %v1439_v47 = vrot.slane %v8412_v4, 3 }
  0x2b   : > { %7464 = vmatprep.subr.bf16.mxu0 %v8071_v62  ;;  %7452 = vmatprep.subr.bf16.mxu1 %v8072_v2  ;;  %v1440_v49 = vrot.slane %v8452_v19, 3  ;;  %v1442_v51 = vrot.slane %v8415_v5, 3  ;;  %v1443_v52 = vrot.slane %v8465_v24, 3  ;;  %v1448_v53 = vrot.slane %v8432_v11, 3 }
  0x2c   : > { %10398 = vst [vmem:[#allocation12_spill] sm:$0xff] %v8604_v36  ;;  %v1449_v56 = vrot.slane %v8485_v30, 3  ;;  %v8621_v59 = vpack.c.bf16 %v1221_v25, %v8590_v23  ;;  %v8624_v60 = vsel %vm1209_vm2, %v1225_v34, %v1226_v35  ;;  %v1452_v63 = vrot.slane %v8503_v37, 3 }
  0x2d   : > { %7465 = vmatpush3.bf16.msra.mxu0 %v8071_v62  ;;  %7453 = vmatpush3.bf16.msra.mxu1 %v8072_v2  ;;  %v1451_v62 = vrot.slane %v8418_v6, 3  ;;  %v1445_v0 = vrot.slane %v8429_v10, 3  ;;  %v1446_v1 = vrot.slane %v8469_v26, 3  ;;  %v1454_v2 = vrot.slane %v8426_v9, 3 }
  0x2e   : > { %7486 = vmatprep.subr.bf16.mxu0 %v8585_v21  ;;  %7474 = vmatprep.subr.bf16.mxu1 %v8596_v29  ;;  %v1455_v3 = vrot.slane %v8513_v41, 3  ;;  %v1450_v7 = vsel %vm1438_vm3, %v1448_v53, %v1449_v56  ;;  %v1457_v12 = vrot.slane %v8446_v17, 3  ;;  %v1458_v14 = vrot.slane %v8517_v43, 3 }
  0x2f   : > { %v1453_v8 = vsel %vm1438_vm3, %v1451_v62, %v1452_v63  ;;  %v8643_v25 = vpack.c.bf16 %v8624_v60, %v1224_v31  ;;  %v1460_v35 = vrot.slane %v8449_v18, 3  ;;  %v8650_v15 = vsel %vm1209_vm2, %v1228_v38, %v1229_v42  ;;  %v8075_v38 = vld [vmem:[%s10385_s3 + $0x30] sm:$0xff]  }
  0x30   : > { %7447 = vmatmul.mubr.msk.bf16.gmra.mxu0 %vm777_vm0, %v8580_v20  ;;  %7435 = vmatmul.mubr.msk.bf16.gmra.mxu1 %vm777_vm0, %v8459_v22  ;;  %v8645_v34 = vpack.c.bf16 %v1453_v8, %v1450_v7  ;;  %v1461_v22 = vrot.slane %v8527_v48, 3  ;;  %v1668_v53 = vrot.slane %v8412_v4, 4  ;;  %v1669_v56 = vrot.slane %v8452_v19, 4 }
  0x31   : > { %7466 = vmatprep.mubr.msk.bf16.mxu0 %vm777_vm0, %v8600_v32  ;;  %7454 = vmatprep.mubr.msk.bf16.mxu1 %vm777_vm0, %v8522_v45  ;;  %10399 = vst [vmem:[#allocation13_spill] sm:$0xff] %v8643_v25  ;;  %v8653_v45 = vsel %vm1209_vm2, %v1231_v44, %v1232_v46  ;;  %v1441_v31 = vsel %vm1438_vm3, %v1439_v47, %v1440_v49  ;;  %v1671_v63 = vrot.slane %v8415_v5, 4  ;;  %v1672_v16 = vrot.slane %v8465_v24, 4  ;;  %v8076_v49 = vld [vmem:[%s10386_s30 + $0x20] sm:$0xff]  }
  0x32   : > { %10400 = vst [vmem:[#allocation14_spill] sm:$0xff] %v8645_v34  ;;  %v8659_v62 = vsel %vm1438_vm3, %v1442_v51, %v1443_v52  ;;  %v8667_v42 = vsel %vm1438_vm3, %v1445_v0, %v1446_v1  ;;  %v8670_v44 = vsel %vm1438_vm3, %v1454_v2, %v1455_v3  ;;  %v8673_v46 = vsel %vm1438_vm3, %v1457_v12, %v1458_v14 }
  0x33   : > { %v1677_v47 = vrot.slane %v8432_v11, 4  ;;  %v8680_v51 = vsel %vm1438_vm3, %v1460_v35, %v1461_v22  ;;  %v1678_v52 = vrot.slane %v8485_v30, 4  ;;  %v1680_v0 = vrot.slane %v8418_v6, 4  ;;  %v8699_v22 = vld [vmem:[%s10385_s3 + $0x48] sm:$0xff]  }
  0x34   : > { %v1681_v1 = vrot.slane %v8503_v37, 4  ;;  %v1670_v2 = vsel %vm1667_vm4, %v1668_v53, %v1669_v56  ;;  %v8689_v3 = vsel %vm1667_vm4, %v1671_v63, %v1672_v16  ;;  %v1674_v12 = vrot.slane %v8429_v10, 4 }
  0x35   : > { %v1675_v14 = vrot.slane %v8469_v26, 4  ;;  %v8702_v35 = vsel %vm1667_vm4, %v1677_v47, %v1678_v52  ;;  %v1683_v53 = vrot.slane %v8426_v9, 4  ;;  %v1684_v56 = vrot.slane %v8513_v41, 4 }
  0x36   : > { %v8705_v16 = vsel %vm1667_vm4, %v1680_v0, %v1681_v1  ;;  %v1686_v47 = vrot.slane %v8446_v17, 4  ;;  %v1687_v52 = vrot.slane %v8517_v43, 4  ;;  %v8728_v0 = vpack.c.bf16 %v1450_v7, %v8667_v42  ;;  %v8733_v1 = vld [vmem:[%s10386_s30 + $0x38] sm:$0xff]  }
  0x37   : > { %v8718_v63 = vpack.c.bf16 %v8705_v16, %v8702_v35  ;;  %v8746_v7 = vsel %vm1667_vm4, %v1674_v12, %v1675_v14  ;;  %v1906_v36 = vrot.slane %v8432_v11, 5  ;;  %v1907_v55 = vrot.slane %v8485_v30, 5 }
  0x38   : > { %7467 = vmatmul.mubr.msk.bf16.vlgmr.msra.gmra.mxu0 %vm777_vm0, %v8621_v59  ;;  %7455 = vmatmul.mubr.msk.bf16.vlgmr.msra.gmra.mxu1 %vm777_vm0, %v8531_v50  ;;  %v8740_v50 = vpack.c.bf16 %v8680_v51, %v8673_v46  ;;  %v8758_v12 = vsel %vm1667_vm4, %v1686_v47, %v1687_v52  ;;  %v1910_v28 = vrot.slane %v8503_v37, 5  ;;  %v1913_v47 = vrot.slane %v8513_v41, 5 }
  0x39   : > { %7487 = vmatpush3.bf16.msra.mxu0 %v8585_v21  ;;  %7475 = vmatpush3.bf16.msra.mxu1 %v8596_v29  ;;  %v8714_v21 = vpack.c.bf16 %v8653_v45, %v8650_v15  ;;  %10401 = vst [vmem:[#allocation15_spill] sm:$0xff] %v8718_v63  ;;  %v8725_v29 = vpack.c.bf16 %v8659_v62, %v1441_v31  ;;  %v1903_v63 = vrot.slane %v8429_v10, 5  ;;  %v1915_v52 = vrot.slane %v8446_v17, 5 }
  0x3a   : > { %7458 = vmatprep.mubr.msk.bf16.mxu1 %vm777_vm0, %v8545_v57  ;;  %7470 = vmatprep.mubr.msk.bf16.mxu0 %vm777_vm0, %v8643_v25  ;;  %v8736_v57 = vpack.c.bf16 %v8670_v44, %v1453_v8  ;;  %v8743_v31 = vpack.c.bf16 %v8689_v3, %v1670_v2  ;;  %v1904_v8 = vrot.slane %v8469_v26, 5  ;;  %v8755_v2 = vsel %vm1667_vm4, %v1683_v53, %v1684_v56 }
  0x3b   : > { %7488 = vmatprep.subr.bf16.mxu0 %v8075_v38  ;;  %7476 = vmatprep.subr.bf16.mxu1 %v8076_v49  ;;  %v1912_v56 = vrot.slane %v8426_v9, 5  ;;  %v2127_v27 = vrot.slane %v8452_v19, 6 }
  0x3c   : > { %v8765_v33 = vsel %vm1896_vm5, %v1903_v63, %v1904_v8  ;;  %v1918_v63 = vrot.slane %v8449_v18, 5  ;;  %v1919_v8 = vrot.slane %v8527_v48, 5 }
  0x3d   : > { %7489 = vmatpush3.bf16.msra.mxu0 %v8075_v38  ;;  %7477 = vmatpush3.bf16.msra.mxu1 %v8076_v49  ;;  %v1909_v38 = vrot.slane %v8418_v6, 5  ;;  %v1908_v49 = vsel %vm1896_vm5, %v1906_v36, %v1907_v55  ;;  %v1916_v36 = vrot.slane %v8517_v43, 5  ;;  %v8788_v14 = vsel %vm1896_vm5, %v1912_v56, %v1913_v47 }
  0x3e   : > { %7510 = vmatprep.subr.bf16.mxu0 %v8699_v22  ;;  %7498 = vmatprep.subr.bf16.mxu1 %v8733_v1  ;;  %v8772_v53 = vpack.c.bf16 %v1908_v49, %v8765_v33  ;;  %v2130_v47 = vrot.slane %v8465_v24, 6 }
  0x3f   : > { %v1911_v55 = vsel %vm1896_vm5, %v1909_v38, %v1910_v28  ;;  %v8798_v38 = vsel %vm1896_vm5, %v1915_v52, %v1916_v36  ;;  %v8079_v52 = vld [vmem:[%s10385_s3 + $0x40] sm:$0xff]   ;;  %v2133_v36 = vrot.slane %v8469_v26, 6  ;;  %v2142_v26 = vrot.slane %v8513_v41, 6 }
  0x40   : > { %7471 = vmatmul.mubr.msk.bf16.gmra.mxu0 %vm777_vm0, %v8714_v21  ;;  %10402 = vst [vmem:[#allocation16_spill] sm:$0xff] %v8772_v53  ;;  %7459 = vmatmul.mubr.msk.bf16.gmra.mxu1 %vm777_vm0, %v8580_v20  ;;  %v8790_v34 = vpack.c.bf16 %v1911_v55, %v1908_v49  ;;  %v2126_v20 = vrot.slane %v8412_v4, 6  ;;  %v8795_v28 = vpack.c.bf16 %v8788_v14, %v1911_v55  ;;  %v2132_v55 = vrot.slane %v8429_v10, 6 }
  0x41   : > { %7490 = vmatprep.mubr.msk.bf16.mxu0 %vm777_vm0, %v8725_v29  ;;  %7478 = vmatprep.mubr.msk.bf16.mxu1 %vm777_vm0, %v8600_v32  ;;  %v8801_v53 = vsel %vm1896_vm5, %v1918_v63, %v1919_v8  ;;  %v2129_v32 = vrot.slane %v8415_v5, 6  ;;  %v2135_v63 = vrot.slane %v8432_v11, 6  ;;  %v2136_v8 = vrot.slane %v8485_v30, 6 }
  0x42   : > { %10403 = vst [vmem:[#allocation17_spill] sm:$0xff] %v8790_v34  ;;  %10404 = vst [vmem:[#allocation18_spill] sm:$0xff] %v8795_v28  ;;  %v8806_v56 = vpack.c.bf16 %v8801_v53, %v8798_v38  ;;  %v2128_v49 = vsel %vm2125_vm6, %v2126_v20, %v2127_v27  ;;  %v2138_v34 = vrot.slane %v8418_v6, 6  ;;  %v8080_v27 = vld [vmem:[%s10386_s30 + $0x30] sm:$0xff]   ;;  %v2139_v10 = vrot.slane %v8503_v37, 6 }
  0x43   : > { %10405 = vst [vmem:[#allocation19_spill] sm:$0xff] %v8801_v53  ;;  %v8822_v20 = vsel %vm2125_vm6, %v2129_v32, %v2130_v47  ;;  %v8831_v30 = vsel %vm2125_vm6, %v2132_v55, %v2133_v36  ;;  %v2137_v6 = vsel %vm2125_vm6, %v2135_v63, %v2136_v8  ;;  %v2144_v28 = vrot.slane %v8446_v17, 6  ;;  %v8836_v53 = vld [vmem:[%s8409_s27 + $0x80] sm:$0xff]  ;;  %v8884_v8 = vld [vmem:[%s8409_s27 + $0x90] sm:$0xff] }
  0x44   : > { %10406 = vst [vmem:[#allocation20_spill] sm:$0xff] %v8806_v56  ;;  %v2141_v56 = vrot.slane %v8426_v9, 6  ;;  %v8828_v11 = vpack.c.bf16 %v8822_v20, %v2128_v49  ;;  %v8843_v9 = vld [vmem:[%s10385_s3 + $0x58] sm:$0xff]   ;;  %v8846_v37 = vpack.c.bf16 %v2137_v6, %v8831_v30  ;;  %v2140_v41 = vsel %vm2125_vm6, %v2138_v34, %v2139_v10  ;;  %v8854_v49 = vld [vmem:[%s8409_s27 + $0x88] sm:$0x3f] }
  0x45   : > { %v2145_v17 = vrot.slane %v8517_v43, 6  ;;  %v8862_v55 = vpack.c.bf16 %v2140_v41, %v2137_v6  ;;  %v2147_v34 = vrot.slane %v8449_v18, 6  ;;  %v2148_v36 = vrot.slane %v8527_v48, 6 }
  0x46   : > { %v8850_v32 = vsel %vm2125_vm6, %v2141_v56, %v2142_v26  ;;  %v8867_v56 = vld [vmem:[%s8409_s27 + $0x98] sm:$0x3f]  ;;  %v8881_v63 = vpack.c.bf16 %v8510_v40, %v8507_v39  ;;  %v2552_v10 = vrot.slane %v8836_v53, 1  ;;  %v8899_v39 = vpack.c.bf16 %v8548_v58, %v8539_v54  ;;  %s717_s27 = scalar_lea.vmem %s10349_s21, %s7094_s4 }
  0x47   : > { %v8860_v47 = vpack.c.bf16 %v8850_v32, %v2140_v41  ;;  %v8873_v43 = vsel %vm2125_vm6, %v2144_v28, %v2145_v17  ;;  %v8895_v28 = vsel %vm2125_vm6, %v2147_v34, %v2148_v36  ;;  %v2553_v40 = vrot.slane %v8854_v49, 1 }
  0x48   : > { %7491 = vmatmul.mubr.msk.bf16.vlgmr.msra.gmra.mxu0 %vm777_vm0, %v8728_v0  ;;  %7479 = vmatmul.mubr.msk.bf16.vlgmr.msra.gmra.mxu1 %vm777_vm0, %v8621_v59  ;;  %v3938_v26 = vrot.slane %v8884_v8, 1  ;;  %v8905_v6 = vpack.c.bf16 %v8895_v28, %v8873_v43  ;;  %v3939_v41 = vrot.slane %v8867_v56, 1  ;;  %v8910_v17 = vpack.c.bf16 %v8590_v23, %v8573_v13 }
  0x49   : > { %7511 = vmatpush3.bf16.msra.mxu0 %v8699_v22  ;;  %7499 = vmatpush3.bf16.msra.mxu1 %v8733_v1  ;;  %v8877_v22 = vpack.c.bf16 %v8836_v53, %v8449_v18  ;;  %v8892_v1 = vld [vmem:[%s10386_s30 + $0x48] sm:$0xff]   ;;  %v8914_v34 = vpack.c.bf16 %v8650_v15, %v8624_v60  ;;  %v2554_v54 = vsel %vm980_vm1, %v2552_v10, %v2553_v40  ;;  %v2752_v58 = vrot.slane %v8836_v53, 2 }
  0x4a   : > { %7482 = vmatprep.mubr.msk.bf16.mxu1 %vm777_vm0, %v8643_v25  ;;  %7494 = vmatprep.mubr.msk.bf16.mxu0 %vm777_vm0, %v8736_v57  ;;  %v2753_v36 = vrot.slane %v8854_v49, 2  ;;  %v8921_v25 = vpack.c.bf16 %v8667_v42, %v8659_v62  ;;  %v8925_v13 = vpack.c.bf16 %v2554_v54, %v8553_v61  ;;  %v3940_v15 = vsel %vm980_vm1, %v3938_v26, %v3939_v41 }
  0x4b   : > { %7512 = vmatprep.subr.bf16.mxu0 %v8079_v52  ;;  %7500 = vmatprep.subr.bf16.mxu1 %v8080_v27  ;;  %v4126_v23 = vrot.slane %v8884_v8, 2  ;;  %v4127_v60 = vrot.slane %v8867_v56, 2  ;;  %v8936_v62 = vpack.c.bf16 %v8673_v46, %v8670_v44  ;;  %v2952_v42 = vrot.slane %v8836_v53, 3 }
  0x4c   : > { %v2754_v10 = vsel %vm1209_vm2, %v2752_v58, %v2753_v36  ;;  %v2953_v40 = vrot.slane %v8854_v49, 3  ;;  %v8948_v26 = vpack.c.bf16 %v8746_v7, %v8689_v3  ;;  %v10407_v44 = vrot.slane %v8465_v24, 5 }
  0x4d   : > { %7513 = vmatpush3.bf16.msra.mxu0 %v8079_v52  ;;  %7501 = vmatpush3.bf16.msra.mxu1 %v8080_v27  ;;  %v8931_v52 = vpack.c.bf16 %v3940_v15, %v2554_v54  ;;  %v8942_v61 = vpack.c.bf16 %v2754_v10, %v8653_v45  ;;  %v4128_v27 = vsel %vm1209_vm2, %v4126_v23, %v4127_v60  ;;  %v10408_v46 = vrot.slane %v8415_v5, 5 }
  0x4e   : > { %7534 = vmatprep.subr.bf16.mxu0 %v8843_v9  ;;  %7522 = vmatprep.subr.bf16.mxu1 %v8892_v1  ;;  %v8959_v41 = vpack.c.bf16 %v4128_v27, %v2754_v10  ;;  %v4314_v54 = vrot.slane %v8884_v8, 3  ;;  %v8964_v3 = vpack.c.bf16 %v8758_v12, %v8755_v2  ;;  %v1690_v58 = vrot.slane %v8527_v48, 4 }
  0x4f   : > { %v1902_v45 = vsel %vm1896_vm5, %v10408_v46, %v10407_v44  ;;  %v2954_v36 = vsel %vm1438_vm3, %v2952_v42, %v2953_v40  ;;  %v4315_v24 = vrot.slane %v8867_v56, 3  ;;  %v3152_v23 = vrot.slane %v8836_v53, 4 }
  0x50   : > { %7495 = vmatmul.mubr.msk.bf16.gmra.mxu0 %vm777_vm0, %v8740_v50  ;;  %7483 = vmatmul.mubr.msk.bf16.gmra.mxu1 %vm777_vm0, %v8714_v21  ;;  %v8972_v5 = vpack.c.bf16 %v8765_v33, %v1902_v45  ;;  %v8975_v15 = vpack.c.bf16 %v2954_v36, %v8680_v51  ;;  %v8980_v60 = vpack.c.bf16 %v8702_v35, %v8746_v7  ;;  %v3153_v48 = vrot.slane %v8854_v49, 4 }
  0x51   : > { %7514 = vmatprep.mubr.msk.bf16.mxu0 %vm777_vm0, %v8743_v31  ;;  %7502 = vmatprep.mubr.msk.bf16.mxu1 %vm777_vm0, %v8725_v29  ;;  %v4316_v29 = vsel %vm1438_vm3, %v4314_v54, %v4315_v24  ;;  %v1897_v10 = vrot.slane %v8412_v4, 5  ;;  %v4502_v33 = vrot.slane %v8884_v8, 4  ;;  %v10409_v27 = vrot.slane %v8449_v18, 4  ;;  %v8083_v4 = vld [vmem:[%s10385_s3 + $0x50] sm:$0xff]   ;;  %v8084_v18 = vld [vmem:[%s10386_s30 + $0x40] sm:$0xff]   ;;  %v8085_v54 = vld [vmem:[%s10385_s3 + $0x68] sm:$0xff]  }
  0x52   : > { %v8985_v42 = vpack.c.bf16 %v4316_v29, %v2954_v36  ;;  %v1898_v40 = vrot.slane %v8452_v19, 5  ;;  %v3154_v44 = vsel %vm1667_vm4, %v3152_v23, %v3153_v48  ;;  %v4503_v35 = vrot.slane %v8867_v56, 4 }
  0x53   : > { %v1691_v51 = vsel %vm1667_vm4, %v10409_v27, %v1690_v58  ;;  %v8996_v7 = vpack.c.bf16 %v8755_v2, %v8705_v16  ;;  %v9023_v58 = vpack.c.bf16 %v8798_v38, %v8788_v14  ;;  %v3352_v36 = vrot.slane %v8836_v53, 5  ;;  %v10410_v38 = vld [vmem:[#allocation19_spill] sm:$0xff]  ;;  %v8088_v27 = vld [vmem:[%s10386_s30 + $0x50] sm:$0xff]  }
  0x54   : > { %v9001_v46 = vpack.c.bf16 %v3154_v44, %v1691_v51  ;;  %v4504_v19 = vsel %vm1667_vm4, %v4502_v33, %v4503_v35  ;;  %v1899_v2 = vsel %vm1896_vm5, %v1897_v10, %v1898_v40  ;;  %v3353_v24 = vrot.slane %v8854_v49, 5  ;;  %v8087_v10 = vld [vmem:[%s10385_s3 + $0x60] sm:$0xff]   ;;  %v8089_v40 = vld [vmem:[%s10385_s3 + $0x78] sm:$0xff]  }
  0x55   : > { %v9012_v16 = vpack.c.bf16 %v4504_v19, %v3154_v44  ;;  %v1929_v23 = vpack.c.bf16 %v1902_v45, %v1899_v2  ;;  %v4691_v45 = vrot.slane %v8867_v56, 5  ;;  %v3552_v44 = vrot.slane %v8836_v53, 6  ;;  %v10413_v2 = vld [vmem:[#allocation20_spill] sm:$0xff] }
  0x56   : > { %v3354_v14 = vsel %vm1896_vm5, %v3352_v36, %v3353_v24  ;;  %v3553_v35 = vrot.slane %v8854_v49, 6  ;;  %v4879_v49 = vrot.slane %v8867_v56, 6  ;;  %v8093_v36 = vld [vmem:[%s10385_s3 + $0x88] sm:$0xff]   ;;  %v8094_v56 = vld [vmem:[%s10386_s30 + $0x78] sm:$0xff]   ;;  %v9119_v24 = vpack.c.bf16 %v8884_v8, %v8836_v53  ;;  %v8096_v53 = vld [vmem:[%s10386_s30 + $0x70] sm:$0xff]  }
  0x57   : > { %v9037_v29 = vpack.c.bf16 %v3354_v14, %v10410_v38  ;;  %v10415_v38 = vld [vmem:[#allocation6_spill] sm:$0xff] }
  0x58   : > { %7515 = vmatmul.mubr.msk.bf16.vlgmr.msra.gmra.mxu0 %vm777_vm0, %v8980_v60  ;;  %7503 = vmatmul.mubr.msk.bf16.vlgmr.msra.gmra.mxu1 %vm777_vm0, %v8728_v0 }
  0x59   : > { %7535 = vmatpush3.bf16.msra.mxu0 %v8843_v9  ;;  %7523 = vmatpush3.bf16.msra.mxu1 %v8892_v1  ;;  %v8086_v9 = vld [vmem:[%s10386_s30 + $0x58] sm:$0xff]   ;;  %v9031_v1 = vpack.c.bf16 %v1691_v51, %v8758_v12  ;;  %v4690_v12 = vrot.slane %v8884_v8, 5  ;;  %v9059_v51 = vpack.c.bf16 %v8831_v30, %v8822_v20  ;;  %v8090_v20 = vld [vmem:[%s10386_s30 + $0x68] sm:$0xff]   ;;  %v10412_v30 = vld [vmem:[#allocation18_spill] sm:$0xff] }
  0x5a   : > { %7506 = vmatprep.mubr.msk.bf16.mxu1 %vm777_vm0, %v8736_v57  ;;  %7518 = vmatprep.mubr.msk.bf16.mxu0 %vm777_vm0, %v8996_v7 }
  0x5b   : > { %7536 = vmatprep.subr.bf16.mxu0 %v8083_v4  ;;  %7524 = vmatprep.subr.bf16.mxu1 %v8084_v18  ;;  %v4692_v48 = vsel %vm1896_vm5, %v4690_v12, %v4691_v45  ;;  %v8098_v12 = vld [vmem:[%s10386_s30 + $0x88] sm:$0xff]   ;;  %v8099_v45 = vld [vmem:[%s10385_s3 + $0x90] sm:$0xff]  }
  0x5c   : > { %v9052_v33 = vpack.c.bf16 %v4692_v48, %v3354_v14  ;;  %v8095_v14 = vld [vmem:[%s10385_s3 + $0x80] sm:$0xff]   ;;  %v10417_v48 = vld [vmem:[#allocation9_spill] sm:$0xff] }
  0x5d   : > { %7537 = vmatpush3.bf16.msra.mxu0 %v8083_v4  ;;  %7525 = vmatpush3.bf16.msra.mxu1 %v8084_v18  ;;  %v9079_v4 = vpack.c.bf16 %v8873_v43, %v8850_v32  ;;  %v3554_v18 = vsel %vm2125_vm6, %v3552_v44, %v3553_v35  ;;  %v4878_v32 = vrot.slane %v8884_v8, 6  ;;  %v10416_v8 = vld [vmem:[#allocation7_spill] sm:$0xff]  ;;  %v10418_v44 = vld [vmem:[#allocation12_spill] sm:$0xff] }
  0x5e   : > { %7558 = vmatprep.subr.bf16.mxu0 %v8085_v54  ;;  %7546 = vmatprep.subr.bf16.mxu1 %v8086_v9  ;;  %v9083_v19 = vpack.c.bf16 %v3554_v18, %v8895_v28  ;;  %v8091_v28 = vld [vmem:[%s10385_s3 + $0x70] sm:$0xff]  }
  0x5f   : > { %v4880_v43 = vsel %vm2125_vm6, %v4878_v32, %v4879_v49  ;;  %v8104_v35 = vld [vmem:[%s10386_s30 + $0x90] sm:$0xff]   ;;  %v8108_v32 = vld [vmem:[%s10386_s30 + $0xa0] sm:$0xff]   ;;  %v10420_v49 = vld [vmem:[#allocation15_spill] sm:$0xff] }
  0x60   : > { %7519 = vmatmul.mubr.msk.bf16.gmra.mxu0 %vm777_vm0, %v9031_v1  ;;  %7507 = vmatmul.mubr.msk.bf16.gmra.mxu1 %vm777_vm0, %v8740_v50 }
  0x61   : > { %7538 = vmatprep.mubr.msk.bf16.mxu0 %vm777_vm0, %v1929_v23  ;;  %7526 = vmatprep.mubr.msk.bf16.mxu1 %vm777_vm0, %v8743_v31  ;;  %v10411_v31 = vld [vmem:[#allocation16_spill] sm:$0xff] }
  0x68   : > { %7539 = vmatmul.mubr.msk.bf16.vlgmr.msra.gmra.mxu0 %vm777_vm0, %v10411_v31  ;;  %7527 = vmatmul.mubr.msk.bf16.vlgmr.msra.gmra.mxu1 %vm777_vm0, %v8980_v60 }
  0x69   : > { %7559 = vmatpush3.bf16.msra.mxu0 %v8085_v54  ;;  %7547 = vmatpush3.bf16.msra.mxu1 %v8086_v9  ;;  %v9098_v54 = vpack.c.bf16 %v4880_v43, %v3554_v18  ;;  %v8092_v9 = vld [vmem:[%s10386_s30 + $0x60] sm:$0xff]   ;;  %v8112_v43 = vld [vmem:[%s10386_s30 + $0xb0] sm:$0xff]  }
  0x6a   : > { %7530 = vmatprep.mubr.msk.bf16.mxu1 %vm777_vm0, %v8996_v7  ;;  %7542 = vmatprep.mubr.msk.bf16.mxu0 %vm777_vm0, %v10412_v30  ;;  %v10419_v18 = vld [vmem:[#allocation14_spill] sm:$0xff] }
  0x6b   : > { %7560 = vmatprep.subr.bf16.mxu0 %v8087_v10  ;;  %7548 = vmatprep.subr.bf16.mxu1 %v8088_v27 }
  0x6d   : > { %7561 = vmatpush3.bf16.msra.mxu0 %v8087_v10  ;;  %7549 = vmatpush3.bf16.msra.mxu1 %v8088_v27  ;;  %v8100_v10 = vld [vmem:[%s10386_s30 + $0x80] sm:$0xff]   ;;  %v8101_v27 = vld [vmem:[%s10385_s3 + $0xa8] sm:$0xff]  }
  0x6e   : > { %7582 = vmatprep.subr.bf16.mxu0 %v8089_v40  ;;  %7570 = vmatprep.subr.bf16.mxu1 %v8090_v20 }
  0x70   : > { %7543 = vmatmul.mubr.msk.bf16.gmra.mxu0 %vm777_vm0, %v10413_v2  ;;  %7531 = vmatmul.mubr.msk.bf16.gmra.mxu1 %vm777_vm0, %v9031_v1 }
  0x71   : > { %7562 = vmatprep.mubr.msk.bf16.mxu0 %vm777_vm0, %v8828_v11  ;;  %7550 = vmatprep.mubr.msk.bf16.mxu1 %vm777_vm0, %v1929_v23  ;;  %v10414_v23 = vld [vmem:[#allocation5_spill] sm:$0xff] }
  0x78   : > { %7563 = vmatmul.mubr.msk.bf16.vlgmr.msra.gmra.mxu0 %vm777_vm0, %v8846_v37  ;;  %7551 = vmatmul.mubr.msk.bf16.vlgmr.msra.gmra.mxu1 %vm777_vm0, %v10411_v31 }
  0x79   : > { %7583 = vmatpush3.bf16.msra.mxu0 %v8089_v40  ;;  %7571 = vmatpush3.bf16.msra.mxu1 %v8090_v20  ;;  %v8102_v40 = vld [vmem:[%s10386_s30 + $0x98] sm:$0xff]   ;;  %v8103_v20 = vld [vmem:[%s10385_s3 + $0xa0] sm:$0xff]  }
  0x7a   : > { %7554 = vmatprep.mubr.msk.bf16.mxu1 %vm777_vm0, %v10412_v30  ;;  %7566 = vmatprep.mubr.msk.bf16.mxu0 %vm777_vm0, %v8860_v47 }
  0x7b   : > { %7584 = vmatprep.subr.bf16.mxu0 %v8091_v28  ;;  %7572 = vmatprep.subr.bf16.mxu1 %v8092_v9 }
  0x7d   : > { %7585 = vmatpush3.bf16.msra.mxu0 %v8091_v28  ;;  %7573 = vmatpush3.bf16.msra.mxu1 %v8092_v9  ;;  %v10421_v28 = vld [vmem:[#allocation17_spill] sm:$0xff]  ;;  %v8116_v9 = vld [vmem:[%s10386_s30 + $0xc0] sm:$0xff]  }
  0x7e   : > { %7606 = vmatprep.subr.bf16.mxu0 %v8093_v36  ;;  %7594 = vmatprep.subr.bf16.mxu1 %v8094_v56 }
  0x80   : > { %7567 = vmatmul.mubr.msk.bf16.gmra.mxu0 %vm777_vm0, %v8905_v6  ;;  %7555 = vmatmul.mubr.msk.bf16.gmra.mxu1 %vm777_vm0, %v10413_v2 }
  0x81   : > { %7586 = vmatprep.mubr.msk.bf16.mxu0 %vm777_vm0, %v10414_v23  ;;  %7574 = vmatprep.mubr.msk.bf16.mxu1 %vm777_vm0, %v8828_v11  ;;  %v8097_v11 = vld [vmem:[%s10385_s3 + $0x98] sm:$0xff]  }
  0x88   : > { %7587 = vmatmul.mubr.msk.bf16.vlgmr.msra.gmra.mxu0 %vm777_vm0, %v10415_v38  ;;  %7575 = vmatmul.mubr.msk.bf16.vlgmr.msra.gmra.mxu1 %vm777_vm0, %v8846_v37 }
  0x89   : > { %7607 = vmatpush3.bf16.msra.mxu0 %v8093_v36  ;;  %7595 = vmatpush3.bf16.msra.mxu1 %v8094_v56 }
  0x8a   : > { %7578 = vmatprep.mubr.msk.bf16.mxu1 %vm777_vm0, %v8860_v47  ;;  %7590 = vmatprep.mubr.msk.bf16.mxu0 %vm777_vm0, %v10416_v8 }
  0x8b   : > { %7608 = vmatprep.subr.bf16.mxu0 %v8095_v14  ;;  %7596 = vmatprep.subr.bf16.mxu1 %v8096_v53 }
  0x8d   : > { %7609 = vmatpush3.bf16.msra.mxu0 %v8095_v14  ;;  %7597 = vmatpush3.bf16.msra.mxu1 %v8096_v53  ;;  %v6578_v14 = vld [vmem:[%s10422_s26] ss:$0 sm:$0xff]  ;;  %s10424_s26 = sld [smem:[#allocation30_spill]] }
  0x8e   : > { %7630 = vmatprep.subr.bf16.mxu0 %v8097_v11  ;;  %7618 = vmatprep.subr.bf16.mxu1 %v8098_v12 }
  0x90   : > { %7591 = vmatmul.mubr.msk.bf16.gmra.mxu0 %vm777_vm0, %v8877_v22  ;;  %7579 = vmatmul.mubr.msk.bf16.gmra.mxu1 %vm777_vm0, %v8905_v6 }
  0x91   : > { %7610 = vmatprep.mubr.msk.bf16.mxu0 %vm777_vm0, %v8881_v63  ;;  %7598 = vmatprep.mubr.msk.bf16.mxu1 %vm777_vm0, %v10414_v23 }
  0x98   : > { %7611 = vmatmul.mubr.msk.bf16.vlgmr.msra.gmra.mxu0 %vm777_vm0, %v10417_v48  ;;  %7599 = vmatmul.mubr.msk.bf16.vlgmr.msra.gmra.mxu1 %vm777_vm0, %v10415_v38 }
  0x99   : > { %7631 = vmatpush3.bf16.msra.mxu0 %v8097_v11  ;;  %7619 = vmatpush3.bf16.msra.mxu1 %v8098_v12 }
  0x9a   : > { %7602 = vmatprep.mubr.msk.bf16.mxu1 %vm777_vm0, %v10416_v8  ;;  %7614 = vmatprep.mubr.msk.bf16.mxu0 %vm777_vm0, %v8899_v39 }
  0x9b   : > { %7632 = vmatprep.subr.bf16.mxu0 %v8099_v45  ;;  %7620 = vmatprep.subr.bf16.mxu1 %v8100_v10 }
  0x9d   : > { %7633 = vmatpush3.bf16.msra.mxu0 %v8099_v45  ;;  %7621 = vmatpush3.bf16.msra.mxu1 %v8100_v10 }
  0x9e   : > { %7654 = vmatprep.subr.bf16.mxu0 %v8101_v27  ;;  %7642 = vmatprep.subr.bf16.mxu1 %v8102_v40 }
  0xa0   : > { %7615 = vmatmul.mubr.msk.bf16.gmra.mxu0 %vm777_vm0, %v8925_v13  ;;  %7603 = vmatmul.mubr.msk.bf16.gmra.mxu1 %vm777_vm0, %v8877_v22  ;;  %v8105_v22 = vld [vmem:[%s10385_s3 + $0xb8] sm:$0xff]  }
  0xa1   : > { %7634 = vmatprep.mubr.msk.bf16.mxu0 %vm777_vm0, %v8910_v17  ;;  %7622 = vmatprep.mubr.msk.bf16.mxu1 %vm777_vm0, %v8881_v63  ;;  %v8106_v63 = vld [vmem:[%s10386_s30 + $0xa8] sm:$0xff]  }
  0xa8   : > { %7635 = vmatmul.mubr.msk.bf16.vlgmr.msra.gmra.mxu0 %vm777_vm0, %v10418_v44  ;;  %7623 = vmatmul.mubr.msk.bf16.vlgmr.msra.gmra.mxu1 %vm777_vm0, %v10417_v48 }
  0xa9   : > { %7655 = vmatpush3.bf16.msra.mxu0 %v8101_v27  ;;  %7643 = vmatpush3.bf16.msra.mxu1 %v8102_v40 }
  0xaa   : > { %7626 = vmatprep.mubr.msk.bf16.mxu1 %vm777_vm0, %v8899_v39  ;;  %7638 = vmatprep.mubr.msk.bf16.mxu0 %vm777_vm0, %v8914_v34  ;;  %v8107_v39 = vld [vmem:[%s10385_s3 + $0xb0] sm:$0xff]  }
  0xab   : > { %7656 = vmatprep.subr.bf16.mxu0 %v8103_v20  ;;  %7644 = vmatprep.subr.bf16.mxu1 %v8104_v35 }
  0xad   : > { %7657 = vmatpush3.bf16.msra.mxu0 %v8103_v20  ;;  %7645 = vmatpush3.bf16.msra.mxu1 %v8104_v35  ;;  %v8121_v20 = vld [vmem:[%s10385_s3 + $0xf8] sm:$0xff]  }
  0xae   : > { %7678 = vmatprep.subr.bf16.mxu0 %v8105_v22  ;;  %7666 = vmatprep.subr.bf16.mxu1 %v8106_v63 }
  0xb0   : > { %7639 = vmatmul.mubr.msk.bf16.gmra.mxu0 %vm777_vm0, %v8942_v61  ;;  %7627 = vmatmul.mubr.msk.bf16.gmra.mxu1 %vm777_vm0, %v8925_v13  ;;  %v8110_v13 = vld [vmem:[%s10386_s30 + $0xb8] sm:$0xff]  }
  0xb1   : > { %7658 = vmatprep.mubr.msk.bf16.mxu0 %vm777_vm0, %v8921_v25  ;;  %7646 = vmatprep.mubr.msk.bf16.mxu1 %vm777_vm0, %v8910_v17  ;;  %v8109_v17 = vld [vmem:[%s10385_s3 + $0xc8] sm:$0xff]  }
  0xb8   : > { %7659 = vmatmul.mubr.msk.bf16.vlgmr.msra.gmra.mxu0 %vm777_vm0, %v10419_v18  ;;  %7647 = vmatmul.mubr.msk.bf16.vlgmr.msra.gmra.mxu1 %vm777_vm0, %v10418_v44 }
  0xb9   : > { %7679 = vmatpush3.bf16.msra.mxu0 %v8105_v22  ;;  %7667 = vmatpush3.bf16.msra.mxu1 %v8106_v63  ;;  %v8122_v63 = vld [vmem:[%s10386_s30 + $0xe8] sm:$0xff]  }
  0xba   : > { %7650 = vmatprep.mubr.msk.bf16.mxu1 %vm777_vm0, %v8914_v34  ;;  %7662 = vmatprep.mubr.msk.bf16.mxu0 %vm777_vm0, %v8936_v62  ;;  %v8111_v34 = vld [vmem:[%s10385_s3 + $0xc0] sm:$0xff]  }
  0xbb   : > { %7680 = vmatprep.subr.bf16.mxu0 %v8107_v39  ;;  %7668 = vmatprep.subr.bf16.mxu1 %v8108_v32 }
  0xbd   : > { %7681 = vmatpush3.bf16.msra.mxu0 %v8107_v39  ;;  %7669 = vmatpush3.bf16.msra.mxu1 %v8108_v32 }
  0xbe   : > { %7702 = vmatprep.subr.bf16.mxu0 %v8109_v17  ;;  %7690 = vmatprep.subr.bf16.mxu1 %v8110_v13 }
  0xc0   : > { %7663 = vmatmul.mubr.msk.bf16.gmra.mxu0 %vm777_vm0, %v8975_v15  ;;  %7651 = vmatmul.mubr.msk.bf16.gmra.mxu1 %vm777_vm0, %v8942_v61  ;;  %v8114_v61 = vld [vmem:[%s10386_s30 + $0xc8] sm:$0xff]  }
  0xc1   : > { %7682 = vmatprep.mubr.msk.bf16.mxu0 %vm777_vm0, %v8948_v26  ;;  %7670 = vmatprep.mubr.msk.bf16.mxu1 %vm777_vm0, %v8921_v25  ;;  %v8113_v25 = vld [vmem:[%s10385_s3 + $0xd8] sm:$0xff]  }
  0xc8   : > { %7683 = vmatmul.mubr.msk.bf16.vlgmr.msra.gmra.mxu0 %vm777_vm0, %v10420_v49  ;;  %7671 = vmatmul.mubr.msk.bf16.vlgmr.msra.gmra.mxu1 %vm777_vm0, %v10419_v18 }
  0xc9   : > { %7703 = vmatpush3.bf16.msra.mxu0 %v8109_v17  ;;  %7691 = vmatpush3.bf16.msra.mxu1 %v8110_v13 }
  0xca   : > { %7674 = vmatprep.mubr.msk.bf16.mxu1 %vm777_vm0, %v8936_v62  ;;  %7686 = vmatprep.mubr.msk.bf16.mxu0 %vm777_vm0, %v8964_v3  ;;  %v8115_v62 = vld [vmem:[%s10385_s3 + $0xd0] sm:$0xff]  }
  0xcb   : > { %7704 = vmatprep.subr.bf16.mxu0 %v8111_v34  ;;  %7692 = vmatprep.subr.bf16.mxu1 %v8112_v43 }
  0xcd   : > { %7705 = vmatpush3.bf16.msra.mxu0 %v8111_v34  ;;  %7693 = vmatpush3.bf16.msra.mxu1 %v8112_v43 }
  0xce   : > { %7726 = vmatprep.subr.bf16.mxu0 %v8113_v25  ;;  %7714 = vmatprep.subr.bf16.mxu1 %v8114_v61 }
  0xd0   : > { %7687 = vmatmul.mubr.msk.bf16.gmra.mxu0 %vm777_vm0, %v9001_v46  ;;  %7675 = vmatmul.mubr.msk.bf16.gmra.mxu1 %vm777_vm0, %v8975_v15  ;;  %v8118_v15 = vld [vmem:[%s10386_s30 + $0xd8] sm:$0xff]  }
  0xd1   : > { %7706 = vmatprep.mubr.msk.bf16.mxu0 %vm777_vm0, %v8972_v5  ;;  %7694 = vmatprep.mubr.msk.bf16.mxu1 %vm777_vm0, %v8948_v26  ;;  %v8117_v26 = vld [vmem:[%s10385_s3 + $0xe8] sm:$0xff]  }
  0xd8   : > { %7707 = vmatmul.mubr.msk.bf16.vlgmr.msra.gmra.mxu0 %vm777_vm0, %v10421_v28  ;;  %7695 = vmatmul.mubr.msk.bf16.vlgmr.msra.gmra.mxu1 %vm777_vm0, %v10420_v49 }
  0xd9   : > { %7727 = vmatpush3.bf16.msra.mxu0 %v8113_v25  ;;  %7715 = vmatpush3.bf16.msra.mxu1 %v8114_v61 }
  0xda   : > { %7698 = vmatprep.mubr.msk.bf16.mxu1 %vm777_vm0, %v8964_v3  ;;  %7710 = vmatprep.mubr.msk.bf16.mxu0 %vm777_vm0, %v9023_v58 }
  0xdb   : > { %7728 = vmatprep.subr.bf16.mxu0 %v8115_v62  ;;  %7716 = vmatprep.subr.bf16.mxu1 %v8116_v9 }
  0xdd   : > { %7729 = vmatpush3.bf16.msra.mxu0 %v8115_v62  ;;  %7717 = vmatpush3.bf16.msra.mxu1 %v8116_v9 }
  0xde   : > { %7750 = vmatprep.subr.bf16.mxu0 %v8117_v26  ;;  %7738 = vmatprep.subr.bf16.mxu1 %v8118_v15 }
  0xe0   : > { %v7420_v36 = vpop.f32.mrf.mxu0  ;;  %7711 = vmatmul.mubr.msk.bf16.gmra.mxu0 %vm777_vm0, %v9037_v29  ;;  %v7424_v3 = vpop.f32.mrf.mxu1  ;;  %7699 = vmatmul.mubr.msk.bf16.gmra.mxu1 %vm777_vm0, %v9001_v46  ;;  %v8119_v46 = vld [vmem:[%s10385_s3 + $0xe0] sm:$0xff]  }
  0xe1   : > { %7730 = vmatprep.mubr.msk.bf16.mxu0 %vm777_vm0, %v9059_v51  ;;  %7718 = vmatprep.mubr.msk.bf16.mxu1 %vm777_vm0, %v8972_v5  ;;  %v863_v8 = vadd.f32 %v7420_v36, %v6578_v14  ;;  %v8120_v5 = vld [vmem:[%s10386_s30 + $0xd0] sm:$0xff]   ;;  %v867_v13 = vadd.f32 %v7424_v3, %v6578_v14 }
  0xe2   : > { %v824_v56 = vpop.f32.mrf.mxu0  ;;  %v840_v23 = vpop.f32.mrf.mxu1 }
  0xe3   : > { %v861_v48 = vadd.f32 %v6578_v14, %v824_v56  ;;  %v865_v25 = vadd.f32 %v6578_v14, %v840_v23  ;;  %v6585_v23 = vld [vmem:[%s10424_s26] ss:$0 sm:$0xff]  ;;  %s704_s26 = scalar_lea.vmem %s10346_s18, %s10487_s25 }
  0xe4   : > { %v7421_v38 = vpop.f32.mrf.mxu0  ;;  %v7425_v53 = vpop.f32.mrf.mxu1 }
  0xe5   : > { %v864_v44 = vadd.f32 %v7421_v38, %v6578_v14 }
  0xe6   : > { %v827_v11 = vpop.f32.mrf.mxu0  ;;  %v843_v12 = vpop.f32.mrf.mxu1 }
  0xe7   : > { %v862_v18 = vadd.f32 %v6578_v14, %v827_v11  ;;  %v866_v56 = vadd.f32 %v6578_v14, %v843_v12 }
  0xe8   : > { %v7444_v45 = vpop.f32.mrf.mxu0  ;;  %7731 = vmatmul.mubr.msk.bf16.vlgmr.msra.gmra.mxu0 %vm777_vm0, %v8862_v55  ;;  %v7432_v10 = vpop.f32.mrf.mxu1  ;;  %7719 = vmatmul.mubr.msk.bf16.vlgmr.msra.gmra.mxu1 %vm777_vm0, %v10421_v28  ;;  %v10423_v28 = vld [vmem:[#allocation3_spill] sm:$0xff] }
  0xe9   : > { %v1113_v27 = vadd.f32 %v7444_v45, %v863_v8  ;;  %7751 = vmatpush3.bf16.msra.mxu0 %v8117_v26  ;;  %7739 = vmatpush3.bf16.msra.mxu1 %v8118_v15  ;;  %v868_v26 = vadd.f32 %v7425_v53, %v6578_v14  ;;  %v8123_v45 = vld [vmem:[%s10385_s3 + $0xf0] sm:$0xff]   ;;  %v10425_v53 = vld [vmem:[#allocation2_spill] sm:$0xff] }
  0xea   : > { %v1080_v40 = vpop.f32.mrf.mxu0  ;;  %7722 = vmatprep.mubr.msk.bf16.mxu1 %vm777_vm0, %v9023_v58  ;;  %v919_v35 = vpop.f32.mrf.mxu1  ;;  %7734 = vmatprep.mubr.msk.bf16.mxu0 %vm777_vm0, %v9079_v4  ;;  %v8124_v14 = vld [vmem:[%s10386_s30 + $0xe0] sm:$0xff]  }
  0xeb   : > { %v1111_v22 = vadd.f32 %v1080_v40, %v861_v48  ;;  %7752 = vmatprep.subr.bf16.mxu0 %v8119_v46  ;;  %7740 = vmatprep.subr.bf16.mxu1 %v8120_v5  ;;  %v956_v40 = vadd.f32 %v6585_v23, %v919_v35 }
  0xec   : > { %v7445_v39 = vpop.f32.mrf.mxu0  ;;  %v7433_v32 = vpop.f32.mrf.mxu1 }
  0xed   : > { %v1114_v58 = vadd.f32 %v7445_v39, %v864_v44  ;;  %7753 = vmatpush3.bf16.msra.mxu0 %v8119_v46  ;;  %7741 = vmatpush3.bf16.msra.mxu1 %v8120_v5  ;;  %v958_v5 = vadd.f32 %v7432_v10, %v6585_v23  ;;  %v8125_v10 = vld [vmem:[%s10385_s3 + $0x108] sm:$0xff]  }
  0xee   : > { %v1083_v17 = vpop.f32.mrf.mxu0  ;;  %7774 = vmatprep.subr.bf16.mxu0 %v8121_v20  ;;  %v922_v34 = vpop.f32.mrf.mxu1  ;;  %7762 = vmatprep.subr.bf16.mxu1 %v8122_v63 }
  0xef   : > { %v1112_v49 = vadd.f32 %v1083_v17, %v862_v18 }
  0xf0   : > { %v7448_v43 = vpop.f32.mrf.mxu0  ;;  %7735 = vmatmul.mubr.msk.bf16.gmra.mxu0 %vm777_vm0, %v9083_v19  ;;  %v7436_v61 = vpop.f32.mrf.mxu1  ;;  %7723 = vmatmul.mubr.msk.bf16.gmra.mxu1 %vm777_vm0, %v9037_v29 }
  0xf1   : > { %v1117_v62 = vadd.f32 %v7448_v43, %v867_v13  ;;  %7754 = vmatprep.mubr.msk.bf16.mxu0 %vm777_vm0, %v10423_v28  ;;  %7742 = vmatprep.mubr.msk.bf16.mxu1 %vm777_vm0, %v9059_v51  ;;  %v10426_v13 = vld [vmem:[#allocation4_spill] sm:$0xff]  ;;  %v957_v43 = vadd.f32 %v6585_v23, %v922_v34 }
  0xf2   : > { %v1096_v9 = vpop.f32.mrf.mxu0  ;;  %v935_v15 = vpop.f32.mrf.mxu1 }
  0xf3   : > { %v1115_v36 = vadd.f32 %v1096_v9, %v865_v25  ;;  %v960_v34 = vadd.f32 %v6585_v23, %v935_v15  ;;  %v8127_v15 = vld [vmem:[%s10385_s3 + $0x100] sm:$0xff]  }
  0xf4   : > { %v7449_v3 = vpop.f32.mrf.mxu0  ;;  %v7437_v38 = vpop.f32.mrf.mxu1 }
  0xf5   : > { %v1118_v11 = vadd.f32 %v7449_v3, %v868_v26  ;;  %v962_v3 = vadd.f32 %v7436_v61, %v6585_v23 }
  0xf6   : > { %v1099_v8 = vpop.f32.mrf.mxu0  ;;  %v938_v29 = vpop.f32.mrf.mxu1 }
  0xf7   : > { %v1116_v46 = vadd.f32 %v1099_v8, %v866_v56 }
  0xf8   : > { %v7468_v51 = vpop.f32.mrf.mxu0  ;;  %7755 = vmatmul.mubr.msk.bf16.vlgmr.msra.gmra.mxu0 %vm777_vm0, %v10425_v53  ;;  %v7456_v12 = vpop.f32.mrf.mxu1  ;;  %7743 = vmatmul.mubr.msk.bf16.vlgmr.msra.gmra.mxu1 %vm777_vm0, %v8862_v55  ;;  %v8126_v55 = vld [vmem:[%s10386_s30 + $0xf8] sm:$0xff]  }
  0xf9   : > { %v1342_v48 = vadd.f32 %v7468_v51, %v1113_v27  ;;  %7775 = vmatpush3.bf16.msra.mxu0 %v8121_v20  ;;  %v1203_v44 = vadd.f32 %v7456_v12, %v958_v5  ;;  %7763 = vmatpush3.bf16.msra.mxu1 %v8122_v63  ;;  %v959_v27 = vadd.f32 %v7433_v32, %v6585_v23 }
  0xfa   : > { %v1309_v39 = vpop.f32.mrf.mxu0  ;;  %7746 = vmatprep.mubr.msk.bf16.mxu1 %vm777_vm0, %v9079_v4  ;;  %v1170_v18 = vpop.f32.mrf.mxu1  ;;  %7758 = vmatprep.mubr.msk.bf16.mxu0 %vm777_vm0, %v10426_v13 }
  0xfb   : > { %v1340_v17 = vadd.f32 %v1309_v39, %v1111_v22  ;;  %7776 = vmatprep.subr.bf16.mxu0 %v8123_v45  ;;  %v1201_v20 = vadd.f32 %v1170_v18, %v956_v40  ;;  %7764 = vmatprep.subr.bf16.mxu1 %v8124_v14 }
  0xfc   : > { %v7469_v35 = vpop.f32.mrf.mxu0  ;;  %v7457_v63 = vpop.f32.mrf.mxu1 }
  0xfd   : > { %v1343_v4 = vadd.f32 %v7469_v35, %v1114_v58  ;;  %7777 = vmatpush3.bf16.msra.mxu0 %v8123_v45  ;;  %v1204_v25 = vadd.f32 %v7457_v63, %v959_v27  ;;  %7765 = vmatpush3.bf16.msra.mxu1 %v8124_v14  ;;  %v10427_v58 = vld [vmem:[#allocation8_spill] sm:$0xff]  ;;  %v963_v14 = vadd.f32 %v7437_v38, %v6585_v23 }
  0xfe   : > { %v1312_v9 = vpop.f32.mrf.mxu0  ;;  %7798 = vmatprep.subr.bf16.mxu0 %v8125_v10  ;;  %v1173_v22 = vpop.f32.mrf.mxu1  ;;  %7786 = vmatprep.subr.bf16.mxu1 %v8126_v55 }
  0xff   : > { %v1341_v26 = vadd.f32 %v1312_v9, %v1112_v49  ;;  %v1202_v56 = vadd.f32 %v1173_v22, %v957_v43  ;;  %v10428_v22 = vld [vmem:[#allocation10_spill] sm:$0xff] }
 0x100   : > { %v7472_v8 = vpop.f32.mrf.mxu0  ;;  %7759 = vmatmul.mubr.msk.bf16.gmra.mxu0 %vm777_vm0, %v9119_v24  ;;  %v7460_v32 = vpop.f32.mrf.mxu1  ;;  %7747 = vmatmul.mubr.msk.bf16.gmra.mxu1 %vm777_vm0, %v9083_v19 }
 0x101   : > { %v1346_v5 = vadd.f32 %v7472_v8, %v1117_v62  ;;  %7778 = vmatprep.mubr.msk.bf16.mxu0 %vm777_vm0, %v10427_v58  ;;  %v1207_v45 = vadd.f32 %v7460_v32, %v962_v3  ;;  %7766 = vmatprep.mubr.msk.bf16.mxu1 %vm777_vm0, %v10423_v28  ;;  %v961_v62 = vadd.f32 %v6585_v23, %v938_v29  ;;  %v8128_v28 = vld [vmem:[%s10386_s30 + $0xf0] sm:$0xff]   ;;  %v8129_v29 = vld [vmem:[%s10385_s3 + $0x118] sm:$0xff]   ;;  %v10429_v8 = vld [vmem:[#allocation11_spill] sm:$0xff] }
 0x102   : > { %v1325_v51 = vpop.f32.mrf.mxu0  ;;  %v1186_v49 = vpop.f32.mrf.mxu1 }
 0x103   : > { %v1344_v61 = vadd.f32 %v1325_v51, %v1115_v36  ;;  %v1205_v12 = vadd.f32 %v1186_v49, %v960_v34 }
 0x104   : > { %v7473_v40 = vpop.f32.mrf.mxu0  ;;  %v7461_v39 = vpop.f32.mrf.mxu1 }
 0x105   : > { %v1347_v18 = vadd.f32 %v7473_v40, %v1118_v11  ;;  %v1208_v27 = vadd.f32 %v7461_v39, %v963_v14 }
 0x106   : > { %v1328_v35 = vpop.f32.mrf.mxu0  ;;  %v1189_v19 = vpop.f32.mrf.mxu1 }
 0x107   : > { %v1345_v63 = vadd.f32 %v1328_v35, %v1116_v46  ;;  %v1206_v43 = vadd.f32 %v1189_v19, %v961_v62 }
 0x108   : > { %v7492_v9 = vpop.f32.mrf.mxu0  ;;  %7779 = vmatmul.mubr.msk.bf16.vlgmr.msra.gmra.mxu0 %vm777_vm0, %v10428_v22  ;;  %v7480_v36 = vpop.f32.mrf.mxu1  ;;  %7767 = vmatmul.mubr.msk.bf16.vlgmr.msra.gmra.mxu1 %vm777_vm0, %v10425_v53  ;;  %v8130_v53 = vld [vmem:[%s10386_s30 + $0x108] sm:$0xff]  }
 0x109   : > { %v1571_v38 = vadd.f32 %v7492_v9, %v1342_v48  ;;  %7799 = vmatpush3.bf16.msra.mxu0 %v8125_v10  ;;  %v1432_v23 = vadd.f32 %v7480_v36, %v1203_v44  ;;  %7787 = vmatpush3.bf16.msra.mxu1 %v8126_v55  ;;  %v10430_v36 = vld [vmem:[#allocation13_spill] sm:$0xff] }
 0x10a   : > { %v1538_v11 = vpop.f32.mrf.mxu0  ;;  %7770 = vmatprep.mubr.msk.bf16.mxu1 %vm777_vm0, %v10426_v13  ;;  %v1399_v46 = vpop.f32.mrf.mxu1  ;;  %7782 = vmatprep.mubr.msk.bf16.mxu0 %vm777_vm0, %v10429_v8 }
 0x10b   : > { %v1569_v3 = vadd.f32 %v1538_v11, %v1340_v17  ;;  %7800 = vmatprep.subr.bf16.mxu0 %v8127_v15  ;;  %v1430_v48 = vadd.f32 %v1399_v46, %v1201_v20  ;;  %7788 = vmatprep.subr.bf16.mxu1 %v8128_v28 }
 0x10c   : > { %v7493_v44 = vpop.f32.mrf.mxu0  ;;  %v7481_v10 = vpop.f32.mrf.mxu1 }
 0x10d   : > { %v1572_v55 = vadd.f32 %v7493_v44, %v1343_v4  ;;  %7801 = vmatpush3.bf16.msra.mxu0 %v8127_v15  ;;  %v1433_v13 = vadd.f32 %v7481_v10, %v1204_v25  ;;  %7789 = vmatpush3.bf16.msra.mxu1 %v8128_v28 }
 0x10e   : > { %v1541_v32 = vpop.f32.mrf.mxu0  ;;  %7822 = vmatprep.subr.bf16.mxu0 %v8129_v29  ;;  %v1402_v34 = vpop.f32.mrf.mxu1  ;;  %7810 = vmatprep.subr.bf16.mxu1 %v8130_v53 }
 0x10f   : > { %v1570_v17 = vadd.f32 %v1541_v32, %v1341_v26  ;;  %v1431_v51 = vadd.f32 %v1402_v34, %v1202_v56 }
 0x110   : > { %v7496_v49 = vpop.f32.mrf.mxu0  ;;  %7783 = vmatmul.mubr.msk.bf16.gmra.mxu0 %vm777_vm0, %v8931_v52  ;;  %v7484_v14 = vpop.f32.mrf.mxu1  ;;  %7771 = vmatmul.mubr.msk.bf16.gmra.mxu1 %vm777_vm0, %v9119_v24  ;;  %v8131_v24 = vld [vmem:[%s10385_s3 + $0x110] sm:$0xff]  }
 0x111   : > { %v1575_v40 = vadd.f32 %v7496_v49, %v1346_v5  ;;  %7802 = vmatprep.mubr.msk.bf16.mxu0 %vm777_vm0, %v8621_v59  ;;  %v1436_v20 = vadd.f32 %v7484_v14, %v1207_v45  ;;  %7790 = vmatprep.mubr.msk.bf16.mxu1 %vm777_vm0, %v10427_v58  ;;  %v8132_v58 = vld [vmem:[%s10386_s30 + $0x100] sm:$0xff]  }
 0x112   : > { %v1554_v4 = vpop.f32.mrf.mxu0  ;;  %v1415_v25 = vpop.f32.mrf.mxu1 }
 0x113   : > { %v1573_v26 = vadd.f32 %v1554_v4, %v1344_v61  ;;  %v1434_v56 = vadd.f32 %v1415_v25, %v1205_v12 }
 0x114   : > { %v7497_v39 = vpop.f32.mrf.mxu0  ;;  %v7485_v62 = vpop.f32.mrf.mxu1 }
 0x115   : > { %v1576_v35 = vadd.f32 %v7497_v39, %v1347_v18  ;;  %v1437_v19 = vadd.f32 %v7485_v62, %v1208_v27 }
 0x116   : > { %v1557_v15 = vpop.f32.mrf.mxu0  ;;  %v1418_v5 = vpop.f32.mrf.mxu1 }
 0x117   : > { %v1574_v9 = vadd.f32 %v1557_v15, %v1345_v63  ;;  %v1435_v28 = vadd.f32 %v1418_v5, %v1206_v43  ;;  %v8133_v63 = vld [vmem:[%s10385_s3 + $0x128] sm:$0xff]  }
 0x118   : > { %v7516_v45 = vpop.f32.mrf.mxu0  ;;  %7803 = vmatmul.mubr.msk.bf16.vlgmr.msra.gmra.mxu0 %vm777_vm0, %v10430_v36  ;;  %v7504_v61 = vpop.f32.mrf.mxu1  ;;  %7791 = vmatmul.mubr.msk.bf16.vlgmr.msra.gmra.mxu1 %vm777_vm0, %v10428_v22  ;;  %v8134_v22 = vld [vmem:[%s10386_s30 + $0x118] sm:$0xff]  }
 0x119   : > { %v1800_v12 = vadd.f32 %v7516_v45, %v1571_v38  ;;  %7823 = vmatpush3.bf16.msra.mxu0 %v8129_v29  ;;  %v1661_v18 = vadd.f32 %v7504_v61, %v1432_v23  ;;  %7811 = vmatpush3.bf16.msra.mxu1 %v8130_v53  ;;  %v8138_v45 = vld [vmem:[%s10386_s30 + $0x128] sm:$0xff]  }
 0x11a   : > { %v1767_v27 = vpop.f32.mrf.mxu0  ;;  %7794 = vmatprep.mubr.msk.bf16.mxu1 %vm777_vm0, %v10429_v8  ;;  %v1628_v43 = vpop.f32.mrf.mxu1  ;;  %7806 = vmatprep.mubr.msk.bf16.mxu0 %vm777_vm0, %v8714_v21 }
 0x11b   : > { %v1798_v11 = vadd.f32 %v1767_v27, %v1569_v3  ;;  %7824 = vmatprep.subr.bf16.mxu0 %v8131_v24  ;;  %v1659_v38 = vadd.f32 %v1628_v43, %v1430_v48  ;;  %7812 = vmatprep.subr.bf16.mxu1 %v8132_v58 }
 0x11c   : > { %v7517_v23 = vpop.f32.mrf.mxu0  ;;  %v7505_v29 = vpop.f32.mrf.mxu1 }
 0x11d   : > { %v1801_v46 = vadd.f32 %v7517_v23, %v1572_v55  ;;  %7825 = vmatpush3.bf16.msra.mxu0 %v8131_v24  ;;  %v1662_v8 = vadd.f32 %v7505_v29, %v1433_v13  ;;  %7813 = vmatpush3.bf16.msra.mxu1 %v8132_v58 }
 0x11e   : > { %v1770_v53 = vpop.f32.mrf.mxu0  ;;  %7846 = vmatprep.subr.bf16.mxu0 %v8133_v63  ;;  %v1631_v44 = vpop.f32.mrf.mxu1  ;;  %7834 = vmatprep.subr.bf16.mxu1 %v8134_v22 }
 0x11f   : > { %v1799_v3 = vadd.f32 %v1770_v53, %v1570_v17  ;;  %v1660_v10 = vadd.f32 %v1631_v44, %v1431_v51 }
 0x120   : > { %v7520_v32 = vpop.f32.mrf.mxu0  ;;  %7807 = vmatmul.mubr.msk.bf16.gmra.mxu0 %vm777_vm0, %v8959_v41  ;;  %v7508_v34 = vpop.f32.mrf.mxu1  ;;  %7795 = vmatmul.mubr.msk.bf16.gmra.mxu1 %vm777_vm0, %v8931_v52  ;;  %v8135_v52 = vld [vmem:[%s10385_s3 + $0x120] sm:$0xff]  }
 0x121   : > { %v1804_v49 = vadd.f32 %v7520_v32, %v1575_v40  ;;  %7826 = vmatprep.mubr.msk.bf16.mxu0 %vm777_vm0, %v8728_v0  ;;  %v1665_v48 = vadd.f32 %v7508_v34, %v1436_v20  ;;  %7814 = vmatprep.mubr.msk.bf16.mxu1 %vm777_vm0, %v8621_v59  ;;  %v8136_v59 = vld [vmem:[%s10386_s30 + $0x110] sm:$0xff]  }
 0x122   : > { %v1783_v55 = vpop.f32.mrf.mxu0  ;;  %v1644_v13 = vpop.f32.mrf.mxu1 }
 0x123   : > { %v1802_v17 = vadd.f32 %v1783_v55, %v1573_v26  ;;  %v1663_v51 = vadd.f32 %v1644_v13, %v1434_v56 }
 0x124   : > { %v7521_v14 = vpop.f32.mrf.mxu0  ;;  %v7509_v4 = vpop.f32.mrf.mxu1 }
 0x125   : > { %v1805_v25 = vadd.f32 %v7521_v14, %v1576_v35  ;;  %v1666_v39 = vadd.f32 %v7509_v4, %v1437_v19 }
 0x126   : > { %v1786_v62 = vpop.f32.mrf.mxu0  ;;  %v1647_v40 = vpop.f32.mrf.mxu1 }
 0x127   : > { %v1803_v15 = vadd.f32 %v1786_v62, %v1574_v9  ;;  %v1664_v5 = vadd.f32 %v1647_v40, %v1435_v28  ;;  %v8137_v9 = vld [vmem:[%s10385_s3 + $0x138] sm:$0xff]  }
 0x128   : > { %v7540_v20 = vpop.f32.mrf.mxu0  ;;  %7827 = vmatmul.mubr.msk.bf16.vlgmr.msra.gmra.mxu0 %vm777_vm0, %v8736_v57  ;;  %v7528_v26 = vpop.f32.mrf.mxu1  ;;  %7815 = vmatmul.mubr.msk.bf16.vlgmr.msra.gmra.mxu1 %vm777_vm0, %v10430_v36 }
 0x129   : > { %v2029_v56 = vadd.f32 %v7540_v20, %v1800_v12  ;;  %7847 = vmatpush3.bf16.msra.mxu0 %v8133_v63  ;;  %v1890_v35 = vadd.f32 %v7528_v26, %v1661_v18  ;;  %7835 = vmatpush3.bf16.msra.mxu1 %v8134_v22 }
 0x12a   : > { %v1996_v19 = vpop.f32.mrf.mxu0  ;;  %7818 = vmatprep.mubr.msk.bf16.mxu1 %vm777_vm0, %v8714_v21  ;;  %v1857_v24 = vpop.f32.mrf.mxu1  ;;  %7830 = vmatprep.mubr.msk.bf16.mxu0 %vm777_vm0, %v8740_v50 }
 0x12b   : > { %v2027_v28 = vadd.f32 %v1996_v19, %v1798_v11  ;;  %7848 = vmatprep.subr.bf16.mxu0 %v8135_v52  ;;  %v1888_v36 = vadd.f32 %v1857_v24, %v1659_v38  ;;  %7836 = vmatprep.subr.bf16.mxu1 %v8136_v59 }
 0x12c   : > { %v7541_v58 = vpop.f32.mrf.mxu0  ;;  %v7529_v61 = vpop.f32.mrf.mxu1 }
 0x12d   : > { %v2030_v12 = vadd.f32 %v7541_v58, %v1801_v46  ;;  %7849 = vmatpush3.bf16.msra.mxu0 %v8135_v52  ;;  %v1891_v21 = vadd.f32 %v7529_v61, %v1662_v8  ;;  %7837 = vmatpush3.bf16.msra.mxu1 %v8136_v59 }
 0x12e   : > { %v1999_v18 = vpop.f32.mrf.mxu0  ;;  %7870 = vmatprep.subr.bf16.mxu0 %v8137_v9  ;;  %v1860_v27 = vpop.f32.mrf.mxu1  ;;  %7858 = vmatprep.subr.bf16.mxu1 %v8138_v45 }
 0x12f   : > { %v2028_v63 = vadd.f32 %v1999_v18, %v1799_v3  ;;  %v1889_v43 = vadd.f32 %v1860_v27, %v1660_v10 }
 0x130   : > { %v7544_v11 = vpop.f32.mrf.mxu0  ;;  %7831 = vmatmul.mubr.msk.bf16.gmra.mxu0 %vm777_vm0, %v8985_v42  ;;  %v7532_v22 = vpop.f32.mrf.mxu1  ;;  %7819 = vmatmul.mubr.msk.bf16.gmra.mxu1 %vm777_vm0, %v8959_v41  ;;  %v8139_v41 = vld [vmem:[%s10385_s3 + $0x130] sm:$0xff]  }
 0x131   : > { %v2033_v23 = vadd.f32 %v7544_v11, %v1804_v49  ;;  %7850 = vmatprep.mubr.msk.bf16.mxu0 %vm777_vm0, %v8980_v60  ;;  %v1894_v38 = vadd.f32 %v7532_v22, %v1665_v48  ;;  %7838 = vmatprep.mubr.msk.bf16.mxu1 %vm777_vm0, %v8728_v0  ;;  %v8140_v0 = vld [vmem:[%s10386_s30 + $0x120] sm:$0xff]  }
 0x132   : > { %v2012_v29 = vpop.f32.mrf.mxu0  ;;  %v1873_v46 = vpop.f32.mrf.mxu1 }
 0x133   : > { %v2031_v8 = vadd.f32 %v2012_v29, %v1802_v17  ;;  %v1892_v53 = vadd.f32 %v1873_v46, %v1663_v51 }
 0x134   : > { %v7545_v44 = vpop.f32.mrf.mxu0  ;;  %v7533_v3 = vpop.f32.mrf.mxu1 }
 0x135   : > { %v2034_v10 = vadd.f32 %v7545_v44, %v1805_v25  ;;  %v1895_v32 = vadd.f32 %v7533_v3, %v1666_v39  ;;  %v8141_v25 = vld [vmem:[%s10385_s3 + $0x148] sm:$0xff]  }
 0x136   : > { %v2015_v34 = vpop.f32.mrf.mxu0  ;;  %v1876_v49 = vpop.f32.mrf.mxu1  ;;  %v8145_v44 = vld [vmem:[%s10386_s30 + $0x148] sm:$0xff]  }
 0x137   : > { %v2032_v55 = vadd.f32 %v2015_v34, %v1803_v15  ;;  %v1893_v13 = vadd.f32 %v1876_v49, %v1664_v5 }
 0x138   : > { %v7564_v48 = vpop.f32.mrf.mxu0  ;;  %7851 = vmatmul.mubr.msk.bf16.vlgmr.msra.gmra.mxu0 %vm777_vm0, %v8996_v7  ;;  %v7552_v17 = vpop.f32.mrf.mxu1  ;;  %7839 = vmatmul.mubr.msk.bf16.vlgmr.msra.gmra.mxu1 %vm777_vm0, %v8736_v57  ;;  %v8142_v57 = vld [vmem:[%s10386_s30 + $0x138] sm:$0xff]  }
 0x139   : > { %v2258_v51 = vadd.f32 %v7564_v48, %v2029_v56  ;;  %7871 = vmatpush3.bf16.msra.mxu0 %v8137_v9  ;;  %v2119_v14 = vadd.f32 %v7552_v17, %v1890_v35  ;;  %7859 = vmatpush3.bf16.msra.mxu1 %v8138_v45 }
 0x13a   : > { %v2225_v4 = vpop.f32.mrf.mxu0  ;;  %7842 = vmatprep.mubr.msk.bf16.mxu1 %vm777_vm0, %v8740_v50  ;;  %v2086_v39 = vpop.f32.mrf.mxu1  ;;  %7854 = vmatprep.mubr.msk.bf16.mxu0 %vm777_vm0, %v9031_v1 }
 0x13b   : > { %v2256_v62 = vadd.f32 %v2225_v4, %v2027_v28  ;;  %7872 = vmatprep.subr.bf16.mxu0 %v8139_v41  ;;  %v2117_v40 = vadd.f32 %v2086_v39, %v1888_v36  ;;  %7860 = vmatprep.subr.bf16.mxu1 %v8140_v0 }
 0x13c   : > { %v7565_v15 = vpop.f32.mrf.mxu0  ;;  %v7553_v52 = vpop.f32.mrf.mxu1 }
 0x13d   : > { %v2259_v5 = vadd.f32 %v7565_v15, %v2030_v12  ;;  %7873 = vmatpush3.bf16.msra.mxu0 %v8139_v41  ;;  %v2120_v50 = vadd.f32 %v7553_v52, %v1891_v21  ;;  %7861 = vmatpush3.bf16.msra.mxu1 %v8140_v0 }
 0x13e   : > { %v2228_v20 = vpop.f32.mrf.mxu0  ;;  %7894 = vmatprep.subr.bf16.mxu0 %v8141_v25  ;;  %v2089_v59 = vpop.f32.mrf.mxu1  ;;  %7882 = vmatprep.subr.bf16.mxu1 %v8142_v57 }
 0x13f   : > { %v9463_v26 = vadd.f32 %v2228_v20, %v2028_v63  ;;  %v2118_v56 = vadd.f32 %v2089_v59, %v1889_v43 }
 0x140   : > { %v7568_v35 = vpop.f32.mrf.mxu0  ;;  %7855 = vmatmul.mubr.msk.bf16.gmra.mxu0 %vm777_vm0, %v9012_v16  ;;  %v7556_v19 = vpop.f32.mrf.mxu1  ;;  %7843 = vmatmul.mubr.msk.bf16.gmra.mxu1 %vm777_vm0, %v8985_v42  ;;  %v8143_v42 = vld [vmem:[%s10385_s3 + $0x140] sm:$0xff]  }
 0x141   : > { %v2262_v9 = vadd.f32 %v7568_v35, %v2033_v23  ;;  %7874 = vmatprep.mubr.msk.bf16.mxu0 %vm777_vm0, %v10411_v31  ;;  %v2123_v24 = vadd.f32 %v7556_v19, %v1894_v38  ;;  %7862 = vmatprep.mubr.msk.bf16.mxu1 %vm777_vm0, %v8980_v60  ;;  %v8144_v60 = vld [vmem:[%s10386_s30 + $0x130] sm:$0xff]  }
 0x142   : > { %v2241_v28 = vpop.f32.mrf.mxu0  ;;  %v2102_v45 = vpop.f32.mrf.mxu1 }
 0x143   : > { %v2260_v36 = vadd.f32 %v2241_v28, %v2031_v8  ;;  %v2121_v58 = vadd.f32 %v2102_v45, %v1892_v53 }
 0x144   : > { %v7569_v61 = vpop.f32.mrf.mxu0  ;;  %v7557_v12 = vpop.f32.mrf.mxu1 }
 0x145   : > { %v2263_v21 = vadd.f32 %v7569_v61, %v2034_v10  ;;  %v2124_v18 = vadd.f32 %v7557_v12, %v1895_v32 }
 0x146   : > { %v2244_v27 = vpop.f32.mrf.mxu0  ;;  %v2105_v63 = vpop.f32.mrf.mxu1 }
 0x147   : > { %v9473_v43 = vadd.f32 %v2244_v27, %v2032_v55  ;;  %v2122_v11 = vadd.f32 %v2105_v63, %v1893_v13 }
 0x148   : > { %v7588_v22 = vpop.f32.mrf.mxu0  ;;  %7875 = vmatmul.mubr.msk.bf16.vlgmr.msra.gmra.mxu0 %vm777_vm0, %v10412_v30  ;;  %v7576_v23 = vpop.f32.mrf.mxu1  ;;  %7863 = vmatmul.mubr.msk.bf16.vlgmr.msra.gmra.mxu1 %vm777_vm0, %v8996_v7 }
 0x149   : > { %v2454_v38 = vadd.f32 %v7588_v22, %v2258_v51  ;;  %7895 = vmatpush3.bf16.msra.mxu0 %v8141_v25  ;;  %v2348_v29 = vadd.f32 %v7576_v23, %v2119_v14  ;;  %7883 = vmatpush3.bf16.msra.mxu1 %v8142_v57 }
 0x14a   : > { %v2421_v46 = vpop.f32.mrf.mxu0  ;;  %7866 = vmatprep.mubr.msk.bf16.mxu1 %vm777_vm0, %v9031_v1  ;;  %v2315_v8 = vpop.f32.mrf.mxu1  ;;  %7878 = vmatprep.mubr.msk.bf16.mxu0 %vm777_vm0, %v10413_v2 }
 0x14b   : > { %v2452_v53 = vadd.f32 %v2421_v46, %v2256_v62  ;;  %7896 = vmatprep.subr.bf16.mxu0 %v8143_v42  ;;  %v2346_v3 = vadd.f32 %v2315_v8, %v2117_v40  ;;  %7884 = vmatprep.subr.bf16.mxu1 %v8144_v60 }
 0x14c   : > { %v7589_v10 = vpop.f32.mrf.mxu0  ;;  %v7577_v7 = vpop.f32.mrf.mxu1 }
 0x14d   : > { %v2455_v32 = vadd.f32 %v7589_v10, %v2259_v5  ;;  %7897 = vmatpush3.bf16.msra.mxu0 %v8143_v42  ;;  %v2349_v34 = vadd.f32 %v7577_v7, %v2120_v50  ;;  %7885 = vmatpush3.bf16.msra.mxu1 %v8144_v60 }
 0x14e   : > { %v9492_v49 = vpop.f32.mrf.mxu0  ;;  %v2318_v1 = vpop.f32.mrf.mxu1  ;;  %7906 = vmatprep.subr.bf16.mxu1 %v8145_v44 }
 0x14f   : > { %v9494_v55 = vadd.f32 %v2318_v1, %v2118_v56 }
 0x150   : > { %v7592_v41 = vpop.f32.mrf.mxu0  ;;  %7879 = vmatmul.mubr.msk.bf16.gmra.mxu0 %vm777_vm0, %v9052_v33  ;;  %v7580_v13 = vpop.f32.mrf.mxu1  ;;  %7867 = vmatmul.mubr.msk.bf16.gmra.mxu1 %vm777_vm0, %v9012_v16  ;;  %v8146_v16 = vld [vmem:[%s10386_s30 + $0x140] sm:$0xff]  }
 0x151   : > { %v2458_v48 = vadd.f32 %v7592_v41, %v2262_v9  ;;  %7898 = vmatprep.mubr.msk.bf16.mxu0 %vm777_vm0, %v8846_v37  ;;  %v2352_v0 = vadd.f32 %v7580_v13, %v2123_v24  ;;  %7886 = vmatprep.mubr.msk.bf16.mxu1 %vm777_vm0, %v10411_v31 }
 0x152   : > { %v2437_v17 = vpop.f32.mrf.mxu0  ;;  %v2331_v51 = vpop.f32.mrf.mxu1 }
 0x153   : > { %v2456_v14 = vadd.f32 %v2437_v17, %v2260_v36  ;;  %v2350_v4 = vadd.f32 %v2331_v51, %v2121_v58 }
 0x154   : > { %v7593_v25 = vpop.f32.mrf.mxu0  ;;  %v7581_v39 = vpop.f32.mrf.mxu1 }
 0x155   : > { %v2459_v62 = vadd.f32 %v7593_v25, %v2263_v21  ;;  %v2353_v57 = vadd.f32 %v7581_v39, %v2124_v18 }
 0x156   : > { %v9504_v40 = vpop.f32.mrf.mxu0  ;;  %v2334_v15 = vpop.f32.mrf.mxu1 }
 0x157   : > { %v9509_v52 = vadd.f32 %v2334_v15, %v2122_v11 }
 0x158   : > { %v7612_v5 = vpop.f32.mrf.mxu0  ;;  %7899 = vmatmul.mubr.msk.bf16.vlgmr.msra.gmra.mxu0 %vm777_vm0, %v8860_v47  ;;  %v7600_v31 = vpop.f32.mrf.mxu1  ;;  %7887 = vmatmul.mubr.msk.bf16.vlgmr.msra.gmra.mxu1 %vm777_vm0, %v10412_v30 }
 0x159   : > { %v2656_v50 = vadd.f32 %v7612_v5, %v2454_v38  ;;  %7902 = vmatprep.mubr.msk.bf16.mxu0 %vm777_vm0, %v8905_v6  ;;  %v2544_v20 = vadd.f32 %v7600_v31, %v2348_v29  ;;  %7907 = vmatpush3.bf16.msra.mxu1 %v8145_v44 }
 0x15a   : > { %v2623_v59 = vpop.f32.mrf.mxu0  ;;  %7890 = vmatprep.mubr.msk.bf16.mxu1 %vm777_vm0, %v10413_v2  ;;  %v2511_v56 = vpop.f32.mrf.mxu1  ;;  %7908 = vmatprep.subr.bf16.mxu1 %v8146_v16 }
 0x15b   : > { %v2654_v35 = vadd.f32 %v2623_v59, %v2452_v53  ;;  %v2542_v19 = vadd.f32 %v2511_v56, %v2346_v3 }
 0x15c   : > { %v7613_v9 = vpop.f32.mrf.mxu0  ;;  %v7601_v24 = vpop.f32.mrf.mxu1 }
 0x15d   : > { %v2657_v28 = vadd.f32 %v7613_v9, %v2455_v32  ;;  %v2545_v45 = vadd.f32 %v7601_v24, %v2349_v34  ;;  %7909 = vmatpush3.bf16.msra.mxu1 %v8146_v16 }
 0x15e   : > { %v9519_v36 = vpop.f32.mrf.mxu0  ;;  %v9521_v30 = vpop.f32.mrf.mxu1 }
 0x160   : > { %v7616_v58 = vpop.f32.mrf.mxu0  ;;  %7903 = vmatmul.mubr.msk.bf16.gmra.mxu0 %vm777_vm0, %v9098_v54  ;;  %v7604_v61 = vpop.f32.mrf.mxu1  ;;  %7891 = vmatmul.mubr.msk.bf16.gmra.mxu1 %vm777_vm0, %v9052_v33 }
 0x161   : > { %v2660_v12 = vadd.f32 %v7616_v58, %v2458_v48  ;;  %v2548_v2 = vadd.f32 %v7604_v61, %v2352_v0  ;;  %7910 = vmatprep.mubr.msk.bf16.mxu1 %vm777_vm0, %v8846_v37 }
 0x162   : > { %v2639_v21 = vpop.f32.mrf.mxu0  ;;  %v2527_v18 = vpop.f32.mrf.mxu1 }
 0x163   : > { %v2658_v27 = vadd.f32 %v2639_v21, %v2456_v14  ;;  %v2546_v63 = vadd.f32 %v2527_v18, %v2350_v4 }
 0x164   : > { %v7617_v42 = vpop.f32.mrf.mxu0  ;;  %v7605_v11 = vpop.f32.mrf.mxu1 }
 0x165   : > { %v2661_v22 = vadd.f32 %v7617_v42, %v2459_v62  ;;  %v2549_v60 = vadd.f32 %v7605_v11, %v2353_v57 }
 0x166   : > { %v9529_v23 = vpop.f32.mrf.mxu0  ;;  %v9531_v38 = vpop.f32.mrf.mxu1 }
 0x168   : > { %v7636_v29 = vpop.f32.mrf.mxu0  ;;  %v7624_v46 = vpop.f32.mrf.mxu1  ;;  %7911 = vmatmul.mubr.msk.bf16.vlgmr.msra.gmra.mxu1 %vm777_vm0, %v8860_v47 }
 0x169   : > { %v2856_v8 = vadd.f32 %v7636_v29, %v2656_v50  ;;  %v2746_v33 = vadd.f32 %v7624_v46, %v2544_v20  ;;  %7914 = vmatprep.mubr.msk.bf16.mxu1 %vm777_vm0, %v8905_v6 }
 0x16a   : > { %v2823_v53 = vpop.f32.mrf.mxu0  ;;  %v2713_v37 = vpop.f32.mrf.mxu1 }
 0x16b   : > { %v2854_v44 = vadd.f32 %v2823_v53, %v2654_v35  ;;  %v2744_v3 = vadd.f32 %v2713_v37, %v2542_v19 }
 0x16c   : > { %v7637_v10 = vpop.f32.mrf.mxu0  ;;  %v7625_v7 = vpop.f32.mrf.mxu1 }
 0x16d   : > { %v2857_v32 = vadd.f32 %v7637_v10, %v2657_v28  ;;  %v2747_v34 = vadd.f32 %v7625_v7, %v2545_v45 }
 0x16e   : > { %v9537_v1 = vpop.f32.mrf.mxu0  ;;  %v9539_v41 = vpop.f32.mrf.mxu1 }
 0x170   : > { %v7640_v13 = vpop.f32.mrf.mxu0  ;;  %v7628_v48 = vpop.f32.mrf.mxu1  ;;  %7915 = vmatmul.mubr.msk.bf16.gmra.mxu1 %vm777_vm0, %v9098_v54 }
 0x171   : > { %v2860_v0 = vadd.f32 %v7640_v13, %v2660_v12  ;;  %v2750_v47 = vadd.f32 %v7628_v48, %v2548_v2 }
 0x172   : > { %v2839_v17 = vpop.f32.mrf.mxu0  ;;  %v2729_v6 = vpop.f32.mrf.mxu1 }
 0x173   : > { %v2858_v51 = vadd.f32 %v2839_v17, %v2658_v27  ;;  %v2748_v14 = vadd.f32 %v2729_v6, %v2546_v63 }
 0x174   : > { %v7641_v4 = vpop.f32.mrf.mxu0  ;;  %v7629_v25 = vpop.f32.mrf.mxu1 }
 0x175   : > { %v2861_v39 = vadd.f32 %v7641_v4, %v2661_v22  ;;  %v2751_v62 = vadd.f32 %v7629_v25, %v2549_v60 }
 0x176   : > { %v9543_v57 = vpop.f32.mrf.mxu0  ;;  %v9545_v15 = vpop.f32.mrf.mxu1 }
 0x178   : > { %v7660_v16 = vpop.f32.mrf.mxu0  ;;  %v7648_v5 = vpop.f32.mrf.mxu1 }
 0x179   : > { %v3056_v31 = vadd.f32 %v7660_v16, %v2856_v8  ;;  %v2946_v50 = vadd.f32 %v7648_v5, %v2746_v33 }
 0x17a   : > { %v3023_v20 = vpop.f32.mrf.mxu0  ;;  %v2913_v59 = vpop.f32.mrf.mxu1 }
 0x17b   : > { %v3054_v54 = vadd.f32 %v3023_v20, %v2854_v44  ;;  %v2944_v56 = vadd.f32 %v2913_v59, %v2744_v3  ;;  %v8147_v59 = vld [vmem:[%s10334_s6 + $0x8] sm:$0xff]  }
 0x17c   : > { %v7661_v35 = vpop.f32.mrf.mxu0  ;;  %v7649_v19 = vpop.f32.mrf.mxu1  ;;  %7930 = vmatprep.subr.bf16.mxu1 %v8147_v59 }
 0x17d   : > { %v3057_v9 = vadd.f32 %v7661_v35, %v2857_v32  ;;  %v2947_v24 = vadd.f32 %v7649_v19, %v2747_v34  ;;  %7931 = vmatpush3.bf16.msra.mxu1 %v8147_v59 }
 0x17e   : > { %v9547_v28 = vpop.f32.mrf.mxu0  ;;  %v9549_v45 = vpop.f32.mrf.mxu1 }
 0x180   : > { %v7664_v58 = vpop.f32.mrf.mxu0  ;;  %v7652_v61 = vpop.f32.mrf.mxu1 }
 0x181   : > { %v3060_v12 = vadd.f32 %v7664_v58, %v2860_v0  ;;  %v2950_v2 = vadd.f32 %v7652_v61, %v2750_v47 }
 0x182   : > { %v3039_v21 = vpop.f32.mrf.mxu0  ;;  %v2929_v18 = vpop.f32.mrf.mxu1 }
 0x183   : > { %v3058_v27 = vadd.f32 %v3039_v21, %v2858_v51  ;;  %v2948_v63 = vadd.f32 %v2929_v18, %v2748_v14 }
 0x184   : > { %v7665_v42 = vpop.f32.mrf.mxu0  ;;  %v7653_v11 = vpop.f32.mrf.mxu1 }
 0x185   : > { %v3061_v22 = vadd.f32 %v7665_v42, %v2861_v39  ;;  %v2951_v60 = vadd.f32 %v7653_v11, %v2751_v62  ;;  %v8148_v11 = vld [vmem:[%s10334_s6] sm:$0xff]  }
 0x186   : > { %v9551_v29 = vpop.f32.mrf.mxu0  ;;  %v9553_v46 = vpop.f32.mrf.mxu1  ;;  %7932 = vmatprep.subr.bf16.mxu1 %v8148_v11 }
 0x187   : > { %7933 = vmatpush3.bf16.msra.mxu1 %v8148_v11 }
 0x188   : > { %v7684_v8 = vpop.f32.mrf.mxu0  ;;  %v7672_v33 = vpop.f32.mrf.mxu1 }
 0x189   : > { %v3256_v53 = vadd.f32 %v7684_v8, %v3056_v31  ;;  %v3146_v37 = vadd.f32 %v7672_v33, %v2946_v50 }
 0x18a   : > { %v3223_v44 = vpop.f32.mrf.mxu0  ;;  %v3113_v3 = vpop.f32.mrf.mxu1 }
 0x18b   : > { %v3254_v10 = vadd.f32 %v3223_v44, %v3054_v54  ;;  %v3144_v7 = vadd.f32 %v3113_v3, %v2944_v56 }
 0x18c   : > { %v7685_v32 = vpop.f32.mrf.mxu0  ;;  %v7673_v34 = vpop.f32.mrf.mxu1 }
 0x18d   : > { %v3257_v13 = vadd.f32 %v7685_v32, %v3057_v9  ;;  %v3147_v48 = vadd.f32 %v7673_v34, %v2947_v24 }
 0x18e   : > { %v9555_v0 = vpop.f32.mrf.mxu0  ;;  %v9557_v47 = vpop.f32.mrf.mxu1 }
 0x190   : > { %v7688_v17 = vpop.f32.mrf.mxu0  ;;  %v7676_v6 = vpop.f32.mrf.mxu1 }
 0x191   : > { %v3260_v51 = vadd.f32 %v7688_v17, %v3060_v12  ;;  %v3150_v14 = vadd.f32 %v7676_v6, %v2950_v2 }
 0x192   : > { %v3239_v4 = vpop.f32.mrf.mxu0  ;;  %v3129_v25 = vpop.f32.mrf.mxu1 }
 0x193   : > { %v3258_v39 = vadd.f32 %v3239_v4, %v3058_v27  ;;  %v3148_v62 = vadd.f32 %v3129_v25, %v2948_v63 }
 0x194   : > { %v7689_v16 = vpop.f32.mrf.mxu0  ;;  %v7677_v5 = vpop.f32.mrf.mxu1 }
 0x195   : > { %v3261_v31 = vadd.f32 %v7689_v16, %v3061_v22  ;;  %v3151_v50 = vadd.f32 %v7677_v5, %v2951_v60 }
 0x196   : > { %v9559_v20 = vpop.f32.mrf.mxu0  ;;  %v9564_v54 = vpop.f32.mrf.mxu1 }
 0x198   : > { %v7708_v56 = vpop.f32.mrf.mxu0  ;;  %v7696_v35 = vpop.f32.mrf.mxu1 }
 0x199   : > { %v3456_v19 = vadd.f32 %v7708_v56, %v3256_v53  ;;  %v3346_v9 = vadd.f32 %v7696_v35, %v3146_v37  ;;  %v2453_v37 = vadd.f32 %v9492_v49, %v9463_v26 }
 0x19a   : > { %v3423_v24 = vpop.f32.mrf.mxu0  ;;  %v3313_v58 = vpop.f32.mrf.mxu1 }
 0x19b   : > { %v3454_v61 = vadd.f32 %v3423_v24, %v3254_v10  ;;  %v3344_v12 = vadd.f32 %v3313_v58, %v3144_v7  ;;  %v2655_v32 = vadd.f32 %v9519_v36, %v2453_v37  ;;  %v9580_v36 = vld [vmem:[%s10336_s8 + $0x8] sm:$0xff]  }
 0x19c   : > { %v7709_v2 = vpop.f32.mrf.mxu0  ;;  %v7697_v21 = vpop.f32.mrf.mxu1  ;;  %7954 = vmatprep.subr.bf16.mxu1 %v9580_v36 }
 0x19d   : > { %v3457_v18 = vadd.f32 %v7709_v2, %v3257_v13  ;;  %v3347_v27 = vadd.f32 %v7697_v21, %v3147_v48  ;;  %v2543_v48 = vadd.f32 %v9521_v30, %v9494_v55 }
 0x19e   : > { %v3426_v63 = vpop.f32.mrf.mxu0  ;;  %v3316_v42 = vpop.f32.mrf.mxu1 }
 0x19f   : > { %v2745_v4 = vadd.f32 %v9539_v41, %v2543_v48 }
 0x1a0   : > { %v7712_v22 = vpop.f32.mrf.mxu0  ;;  %v7700_v60 = vpop.f32.mrf.mxu1 }
 0x1a1   : > { %v3460_v8 = vadd.f32 %v7712_v22, %v3260_v51  ;;  %v3350_v33 = vadd.f32 %v7700_v60, %v3150_v14  ;;  %v2855_v51 = vadd.f32 %v9537_v1, %v2655_v32  ;;  %v2457_v1 = vadd.f32 %v9504_v40, %v9473_v43 }
 0x1a2   : > { %v3439_v53 = vpop.f32.mrf.mxu0  ;;  %v3329_v44 = vpop.f32.mrf.mxu1  ;;  %v2547_v43 = vadd.f32 %v9531_v38, %v9509_v52 }
 0x1a3   : > { %v3458_v3 = vadd.f32 %v3439_v53, %v3258_v39  ;;  %v3348_v10 = vadd.f32 %v3329_v44, %v3148_v62  ;;  %v3055_v26 = vadd.f32 %v9547_v28, %v2855_v51  ;;  %v2945_v62 = vadd.f32 %v9549_v45, %v2745_v4  ;;  %v8150_v28 = vld [vmem:[%s10335_s7 + $0x8] sm:$0xff]  }
 0x1a4   : > { %v7713_v7 = vpop.f32.mrf.mxu0  ;;  %v7701_v34 = vpop.f32.mrf.mxu1  ;;  %v2659_v45 = vadd.f32 %v9529_v23, %v2457_v1  ;;  %7918 = vmatprep.subr.bf16.mxu0 %v8150_v28  ;;  %v8152_v23 = vld [vmem:[%s10335_s7] sm:$0xff]  }
 0x1a5   : > { %v3461_v13 = vadd.f32 %v7713_v7, %v3261_v31  ;;  %v3351_v17 = vadd.f32 %v7701_v34, %v3151_v50  ;;  %v3255_v16 = vadd.f32 %v9555_v0, %v3055_v26  ;;  %v3145_v31 = vadd.f32 %v9557_v47, %v2945_v62  ;;  %7919 = vmatpush3.bf16.msra.mxu0 %v8150_v28 }
 0x1a6   : > { %v3442_v6 = vpop.f32.mrf.mxu0  ;;  %v3332_v14 = vpop.f32.mrf.mxu1  ;;  %v2859_v24 = vadd.f32 %v9543_v57, %v2659_v45  ;;  %v2749_v47 = vadd.f32 %v9545_v15, %v2547_v43  ;;  %7920 = vmatprep.subr.bf16.mxu0 %v8152_v23 }
 0x1a7   : > { %v3455_v56 = vadd.f32 %v3426_v63, %v3255_v16  ;;  %v3345_v40 = vadd.f32 %v3316_v42, %v3145_v31 }
 0x1a8   : > { %v7732_v25 = vpop.f32.mrf.mxu0  ;;  %v7720_v49 = vpop.f32.mrf.mxu1  ;;  %v3059_v21 = vadd.f32 %v9551_v29, %v2859_v24  ;;  %v2949_v38 = vadd.f32 %v9553_v46, %v2749_v47 }
 0x1a9   : > { %v3656_v39 = vadd.f32 %v7732_v25, %v3456_v19  ;;  %v3546_v55 = vadd.f32 %v7720_v49, %v3346_v9  ;;  %7921 = vmatpush3.bf16.msra.mxu0 %v8152_v23 }
 0x1aa   : > { %v3623_v30 = vpop.f32.mrf.mxu0  ;;  %v3513_v41 = vpop.f32.mrf.mxu1  ;;  %v3259_v57 = vadd.f32 %v9559_v20, %v3059_v21  ;;  %v3149_v15 = vadd.f32 %v9564_v54, %v2949_v38 }
 0x1ab   : > { %v3654_v5 = vadd.f32 %v3623_v30, %v3454_v61  ;;  %v3544_v50 = vadd.f32 %v3513_v41, %v3344_v12 }
 0x1ac   : > { %v7733_v59 = vpop.f32.mrf.mxu0  ;;  %v7721_v35 = vpop.f32.mrf.mxu1  ;;  %v3459_v53 = vadd.f32 %v3442_v6, %v3259_v57  ;;  %v3349_v29 = vadd.f32 %v3332_v14, %v3149_v15 }
 0x1ad   : > { %v3657_v19 = vadd.f32 %v7733_v59, %v3457_v18  ;;  %v3547_v0 = vadd.f32 %v7721_v35, %v3347_v27 }
 0x1ae   : > { %v3626_v9 = vpop.f32.mrf.mxu0  ;;  %v3516_v58 = vpop.f32.mrf.mxu1 }
 0x1af   : > { %v3655_v61 = vadd.f32 %v3626_v9, %v3455_v56  ;;  %v3545_v12 = vadd.f32 %v3516_v58, %v3345_v40 }
 0x1b0   : > { %v7736_v2 = vpop.f32.mrf.mxu0  ;;  %v7724_v18 = vpop.f32.mrf.mxu1 }
 0x1b1   : > { %v3660_v52 = vadd.f32 %v7736_v2, %v3460_v8  ;;  %v3550_v27 = vadd.f32 %v7724_v18, %v3350_v33 }
 0x1b2   : > { %v3639_v63 = vpop.f32.mrf.mxu0  ;;  %v3529_v42 = vpop.f32.mrf.mxu1 }
 0x1b3   : > { %v3658_v11 = vadd.f32 %v3639_v63, %v3458_v3  ;;  %v3548_v22 = vadd.f32 %v3529_v42, %v3348_v10  ;;  %v9606_v10 = vld [vmem:[%s10337_s9 + $0x8] sm:$0xff]  }
 0x1b4   : > { %v7737_v60 = vpop.f32.mrf.mxu0  ;;  %v7725_v37 = vpop.f32.mrf.mxu1  ;;  %10431 = vst [vmem:[#allocation19_spill] sm:$0xff] %v9606_v10  ;;  %7942 = vmatprep.subr.bf16.mxu0 %v9606_v10 }
 0x1b5   : > { %v3661_v44 = vadd.f32 %v7737_v60, %v3461_v13  ;;  %v3551_v7 = vadd.f32 %v7725_v37, %v3351_v17 }
 0x1b6   : > { %v3642_v8 = vpop.f32.mrf.mxu0  ;;  %v3532_v32 = vpop.f32.mrf.mxu1 }
 0x1b7   : > { %v3659_v46 = vadd.f32 %v3642_v8, %v3459_v53  ;;  %v3549_v33 = vadd.f32 %v3532_v32, %v3349_v29 }
 0x1b8   : > { %v7756_v34 = vpop.f32.mrf.mxu0  ;;  %v7744_v48 = vpop.f32.mrf.mxu1 }
 0x1b9   : > { %v3840_v51 = vadd.f32 %v7756_v34, %v3656_v39  ;;  %v3746_v20 = vadd.f32 %v7744_v48, %v3546_v55 }
 0x1ba   : > { %v3807_v4 = vpop.f32.mrf.mxu0  ;;  %v3713_v3 = vpop.f32.mrf.mxu1 }
 0x1bb   : > { %v3838_v25 = vadd.f32 %v3807_v4, %v3654_v5  ;;  %v3744_v26 = vadd.f32 %v3713_v3, %v3544_v50 }
 0x1bc   : > { %v7757_v54 = vpop.f32.mrf.mxu0  ;;  %v7745_v13 = vpop.f32.mrf.mxu1 }
 0x1bd   : > { %v3841_v17 = vadd.f32 %v7757_v54, %v3657_v19  ;;  %v3747_v6 = vadd.f32 %v7745_v13, %v3547_v0 }
 0x1be   : > { %v3810_v14 = vpop.f32.mrf.mxu0  ;;  %v3716_v49 = vpop.f32.mrf.mxu1 }
 0x1bf   : > { %v3839_v62 = vadd.f32 %v3810_v14, %v3655_v61  ;;  %v3745_v39 = vadd.f32 %v3716_v49, %v3545_v12 }
 0x1c0   : > { %v7760_v55 = vpop.f32.mrf.mxu0  ;;  %v7748_v30 = vpop.f32.mrf.mxu1 }
 0x1c1   : > { %v3844_v1 = vadd.f32 %v7760_v55, %v3660_v52  ;;  %v3750_v16 = vadd.f32 %v7748_v30, %v3550_v27 }
 0x1c2   : > { %v3823_v41 = vpop.f32.mrf.mxu0  ;;  %v3729_v5 = vpop.f32.mrf.mxu1 }
 0x1c3   : > { %v3842_v28 = vadd.f32 %v3823_v41, %v3658_v11  ;;  %v3748_v31 = vadd.f32 %v3729_v5, %v3548_v22 }
 0x1c4   : > { %v7761_v50 = vpop.f32.mrf.mxu0  ;;  %v7749_v59 = vpop.f32.mrf.mxu1 }
 0x1c5   : > { %v3845_v45 = vadd.f32 %v7761_v50, %v3661_v44  ;;  %v3751_v56 = vadd.f32 %v7749_v59, %v3551_v7 }
 0x1c6   : > { %v3826_v35 = vpop.f32.mrf.mxu0  ;;  %v3732_v19 = vpop.f32.mrf.mxu1 }
 0x1c7   : > { %v3843_v43 = vadd.f32 %v3826_v35, %v3659_v46  ;;  %v3749_v40 = vadd.f32 %v3732_v19, %v3549_v33 }
 0x1c8   : > { %v7780_v0 = vpop.f32.mrf.mxu0  ;;  %v7768_v9 = vpop.f32.mrf.mxu1 }
 0x1c9   : > { %v9609_v24 = vadd.f32 %v7780_v0, %v3840_v51  ;;  %v3930_v58 = vadd.f32 %v7768_v9, %v3746_v20 }
 0x1ca   : > { %v3997_v61 = vpop.f32.mrf.mxu0  ;;  %v3897_v47 = vpop.f32.mrf.mxu1 }
 0x1cb   : > { %v9611_v12 = vadd.f32 %v3997_v61, %v3838_v25  ;;  %v3928_v2 = vadd.f32 %v3897_v47, %v3744_v26 }
 0x1cc   : > { %v7781_v23 = vpop.f32.mrf.mxu0  ;;  %v7769_v21 = vpop.f32.mrf.mxu1 }
 0x1cd   : > { %v9613_v18 = vadd.f32 %v7781_v23, %v3841_v17  ;;  %v3931_v52 = vadd.f32 %v7769_v21, %v3747_v6 }
 0x1ce   : > { %v4000_v38 = vpop.f32.mrf.mxu0  ;;  %v3900_v27 = vpop.f32.mrf.mxu1 }
 0x1cf   : > { %v9615_v63 = vadd.f32 %v4000_v38, %v3839_v62  ;;  %v3929_v57 = vadd.f32 %v3900_v27, %v3745_v39 }
 0x1d0   : > { %v7784_v42 = vpop.f32.mrf.mxu0  ;;  %v7772_v11 = vpop.f32.mrf.mxu1 }
 0x1d1   : > { %v9617_v15 = vadd.f32 %v7784_v42, %v3844_v1  ;;  %v3934_v22 = vadd.f32 %v7772_v11, %v3750_v16 }
 0x1d2   : > { %v4013_v60 = vpop.f32.mrf.mxu0  ;;  %v3913_v53 = vpop.f32.mrf.mxu1 }
 0x1d3   : > { %v9619_v37 = vadd.f32 %v4013_v60, %v3842_v28  ;;  %v3932_v44 = vadd.f32 %v3913_v53, %v3748_v31 }
 0x1d4   : > { %v7785_v29 = vpop.f32.mrf.mxu0  ;;  %v7773_v7 = vpop.f32.mrf.mxu1 }
 0x1d5   : > { %v9621_v8 = vadd.f32 %v7785_v29, %v3845_v45  ;;  %v3935_v32 = vadd.f32 %v7773_v7, %v3751_v56 }
 0x1d6   : > { %v4016_v46 = vpop.f32.mrf.mxu0  ;;  %v3916_v33 = vpop.f32.mrf.mxu1 }
 0x1d7   : > { %v9623_v34 = vadd.f32 %v4016_v46, %v3843_v43  ;;  %v3933_v48 = vadd.f32 %v3916_v33, %v3749_v40 }
 0x1d8   : > { %v9625_v51 = vpop.f32.mrf.mxu0  ;;  %v7792_v20 = vpop.f32.mrf.mxu1 }
 0x1d9   : > { %v9627_v4 = vadd.f32 %v7792_v20, %v3930_v58 }
 0x1da   : > { %v9629_v3 = vpop.f32.mrf.mxu0  ;;  %v4087_v25 = vpop.f32.mrf.mxu1 }
 0x1db   : > { %v9631_v26 = vadd.f32 %v4087_v25, %v3928_v2 }
 0x1dc   : > { %v9633_v54 = vpop.f32.mrf.mxu0  ;;  %v7793_v13 = vpop.f32.mrf.mxu1 }
 0x1dd   : > { %v9635_v17 = vadd.f32 %v7793_v13, %v3931_v52 }
 0x1de   : > { %v9637_v6 = vpop.f32.mrf.mxu0  ;;  %v4090_v14 = vpop.f32.mrf.mxu1 }
 0x1df   : > { %v9639_v49 = vadd.f32 %v4090_v14, %v3929_v57 }
 0x1e0   : > { %v9641_v62 = vpop.f32.mrf.mxu0  ;;  %v7796_v39 = vpop.f32.mrf.mxu1 }
 0x1e1   : > { %10432 = vst [vmem:[#allocation16_spill] sm:$0xff] %v9639_v49  ;;  %v9643_v55 = vadd.f32 %v7796_v39, %v3934_v22 }
 0x1e2   : > { %v9645_v30 = vpop.f32.mrf.mxu0  ;;  %v4103_v1 = vpop.f32.mrf.mxu1 }
 0x1e3   : > { %10433 = vst [vmem:[#allocation18_spill] sm:$0xff] %v9643_v55  ;;  %v9647_v16 = vadd.f32 %v4103_v1, %v3932_v44 }
 0x1e4   : > { %v9649_v41 = vpop.f32.mrf.mxu0  ;;  %v7797_v5 = vpop.f32.mrf.mxu1 }
 0x1e5   : > { %10434 = vst [vmem:[#allocation20_spill] sm:$0xff] %v9647_v16  ;;  %v9651_v28 = vadd.f32 %v7797_v5, %v3935_v32  ;;  %v4216_v16 = vadd.f32 %v9629_v3, %v9611_v12  ;;  %v4223_v3 = vadd.f32 %v9649_v41, %v9621_v8 }
 0x1e6   : > { %v9653_v31 = vpop.f32.mrf.mxu0  ;;  %v4106_v50 = vpop.f32.mrf.mxu1 }
 0x1e7   : > { %10435 = vst [vmem:[#allocation5_spill] sm:$0xff] %v9651_v28  ;;  %v9655_v59 = vadd.f32 %v4106_v50, %v3933_v48 }
 0x1e8   : > { %v7828_v45 = vpop.f32.mrf.mxu0  ;;  %v9657_v56 = vpop.f32.mrf.mxu1 }
 0x1e9   : > { %10436 = vst [vmem:[#allocation6_spill] sm:$0xff] %v9655_v59 }
 0x1ea   : > { %v4373_v35 = vpop.f32.mrf.mxu0  ;;  %v9659_v19 = vpop.f32.mrf.mxu1 }
 0x1eb   : > { %v4404_v55 = vadd.f32 %v4373_v35, %v4216_v16 }
 0x1ec   : > { %v7829_v43 = vpop.f32.mrf.mxu0  ;;  %v9661_v40 = vpop.f32.mrf.mxu1 }
 0x1ee   : > { %v4376_v0 = vpop.f32.mrf.mxu0  ;;  %v9663_v9 = vpop.f32.mrf.mxu1 }
 0x1ef   : > { %10437 = vst [vmem:[#allocation7_spill] sm:$0xff] %v9663_v9 }
 0x1f0   : > { %v9665_v58 = vpop.f32.mrf.mxu0  ;;  %v9667_v61 = vpop.f32.mrf.mxu1 }
 0x1f1   : > { %10438 = vst [vmem:[#allocation9_spill] sm:$0xff] %v9667_v61 }
 0x1f2   : > { %v9669_v47 = vpop.f32.mrf.mxu0  ;;  %v9671_v2 = vpop.f32.mrf.mxu1 }
 0x1f3   : > { %10439 = vst [vmem:[#allocation12_spill] sm:$0xff] %v9671_v2 }
 0x1f4   : > { %v9673_v23 = vpop.f32.mrf.mxu0  ;;  %v9675_v21 = vpop.f32.mrf.mxu1 }
 0x1f5   : > { %10440 = vst [vmem:[#allocation14_spill] sm:$0xff] %v9675_v21  ;;  %v4411_v8 = vadd.f32 %v9673_v23, %v4223_v3  ;;  %v9815_v3 = vld [vmem:[%s707_s24] ss:$0 sm:$0xff] }
 0x1f6   : > { %v9677_v52 = vpop.f32.mrf.mxu0  ;;  %v9679_v38 = vpop.f32.mrf.mxu1 }
 0x1f7   : > { %10441 = vst [vmem:[#allocation15_spill] sm:$0xff] %v9679_v38 }
 0x1f8   : > { %v7852_v27 = vpop.f32.mrf.mxu0  ;;  %v9681_v57 = vpop.f32.mrf.mxu1 }
 0x1fa   : > { %v4561_v42 = vpop.f32.mrf.mxu0  ;;  %v9683_v11 = vpop.f32.mrf.mxu1 }
 0x1fc   : > { %v7853_v22 = vpop.f32.mrf.mxu0  ;;  %v9685_v60 = vpop.f32.mrf.mxu1 }
 0x1fd   : > { %10442 = vst [vmem:[#allocation17_spill] sm:$0xff] %v9685_v60 }
 0x1fe   : > { %v4564_v53 = vpop.f32.mrf.mxu0  ;;  %v9687_v44 = vpop.f32.mrf.mxu1 }
 0x1ff   : > { %10443 = vst [vmem:[#allocation3_spill] sm:$0xff] %v9687_v44 }
 0x200   : > { %v7856_v29 = vpop.f32.mrf.mxu0  ;;  %v9689_v7 = vpop.f32.mrf.mxu1 }
 0x201   : > { %10444 = vst [vmem:[#allocation2_spill] sm:$0xff] %v9689_v7  ;;  %v4219_v7 = vadd.f32 %v9633_v54, %v9613_v18  ;;  %v4592_v54 = vadd.f32 %v4561_v42, %v4404_v55  ;;  %v4220_v55 = vadd.f32 %v9645_v30, %v9619_v37  ;;  %v4308_v42 = vadd.f32 %v9657_v56, %v9627_v4 }
 0x202   : > { %v9691_v32 = vpop.f32.mrf.mxu0  ;;  %v9693_v46 = vpop.f32.mrf.mxu1 }
 0x203   : > { %10445 = vst [vmem:[#allocation4_spill] sm:$0xff] %v9693_v46  ;;  %v4408_v37 = vadd.f32 %v9669_v47, %v4220_v55  ;;  %v4496_v4 = vadd.f32 %v9681_v57, %v4308_v42 }
 0x204   : > { %v7857_v33 = vpop.f32.mrf.mxu0  ;;  %v9695_v48 = vpop.f32.mrf.mxu1 }
 0x205   : > { %10446 = vst [vmem:[#allocation8_spill] sm:$0xff] %v9695_v48  ;;  %v4596_v47 = vadd.f32 %v9691_v32, %v4408_v37 }
 0x206   : > { %v9697_v20 = vpop.f32.mrf.mxu0  ;;  %v9699_v25 = vpop.f32.mrf.mxu1 }
 0x207   : > { %10447 = vst [vmem:[#allocation10_spill] sm:$0xff] %v9699_v25  ;;  %v4218_v25 = vadd.f32 %v9625_v51, %v9609_v24 }
 0x208   : > { %v7876_v13 = vpop.f32.mrf.mxu0  ;;  %v9701_v14 = vpop.f32.mrf.mxu1  ;;  %v10464_v37 = vld [vmem:[#allocation2_spill] sm:$0xff] }
 0x20a   : > { %v4749_v39 = vpop.f32.mrf.mxu0  ;;  %v9703_v1 = vpop.f32.mrf.mxu1 }
 0x20b   : > { %10448 = vst [vmem:[#allocation11_spill] sm:$0xff] %v9703_v1  ;;  %v4780_v16 = vadd.f32 %v4749_v39, %v4592_v54 }
 0x20c   : > { %v7877_v5 = vpop.f32.mrf.mxu0  ;;  %v9705_v50 = vpop.f32.mrf.mxu1 }
 0x20d   : > { %10449 = vst [vmem:[#allocation13_spill] sm:$0xff] %v9705_v50  ;;  %v4407_v50 = vadd.f32 %v7829_v43, %v4219_v7  ;;  %v4306_v7 = vadd.f32 %v9659_v19, %v9631_v26  ;;  %v4684_v19 = vadd.f32 %v9701_v14, %v4496_v4 }
 0x20e   : > { %v4752_v10 = vpop.f32.mrf.mxu0  ;;  %v9707_v38 = vpop.f32.mrf.mxu1 }
 0x20f   : > { %10450 = vst [vmem:[#allocation21_spill] sm:$0xff] %v9707_v38  ;;  %v4217_v38 = vadd.f32 %v9637_v6, %v9615_v63  ;;  %v4595_v51 = vadd.f32 %v7853_v22, %v4407_v50  ;;  %v4222_v63 = vadd.f32 %v9641_v62, %v9617_v15  ;;  %v4494_v26 = vadd.f32 %v9683_v11, %v4306_v7  ;;  %v10454_v11 = vld [vmem:[#allocation17_spill] sm:$0xff] }
 0x210   : > { %v7880_v59 = vpop.f32.mrf.mxu0  ;;  %v9709_v46 = vpop.f32.mrf.mxu1 }
 0x211   : > { %10451 = vst [vmem:[#allocation22_spill] sm:$0xff] %v9709_v46  ;;  %v4406_v46 = vadd.f32 %v7828_v45, %v4218_v25  ;;  %v4405_v9 = vadd.f32 %v4376_v0, %v4217_v38  ;;  %v4783_v60 = vadd.f32 %v7877_v5, %v4595_v51  ;;  %v4410_v15 = vadd.f32 %v9665_v58, %v4222_v63  ;;  %v10457_v5 = vld [vmem:[#allocation7_spill] sm:$0xff]  ;;  %v10459_v51 = vld [vmem:[#allocation9_spill] sm:$0xff] }
 0x212   : > { %v4765_v48 = vpop.f32.mrf.mxu0  ;;  %v9711_v21 = vpop.f32.mrf.mxu1  ;;  %v4599_v58 = vadd.f32 %v7857_v33, %v4411_v8 }
 0x213   : > { %10452 = vst [vmem:[#allocation23_spill] sm:$0xff] %v9711_v21  ;;  %v4594_v24 = vadd.f32 %v7852_v27, %v4406_v46  ;;  %v4784_v46 = vadd.f32 %v4765_v48, %v4596_v47  ;;  %v10467_v47 = vld [vmem:[#allocation4_spill] sm:$0xff] }
 0x214   : > { %v7881_v28 = vpop.f32.mrf.mxu0  ;;  %v9717_v44 = vpop.f32.mrf.mxu1 }
 0x215   : > { %10453 = vst [vmem:[#allocation24_spill] sm:$0xff] %v9717_v44  ;;  %v4593_v44 = vadd.f32 %v4564_v53, %v4405_v9  ;;  %v4782_v1 = vadd.f32 %v7876_v13, %v4594_v24  ;;  %v4221_v9 = vadd.f32 %v9653_v31, %v9623_v34  ;;  %v4598_v31 = vadd.f32 %v7856_v29, %v4410_v15  ;;  %v10455_v13 = vld [vmem:[#allocation11_spill] sm:$0xff]  ;;  %v10458_v24 = vld [vmem:[#allocation18_spill] sm:$0xff] }
 0x216   : > { %v4768_v2 = vpop.f32.mrf.mxu0  ;;  %v9723_v61 = vpop.f32.mrf.mxu1  ;;  %v4682_v14 = vadd.f32 %v10455_v13, %v4494_v26 }
 0x217   : > { %v4781_v45 = vadd.f32 %v4752_v10, %v4593_v44  ;;  %v4409_v34 = vadd.f32 %v9677_v52, %v4221_v9  ;;  %v4786_v52 = vadd.f32 %v7880_v59, %v4598_v31  ;;  %v4787_v44 = vadd.f32 %v7881_v28, %v4599_v58  ;;  %v10462_v9 = vld [vmem:[#allocation12_spill] sm:$0xff] }
 0x218   : > { %v7900_v21 = vpop.f32.mrf.mxu0  ;;  %v9725_v49 = vpop.f32.mrf.mxu1  ;;  %v10469_v7 = vld [vmem:[#allocation22_spill] sm:$0xff] }
 0x219   : > { %v9733_v35 = vadd.f32 %v7900_v21, %v4782_v1  ;;  %v4597_v53 = vadd.f32 %v9697_v20, %v4409_v34  ;;  %v4309_v20 = vadd.f32 %v9661_v40, %v9635_v17  ;;  %v4872_v39 = vadd.f32 %v9725_v49, %v4684_v19  ;;  %v10456_v1 = vld [vmem:[#allocation16_spill] sm:$0xff] }
 0x21a   : > { %v4937_v18 = vpop.f32.mrf.mxu0  ;;  %v9727_v12 = vpop.f32.mrf.mxu1  ;;  %v4307_v50 = vadd.f32 %v10457_v5, %v10456_v1  ;;  %v10461_v49 = vld [vmem:[#allocation20_spill] sm:$0xff]  ;;  %v10471_v19 = vld [vmem:[#allocation23_spill] sm:$0xff] }
 0x21b   : > { %v9745_v41 = vadd.f32 %v4937_v18, %v4780_v16  ;;  %v4785_v32 = vadd.f32 %v4768_v2, %v4597_v53  ;;  %v9794_v2 = vld [vmem:[%s10341_s13 + $0x8] sm:$0xff]   ;;  %v4497_v25 = vadd.f32 %v10454_v11, %v4309_v20  ;;  %v4312_v18 = vadd.f32 %v10459_v51, %v10458_v24  ;;  %v10470_v20 = vld [vmem:[#allocation8_spill] sm:$0xff] }
 0x21c   : > { %v7901_v6 = vpop.f32.mrf.mxu0  ;;  %v9735_v43 = vpop.f32.mrf.mxu1  ;;  %v4310_v15 = vadd.f32 %v10462_v9, %v10461_v49  ;;  %v10473_v5 = vld [vmem:[#allocation15_spill] sm:$0xff]  ;;  %v10474_v24 = vld [vmem:[#allocation24_spill] sm:$0xff] }
 0x21d   : > { %v9737_v0 = vadd.f32 %v7901_v6, %v4783_v60  ;;  %v8151_v60 = vld [vmem:[%s10336_s8] sm:$0xff]   ;;  %v10460_v6 = vld [vmem:[#allocation13_spill] sm:$0xff] }
 0x21e   : > { %v4940_v62 = vpop.f32.mrf.mxu0  ;;  %v9751_v21 = vpop.f32.mrf.mxu1  ;;  %v4685_v16 = vadd.f32 %v10460_v6, %v4497_v25  ;;  %v4498_v53 = vadd.f32 %v10467_v47, %v4310_v15  ;;  %v8155_v15 = vld [vmem:[%s10341_s13] sm:$0xff]   ;;  %v9892_v47 = vld [vmem:[%s10341_s13 + $0x18] sm:$0xff]  }
 0x21f   : > { %v9749_v10 = vpack.c.bf16 %v9737_v0, %v9733_v35  ;;  %v9753_v38 = vadd.f32 %v4940_v62, %v4781_v45  ;;  %v4870_v45 = vadd.f32 %v9727_v12, %v4682_v14  ;;  %v10463_v62 = vld [vmem:[#allocation3_spill] sm:$0xff]  ;;  %v10465_v12 = vld [vmem:[#allocation5_spill] sm:$0xff] }
 0x220   : > { %v7904_v30 = vpop.f32.mrf.mxu0  ;;  %v9759_v27 = vpop.f32.mrf.mxu1  ;;  %v4495_v8 = vadd.f32 %v10463_v62, %v4307_v50  ;;  %v4873_v31 = vadd.f32 %v9735_v43, %v4685_v16  ;;  %v10475_v16 = vld [vmem:[#allocation10_spill] sm:$0xff] }
 0x221   : > { %v5168_v23 = vpack.c.bf16 %v9753_v38, %v9745_v41  ;;  %v9776_v33 = vadd.f32 %v7904_v30, %v4786_v52  ;;  %v4500_v30 = vadd.f32 %v10464_v37, %v4312_v18  ;;  %v10468_v52 = vld [vmem:[#allocation21_spill] sm:$0xff]  ;;  %v8156_v37 = vld [vmem:[%s10337_s9] sm:$0xff]  }
 0x222   : > { %v4953_v22 = vpop.f32.mrf.mxu0  ;;  %v9768_v29 = vpop.f32.mrf.mxu1 }
 0x223   : > { %7934 = vmatprep.mubr.msk.bf16.mxu1 %vm777_vm0, %v5168_v23  ;;  %v9796_v48 = vadd.f32 %v4953_v22, %v4784_v46  ;;  %v10466_v22 = vld [vmem:[#allocation14_spill] sm:$0xff]  ;;  %v4688_v4 = vadd.f32 %v10469_v7, %v4500_v30 }
 0x224   : > { %v7905_v56 = vpop.f32.mrf.mxu0  ;;  %7935 = vmatmul.mubr.msk.bf16.vlgmr.msra.gmra.mxu1 %vm777_vm0, %v9749_v10  ;;  %v9778_v59 = vpop.f32.mrf.mxu1 }
 0x225   : > { %v9780_v28 = vadd.f32 %v7905_v56, %v4787_v44  ;;  %7955 = vmatpush3.bf16.msra.mxu1 %v9580_v36  ;;  %v4683_v44 = vadd.f32 %v10468_v52, %v4495_v8  ;;  %v4876_v25 = vadd.f32 %v9759_v27, %v4688_v4 }
 0x226   : > { %v4956_v57 = vpop.f32.mrf.mxu0  ;;  %7956 = vmatprep.subr.bf16.mxu1 %v8151_v60  ;;  %v9802_v17 = vpop.f32.mrf.mxu1 }
 0x227   : > { %v9800_v36 = vpack.c.bf16 %v9780_v28, %v9776_v33  ;;  %v9804_v40 = vadd.f32 %v4956_v57, %v4785_v32  ;;  %v4686_v57 = vadd.f32 %v10471_v19, %v4498_v53  ;;  %v4871_v11 = vadd.f32 %v9751_v21, %v4683_v44 }
 0x228   : > { %v7912_v63 = vpop.f32.mrf.mxu1 }
 0x229   : > { %v5170_v54 = vpack.c.bf16 %v9804_v40, %v9796_v48  ;;  %7957 = vmatpush3.bf16.msra.mxu1 %v8151_v60  ;;  %v5060_v55 = vadd.f32 %v7912_v63, %v4872_v39  ;;  %v4313_v60 = vadd.f32 %v10466_v22, %v10465_v12  ;;  %v4874_v21 = vadd.f32 %v9768_v29, %v4686_v57  ;;  %v9883_v12 = vld [vmem:[%s9858_s23 + $0x10] sm:$0xff] }
 0x22a   : > { %7978 = vmatprep.subr.bf16.mxu1 %v9794_v2  ;;  %v5027_v34 = vpop.f32.mrf.mxu1 }
 0x22b   : > { %7938 = vmatprep.mubr.msk.bf16.mxu1 %vm777_vm0, %v5170_v54  ;;  %v5098_v58 = vadd.f32 %v9815_v3, %v5060_v55  ;;  %v5058_v42 = vadd.f32 %v5027_v34, %v4870_v45  ;;  %v4501_v26 = vadd.f32 %v10470_v20, %v4313_v60  ;;  %v9918_v20 = vld [vmem:[%s9858_s23 + $0x30] sm:$0xff] }
 0x22c   : > { %7939 = vmatmul.mubr.msk.bf16.gmra.mxu1 %vm777_vm0, %v9800_v36  ;;  %v7913_v56 = vpop.f32.mrf.mxu1 }
 0x22d   : > { %7958 = vmatprep.mubr.msk.bf16.mxu1 %vm777_vm0, %v5168_v23  ;;  %v6990_v43 = vmul.f32 -1.442695, %v5098_v58  ;;  %v5096_v46 = vadd.f32 %v9815_v3, %v5058_v42  ;;  %v5061_v32 = vadd.f32 %v7913_v56, %v4873_v31  ;;  %v10472_v23 = vld [vmem:[#allocation6_spill] sm:$0xff]  ;;  %v4689_v51 = vadd.f32 %v10474_v24, %v4501_v26  ;;  %v9925_v26 = vld [vmem:[%s9858_s23 + $0x50] sm:$0xff] }
 0x22e   : > { %v5030_v13 = vpop.f32.mrf.mxu1  ;;  %v4311_v50 = vadd.f32 %v10473_v5, %v10472_v23 }
 0x22f   : > { %8169 = vpow2.f32 %v6990_v43  ;;  %v6988_v14 = vmul.f32 -1.442695, %v5096_v46  ;;  %v5099_v39 = vadd.f32 %v9815_v3, %v5061_v32  ;;  %v9841_v1 = vpack.c.bf16 %v5061_v32, %v5060_v55  ;;  %v9912_v32 = vld [vmem:[%s9858_s23 + $0x20] sm:$0xff] }
 0x230   : > { %v5059_v18 = vadd.f32 %v5030_v13, %v4871_v11  ;;  %v7916_v63 = vpop.f32.mrf.mxu1  ;;  %v4499_v45 = vadd.f32 %v10475_v16, %v4311_v50  ;;  %v4877_v29 = vadd.f32 %v9778_v59, %v4689_v51  ;;  %v9939_v13 = vld [vmem:[%s9858_s23 + $0x18] sm:$0x7]  ;;  %v9965_v16 = vld [vmem:[%s9858_s23 + $0x60] sm:$0xff] }
 0x231   : > { %8171 = vpow2.f32 %v6988_v14  ;;  %v6991_v27 = vmul.f32 -1.442695, %v5099_v39  ;;  %v5064_v6 = vadd.f32 %v7916_v63, %v4876_v25  ;;  %v9947_v39 = vpack.c.bf16 %v9918_v20, %v9912_v32 }
 0x232   : > { %v5097_v49 = vadd.f32 %v9815_v3, %v5059_v18  ;;  %v9850_v55 = vpack.c.bf16 %v5059_v18, %v5058_v42  ;;  %v5043_v9 = vpop.f32.mrf.mxu1  ;;  %v4687_v30 = vadd.f32 %v9723_v61, %v4499_v45  ;;  %v9885_v61 = vld [vmem:[%s704_s26] ss:$0 sm:$0xff]  ;;  %v5781_v18 = vrot.slane %v9883_v12, 1  ;;  %v9968_v45 = vld [vmem:[%s9858_s23 + $0x70] sm:$0xff] }
 0x233   : > { %8173 = vpow2.f32 %v6991_v27  ;;  %v5102_v62 = vadd.f32 %v9815_v3, %v5064_v6  ;;  %v5062_v8 = vadd.f32 %v5043_v9, %v4874_v21  ;;  %v5076_v4 = vadd.f32 %v9885_v61, %v9733_v35  ;;  %v9922_v35 = vld [vmem:[%s9858_s23 + $0x40] sm:$0xff] }
 0x234   : > { %7959 = vmatmul.mubr.msk.bf16.vlgmr.msra.gmra.mxu1 %vm777_vm0, %v9749_v10  ;;  %v6989_v34 = vmul.f32 -1.442695, %v5097_v49  ;;  %7922 = vmatprep.mubr.msk.bf16.mxu0 %vm777_vm0, %v9850_v55  ;;  %v7917_v59 = vpop.f32.mrf.mxu1  ;;  %v9880_v10 = vld [vmem:[%s9858_s23] sm:$0xff]  ;;  %v4875_v22 = vadd.f32 %v9802_v17, %v4687_v30  ;;  %v9900_v17 = vld [vmem:[%s10340_s12 + $0x8] sm:$0xff]   ;;  %v5074_v57 = vadd.f32 %v9885_v61, %v9745_v41  ;;  %v5077_v41 = vadd.f32 %v9885_v61, %v9737_v0 }
 0x235   : > { %7962 = vmatprep.mubr.msk.bf16.mxu1 %vm777_vm0, %v5170_v54  ;;  %v6994_v31 = vmul.f32 -1.442695, %v5102_v62  ;;  %v5100_v58 = vadd.f32 %v9815_v3, %v5062_v8  ;;  %v5065_v42 = vadd.f32 %v7917_v59, %v4877_v29  ;;  %7923 = vmatmul.mubr.msk.bf16.vlgmr.msra.gmra.mxu0 %vm777_vm0, %v9841_v1  ;;  %v10477_v54 = vld [vmem:[#allocation19_spill] sm:$0xff]  ;;  %v9904_v7 = vpack.c.bf16 %v9883_v12, %v9880_v10 }
 0x236   : > { %7979 = vmatpush3.bf16.msra.mxu1 %v9794_v2  ;;  %8175 = vpow2.f32 %v6989_v34  ;;  %v5046_v60 = vpop.f32.mrf.mxu1  ;;  %7943 = vmatpush3.bf16.msra.mxu0 %v10477_v54  ;;  %v9951_v23 = vpack.c.bf16 %v9925_v26, %v9922_v35  ;;  %v5778_v50 = vrot.slane %v9880_v10, 1  ;;  %v5075_v51 = vadd.f32 %v9885_v61, %v9753_v38  ;;  %v9998_v34 = vld [vmem:[%s10341_s13 + $0x28] sm:$0xff]  }
 0x237   : > { %7980 = vmatprep.subr.bf16.mxu1 %v8155_v15  ;;  %8177 = vpow2.f32 %v6994_v31  ;;  %v6992_v2 = vmul.f32 -1.442695, %v5100_v58  ;;  %v5103_v53 = vadd.f32 %v9815_v3, %v5065_v42  ;;  %v9895_v52 = vpack.c.bf16 %v5065_v42, %v5064_v6  ;;  %7944 = vmatprep.subr.bf16.mxu0 %v8156_v37  ;;  %v8159_v6 = vld [vmem:[%s10341_s13 + $0x10] sm:$0xff]   ;;  %v10001_v59 = vld [vmem:[%s9858_s23 + $0x48] sm:$0x7] }
 0x238   : > { %v5063_v44 = vadd.f32 %v5046_v60, %v4875_v22  ;;  %v5782_v63 = vrot.slane %v9939_v13, 1  ;;  %v5080_v21 = vadd.f32 %v9885_v61, %v9776_v33  ;;  %v8160_v33 = vld [vmem:[%s10340_s12] sm:$0xff]   ;;  %v5784_v30 = vrot.slane %v9912_v32, 1  ;;  %v10011_v22 = vld [vmem:[%s9858_s23 + $0x58] sm:$0x7] }
 0x239   : > { %8179 = vpow2.f32 %v6992_v2  ;;  %v6995_v56 = vmul.f32 -1.442695, %v5103_v53  ;;  %v5081_v58 = vadd.f32 %v9885_v61, %v9780_v28  ;;  %v5790_v53 = vrot.slane %v9922_v35, 1 }
 0x23a   : > { %7981 = vmatpush3.bf16.msra.mxu1 %v8155_v15  ;;  %v5101_v43 = vadd.f32 %v9815_v3, %v5063_v44  ;;  %v9909_v46 = vpack.c.bf16 %v5063_v44, %v5062_v8  ;;  %7945 = vmatpush3.bf16.msra.mxu0 %v8156_v37  ;;  %v5078_v15 = vadd.f32 %v9885_v61, %v9796_v48  ;;  %v9986_v8 = vld [vmem:[%s9858_s23 + $0x38] sm:$0x7]  ;;  %v5791_v44 = vrot.slane %v10001_v59, 1 }
 0x23b   : > { %8002 = vmatprep.subr.bf16.mxu1 %v9892_v47  ;;  %8181 = vpow2.f32 %v6995_v56  ;;  %7966 = vmatprep.subr.bf16.mxu0 %v9900_v17  ;;  %v5783_v62 = vsel %vm980_vm1, %v5781_v18, %v5782_v63  ;;  %v9993_v48 = vpack.c.bf16 %v9968_v45, %v9965_v16  ;;  %v5788_v28 = vrot.slane %v9986_v8, 1 }
 0x23c   : > { %7963 = vmatmul.mubr.msk.bf16.gmra.mxu1 %vm777_vm0, %v9800_v36  ;;  %v8170_v19 = vpop.eup %8169  ;;  %v6993_v11 = vmul.f32 -1.442695, %v5101_v43  ;;  %7926 = vmatprep.mubr.msk.bf16.mxu0 %vm777_vm0, %v9909_v46  ;;  %v9934_v36 = vld [vmem:[%s9858_s23 + $0x8] sm:$0x7]  ;;  %8183 = vtanh.f32 %v5076_v4  ;;  %v5079_v4 = vadd.f32 %v9885_v61, %v9804_v40  ;;  %v5794_v43 = vrot.slane %v10011_v22, 1 }
 0x23d   : > { %7982 = vmatprep.mubr.msk.bf16.mxu1 %vm777_vm0, %v9904_v7  ;;  %v5130_v25 = vadd.f32 1.0, %v8170_v19  ;;  %7927 = vmatmul.mubr.msk.bf16.gmra.mxu0 %vm777_vm0, %v9895_v52  ;;  %v5779_v0 = vrot.slane %v9934_v36, 1 }
 0x23e   : > { %v8172_v14 = vpop.eup %8171  ;;  %8185 = vpow2.f32 %v6993_v11  ;;  %7946 = vmatprep.mubr.msk.bf16.mxu0 %vm777_vm0, %v9850_v55  ;;  %v9977_v55 = vld [vmem:[%s9858_s23 + $0x28] sm:$0x7] }
 0x23f   : > { %8187 = vrcp.f32 %v5130_v25  ;;  %v5128_v5 = vadd.f32 1.0, %v8172_v14  ;;  %v5780_v49 = vsel %vm980_vm1, %v5778_v50, %v5779_v0  ;;  %v5785_v42 = vrot.slane %v9977_v55, 1  ;;  %v10048_v0 = vld [vmem:[%s9858_s23 + $0x68] sm:$0x7] }
 0x240   : > { %v8174_v24 = vpop.eup %8173  ;;  %8189 = vtanh.f32 %v5074_v57  ;;  %v10013_v54 = vpack.c.bf16 %v5783_v62, %v5780_v49  ;;  %v5797_v49 = vrot.slane %v10048_v0, 1  ;;  %v8163_v62 = vld [vmem:[%s10341_s13 + $0x20] sm:$0xff]  }
 0x241   : > { %8191 = vrcp.f32 %v5128_v5  ;;  %v5131_v27 = vadd.f32 1.0, %v8174_v24  ;;  %v5786_v11 = vsel %vm980_vm1, %v5784_v30, %v5785_v42  ;;  %v5792_v5 = vsel %vm980_vm1, %v5790_v53, %v5791_v44  ;;  %v10051_v24 = vld [vmem:[%s9858_s23 + $0x78] sm:$0x7] }
 0x242   : > { %8193 = vtanh.f32 %v5077_v41  ;;  %v6010_v30 = vrot.slane %v9939_v13, 2  ;;  %v6012_v44 = vrot.slane %v9912_v32, 2  ;;  %v6016_v32 = vrot.slane %v9986_v8, 2 }
 0x243   : > { %v8176_v38 = vpop.eup %8175  ;;  %8195 = vrcp.f32 %v5131_v27 }
 0x244   : > { %7983 = vmatmul.mubr.msk.bf16.vlgmr.msra.gmra.mxu1 %vm777_vm0, %v9947_v39  ;;  %v8178_v9 = vpop.eup %8177  ;;  %8197 = vtanh.f32 %v5075_v51  ;;  %v5129_v29 = vadd.f32 1.0, %v8176_v38  ;;  %v6006_v38 = vrot.slane %v9880_v10, 2 }
 0x245   : > { %8003 = vmatpush3.bf16.msra.mxu1 %v9892_v47  ;;  %7986 = vmatprep.mubr.msk.bf16.mxu1 %vm777_vm0, %v9951_v23  ;;  %8199 = vtanh.f32 %v5080_v21  ;;  %v5134_v37 = vadd.f32 1.0, %v8178_v9  ;;  %v10019_v47 = vld [vmem:[%s10340_s12 + $0x18] sm:$0xff]   ;;  %v5796_v21 = vrot.slane %v9965_v16, 1 }
 0x246   : > { %7947 = vmatmul.mubr.msk.bf16.vlgmr.msra.gmra.mxu0 %vm777_vm0, %v9841_v1  ;;  %8004 = vmatprep.subr.bf16.mxu1 %v8159_v6  ;;  %v8180_v31 = vpop.eup %8179  ;;  %8201 = vrcp.f32 %v5129_v29  ;;  %v5787_v1 = vrot.slane %v9918_v20, 1  ;;  %v6009_v29 = vrot.slane %v9883_v12, 2 }
 0x247   : > { %7950 = vmatprep.mubr.msk.bf16.mxu0 %vm777_vm0, %v9909_v46  ;;  %7967 = vmatpush3.bf16.msra.mxu0 %v9900_v17  ;;  %8203 = vrcp.f32 %v5134_v37  ;;  %v5132_v60 = vadd.f32 1.0, %v8180_v31  ;;  %v5793_v17 = vrot.slane %v9925_v26, 1  ;;  %v6007_v37 = vrot.slane %v9934_v36, 2 }
 0x248   : > { %7968 = vmatprep.subr.bf16.mxu0 %v8160_v33  ;;  %v8182_v2 = vpop.eup %8181  ;;  %8205 = vtanh.f32 %v5078_v15  ;;  %v5789_v25 = vsel %vm980_vm1, %v5787_v1, %v5788_v28  ;;  %v5798_v36 = vsel %vm980_vm1, %v5796_v21, %v5797_v49 }
 0x249   : > { %8005 = vmatpush3.bf16.msra.mxu1 %v8159_v6  ;;  %8207 = vrcp.f32 %v5132_v60  ;;  %v5135_v56 = vadd.f32 1.0, %v8182_v2  ;;  %v8184_v46 = vpop.eup %8183  ;;  %v5795_v50 = vsel %vm980_vm1, %v5793_v17, %v5794_v43  ;;  %v10057_v27 = vpack.c.bf16 %v5789_v25, %v5786_v11 }
 0x24a   : > { %8026 = vmatprep.subr.bf16.mxu1 %v9998_v34  ;;  %8209 = vtanh.f32 %v5081_v58  ;;  %v8164_v58 = vld [vmem:[%s10340_s12 + $0x10] sm:$0xff]   ;;  %v6008_v28 = vsel %vm1209_vm2, %v6006_v38, %v6007_v37  ;;  %v6011_v2 = vsel %vm1209_vm2, %v6009_v29, %v6010_v30 }
 0x24b   : > { %7969 = vmatpush3.bf16.msra.mxu0 %v8160_v33  ;;  %v8186_v19 = vpop.eup %8185  ;;  %8211 = vrcp.f32 %v5135_v56  ;;  %v10062_v33 = vpack.c.bf16 %v5795_v50, %v5792_v5  ;;  %v8165_v56 = vld [vmem:[%s10340_s12 + $0x28] sm:$0xff]   ;;  %v6038_v43 = vpack.c.bf16 %v6011_v2, %v6008_v28  ;;  %v6025_v50 = vrot.slane %v10048_v0, 2 }
 0x24c   : > { %7987 = vmatmul.mubr.msk.bf16.gmra.mxu1 %vm777_vm0, %v9993_v48  ;;  %7990 = vmatprep.subr.bf16.mxu0 %v10019_v47  ;;  %v8188_v40 = vpop.eup %8187  ;;  %v5133_v57 = vadd.f32 1.0, %v8186_v19  ;;  %8213 = vtanh.f32 %v5079_v4  ;;  %v8167_v0 = vld [vmem:[%s10344_s16 + $0x8] sm:$0xff]  }
 0x24d   : > { %8006 = vmatprep.mubr.msk.bf16.mxu1 %vm777_vm0, %v10013_v54  ;;  %v8190_v14 = vpop.eup %8189  ;;  %v5154_v41 = vmul.f32 %v8188_v40, %v8184_v46  ;;  %v6013_v46 = vrot.slane %v9977_v55, 2  ;;  %v6019_v40 = vrot.slane %v10001_v59, 2 }
 0x24e   : > { %7951 = vmatmul.mubr.msk.bf16.gmra.mxu0 %vm777_vm0, %v9895_v52  ;;  %v8192_v51 = vpop.eup %8191  ;;  %8215 = vrcp.f32 %v5133_v57  ;;  %v5799_v52 = vrot.slane %v9968_v45, 1  ;;  %v6022_v57 = vrot.slane %v10011_v22, 2  ;;  %v6024_v22 = vrot.slane %v9965_v16, 2 }
 0x24f   : > { %7970 = vmatprep.mubr.msk.bf16.mxu0 %vm777_vm0, %v9904_v7  ;;  %v8194_v18 = vpop.eup %8193  ;;  %v5152_v63 = vmul.f32 %v8192_v51, %v8190_v14  ;;  %5162 = vst.msk [vmem:[%s10041_s1 + $0x10] sm:$0xff] %vm777_vm0, %v5154_v41  ;;  %v5800_v7 = vrot.slane %v10051_v24, 1  ;;  %v6027_v41 = vrot.slane %v9968_v45, 2  ;;  %v6028_v51 = vrot.slane %v10051_v24, 2  ;;  %v8168_v24 = vld [vmem:[%s10344_s16] sm:$0xff]  }
 0x250   : > { %v8196_v6 = vpop.eup %8195 }
 0x251   : > { %v8198_v9 = vpop.eup %8197  ;;  %v5155_v15 = vmul.f32 %v8196_v6, %v8194_v18  ;;  %5160 = vst.msk [vmem:[%s10041_s1] sm:$0xff] %vm777_vm0, %v5152_v63  ;;  %v5801_v13 = vsel %vm980_vm1, %v5799_v52, %v5800_v7  ;;  %v6029_v16 = vsel %vm1209_vm2, %v6027_v41, %v6028_v51  ;;  %v7035_v51 = vld [vmem:[%s10343_s15] ss:$0 sm:$0xff] }
 0x252   : > { %v8200_v10 = vpop.eup %8199  ;;  %v5813_v4 = vpack.c.bf16 %v5801_v13, %v5798_v36 }
 0x253   : > { %v8202_v31 = vpop.eup %8201  ;;  %5163 = vst.msk [vmem:[%s10041_s1 + $0x18] sm:$0xff] %vm777_vm0, %v5155_v15 }
 0x254   : > { %8007 = vmatmul.mubr.msk.bf16.vlgmr.msra.gmra.mxu1 %vm777_vm0, %v10057_v27  ;;  %v8204_v12 = vpop.eup %8203  ;;  %v5153_v1 = vmul.f32 %v8202_v31, %v8198_v9 }
 0x255   : > { %8027 = vmatpush3.bf16.msra.mxu1 %v9998_v34  ;;  %8010 = vmatprep.mubr.msk.bf16.mxu1 %vm777_vm0, %v10062_v33  ;;  %v8206_v42 = vpop.eup %8205  ;;  %v5158_v60 = vmul.f32 %v8204_v12, %v8200_v10 }
 0x256   : > { %7971 = vmatmul.mubr.msk.bf16.vlgmr.msra.gmra.mxu0 %vm777_vm0, %v9947_v39  ;;  %8028 = vmatprep.subr.bf16.mxu1 %v8163_v62  ;;  %v8208_v53 = vpop.eup %8207  ;;  %5161 = vst.msk [vmem:[%s10041_s1 + $0x8] sm:$0xff] %vm777_vm0, %v5153_v1  ;;  %v6015_v39 = vrot.slane %v9918_v20, 2  ;;  %v6021_v20 = vrot.slane %v9925_v26, 2  ;;  %v6014_v26 = vsel %vm1209_vm2, %v6012_v44, %v6013_v46 }
 0x257   : > { %7991 = vmatpush3.bf16.msra.mxu0 %v10019_v47  ;;  %7974 = vmatprep.mubr.msk.bf16.mxu0 %vm777_vm0, %v9951_v23  ;;  %v8210_v34 = vpop.eup %8209  ;;  %v5156_v17 = vmul.f32 %v8208_v53, %v8206_v42  ;;  %5166 = vst.msk [vmem:[%s10041_s1 + $0x30] sm:$0xff] %vm777_vm0, %v5158_v60  ;;  %v6018_v23 = vrot.slane %v9922_v35, 2 }
 0x258   : > { %7992 = vmatprep.subr.bf16.mxu0 %v8164_v58  ;;  %v8212_v47 = vpop.eup %8211  ;;  %v6017_v55 = vsel %vm1209_vm2, %v6015_v39, %v6016_v32  ;;  %v6023_v59 = vsel %vm1209_vm2, %v6021_v20, %v6022_v57 }
 0x259   : > { %8029 = vmatpush3.bf16.msra.mxu1 %v8163_v62  ;;  %v5159_v19 = vmul.f32 %v8212_v47, %v8210_v34  ;;  %5164 = vst.msk [vmem:[%s10041_s1 + $0x20] sm:$0xff] %vm777_vm0, %v5156_v17  ;;  %v8214_v11 = vpop.eup %8213  ;;  %v6020_v8 = vsel %vm1209_vm2, %v6018_v23, %v6019_v40  ;;  %v6039_v14 = vpack.c.bf16 %v6017_v55, %v6014_v26 }
 0x25a   : > { %v6040_v5 = vpack.c.bf16 %v6023_v59, %v6020_v8 }
 0x25b   : > { %7993 = vmatpush3.bf16.msra.mxu0 %v8164_v58  ;;  %v8216_v25 = vpop.eup %8215  ;;  %5167 = vst.msk [vmem:[%s10041_s1 + $0x38] sm:$0xff] %vm777_vm0, %v5159_v19 }
 0x25c   : > { %8011 = vmatmul.mubr.msk.bf16.gmra.mxu1 %vm777_vm0, %v5813_v4  ;;  %8014 = vmatprep.subr.bf16.mxu0 %v8165_v56  ;;  %v5157_v35 = vmul.f32 %v8216_v25, %v8214_v11 }
 0x25d   : > { %8030 = vmatprep.mubr.msk.bf16.mxu1 %vm777_vm0, %v6038_v43 }
 0x25e   : > { %7975 = vmatmul.mubr.msk.bf16.gmra.mxu0 %vm777_vm0, %v9993_v48  ;;  %5165 = vst.msk [vmem:[%s10041_s1 + $0x28] sm:$0xff] %vm777_vm0, %v5157_v35  ;;  %v8166_v48 = vld [vmem:[%s10340_s12 + $0x20] sm:$0xff]  }
 0x25f   : > { %7994 = vmatprep.mubr.msk.bf16.mxu0 %vm777_vm0, %v10013_v54  ;;  %v6026_v54 = vsel %vm1209_vm2, %v6024_v22, %v6025_v50 }
 0x260   : > { %v6041_v45 = vpack.c.bf16 %v6029_v16, %v6026_v54 }
 0x264   : > { %8031 = vmatmul.mubr.msk.bf16.vlgmr.msra.gmra.mxu1 %vm777_vm0, %v6039_v14 }
 0x265   : > { %8034 = vmatprep.mubr.msk.bf16.mxu1 %vm777_vm0, %v6040_v5 }
 0x266   : > { %7995 = vmatmul.mubr.msk.bf16.vlgmr.msra.gmra.mxu0 %vm777_vm0, %v10057_v27 }
 0x267   : > { %8015 = vmatpush3.bf16.msra.mxu0 %v8165_v56  ;;  %7998 = vmatprep.mubr.msk.bf16.mxu0 %vm777_vm0, %v10062_v33 }
 0x268   : > { %8016 = vmatprep.subr.bf16.mxu0 %v8166_v48 }
 0x26b   : > { %8017 = vmatpush3.bf16.msra.mxu0 %v8166_v48 }
 0x26c   : > { %8035 = vmatmul.mubr.msk.bf16.gmra.mxu1 %vm777_vm0, %v6041_v45  ;;  %8038 = vmatprep.subr.bf16.mxu0 %v8167_v0 }
 0x26e   : > { %7999 = vmatmul.mubr.msk.bf16.gmra.mxu0 %vm777_vm0, %v5813_v4 }
 0x26f   : > { %8018 = vmatprep.mubr.msk.bf16.mxu0 %vm777_vm0, %v6038_v43 }
 0x276   : > { %8019 = vmatmul.mubr.msk.bf16.vlgmr.msra.gmra.mxu0 %vm777_vm0, %v6039_v14 }
 0x277   : > { %8022 = vmatprep.mubr.msk.bf16.mxu0 %vm777_vm0, %v6040_v5  ;;  %8039 = vmatpush3.bf16.msra.mxu0 %v8167_v0 }
 0x278   : > { %8040 = vmatprep.subr.bf16.mxu0 %v8168_v24 }
 0x27b   : > { %8041 = vmatpush3.bf16.msra.mxu0 %v8168_v24 }
 0x27e   : > { %8023 = vmatmul.mubr.msk.bf16.gmra.mxu0 %vm777_vm0, %v6041_v45 }
 0x2e4   : > { %v7936_v18 = vpop.f32.mrf.mxu1 }
 0x2e6   : > { %v5331_v63 = vpop.f32.mrf.mxu1 }
 0x2e8   : > { %v7937_v21 = vpop.f32.mrf.mxu1 }
 0x2ea   : > { %v10151_v52 = vpop.f32.mrf.mxu1 }
 0x2ec   : > { %v7940_v27 = vpop.f32.mrf.mxu1 }
 0x2ee   : > { %v5347_v6 = vpop.f32.mrf.mxu1 }
 0x2f0   : > { %v7941_v38 = vpop.f32.mrf.mxu1 }
 0x2f2   : > { %v10153_v33 = vpop.f32.mrf.mxu1 }
 0x2f3   : > { %10478 = vst [vmem:[#allocation17_spill] sm:$0xff] %v10153_v33 }
 0x2f4   : > { %v7960_v49 = vpop.f32.mrf.mxu1 }
 0x2f5   : > { %v7924_v7 = vpop.f32.mrf.mxu0 }
 0x2f6   : > { %v5508_v9 = vpop.f32.mrf.mxu1  ;;  %v10155_v15 = vadd.f32 %v7936_v18, %v7924_v7  ;;  %v10199_v18 = vld [vmem:[%s10339_s11] ss:$0 sm:$0xff] }
 0x2f7   : > { %v5242_v29 = vpop.f32.mrf.mxu0 }
 0x2f8   : > { %v7961_v62 = vpop.f32.mrf.mxu1  ;;  %v10157_v37 = vadd.f32 %v5331_v63, %v5242_v29 }
 0x2f9   : > { %v7925_v30 = vpop.f32.mrf.mxu0 }
 0x2fa   : > { %v5511_v10 = vpop.f32.mrf.mxu1  ;;  %v10159_v31 = vadd.f32 %v7937_v21, %v7925_v30 }
 0x2fb   : > { %v10161_v58 = vpop.f32.mrf.mxu0 }
 0x2fc   : > { %v7964_v12 = vpop.f32.mrf.mxu1 }
 0x2fd   : > { %v7928_v1 = vpop.f32.mrf.mxu0 }
 0x2fe   : > { %v10163_v36 = vpop.f32.mrf.mxu1  ;;  %v10165_v13 = vadd.f32 %v7940_v27, %v7928_v1 }
 0x2ff   : > { %v5258_v42 = vpop.f32.mrf.mxu0 }
 0x300   : > { %v10167_v60 = vpop.f32.mrf.mxu1  ;;  %v10169_v28 = vadd.f32 %v5347_v6, %v5258_v42 }
 0x301   : > { %v7929_v2 = vpop.f32.mrf.mxu0 }
 0x302   : > { %v10171_v53 = vpop.f32.mrf.mxu1  ;;  %v10173_v34 = vadd.f32 %v7941_v38, %v7929_v2 }
 0x303   : > { %v10175_v17 = vpop.f32.mrf.mxu0 }
 0x304   : > { %10479 = vst [vmem:[#allocation11_spill] sm:$0xff] %v10173_v34  ;;  %10480 = vst [vmem:[#allocation16_spill] sm:$0xff] %v10175_v17  ;;  %v7984_v44 = vpop.f32.mrf.mxu1 }
 0x305   : > { %v5756_v24 = vadd.f32 %v7984_v44, %v7035_v51 }
 0x306   : > { %v7948_v39 = vpop.f32.mrf.mxu0  ;;  %v5717_v4 = vpop.f32.mrf.mxu1 }
 0x307   : > { %v5517_v0 = vadd.f32 %v7960_v49, %v7948_v39  ;;  %v5754_v6 = vadd.f32 %v7035_v51, %v5717_v4 }
 0x308   : > { %v5431_v56 = vpop.f32.mrf.mxu0  ;;  %v7985_v47 = vpop.f32.mrf.mxu1 }
 0x309   : > { %v5509_v27 = vadd.f32 %v5508_v9, %v5431_v56  ;;  %v5548_v1 = vadd.f32 %v10199_v18, %v5517_v0  ;;  %v5757_v49 = vadd.f32 %v7985_v47, %v7035_v51 }
 0x30a   : > { %v7949_v23 = vpop.f32.mrf.mxu0  ;;  %v5720_v43 = vpop.f32.mrf.mxu1 }
 0x30b   : > { %v5520_v7 = vadd.f32 %v7961_v62, %v7949_v23  ;;  %v5546_v34 = vadd.f32 %v10199_v18, %v5509_v27  ;;  %v5755_v56 = vadd.f32 %v7035_v51, %v5720_v43 }
 0x30c   : > { %v5434_v46 = vpop.f32.mrf.mxu0  ;;  %v7988_v32 = vpop.f32.mrf.mxu1 }
 0x30d   : > { %v5512_v44 = vadd.f32 %v5511_v10, %v5434_v46  ;;  %v5549_v62 = vadd.f32 %v10199_v18, %v5520_v7 }
 0x30e   : > { %v7952_v19 = vpop.f32.mrf.mxu0  ;;  %v5733_v20 = vpop.f32.mrf.mxu1 }
 0x30f   : > { %v5533_v39 = vadd.f32 %v7964_v12, %v7952_v19  ;;  %v5547_v19 = vadd.f32 %v10199_v18, %v5512_v44 }
 0x310   : > { %v5447_v40 = vpop.f32.mrf.mxu0  ;;  %v7989_v57 = vpop.f32.mrf.mxu1 }
 0x311   : > { %v5525_v23 = vadd.f32 %v10163_v36, %v5447_v40  ;;  %v5552_v0 = vadd.f32 %v10199_v18, %v5533_v39  ;;  %v5761_v43 = vadd.f32 %v7989_v57, %v7035_v51 }
 0x312   : > { %v7953_v11 = vpop.f32.mrf.mxu0  ;;  %v10177_v25 = vpop.f32.mrf.mxu1 }
 0x314   : > { %v10179_v35 = vpop.f32.mrf.mxu0  ;;  %v8008_v26 = vpop.f32.mrf.mxu1 }
 0x315   : > { %v6000_v38 = vadd.f32 %v8008_v26, %v5756_v24  ;;  %v5528_v57 = vadd.f32 %v10171_v53, %v10179_v35 }
 0x316   : > { %v10181_v55 = vpop.f32.mrf.mxu0  ;;  %v5967_v8 = vpop.f32.mrf.mxu1 }
 0x317   : > { %v5998_v42 = vadd.f32 %v5967_v8, %v5754_v6  ;;  %v5760_v8 = vadd.f32 %v7988_v32, %v7035_v51  ;;  %v5550_v32 = vadd.f32 %v10199_v18, %v5525_v23 }
 0x318   : > { %v10183_v59 = vpop.f32.mrf.mxu0  ;;  %v8009_v22 = vpop.f32.mrf.mxu1 }
 0x31a   : > { %v10185_v14 = vpop.f32.mrf.mxu0  ;;  %v5970_v41 = vpop.f32.mrf.mxu1 }
 0x31b   : > { %v5999_v24 = vadd.f32 %v5970_v41, %v5755_v56  ;;  %v5551_v56 = vadd.f32 %v10199_v18, %v5528_v57 }
 0x31c   : > { %v10187_v5 = vpop.f32.mrf.mxu0  ;;  %v8012_v50 = vpop.f32.mrf.mxu1 }
 0x31e   : > { %v10192_v48 = vpop.f32.mrf.mxu0  ;;  %v5983_v54 = vpop.f32.mrf.mxu1 }
 0x320   : > { %v10194_v16 = vpop.f32.mrf.mxu0  ;;  %v8013_v45 = vpop.f32.mrf.mxu1 }
 0x322   : > { %v10201_v63 = vpop.f32.mrf.mxu0  ;;  %v10203_v21 = vpop.f32.mrf.mxu1 }
 0x323   : > { %10481 = vst [vmem:[#allocation7_spill] sm:$0xff] %v10201_v63  ;;  %v6001_v63 = vadd.f32 %v8009_v22, %v5757_v49  ;;  %v5758_v22 = vadd.f32 %v7035_v51, %v5733_v20  ;;  %v5759_v49 = vadd.f32 %v7035_v51, %v10177_v25 }
 0x324   : > { %v10205_v29 = vpop.f32.mrf.mxu0  ;;  %v8032_v30 = vpop.f32.mrf.mxu1 }
 0x325   : > { %v6228_v2 = vadd.f32 %v8032_v30, %v6000_v38  ;;  %v5536_v38 = vadd.f32 %v10167_v60, %v7953_v11  ;;  %v6005_v11 = vadd.f32 %v8013_v45, %v5761_v43 }
 0x326   : > { %v10208_v33 = vpop.f32.mrf.mxu0  ;;  %v6195_v17 = vpop.f32.mrf.mxu1 }
 0x327   : > { %v6260_v9 = vadd.f32 %v6228_v2, %v5548_v1  ;;  %v6226_v4 = vadd.f32 %v6195_v17, %v5998_v42  ;;  %v6002_v1 = vadd.f32 %v5983_v54, %v5758_v22  ;;  %v5553_v54 = vadd.f32 %v10199_v18, %v5536_v38 }
 0x328   : > { %v10213_v26 = vpop.f32.mrf.mxu0  ;;  %v8033_v47 = vpop.f32.mrf.mxu1  ;;  %v5335_v18 = vadd.f32 %v10151_v52, %v10161_v58 }
 0x329   : > { %v6268_v10 = vadd.f32 %v9815_v3, %v6260_v9  ;;  %v6258_v12 = vadd.f32 %v6226_v4, %v5546_v34  ;;  %v6229_v46 = vadd.f32 %v8033_v47, %v6001_v63  ;;  %v6004_v34 = vadd.f32 %v8012_v50, %v5760_v8  ;;  %v10235_v9 = vld [vmem:[%s10342_s14] ss:$0 sm:$0xff] }
 0x32a   : > { %v10218_v17 = vpop.f32.mrf.mxu0  ;;  %v6198_v27 = vpop.f32.mrf.mxu1  ;;  %v6003_v4 = vadd.f32 %v10203_v21, %v5759_v49  ;;  %v5659_v22 = vadd.f32 %v10235_v9, %v10183_v59 }
 0x32b   : > { %v7078_v6 = vmul.f32 -1.442695, %v6268_v10  ;;  %v6266_v36 = vadd.f32 %v9815_v3, %v6258_v12  ;;  %v6261_v40 = vadd.f32 %v6229_v46, %v5549_v62  ;;  %v6227_v7 = vadd.f32 %v6198_v27, %v5999_v24  ;;  %v10248_v12 = vld [vmem:[%s10338_s10] ss:$0 sm:$0xff] }
 0x32c   : > { %v10223_v63 = vpop.f32.mrf.mxu0  ;;  %v8036_v30 = vpop.f32.mrf.mxu1  ;;  %v5661_v46 = vadd.f32 %v10181_v55, %v10235_v9  ;;  %v5908_v52 = vadd.f32 %v10213_v26, %v5659_v22  ;;  %v10485_v22 = vld [vmem:[#allocation17_spill] sm:$0xff] }
 0x32d   : > { %8217 = vpow2.f32 %v7078_v6  ;;  %v7076_v20 = vmul.f32 -1.442695, %v6266_v36  ;;  %v6269_v41 = vadd.f32 %v9815_v3, %v6261_v40  ;;  %v6259_v42 = vadd.f32 %v6227_v7, %v5547_v19 }
 0x32e   : > { %v10229_v2 = vpop.f32.mrf.mxu0  ;;  %v6232_v44 = vadd.f32 %v8036_v30, %v6004_v34  ;;  %v6211_v60 = vpop.f32.mrf.mxu1  ;;  %v5910_v43 = vadd.f32 %v10208_v33, %v5661_v46  ;;  %v5371_v40 = vadd.f32 %v10248_v12, %v10155_v15  ;;  %v5372_v33 = vadd.f32 %v10248_v12, %v10159_v31 }
 0x32f   : > { %8219 = vpow2.f32 %v7076_v20  ;;  %v7079_v50 = vmul.f32 -1.442695, %v6269_v41  ;;  %v6230_v39 = vadd.f32 %v6211_v60, %v6002_v1  ;;  %v6267_v53 = vadd.f32 %v9815_v3, %v6259_v42 }
 0x330   : > { %v6264_v35 = vadd.f32 %v6232_v44, %v5552_v0  ;;  %v10238_v25 = vpop.f32.mrf.mxu0  ;;  %v8037_v51 = vpop.f32.mrf.mxu1  ;;  %v5370_v7 = vadd.f32 %v10248_v12, %v5335_v18  ;;  %v5662_v15 = vadd.f32 %v10185_v14, %v10235_v9  ;;  %v5665_v31 = vadd.f32 %v10192_v48, %v10235_v9  ;;  %v10484_v18 = vld [vmem:[#allocation16_spill] sm:$0xff] }
 0x331   : > { %8221 = vpow2.f32 %v7079_v50  ;;  %v6262_v45 = vadd.f32 %v6230_v39, %v5550_v32  ;;  %v6233_v62 = vadd.f32 %v8037_v51, %v6005_v11  ;;  %v7077_v23 = vmul.f32 -1.442695, %v6267_v53 }
 0x332   : > { %v6272_v47 = vadd.f32 %v9815_v3, %v6264_v35  ;;  %v10243_v8 = vpop.f32.mrf.mxu0  ;;  %v6214_v10 = vpop.f32.mrf.mxu1  ;;  %v5369_v32 = vadd.f32 %v10248_v12, %v10157_v37  ;;  %v5660_v37 = vadd.f32 %v10235_v9, %v10187_v5  ;;  %v5911_v57 = vadd.f32 %v10218_v17, %v5662_v15  ;;  %v10482_v35 = vld [vmem:[#allocation7_spill] sm:$0xff] }
 0x333   : > { %v6270_v21 = vadd.f32 %v9815_v3, %v6262_v45  ;;  %v6265_v19 = vadd.f32 %v6233_v62, %v5553_v54  ;;  %v6231_v0 = vadd.f32 %v6214_v10, %v6003_v4  ;;  %8223 = vpow2.f32 %v7077_v23 }
 0x334   : > { %v7082_v24 = vmul.f32 -1.442695, %v6272_v47  ;;  %v10257_v27 = vpop.f32.mrf.mxu0  ;;  %v5909_v49 = vadd.f32 %v10223_v63, %v5660_v37  ;;  %v5373_v11 = vadd.f32 %v10248_v12, %v10169_v28  ;;  %v5914_v50 = vadd.f32 %v10229_v2, %v5665_v31 }
 0x335   : > { %v7080_v6 = vmul.f32 -1.442695, %v6270_v21  ;;  %v6273_v36 = vadd.f32 %v9815_v3, %v6265_v19  ;;  %v6263_v55 = vadd.f32 %v6231_v0, %v5551_v56  ;;  %v5666_v51 = vadd.f32 %v10482_v35, %v10235_v9  ;;  %v10483_v56 = vld [vmem:[#allocation11_spill] sm:$0xff] }
 0x336   : > { %8225 = vpow2.f32 %v7082_v24  ;;  %v8020_v58 = vpop.f32.mrf.mxu0  ;;  %v5376_v23 = vadd.f32 %v10248_v12, %v10483_v56  ;;  %v5351_v24 = vadd.f32 %v10485_v22, %v10484_v18 }
 0x337   : > { %8227 = vpow2.f32 %v7080_v6  ;;  %v7083_v59 = vmul.f32 -1.442695, %v6273_v36  ;;  %v6271_v38 = vadd.f32 %v9815_v3, %v6263_v55  ;;  %v6138_v34 = vadd.f32 %v8020_v58, %v5910_v43 }
 0x338   : > { %v6105_v30 = vpop.f32.mrf.mxu0  ;;  %v5375_v3 = vadd.f32 %v10248_v12, %v10165_v13  ;;  %v5663_v13 = vadd.f32 %v10235_v9, %v10194_v16  ;;  %v5915_v47 = vadd.f32 %v10243_v8, %v5666_v51  ;;  %v5664_v43 = vadd.f32 %v10235_v9, %v10205_v29 }
 0x339   : > { %8229 = vpow2.f32 %v7083_v59  ;;  %v7081_v26 = vmul.f32 -1.442695, %v6271_v38  ;;  %v6236_v1 = vadd.f32 %v6138_v34, %v5371_v40  ;;  %v6136_v20 = vadd.f32 %v6105_v30, %v5908_v52 }
 0x33a   : > { %v8218_v41 = vpop.eup %8217  ;;  %v8021_v14 = vpop.f32.mrf.mxu0  ;;  %v5912_v4 = vadd.f32 %v10238_v25, %v5663_v13  ;;  %v5913_v59 = vadd.f32 %v10257_v27, %v5664_v43 }
 0x33b   : > { %v6300_v42 = vadd.f32 1.0, %v8218_v41  ;;  %8231 = vpow2.f32 %v7081_v26  ;;  %v6244_v5 = vadd.f32 %v9885_v61, %v6236_v1  ;;  %v6234_v44 = vadd.f32 %v6136_v20, %v5369_v32 }
 0x33c   : > { %v8220_v60 = vpop.eup %8219  ;;  %v6139_v48 = vadd.f32 %v8021_v14, %v5911_v57  ;;  %v6108_v39 = vpop.f32.mrf.mxu0 }
 0x33d   : > { %8233 = vrcp.f32 %v6300_v42  ;;  %v6298_v17 = vadd.f32 1.0, %v8220_v60  ;;  %v6242_v63 = vadd.f32 %v9885_v61, %v6234_v44  ;;  %v6137_v54 = vadd.f32 %v6108_v39, %v5909_v49 }
 0x33e   : > { %v8222_v53 = vpop.eup %8221  ;;  %8235 = vtanh.f32 %v6244_v5  ;;  %v6237_v28 = vadd.f32 %v6139_v48, %v5372_v33  ;;  %v8024_v45 = vpop.f32.mrf.mxu0 }
 0x33f   : > { %8237 = vrcp.f32 %v6298_v17  ;;  %v6301_v16 = vadd.f32 1.0, %v8222_v53  ;;  %v6235_v62 = vadd.f32 %v6137_v54, %v5370_v7  ;;  %v6142_v2 = vadd.f32 %v8024_v45, %v5914_v50 }
 0x340   : > { %8239 = vtanh.f32 %v6242_v63  ;;  %v6245_v10 = vadd.f32 %v9885_v61, %v6237_v28  ;;  %v6121_v46 = vpop.f32.mrf.mxu0  ;;  %v8224_v21 = vpop.eup %8223  ;;  %v5374_v7 = vadd.f32 %v10248_v12, %v5351_v24 }
 0x341   : > { %8241 = vrcp.f32 %v6301_v16  ;;  %v6243_v25 = vadd.f32 %v9885_v61, %v6235_v62  ;;  %v6240_v19 = vadd.f32 %v6142_v2, %v5375_v3  ;;  %v6140_v0 = vadd.f32 %v6121_v46, %v5912_v4  ;;  %v7084_v2 = vld [vmem:[%s10345_s17] ss:$0 sm:$0xff] }
 0x342   : > { %v6299_v6 = vadd.f32 1.0, %v8224_v21  ;;  %8243 = vtanh.f32 %v6245_v10  ;;  %v8025_v36 = vpop.f32.mrf.mxu0 }
 0x343   : > { %v8226_v8 = vpop.eup %8225  ;;  %8245 = vtanh.f32 %v6243_v25  ;;  %v6248_v55 = vadd.f32 %v9885_v61, %v6240_v19  ;;  %v6238_v40 = vadd.f32 %v6140_v0, %v5373_v11  ;;  %v6143_v32 = vadd.f32 %v8025_v36, %v5915_v47 }
 0x344   : > { %v8228_v52 = vpop.eup %8227  ;;  %8247 = vrcp.f32 %v6299_v6  ;;  %v6304_v58 = vadd.f32 1.0, %v8226_v8  ;;  %v6124_v38 = vpop.f32.mrf.mxu0 }
 0x345   : > { %v6302_v34 = vadd.f32 1.0, %v8228_v52  ;;  %8249 = vtanh.f32 %v6248_v55  ;;  %v6246_v33 = vadd.f32 %v9885_v61, %v6238_v40  ;;  %v6241_v29 = vadd.f32 %v6143_v32, %v5376_v23 }
 0x346   : > { %v8230_v9 = vpop.eup %8229  ;;  %8251 = vrcp.f32 %v6304_v58  ;;  %v6141_v15 = vadd.f32 %v6124_v38, %v5913_v59 }
 0x347   : > { %8253 = vrcp.f32 %v6302_v34  ;;  %v6305_v37 = vadd.f32 1.0, %v8230_v9  ;;  %v6249_v30 = vadd.f32 %v9885_v61, %v6241_v29 }
 0x348   : > { %v8232_v26 = vpop.eup %8231  ;;  %8255 = vtanh.f32 %v6246_v33  ;;  %v6239_v1 = vadd.f32 %v6141_v15, %v5374_v7 }
 0x349   : > { %8257 = vrcp.f32 %v6305_v37  ;;  %v6303_v27 = vadd.f32 1.0, %v8232_v26 }
 0x34a   : > { %v8234_v20 = vpop.eup %8233  ;;  %8259 = vtanh.f32 %v6249_v30  ;;  %v6247_v41 = vadd.f32 %v9885_v61, %v6239_v1 }
 0x34b   : > { %v8236_v3 = vpop.eup %8235  ;;  %8261 = vrcp.f32 %v6303_v27 }
 0x34c   : > { %v8238_v31 = vpop.eup %8237  ;;  %8263 = vtanh.f32 %v6247_v41  ;;  %v6324_v42 = vmul.f32 %v8236_v3, %v8234_v20 }
 0x34d   : > { %v8240_v12 = vpop.eup %8239 }
 0x34e   : > { %v8242_v57 = vpop.eup %8241  ;;  %v6322_v13 = vmul.f32 %v8240_v12, %v8238_v31 }
 0x34f   : > { %v8244_v49 = vpop.eup %8243 }
 0x350   : > { %v8246_v14 = vpop.eup %8245  ;;  %v6325_v5 = vmul.f32 %v8244_v49, %v8242_v57 }
 0x351   : > { %v8248_v44 = vpop.eup %8247 }
 0x352   : > { %v8250_v60 = vpop.eup %8249  ;;  %v6331_v11 = vpack.c.bf16 %v6325_v5, %v6324_v42  ;;  %v6323_v50 = vmul.f32 %v8248_v44, %v8246_v14 }
 0x353   : > { %v8252_v48 = vpop.eup %8251 }
 0x354   : > { %v8254_v39 = vpop.eup %8253  ;;  %v6330_v17 = vpack.c.bf16 %v6323_v50, %v6322_v13  ;;  %v6328_v35 = vmul.f32 %v8252_v48, %v8250_v60 }
 0x355   : > { %v8256_v63 = vpop.eup %8255 }
 0x356   : > { %v8258_v61 = vpop.eup %8257  ;;  %8042 = vmatprep.mubr.msk.bf16.mxu0 %vm777_vm0, %v6330_v17  ;;  %v6326_v28 = vmul.f32 %v8256_v63, %v8254_v39 }
 0x357   : > { %v8260_v54 = vpop.eup %8259  ;;  %8043 = vmatmul.mubr.msk.bf16.vlgmr.msra.gmra.mxu0 %vm777_vm0, %v6331_v11 }
 0x358   : > { %v8262_v53 = vpop.eup %8261  ;;  %v6329_v51 = vmul.f32 %v8260_v54, %v8258_v61 }
 0x359   : > { %v8264_v4 = vpop.eup %8263 }
 0x35a   : > { %v6327_v45 = vmul.f32 %v8264_v4, %v8262_v53  ;;  %v6333_v16 = vpack.c.bf16 %v6329_v51, %v6328_v35 }
 0x35c   : > { %v6332_v62 = vpack.c.bf16 %v6327_v45, %v6326_v28 }
 0x35e   : > { %8046 = vmatprep.mubr.msk.bf16.mxu0 %vm777_vm0, %v6332_v62 }
 0x35f   : > { %8047 = vmatmul.mubr.msk.bf16.gmra.mxu0 %vm777_vm0, %v6333_v16 }
 0x417   : > { %v8044_v56 = vpop.f32.mrf.mxu0 }
 0x418   : > { %v6412_v23 = vadd.f32 %v8044_v56, %v7084_v2 }
 0x419   : > { %v6403_v47 = vpop.f32.mrf.mxu0 }
 0x41a   : > { %6436 = vst.msk [vmem:[%s717_s27 + $0x10] sm:$0xff] %vm777_vm0, %v6412_v23  ;;  %v6404_v10 = vadd.f32 %v7084_v2, %v6403_v47 }
 0x41b   : > { %v8045_v46 = vpop.f32.mrf.mxu0 }
 0x41c   : > { %6434 = vst.msk [vmem:[%s717_s27] sm:$0xff] %vm777_vm0, %v6404_v10  ;;  %v6415_v21 = vadd.f32 %v8045_v46, %v7084_v2 }
 0x41d   : > { %v6406_v25 = vpop.f32.mrf.mxu0 }
 0x41e   : > { %6437 = vst.msk [vmem:[%s717_s27 + $0x18] sm:$0xff] %vm777_vm0, %v6415_v21  ;;  %v6407_v19 = vadd.f32 %v7084_v2, %v6406_v25 }
 0x41f   : > { %v8048_v0 = vpop.f32.mrf.mxu0 }
 0x420   : > { %6435 = vst.msk [vmem:[%s717_s27 + $0x8] sm:$0xff] %vm777_vm0, %v6407_v19  ;;  %v6428_v18 = vadd.f32 %v8048_v0, %v7084_v2 }
 0x421   : > { %v6419_v22 = vpop.f32.mrf.mxu0 }
 0x422   : > { %6440 = vst.msk [vmem:[%s717_s27 + $0x30] sm:$0xff] %vm777_vm0, %v6428_v18  ;;  %v6420_v24 = vadd.f32 %v7084_v2, %v6419_v22 }
 0x423   : > { %v8049_v43 = vpop.f32.mrf.mxu0 }
 0x424   : > { %6438 = vst.msk [vmem:[%s717_s27 + $0x20] sm:$0xff] %vm777_vm0, %v6420_v24  ;;  %v6431_v6 = vadd.f32 %v8049_v43, %v7084_v2 }
 0x425   : > { %v6422_v36 = vpop.f32.mrf.mxu0 }
 0x426   : > { %6441 = vst.msk [vmem:[%s717_s27 + $0x38] sm:$0xff] %vm777_vm0, %v6431_v6  ;;  %v6423_v8 = vadd.f32 %v7084_v2, %v6422_v36 }
 0x428   : > { %6439 = vst.msk [vmem:[%s717_s27 + $0x28] sm:$0xff] %vm777_vm0, %v6423_v8 }
 0x429 PF: > { %s32_s2 = sadd.s32 1, %s8271_s2  }
 0x42a   : > { %p29_p4 = scmp.ge.s32.totalorder %s32_s2, 4  }
 0x42c   :  { %31 = sbr.rel (!%p29_p4) target bundleno = 7 (0x7), region = 195 }

</bundles_post_ra>
